<compile_context>
chip_gen: v5e
topology: v5e:2x2
jax: 0.10.0
libtpu: 0.0.40
codegen_flags: <defaults>
</compile_context>

<pallas_src>
import jax
import jax.numpy as jnp
from jax import lax
from jax.experimental import pallas as pl
from jax.experimental.pallas import tpu as pltpu


def _affinity_attention_kernel(x_ref, q_ref, k_ref, j_ref, v_ref, gam_ref, o_ref):
    # x_ref : (C,  S) f32   flattened input (one batch element)
    # q_ref : (C8, S)       query projection (Conv3d 1x3x1)
    # k_ref : (C8, S)       key   projection (Conv3d 3x1x1)
    # j_ref : (C8, S)       judge projection (Conv3d 1x1x3)
    # v_ref : (C,  S)       value projection (Conv3d 1x1x1)
    # gam_ref: (2,) f32 in SMEM  -> (gamma_spatial, gamma_channel)
    # o_ref : (C,  S)       output = sab + cab + x
    f32 = jnp.float32
    x = x_ref[...].astype(f32)
    q = q_ref[...].astype(f32)
    k = k_ref[...].astype(f32)
    j = j_ref[...].astype(f32)
    v = v_ref[...].astype(f32)

    dn_lane = (((1,), (1,)), ((), ()))  # contract the S (lane) axis of both operands
    dn_chan = (((0,), (0,)), ((), ()))  # contract the channel axis of both operands

    # ---------------- spatial attention block ----------------
    # affinity = (Q^T K)(J^T K) = Q^T (K J^T) K   (exact, associativity)
    m = lax.dot_general(k, j, dn_lane, preferred_element_type=f32)       # (C8, C8) = K J^T
    p1 = lax.dot_general(m, q, dn_chan, preferred_element_type=f32)      # (C8, S)  = M^T Q
    logits = lax.dot_general(p1, k, dn_chan, preferred_element_type=f32)  # (S, S)

    logits = logits - jnp.max(logits, axis=-1, keepdims=True)            # stable softmax
    p = jnp.exp(logits)
    p = p * pl.reciprocal(jnp.sum(p, axis=-1, keepdims=True), approx=True)

    # weights = proj_value @ affinity ; bf16 operands, f32 MXU accumulation.
    w_sp = jnp.dot(v.astype(jnp.bfloat16), p.astype(jnp.bfloat16),
                   preferred_element_type=f32)                            # (C, S)

    # ---------------- channel attention block ----------------
    g1 = lax.dot_general(x, x, dn_lane, preferred_element_type=f32)       # (C, C) = X X^T
    g = jnp.dot(g1, g1, preferred_element_type=f32)                       # (C, C)
    gn = jnp.max(g, axis=-1, keepdims=True) - g
    gn = gn - jnp.max(gn, axis=-1, keepdims=True)                         # stable softmax
    e = jnp.exp(gn)
    pc = e * pl.reciprocal(jnp.sum(e, axis=-1, keepdims=True), approx=True)
    w_ch = jnp.dot(pc, x, preferred_element_type=f32)                     # (C, S)

    # out = (gamma_s*w_sp + x) + (gamma_c*w_ch + x) + x
    gs = gam_ref[0]
    gc = gam_ref[1]
    o_ref[...] = (gs * w_sp + gc * w_ch + 3.0 * x).astype(o_ref.dtype)


def _conv3d(x, w, b, padding):
    """PyTorch-style Conv3d (NCHWD input, OIDHW-positional weight) with bias."""
    out = lax.conv_general_dilated(
        x, w, window_strides=(1, 1, 1), padding=padding,
        dimension_numbers=("NCDHW", "OIDHW", "NCDHW"),
        precision=lax.Precision.HIGHEST)
    return out + b[None, :, None, None, None]


def affinity_attention3d(x, params):
    """Forward pass of AffinityAttention3d. x: (B, C, H, W, D)."""
    B, C, H, W, D = x.shape
    S = H * W * D

    # Small projection convs (Q/K/J/V) computed in XLA, flattened lane-dense.
    q = _conv3d(x, params["wq"], params["bq"], ((0, 0), (1, 1), (0, 0))).reshape(B, -1, S)
    k = _conv3d(x, params["wk"], params["bk"], ((1, 1), (0, 0), (0, 0))).reshape(B, -1, S)
    j = _conv3d(x, params["wj"], params["bj"], ((0, 0), (0, 0), (1, 1))).reshape(B, -1, S)
    v = _conv3d(x, params["wv"], params["bv"], ((0, 0), (0, 0), (0, 0))).reshape(B, C, S)
    xf = x.reshape(B, C, S)
    C8 = q.shape[1]

    gammas = jnp.stack([jnp.asarray(params["gamma_s"], jnp.float32),
                        jnp.asarray(params["gamma_c"], jnp.float32)])      # (2,)

    out_flat = pl.pallas_call(
        _affinity_attention_kernel,
        out_shape=jax.ShapeDtypeStruct((B, C, S), x.dtype),
        grid=(B,),
        in_specs=[
            pl.BlockSpec((None, C, S), lambda b: (b, 0, 0)),    # x
            pl.BlockSpec((None, C8, S), lambda b: (b, 0, 0)),   # q
            pl.BlockSpec((None, C8, S), lambda b: (b, 0, 0)),   # k
            pl.BlockSpec((None, C8, S), lambda b: (b, 0, 0)),   # j
            pl.BlockSpec((None, C, S), lambda b: (b, 0, 0)),    # v
            pl.BlockSpec(memory_space=pltpu.MemorySpace.SMEM),  # gammas
        ],
        out_specs=pl.BlockSpec((None, C, S), lambda b: (b, 0, 0)),
        compiler_params=pltpu.CompilerParams(
            dimension_semantics=("parallel",),
            vmem_limit_bytes=32 * 1024 * 1024),
    )(xf, q, k, j, v, gammas)

    return out_flat.reshape(B, C, H, W, D)


def _reference(x, params):
    """Pure-JAX translation of the PyTorch AffinityAttention3d forward."""
    B, C, H, W, D = x.shape
    S = H * W * D
    hp = lax.Precision.HIGHEST

    q = _conv3d(x, params["wq"], params["bq"], ((0, 0), (1, 1), (0, 0))).reshape(B, -1, S)
    k = _conv3d(x, params["wk"], params["bk"], ((1, 1), (0, 0), (0, 0))).reshape(B, -1, S)
    j = _conv3d(x, params["wj"], params["bj"], ((0, 0), (0, 0), (1, 1))).reshape(B, -1, S)
    v = _conv3d(x, params["wv"], params["bv"], ((0, 0), (0, 0), (0, 0))).reshape(B, C, S)
    xf = x.reshape(B, C, S)

    # Spatial attention block.
    pq = jnp.swapaxes(q, 1, 2)
    pj = jnp.swapaxes(j, 1, 2)
    a1 = jnp.matmul(pq, k, precision=hp)            # (B, S, S)
    a2 = jnp.matmul(pj, k, precision=hp)            # (B, S, S)
    aff = jnp.matmul(a1, a2, precision=hp)          # (B, S, S)
    aff = jax.nn.softmax(aff, axis=-1)
    w_sp = jnp.matmul(v, aff, precision=hp)         # (B, C, S)
    sab = params["gamma_s"] * w_sp + xf

    # Channel attention block.
    g1 = jnp.matmul(xf, jnp.swapaxes(xf, 1, 2), precision=hp)   # (B, C, C)
    g = jnp.matmul(g1, g1, precision=hp)
    gn = jnp.max(g, axis=-1, keepdims=True) - g
    gn = jax.nn.softmax(gn, axis=-1)
    w_ch = jnp.matmul(gn, xf, precision=hp)
    cab = params["gamma_c"] * w_ch + xf

    return (sab + cab + xf).reshape(B, C, H, W, D)


if __name__ == "__main__":
    key = jax.random.PRNGKey(0)
    ks = jax.random.split(key, 9)

    # Small shapes consistent with the module: in_channels must be >= 8.
    B, C, H, W, D = 2, 32, 8, 8, 8        # S = H*W*D = 512 (lane-dense)
    C8 = C // 8

    x = 0.125 * jax.random.normal(ks[0], (B, C, H, W, D), dtype=jnp.float32)
    params = dict(
        wq=0.3 * jax.random.normal(ks[1], (C8, C, 1, 3, 1), dtype=jnp.float32),
        bq=0.1 * jax.random.normal(ks[2], (C8,), dtype=jnp.float32),
        wk=0.3 * jax.random.normal(ks[3], (C8, C, 3, 1, 1), dtype=jnp.float32),
        bk=0.1 * jax.random.normal(ks[4], (C8,), dtype=jnp.float32),
        wj=0.3 * jax.random.normal(ks[5], (C8, C, 1, 1, 3), dtype=jnp.float32),
        bj=0.1 * jax.random.normal(ks[6], (C8,), dtype=jnp.float32),
        wv=0.3 * jax.random.normal(ks[7], (C, C, 1, 1, 1), dtype=jnp.float32),
        bv=0.1 * jax.random.normal(ks[8], (C,), dtype=jnp.float32),
        # gamma is zero-initialized in the PyTorch module; use nonzero values so
        # both attention branches are actually exercised by the test.
        gamma_s=jnp.float32(0.75),
        gamma_c=jnp.float32(0.35),
    )

    out = affinity_attention3d(x, params)
    out = jax.block_until_ready(out)

    ref = _reference(x, params)
    max_err = float(jnp.max(jnp.abs(out - ref)))
    assert jnp.allclose(out, ref, atol=2e-2, rtol=2e-2), f"max abs err={max_err}"

    print("KERNEL_OK")
</pallas_src>

<mosaic_0001>
module attributes {stable_mosaic.version = 11 : i64} {
  func.func @_affinity_attention_kernel(%arg0: i32, %arg1: memref<1x32x512xf32, #tpu.memory_space<vmem>>, %arg2: memref<1x4x512xf32, #tpu.memory_space<vmem>>, %arg3: memref<1x4x512xf32, #tpu.memory_space<vmem>>, %arg4: memref<1x4x512xf32, #tpu.memory_space<vmem>>, %arg5: memref<1x32x512xf32, #tpu.memory_space<vmem>>, %arg6: memref<2xf32, #tpu.memory_space<smem>>, %arg7: memref<1x32x512xf32, #tpu.memory_space<vmem>>) attributes {dimension_semantics = [#tpu.dimension_semantics<parallel>], iteration_bounds = array<i64: 2>, scalar_prefetch = 0 : i64, scratch_operands = 0 : i64, tpu.core_type = #tpu.core_type<tc>, window_params = [{transform_indices = @transform_0, window_bounds = array<i64: 1, 32, 512>}, {transform_indices = @transform_1, window_bounds = array<i64: 1, 4, 512>}, {transform_indices = @transform_2, window_bounds = array<i64: 1, 4, 512>}, {transform_indices = @transform_3, window_bounds = array<i64: 1, 4, 512>}, {transform_indices = @transform_4, window_bounds = array<i64: 1, 32, 512>}, {transform_indices = @transform_5, window_bounds = array<i64: 2>}, {transform_indices = @transform_6, window_bounds = array<i64: 1, 32, 512>}]} {
    %c0 = arith.constant 0 : index
    %c0_0 = arith.constant 0 : index
    %c0_1 = arith.constant 0 : index
    %0 = vector.load %arg1[%c0, %c0_0, %c0_1] : memref<1x32x512xf32, #tpu.memory_space<vmem>>, vector<1x32x512xf32>
    %1 = vector.shape_cast %0 : vector<1x32x512xf32> to vector<32x512xf32>
    %c0_2 = arith.constant 0 : index
    %c0_3 = arith.constant 0 : index
    %c0_4 = arith.constant 0 : index
    %2 = vector.load %arg2[%c0_2, %c0_3, %c0_4] : memref<1x4x512xf32, #tpu.memory_space<vmem>>, vector<1x4x512xf32>
    %3 = vector.shape_cast %2 : vector<1x4x512xf32> to vector<4x512xf32>
    %c0_5 = arith.constant 0 : index
    %c0_6 = arith.constant 0 : index
    %c0_7 = arith.constant 0 : index
    %4 = vector.load %arg3[%c0_5, %c0_6, %c0_7] : memref<1x4x512xf32, #tpu.memory_space<vmem>>, vector<1x4x512xf32>
    %5 = vector.shape_cast %4 : vector<1x4x512xf32> to vector<4x512xf32>
    %c0_8 = arith.constant 0 : index
    %c0_9 = arith.constant 0 : index
    %c0_10 = arith.constant 0 : index
    %6 = vector.load %arg4[%c0_8, %c0_9, %c0_10] : memref<1x4x512xf32, #tpu.memory_space<vmem>>, vector<1x4x512xf32>
    %7 = vector.shape_cast %6 : vector<1x4x512xf32> to vector<4x512xf32>
    %c0_11 = arith.constant 0 : index
    %c0_12 = arith.constant 0 : index
    %c0_13 = arith.constant 0 : index
    %8 = vector.load %arg5[%c0_11, %c0_12, %c0_13] : memref<1x32x512xf32, #tpu.memory_space<vmem>>, vector<1x32x512xf32>
    %9 = vector.shape_cast %8 : vector<1x32x512xf32> to vector<32x512xf32>
    %cst = arith.constant dense<0.000000e+00> : vector<4x4xf32>
    %10 = tpu.matmul %5, %7, %cst {dimension_numbers = #tpu.dot_dimension_numbers<[1], [1], [0], [0], [0, 0, 1, 0], [], []>} : vector<4x512xf32>, vector<4x512xf32>, vector<4x4xf32> -> vector<4x4xf32>
    %cst_14 = arith.constant dense<0.000000e+00> : vector<4x512xf32>
    %11 = tpu.matmul %10, %3, %cst_14 {dimension_numbers = #tpu.dot_dimension_numbers<[0], [0], [1], [1], [0, 1, 1, 1], [], []>} : vector<4x4xf32>, vector<4x512xf32>, vector<4x512xf32> -> vector<4x512xf32>
    %cst_15 = arith.constant dense<0.000000e+00> : vector<512x512xf32>
    %12 = tpu.matmul %11, %5, %cst_15 {dimension_numbers = #tpu.dot_dimension_numbers<[0], [0], [1], [1], [0, 1, 1, 1], [], []>} : vector<4x512xf32>, vector<4x512xf32>, vector<512x512xf32> -> vector<512x512xf32>
    %cst_16 = arith.constant dense<0xFF800000> : vector<512xf32>
    %13 = vector.multi_reduction <maximumf>, %12, %cst_16 [1] : vector<512x512xf32> to vector<512xf32>
    %14 = vector.shape_cast %13 : vector<512xf32> to vector<512x1xf32>
    %15 = vector.broadcast %14 : vector<512x1xf32> to vector<512x512xf32>
    %16 = arith.subf %12, %15 : vector<512x512xf32>
    %17 = math.exp %16 : vector<512x512xf32>
    %cst_17 = arith.constant dense<0.000000e+00> : vector<512xf32>
    %18 = vector.multi_reduction <add>, %17, %cst_17 [1] : vector<512x512xf32> to vector<512xf32>
    %19 = vector.shape_cast %18 : vector<512xf32> to vector<512x1xf32>
    %20 = tpu.reciprocal %19 {approx = true} : vector<512x1xf32> -> vector<512x1xf32>
    %21 = vector.broadcast %20 : vector<512x1xf32> to vector<512x512xf32>
    %22 = arith.mulf %17, %21 : vector<512x512xf32>
    %23 = arith.truncf %9 : vector<32x512xf32> to vector<32x512xbf16>
    %24 = arith.truncf %22 : vector<512x512xf32> to vector<512x512xbf16>
    %cst_18 = arith.constant dense<0.000000e+00> : vector<32x512xf32>
    %25 = tpu.matmul %23, %24, %cst_18 {dimension_numbers = #tpu.dot_dimension_numbers<[1], [0], [0], [1], [0, 0, 1, 1], [], []>} : vector<32x512xbf16>, vector<512x512xbf16>, vector<32x512xf32> -> vector<32x512xf32>
    %cst_19 = arith.constant dense<0.000000e+00> : vector<32x32xf32>
    %26 = tpu.matmul %1, %1, %cst_19 {dimension_numbers = #tpu.dot_dimension_numbers<[1], [1], [0], [0], [0, 0, 1, 0], [], []>} : vector<32x512xf32>, vector<32x512xf32>, vector<32x32xf32> -> vector<32x32xf32>
    %cst_20 = arith.constant dense<0.000000e+00> : vector<32x32xf32>
    %27 = tpu.matmul %26, %26, %cst_20 {dimension_numbers = #tpu.dot_dimension_numbers<[1], [0], [0], [1], [0, 0, 1, 1], [], []>} : vector<32x32xf32>, vector<32x32xf32>, vector<32x32xf32> -> vector<32x32xf32>
    %cst_21 = arith.constant dense<0xFF800000> : vector<32xf32>
    %28 = vector.multi_reduction <maximumf>, %27, %cst_21 [1] : vector<32x32xf32> to vector<32xf32>
    %29 = vector.shape_cast %28 : vector<32xf32> to vector<32x1xf32>
    %30 = vector.broadcast %29 : vector<32x1xf32> to vector<32x32xf32>
    %31 = arith.subf %30, %27 : vector<32x32xf32>
    %cst_22 = arith.constant dense<0xFF800000> : vector<32xf32>
    %32 = vector.multi_reduction <maximumf>, %31, %cst_22 [1] : vector<32x32xf32> to vector<32xf32>
    %33 = vector.shape_cast %32 : vector<32xf32> to vector<32x1xf32>
    %34 = vector.broadcast %33 : vector<32x1xf32> to vector<32x32xf32>
    %35 = arith.subf %31, %34 : vector<32x32xf32>
    %36 = math.exp %35 : vector<32x32xf32>
    %cst_23 = arith.constant dense<0.000000e+00> : vector<32xf32>
    %37 = vector.multi_reduction <add>, %36, %cst_23 [1] : vector<32x32xf32> to vector<32xf32>
    %38 = vector.shape_cast %37 : vector<32xf32> to vector<32x1xf32>
    %39 = tpu.reciprocal %38 {approx = true} : vector<32x1xf32> -> vector<32x1xf32>
    %40 = vector.broadcast %39 : vector<32x1xf32> to vector<32x32xf32>
    %41 = arith.mulf %36, %40 : vector<32x32xf32>
    %cst_24 = arith.constant dense<0.000000e+00> : vector<32x512xf32>
    %42 = tpu.matmul %41, %1, %cst_24 {dimension_numbers = #tpu.dot_dimension_numbers<[1], [0], [0], [1], [0, 0, 1, 1], [], []>} : vector<32x32xf32>, vector<32x512xf32>, vector<32x512xf32> -> vector<32x512xf32>
    %c0_25 = arith.constant 0 : index
    %43 = memref.load %arg6[%c0_25] : memref<2xf32, #tpu.memory_space<smem>>
    %c1 = arith.constant 1 : index
    %44 = memref.load %arg6[%c1] : memref<2xf32, #tpu.memory_space<smem>>
    %45 = vector.broadcast %43 : f32 to vector<32x512xf32>
    %46 = arith.mulf %45, %25 : vector<32x512xf32>
    %47 = vector.broadcast %44 : f32 to vector<32x512xf32>
    %48 = arith.mulf %47, %42 : vector<32x512xf32>
    %49 = arith.addf %46, %48 : vector<32x512xf32>
    %cst_26 = arith.constant 3.000000e+00 : f32
    %50 = vector.broadcast %cst_26 : f32 to vector<32x512xf32>
    %51 = arith.mulf %50, %1 : vector<32x512xf32>
    %52 = arith.addf %49, %51 : vector<32x512xf32>
    %c0_27 = arith.constant 0 : index
    %c0_28 = arith.constant 0 : index
    %c0_29 = arith.constant 0 : index
    %53 = vector.load %arg7[%c0_27, %c0_28, %c0_29] : memref<1x32x512xf32, #tpu.memory_space<vmem>>, vector<1x32x512xf32>
    %54 = vector.shape_cast %53 : vector<1x32x512xf32> to vector<32x512xf32>
    %55 = vector.shape_cast %52 : vector<32x512xf32> to vector<1x32x512xf32>
    tpu.vector_store %arg7[%c0_27, %c0_28, %c0_29], %55 {strides = array<i32>} : memref<1x32x512xf32, #tpu.memory_space<vmem>>, vector<1x32x512xf32>,
    return
  }
  func.func @transform_0(%arg0: i32) -> (i32, i32, i32) {
    %c0_i32 = arith.constant 0 : i32
    %c0_i32_0 = arith.constant 0 : i32
    %c0_i32_1 = arith.constant 0 : i32
    return %arg0, %c0_i32, %c0_i32_0 : i32, i32, i32
  }
  func.func @transform_1(%arg0: i32) -> (i32, i32, i32) {
    %c0_i32 = arith.constant 0 : i32
    %c0_i32_0 = arith.constant 0 : i32
    %c0_i32_1 = arith.constant 0 : i32
    return %arg0, %c0_i32, %c0_i32_0 : i32, i32, i32
  }
  func.func @transform_2(%arg0: i32) -> (i32, i32, i32) {
    %c0_i32 = arith.constant 0 : i32
    %c0_i32_0 = arith.constant 0 : i32
    %c0_i32_1 = arith.constant 0 : i32
    return %arg0, %c0_i32, %c0_i32_0 : i32, i32, i32
  }
  func.func @transform_3(%arg0: i32) -> (i32, i32, i32) {
    %c0_i32 = arith.constant 0 : i32
    %c0_i32_0 = arith.constant 0 : i32
    %c0_i32_1 = arith.constant 0 : i32
    return %arg0, %c0_i32, %c0_i32_0 : i32, i32, i32
  }
  func.func @transform_4(%arg0: i32) -> (i32, i32, i32) {
    %c0_i32 = arith.constant 0 : i32
    %c0_i32_0 = arith.constant 0 : i32
    %c0_i32_1 = arith.constant 0 : i32
    return %arg0, %c0_i32, %c0_i32_0 : i32, i32, i32
  }
  func.func @transform_5(%arg0: i32) -> i32 {
    %c0_i32 = arith.constant 0 : i32
    %c0_i32_0 = arith.constant 0 : i32
    return %c0_i32 : i32
  }
  func.func @transform_6(%arg0: i32) -> (i32, i32, i32) {
    %c0_i32 = arith.constant 0 : i32
    %c0_i32_0 = arith.constant 0 : i32
    %c0_i32_1 = arith.constant 0 : i32
    return %arg0, %c0_i32, %c0_i32_0 : i32, i32, i32
  }
}

</mosaic_0001>

<bundles_post_ra>
// kernel: tpu_custom_call.1
= control target key start
LH: loop header
LB: loop body
LE: loop exit
PB: predicated region body
PF: predicated region fallthrough
CT: control target
= control target key end

     0   :  { %s10462_s0 = inlined_call_operand.hbm [shape: f32[2,32,512], index: 0, kind: input, shape index: {}]   ;;  %s10463_s1 = inlined_call_operand.hbm [shape: f32[2,4,512], index: 1, kind: input, shape index: {}]   ;;  %s10464_s2 = inlined_call_operand.hbm [shape: f32[2,4,512], index: 2, kind: input, shape index: {}]   ;;  %s10465_s3 = inlined_call_operand.hbm [shape: f32[2,4,512], index: 3, kind: input, shape index: {}]   ;;  %s10466_s4 = inlined_call_operand.hbm [shape: f32[2,32,512], index: 4, kind: input, shape index: {}]   ;;  %s10467_s5 = inlined_call_operand.vmem [shape: f32[2], index: 5, kind: input, shape index: {}]   ;;  %s10468_s6 = inlined_call_operand.hbm [shape: f32[2,32,512], index: 6, kind: output, shape index: {}]  }
   0x1   :  { %11021 = sst [smem:[#allocation250_spill]] %s10462_s0 }
   0x2   :  { %11022 = sst [smem:[#allocation251_spill]] %s10463_s1 }
   0x3   :  { %11023 = sst [smem:[#allocation252_spill]] %s10465_s3 }
   0x4   :  { %11024 = sst [smem:[#allocation253_spill]] %s10467_s5 }
   0x5   :  { %11025 = sst [smem:[#allocation254_spill]] %s10468_s6 }
   0x6   :  { %11 = vsyncpa [#allocation3], 0 }
   0x7   :  { %13 = vsyncpa [#allocation3 + $0x1], 0 }
   0x8   :  { %14 = vsyncpa [#allocation7], 0 }
   0x9   :  { %16 = vsyncpa [#allocation7 + $0x1], 0 }
   0xa   :  { %17 = vsyncpa [#allocation10], 0 }
   0xb   :  { %19 = vsyncpa [#allocation10 + $0x1], 0 }
   0xc   :  { %20 = vsyncpa [#allocation5], 0 }
   0xd   :  { %21 = vsyncpa [#allocation4], 0 }
   0xe   :  { %23 = vsyncpa [#allocation4 + $0x1], 0  ;;  %s6042_s21 = smov 0   ;;  %s6044_s22 = smov 0  }
   0xf   :  { %s6046_s23 = smov 0   ;;  %s6048_s24 = smov 0  }
  0x10 LB: > { %11026 = sst [smem:[#allocation19_spill]] %s5988_s21  ;;  %s6063_s25 = sadd.s32 1, %s6000_s24   ;;  %s6000_s24 = sphi %s6048_s24, %s12219_s24   ;;  %s5996_s23 = sphi %s6046_s23, %s12224_s23   ;;  %s5992_s22 = sphi %s6044_s22, %s12223_s22   ;;  %s5988_s21 = sphi %s6042_s21, %s12222_s21  }
  0x11   : > { %11027 = sst [smem:[#allocation20_spill]] %s5996_s23  ;;  %s36_s26 = sadd.s32 1, %s5996_s23 }
  0x12   : > { %11028 = sst [smem:[#allocation21_spill]] %s6063_s25  ;;  %s33_s27 = ssub.s32 %s6000_s24, %s6063_s25 }
  0x13   : > { %p43_p0 = scmp.ne.s32.totalorder %s5996_s23, %s5992_s22  ;;  %p34_p1 = scmp.eq.s32.totalorder %s33_s27, 0 }
  0x14   : > { %p44_p2 = scmp.eq.s32.totalorder %s6000_s24, 0  ;;  %p5060_p4 = scmp.lt.s32.totalorder %s6000_s24, 2 }
  0x15   : > { %s6074_s28 = scalar_select %p34_p1, %s5996_s23, %s36_s26  }
  0x16   : > { %p45_p5 = por %p44_p2, %p43_p0  ;;  %s6080_s29 = sand.u32 1, %s5996_s23  }
  0x17   : > { %11029 = sst [smem:[#allocation22_spill]] %s6074_s28  ;;  %s10469_s30 = sand.u32 1, %s6000_s24  }
  0x18   : > { %s6084_s7 = sshll.u32 %s6080_s29, 4  ;;  %p6086_p6 = pnand %p5060_p4, %p45_p5 }
  0x19   : > { %s6091_s9 = sshll.u32 %s6000_s24, 4  ;;  %s11031_s1 = sld [smem:[#allocation251_spill]] }
  0x1a   : > { %s260_s14 = scalar_lea.vmem [#allocation6], %s6084_s7  ;;  %s6100_s16 = scalar_lea.sflag [#allocation7], %s10469_s30 }
  0x1b   : > { %s269_s15 = sshll.u32 %s260_s14, 4  ;;  %p6104_p8 = pneg %p6086_p6  ;;  %s270_s15 = int_to_ptr.vmem [resolvable:$true] %s269_s15 }
  0x1f   : > { %s265_s12 = scalar_lea.hbm %s11031_s1, %s6091_s9  ;;  %s5764_s27 = scalar_lea.hbm %s11031_s1, 32 }
  0x20   : > { %s267_s13 = sshll.u32 %s265_s12, 4  ;;  %s268_s13 = int_to_ptr.hbm [resolvable:$true] %s267_s13 }
  0x21   : > { %s5757_s17 = sshra.s32 %s268_s13, 4  ;;  %s5758_s17 = int_to_ptr.hbm [resolvable:$true] %s5757_s17 }
  0x22   : > { %s5759_s18 = scalar_lea.hbm %s5758_s17, 16  ;;  %p5765_p11 = scmp.lt.s32.totalorder %s5758_s17, %s11031_s1 }
  0x23   : > { %p5760_p7 = scmp.ne.s32.totalorder %s5758_s17, %s5759_s18  ;;  %p5766_p12 = scmp.lt.s32.totalorder %s5764_s27, %s5759_s18 }
  0x25   : > { %p5762_p9 = pnand %p6104_p8, %p5760_p7  ;;  %p5767_p13 = por %p5766_p12, %p5765_p11 }
  0x27   : > { %p5763_p10 = pneg %p5762_p9 }
  0x29   : > { %p5768_p1 = pnand %p5767_p13, %p5763_p10 }
  0x2b   : > { %5771 = shalt.err (!%p5768_p1)
}
  0x2c   : > { %5045 = dma.hbm_to_vmem [thread:$0]  (!%p6086_p6), %s268_s13, 256, %s270_s15, %s6100_s16  }
  0x2d   : > { %s11033_s3 = sld [smem:[#allocation252_spill]]  ;;  %s300_s26 = scalar_lea.vmem [#allocation9], %s6084_s7 }
  0x2e   : > { %s309_s30 = sshll.u32 %s300_s26, 4  ;;  %s11034_s17 = sand.u32 1, %s6000_s24   ;;  %s310_s30 = int_to_ptr.vmem [resolvable:$true] %s309_s30 }
  0x2f   : > { %s6126_s18 = scalar_lea.sflag [#allocation10], %s11034_s17 }
  0x33   : > { %s305_s20 = scalar_lea.hbm %s11033_s3, %s6091_s9  ;;  %s5794_s12 = scalar_lea.hbm %s11033_s3, 32 }
  0x34   : > { %s307_s10 = sshll.u32 %s305_s20, 4  ;;  %s308_s10 = int_to_ptr.hbm [resolvable:$true] %s307_s10 }
  0x35   : > { %s5787_s27 = sshra.s32 %s308_s10, 4  ;;  %s5788_s27 = int_to_ptr.hbm [resolvable:$true] %s5787_s27 }
  0x36   : > { %s5789_s11 = scalar_lea.hbm %s5788_s27, 16  ;;  %p5795_p7 = scmp.lt.s32.totalorder %s5788_s27, %s11033_s3 }
  0x37   : > { %p5790_p2 = scmp.ne.s32.totalorder %s5788_s27, %s5789_s11  ;;  %p5796_p9 = scmp.lt.s32.totalorder %s5794_s12, %s5789_s11 }
  0x39   : > { %p5792_p4 = pnand %p5790_p2, %p6104_p8  ;;  %p5797_p10 = por %p5796_p9, %p5795_p7 }
  0x3b   : > { %p5793_p5 = pneg %p5792_p4 }
  0x3d   : > { %p5798_p11 = pnand %p5797_p10, %p5793_p5 }
  0x3f   : > { %5801 = shalt.err (!%p5798_p11)
}
  0x40   : > { %5051 = dma.hbm_to_vmem [thread:$0]  (!%p6086_p6), %s308_s10, 256, %s310_s30, %s6126_s18  }
  0x41   : > { %s6140_s20 = sadd.s32 4294967295, %s6000_s24   ;;  %s4692_s1 = sadd.s32 4294967294, %s6000_s24  }
  0x42   : > { %p49_p12 = scmp.ne.s32.totalorder %s5992_s22, %s5988_s21  ;;  %p10478_p13 = scmp.eq.s32.totalorder %s6140_s20, 0 }
  0x43   : > { %p198_p1 = scmp.eq.s32.totalorder %s6140_s20, 1  ;;  %p204_p2 = scmp.eq.s32.totalorder %s4692_s1, 1 }
  0x44   : > { %p4693_p4 = scmp.ge.s32.totalorder %s6000_s24, 1  ;;  %p6150_p5 = por %p10478_p13, %p49_p12 }
  0x45   : > { %p6157_p7 = por %p198_p1, %p43_p0  ;;  %p6161_p9 = por %p204_p2, %p49_p12 }
  0x46   : > { %p211_p10 = scmp.lt.s32.totalorder %s6000_s24, 3  ;;  %s11040_s5 = sld [smem:[#allocation253_spill]] }
  0x47   : > { %s11036_s30 = scalar_select %p6157_p7, 1, 0 }
  0x48   : > { %s11038_s10 = scalar_select %p6161_p9, 1, 0 }
  0x49   : > { %11037 = sst [smem:[#allocation23_spill]] %s11036_s30  ;;  %p6169_p11 = pnand %p4693_p4, %p211_p10 }
  0x4a   : > { %11039 = sst [smem:[#allocation24_spill]] %s11038_s10  ;;  %s4696_s15 = sshll.u32 %s6080_s29, 7 }
  0x4b   : > { %p5035_p0 = pneg %p6169_p11  ;;  %s5013_s12 = sshll.u32 %s6000_s24, 7 }
  0x4c   : > { %s223_s11 = sshll.u32 %s11040_s5, 4  ;;  %s11042_s0 = sld [smem:[#allocation250_spill]]  ;;  %s224_s11 = int_to_ptr.vmem [resolvable:$true] %s223_s11 }
  0x4d   : > { %p5036_p12 = pnand %p5035_p0, %p10478_p13  ;;  %s238_s3 = scalar_lea.vmem [#allocation2], %s4696_s15 }
  0x4e   : > { %s246_s5 = sshll.u32 %s238_s3, 4  ;;  %s6002_s28 = smov [#allocation12]   ;;  %s247_s5 = int_to_ptr.vmem [resolvable:$true] %s246_s5 }
  0x4f   : > { %5038 = dma.vmem_to_smem (!%p5036_p12), %s224_s11, 16, %s6002_s28, [#allocation5]  }
  0x50   : > { %s235_s23 = scalar_lea.sflag [#allocation3], %s6080_s29 }
  0x52   : > { %s243_s17 = scalar_lea.hbm %s11042_s0, %s5013_s12  ;;  %s5839_s14 = scalar_lea.hbm %s11042_s0, 256 }
  0x53   : > { %s244_s27 = sshll.u32 %s243_s17, 4  ;;  %s245_s27 = int_to_ptr.hbm [resolvable:$true] %s244_s27 }
  0x54   : > { %s5832_s25 = sshra.s32 %s245_s27, 4  ;;  %s5833_s25 = int_to_ptr.hbm [resolvable:$true] %s5832_s25 }
  0x55   : > { %s5834_s10 = scalar_lea.hbm %s5833_s25, 128  ;;  %p5840_p10 = scmp.lt.s32.totalorder %s5833_s25, %s11042_s0 }
  0x56   : > { %p5835_p1 = scmp.ne.s32.totalorder %s5833_s25, %s5834_s10  ;;  %p5841_p0 = scmp.lt.s32.totalorder %s5839_s14, %s5834_s10 }
  0x58   : > { %p5837_p2 = pnand %p5835_p1, %p6104_p8  ;;  %p5842_p3 = por %p5841_p0, %p5840_p10 }
  0x5a   : > { %p5838_p4 = pneg %p5837_p2 }
  0x5c   : > { %p5843_p12 = pnand %p5842_p3, %p5838_p4 }
  0x5e   : > { %5846 = shalt.err (!%p5843_p12)
}
  0x5f   : > { %s6003_s3 = smov 512   ;;  %s6004_s28 = smov 32  }
  0x60   : > { %5042 = dma.hbm_to_vmem [thread:$0]  (!%p6086_p6), %s245_s27, 2048, %s247_s5, %s235_s23, %s6003_s3, %s6003_s3, %s6004_s28  }
  0x61   : > { %s325_s25 = scalar_lea.hbm %s10466_s4, %s5013_s12  ;;  %s320_s10 = scalar_lea.vmem [#allocation11], %s4696_s15 }
  0x62   : > { %s328_s11 = sshll.u32 %s320_s10, 4  ;;  %s326_s14 = sshll.u32 %s325_s25, 4  ;;  %s6207_s11 = int_to_ptr.vmem [resolvable:$true] %s328_s11  ;;  %s6209_s14 = int_to_ptr.hbm [resolvable:$true] %s326_s14 }
  0x63   : > { %s285_s0 = scalar_lea.hbm %s10464_s2, %s6091_s9  ;;  %s280_s6 = scalar_lea.vmem [#allocation8], %s6084_s7 }
  0x64   : > { %s289_s5 = sshll.u32 %s280_s6, 4  ;;  %s287_s23 = sshll.u32 %s285_s0, 4  ;;  %s290_s5 = int_to_ptr.vmem [resolvable:$true] %s289_s5  ;;  %s288_s23 = int_to_ptr.hbm [resolvable:$true] %s287_s23 }
  0x65   : > { %s5862_s27 = sshra.s32 %s288_s23, 4  ;;  %s5869_s21 = scalar_lea.hbm %s10464_s2, 32  ;;  %s5863_s27 = int_to_ptr.hbm [resolvable:$true] %s5862_s27 }
  0x66   : > { %s5864_s29 = scalar_lea.hbm %s5863_s27, 16  ;;  %p5870_p4 = scmp.lt.s32.totalorder %s5863_s27, %s10464_s2 }
  0x67   : > { %p5865_p3 = scmp.ne.s32.totalorder %s5863_s27, %s5864_s29  ;;  %p5871_p10 = scmp.lt.s32.totalorder %s5869_s21, %s5864_s29 }
  0x69   : > { %p5867_p1 = pnand %p5865_p3, %p6104_p8  ;;  %p5872_p0 = por %p5871_p10, %p5870_p4 }
  0x6b   : > { %p5868_p2 = pneg %p5867_p1 }
  0x6d   : > { %p5873_p12 = pnand %p5872_p0, %p5868_p2 }
  0x6f   : > { %5876 = shalt.err (!%p5873_p12)
}
  0x70   : > { %5048 = dma.hbm_to_vmem [thread:$0]  (!%p6086_p6), %s288_s23, 256, %s290_s5, %s6100_s16  }
  0x71   : > { %s5892_s0 = sshra.s32 %s6209_s14, 4  ;;  %s5899_s10 = scalar_lea.hbm %s10466_s4, 256  ;;  %s5893_s0 = int_to_ptr.hbm [resolvable:$true] %s5892_s0 }
  0x72   : > { %s5894_s6 = scalar_lea.hbm %s5893_s0, 128  ;;  %p5900_p2 = scmp.lt.s32.totalorder %s5893_s0, %s10466_s4 }
  0x73   : > { %p5895_p3 = scmp.ne.s32.totalorder %s5893_s0, %s5894_s6  ;;  %p5901_p4 = scmp.lt.s32.totalorder %s5899_s10, %s5894_s6 }
  0x75   : > { %p5897_p1 = pnand %p5895_p3, %p6104_p8  ;;  %p5902_p10 = por %p5901_p4, %p5900_p2 }
  0x77   : > { %p5898_p13 = pneg %p5897_p1 }
  0x79   : > { %p5903_p0 = pnand %p5902_p10, %p5898_p13 }
  0x7b   : > { %5906 = shalt.err (!%p5903_p0)
}
  0x7c   : > { %5054 = dma.hbm_to_vmem [thread:$0]  (!%p6086_p6), %s6209_s14, 2048, %s6207_s11, %s6126_s18, %s6003_s3, %s6003_s3, %s6004_s28  }
  0x7d   : > { %340 = sbr.rel (%p6169_p11) target bundleno = 2698 (0xa8a), region = 44 }
  0x82   : > { %s6247_s16 = sand.u32 1, %s5992_s22  }
  0x83   : > { %s6250_s19 = sshll.u32 %s6247_s16, 7  ;;  %s343_s8 = scalar_lea.sflag [#allocation3], %s6247_s16 }
  0x84   : > { %s6254_s5 = scalar_lea.vmem [#allocation2], %s6250_s19 }
  0x85   : > { %5967 = dma.done.wait (%p6150_p5), %s343_s8, 2048  }
  0x86   : > { %5969 = vsyncadd (%p6150_p5), %s343_s8, 4294965248  ;;  %s352_s18 = sand.u32 1, %s6140_s20   ;;  %s4713_s13 = sshll.u32 %s6247_s16, 4 }
  0x87   : > { %s353_s3 = scalar_lea.sflag [#allocation7], %s352_s18  ;;  %s356_s28 = scalar_lea.vmem [#allocation6], %s4713_s13 }
  0x88   : > { %5971 = dma.done.wait (%p6150_p5), %s353_s3, 512  }
  0x89   : > { %5973 = vsyncadd (%p6150_p5), %s353_s3, 4294966784  ;;  %s366_s11 = scalar_lea.vmem [#allocation8], %s4713_s13  ;;  %s373_s14 = scalar_lea.sflag [#allocation10], %s352_s18 }
  0x8a   : > { %s376_s23 = scalar_lea.vmem [#allocation9], %s4713_s13 }
  0x8b   : > { %5975 = dma.done.wait (%p6150_p5), %s373_s14, 2304  }
  0x8c   : > { %5977 = vsyncadd (%p6150_p5), %s373_s14, 4294964992  ;;  %s6271_s27 = scalar_lea.vmem [#allocation11], %s6250_s19  ;;  %p11043_p6 = scmp.eq.s32.totalorder %s6140_s20, 0 }
  0x8e   : > { %5979 = dma.done.wait (%p11043_p6), [#allocation5], 16   ;;  %p11044_p8 = pmov %p11043_p6 }
  0x90   : > { %5981 = vsyncadd (%p11044_p8), [#allocation5], 4294967280 }
  0x91   : > { %397 = sfence }
  0x92   : > { %v460_v0 = vld [vmem:[%s366_s11] sm:$0xff]  ;;  %v461_v1 = vld [vmem:[%s366_s11 + $0x8] sm:$0xff]  ;;  %vm631_vm0 = vcmask 1043456   ;;  %vm627_vm1 = vcmask 31744   ;;  %vm4175_vm2 = vcmask 261120   ;;  %s4405_s26 = sld [smem:[#allocation12]] }
  0x93   : > { %482 = vst [vmem:[#allocation1] ss:$2 sm:$0xff] %v460_v0  ;;  %v462_v2 = vld [vmem:[%s376_s23] sm:$0xff]  ;;  %v463_v3 = vld [vmem:[%s376_s23 + $0x8] sm:$0xff]  ;;  %s5007_s29 = sld [smem:[#allocation12 + $0x1]]  ;;  %s10356_s15 = scalar_lea.vmem [#allocation13], %s6250_s19 }
  0x94   : > { %484 = vst [vmem:[#allocation1 + $0x10] ss:$2 sm:$0xff] %v461_v1  ;;  %v458_v8 = vld [vmem:[%s356_s28] sm:$0xff]  ;;  %v459_v9 = vld [vmem:[%s356_s28 + $0x8] sm:$0xff]  ;;  %s5018_s12 = sshll.u32 %s6140_s20, 7  ;;  %s12214_s25 = sld [smem:[#allocation254_spill]] }
  0x95   : > { %s4518_s6 = sshll.u32 %s10356_s15, 4  ;;  %s4506_s9 = scalar_lea.sflag [#allocation4], %s6247_s16  ;;  %s4519_s6 = int_to_ptr.vmem [resolvable:$true] %s4518_s6 }
  0x9a   : > { %v485_v4 = vld.sshfl [vmem:[#allocation1] sm:$0xff pattern:$0x75316420]  ;;  %v486_v5 = vld.sshfl [vmem:[#allocation1 + $0x8] sm:$0xff pattern:$0x75316420]  ;;  %s4517_s0 = scalar_lea.hbm %s12214_s25, %s5018_s12 }
  0x9b   : > { %495 = vst [vmem:[#allocation1] ss:$2 sm:$0xff] %v462_v2  ;;  %v487_v6 = vld.sshfl [vmem:[#allocation1 + $0x10] sm:$0xff pattern:$0x75316420]  ;;  %s4520_s7 = sshll.u32 %s4517_s0, 4  ;;  %s4521_s7 = int_to_ptr.hbm [resolvable:$true] %s4520_s7 }
  0x9c   : > { %v488_v7 = vld.sshfl [vmem:[#allocation1 + $0x18] sm:$0xff pattern:$0x75316420]  ;;  %s5936_s10 = sshra.s32 %s4521_s7, 4  ;;  %s5942_s8 = scalar_lea.hbm %s12214_s25, 256  ;;  %s5937_s10 = int_to_ptr.hbm [resolvable:$true] %s5936_s10 }
  0x9d   : > { %497 = vst [vmem:[#allocation1 + $0x10] ss:$2 sm:$0xff] %v463_v3  ;;  %s5938_s1 = scalar_lea.hbm %s5937_s10, 128  ;;  %p5943_p12 = scmp.lt.s32.totalorder %s5937_s10, %s12214_s25 }
  0x9e   : > { %p5939_p13 = scmp.ne.s32.totalorder %s5937_s10, %s5938_s1  ;;  %p5944_p3 = scmp.lt.s32.totalorder %s5942_s8, %s5938_s1 }
  0xa0   : > { %p5940_p5 = pnand %p5939_p13, %p6157_p7  ;;  %p5945_p1 = por %p5944_p3, %p5943_p12 }
  0xa2   : > { %v498_v10 = vld.sshfl [vmem:[#allocation1] sm:$0xff pattern:$0x75316420]  ;;  %v499_v11 = vld.sshfl [vmem:[#allocation1 + $0x8] sm:$0xff pattern:$0x75316420]  ;;  %p5941_p11 = pneg %p5940_p5 }
  0xa3   : > { %521 = vmatpush.xpose.msra.mxu1 %v498_v10  ;;  %620 = vst [vmem:[#allocation1] ss:$2 sm:$0xff] %v458_v8 }
  0xa4   : > { %v500_v12 = vld.sshfl [vmem:[#allocation1 + $0x10] sm:$0xff pattern:$0x75316420]  ;;  %v501_v13 = vld.sshfl [vmem:[#allocation1 + $0x18] sm:$0xff pattern:$0x75316420]  ;;  %p5946_p2 = pnand %p5945_p1, %p5941_p11 }
  0xa5   : > { %561 = vmatpush.xpose.msra.mxu2 %v500_v12  ;;  %581 = vmatpush.xpose.msra.mxu3 %v501_v13  ;;  %622 = vst [vmem:[#allocation1 + $0x10] ss:$2 sm:$0xff] %v459_v9 }
  0xa6   : > { %522 = vmatmul.f32.vlgmr.msra.gmra.mxu1 %v485_v4 }
  0xa7   : > { %541 = vmatpush.xpose.msrb.mxu1 %v499_v11 }
  0xa8   : > { %562 = vmatmul.f32.vlgmr.msra.gmra.mxu2 %v487_v6  ;;  %582 = vmatmul.f32.vlgmr.msra.gmra.mxu3 %v488_v7 }
  0xaa   : > { %v623_v21 = vld.sshfl [vmem:[#allocation1] sm:$0xff pattern:$0x75316420]  ;;  %v624_v22 = vld.sshfl [vmem:[#allocation1 + $0x8] sm:$0xff pattern:$0x75316420] }
  0xab   : > { %4719 = vmatpush.msk.msrb.mxu2 %vm631_vm0, %v623_v21  ;;  %4721 = vmatpush.msk.msra.mxu1 %vm631_vm0, %v624_v22  ;;  %848 = vst [vmem:[#allocation1] ss:$2 sm:$0xff] %v460_v0 }
  0xac   : > { %v626_v23 = vld.sshfl [vmem:[#allocation1 + $0x18] sm:$0xff pattern:$0x75316420]  ;;  %v625_v24 = vld.sshfl [vmem:[#allocation1 + $0x10] sm:$0xff pattern:$0x75316420] }
  0xad   : > { %4725 = vmatpush.msk.msrb.mxu3 %vm631_vm0, %v626_v23  ;;  %4723 = vmatpush.msk.msra.mxu2 %vm631_vm0, %v625_v24  ;;  %850 = vst [vmem:[#allocation1 + $0x10] ss:$2 sm:$0xff] %v461_v1 }
  0xae   : > { %542 = vmatmul.f32.vlgmr.msrb.gmra.mxu1 %v486_v5 }
  0xb2   : > { %v851_v29 = vld.sshfl [vmem:[#allocation1] sm:$0xff pattern:$0x75316420]  ;;  %v852_v30 = vld.sshfl [vmem:[#allocation1 + $0x8] sm:$0xff pattern:$0x75316420] }
  0xb3   : > { %4727 = vmatpush.msk.msra.mxu0 %vm631_vm0, %v851_v29  ;;  %4792 = vmatpush.msk.msrb.mxu1 %vm631_vm0, %v852_v30 }
  0xb4   : > { %v853_v31 = vld.sshfl [vmem:[#allocation1 + $0x10] sm:$0xff pattern:$0x75316420]  ;;  %v854_v32 = vld.sshfl [vmem:[#allocation1 + $0x18] sm:$0xff pattern:$0x75316420] }
  0xb5   : > { %4922 = vmatpush.msk.msra.mxu3 %vm631_vm0, %v854_v32 }
 0x123   : > { %v523_v14 = vpop.f32.mrf.mxu1 }
 0x12b   : > { %v543_v15 = vpop.f32.mrf.mxu1  ;;  %v563_v16 = vpop.f32.mrf.mxu2 }
 0x12c   : > { %v544_v17 = vadd.f32 %v543_v15, %v523_v14  ;;  %v583_v18 = vpop.f32.mrf.mxu3 }
 0x12e   : > { %v564_v19 = vadd.f32 %v563_v16, %v544_v17 }
 0x130   : > { %v584_v20 = vadd.f32 %v583_v18, %v564_v19 }
 0x132   : > { %586 = vxpose.xlu0.b32.start.end [1/1] (short) (narrow) %v584_v20, 8 }
 0x1d6   : > { %v602_v25 = vpop.trf.xlu0 }
 0x1d7   : > { %4720 = vmatmul.msk.f32.vlgmr.msrb.gmra.mxu2 %vm627_vm1, %v602_v25  ;;  %4722 = vmatmul.msk.f32.vlgmr.msra.gmra.mxu1 %vm627_vm1, %v602_v25 }
 0x1d8   : > { %4726 = vmatmul.msk.f32.vlgmr.msrb.gmra.mxu3 %vm627_vm1, %v602_v25  ;;  %4857 = vmatpush.msk.msrb.mxu2 %vm631_vm0, %v853_v31 }
 0x1df   : > { %4724 = vmatmul.msk.f32.vlgmr.msra.gmra.mxu2 %vm627_vm1, %v602_v25 }
 0x254   : > { %v677_v26 = vpop.f32.mrf.mxu1 }
 0x255   : > { %752 = vxpose.xlu1.b32.start.end [1/1] (short) %v677_v26, 128 }
 0x25a   : > { %v657_v27 = vpop.f32.mrf.mxu2 }
 0x25b   : > { %v717_v28 = vpop.f32.mrf.mxu3  ;;  %720 = vxpose.xlu0.b32.start.end [1/1] (short) %v657_v27, 128 }
 0x25c   : > { %816 = vxpose.xlu2.b32.start.end [1/1] (short) %v717_v28, 128 }
 0x262   : > { %v697_v33 = vpop.f32.mrf.mxu2 }
 0x2d5   : > { %784 = vxpose.xlu1.b32.start.end [1/1] (short) %v697_v33, 128 }
 0x2f5   : > { %v6415_v9 = vpop.trf.xlu2 }
 0x2f6   : > { %11051 = vst [vmem:[#allocation31_spill] sm:$0xff] %v6415_v9 }
 0x2f9   : > { %v6289_v35 = vpop.trf.xlu1 }
 0x2fd   : > { %v6443_v20 = vpop.trf.xlu2 }
 0x2fe   : > { %11056 = vst [vmem:[#allocation36_spill] sm:$0xff] %v6443_v20 }
 0x2ff   : > { %v736_v34 = vpop.trf.xlu0 }
 0x300   : > { %4728 = vmatmul.msk.f32.vlgmr.msra.gmra.mxu0 %vm627_vm1, %v736_v34  ;;  %4793 = vmatmul.msk.f32.vlgmr.msrb.gmra.mxu1 %vm627_vm1, %v736_v34 }
 0x301   : > { %4858 = vmatmul.msk.f32.vlgmr.msrb.gmra.mxu2 %vm627_vm1, %v736_v34  ;;  %4923 = vmatmul.msk.f32.vlgmr.msra.gmra.mxu3 %vm627_vm1, %v736_v34  ;;  %v6295_v37 = vpop.trf.xlu1 }
 0x307   : > { %v737_v36 = vpop.trf.xlu0 }
 0x308   : > { %4729 = vmatmul.msk.f32.gmra.mxu0 %vm627_vm1, %v737_v36  ;;  %4794 = vmatmul.msk.f32.gmra.mxu1 %vm627_vm1, %v737_v36 }
 0x309   : > { %4859 = vmatmul.msk.f32.gmra.mxu2 %vm627_vm1, %v737_v36  ;;  %4924 = vmatmul.msk.f32.gmra.mxu3 %vm627_vm1, %v737_v36  ;;  %v6301_v39 = vpop.trf.xlu1 }
 0x30f   : > { %v738_v38 = vpop.trf.xlu0 }
 0x310   : > { %4730 = vmatmul.msk.f32.gmra.mxu0 %vm627_vm1, %v738_v38  ;;  %4795 = vmatmul.msk.f32.gmra.mxu1 %vm627_vm1, %v738_v38 }
 0x311   : > { %4860 = vmatmul.msk.f32.gmra.mxu2 %vm627_vm1, %v738_v38  ;;  %4925 = vmatmul.msk.f32.gmra.mxu3 %vm627_vm1, %v738_v38  ;;  %v6307_v41 = vpop.trf.xlu1 }
 0x317   : > { %v739_v40 = vpop.trf.xlu0 }
 0x318   : > { %4731 = vmatmul.msk.f32.gmra.mxu0 %vm627_vm1, %v739_v40  ;;  %4796 = vmatmul.msk.f32.gmra.mxu1 %vm627_vm1, %v739_v40 }
 0x319   : > { %4861 = vmatmul.msk.f32.gmra.mxu2 %vm627_vm1, %v739_v40  ;;  %4926 = vmatmul.msk.f32.gmra.mxu3 %vm627_vm1, %v739_v40  ;;  %v6313_v43 = vpop.trf.xlu1 }
 0x31f   : > { %v740_v42 = vpop.trf.xlu0 }
 0x320   : > { %4732 = vmatmul.msk.f32.gmra.mxu0 %vm627_vm1, %v740_v42  ;;  %4797 = vmatmul.msk.f32.gmra.mxu1 %vm627_vm1, %v740_v42 }
 0x321   : > { %4862 = vmatmul.msk.f32.gmra.mxu2 %vm627_vm1, %v740_v42  ;;  %4927 = vmatmul.msk.f32.gmra.mxu3 %vm627_vm1, %v740_v42  ;;  %v6319_v45 = vpop.trf.xlu1 }
 0x327   : > { %v741_v44 = vpop.trf.xlu0 }
 0x328   : > { %4733 = vmatmul.msk.f32.gmra.mxu0 %vm627_vm1, %v741_v44  ;;  %4798 = vmatmul.msk.f32.gmra.mxu1 %vm627_vm1, %v741_v44 }
 0x329   : > { %4863 = vmatmul.msk.f32.gmra.mxu2 %vm627_vm1, %v741_v44  ;;  %4928 = vmatmul.msk.f32.gmra.mxu3 %vm627_vm1, %v741_v44  ;;  %v6325_v47 = vpop.trf.xlu1 }
 0x32f   : > { %v742_v46 = vpop.trf.xlu0 }
 0x330   : > { %4734 = vmatmul.msk.f32.gmra.mxu0 %vm627_vm1, %v742_v46  ;;  %4799 = vmatmul.msk.f32.gmra.mxu1 %vm627_vm1, %v742_v46 }
 0x331   : > { %4864 = vmatmul.msk.f32.gmra.mxu2 %vm627_vm1, %v742_v46  ;;  %4929 = vmatmul.msk.f32.gmra.mxu3 %vm627_vm1, %v742_v46  ;;  %v6331_v49 = vpop.trf.xlu1 }
 0x337   : > { %v743_v48 = vpop.trf.xlu0 }
 0x338   : > { %4735 = vmatmul.msk.f32.gmra.mxu0 %vm627_vm1, %v743_v48  ;;  %4800 = vmatmul.msk.f32.gmra.mxu1 %vm627_vm1, %v743_v48 }
 0x339   : > { %4865 = vmatmul.msk.f32.gmra.mxu2 %vm627_vm1, %v743_v48  ;;  %4930 = vmatmul.msk.f32.gmra.mxu3 %vm627_vm1, %v743_v48  ;;  %v6337_v51 = vpop.trf.xlu1 }
 0x33f   : > { %v744_v50 = vpop.trf.xlu0 }
 0x340   : > { %4736 = vmatmul.msk.f32.gmra.mxu0 %vm627_vm1, %v744_v50  ;;  %4801 = vmatmul.msk.f32.gmra.mxu1 %vm627_vm1, %v744_v50 }
 0x341   : > { %4866 = vmatmul.msk.f32.gmra.mxu2 %vm627_vm1, %v744_v50  ;;  %4931 = vmatmul.msk.f32.gmra.mxu3 %vm627_vm1, %v744_v50  ;;  %v6343_v53 = vpop.trf.xlu1 }
 0x347   : > { %v745_v52 = vpop.trf.xlu0 }
 0x348   : > { %4737 = vmatmul.msk.f32.gmra.mxu0 %vm627_vm1, %v745_v52  ;;  %4802 = vmatmul.msk.f32.gmra.mxu1 %vm627_vm1, %v745_v52 }
 0x349   : > { %4867 = vmatmul.msk.f32.gmra.mxu2 %vm627_vm1, %v745_v52  ;;  %4932 = vmatmul.msk.f32.gmra.mxu3 %vm627_vm1, %v745_v52  ;;  %v6349_v55 = vpop.trf.xlu1 }
 0x34f   : > { %v746_v54 = vpop.trf.xlu0 }
 0x350   : > { %4738 = vmatmul.msk.f32.gmra.mxu0 %vm627_vm1, %v746_v54  ;;  %4803 = vmatmul.msk.f32.gmra.mxu1 %vm627_vm1, %v746_v54 }
 0x351   : > { %4868 = vmatmul.msk.f32.gmra.mxu2 %vm627_vm1, %v746_v54  ;;  %4933 = vmatmul.msk.f32.gmra.mxu3 %vm627_vm1, %v746_v54  ;;  %v6355_v57 = vpop.trf.xlu1 }
 0x357   : > { %v747_v56 = vpop.trf.xlu0 }
 0x358   : > { %4739 = vmatmul.msk.f32.gmra.mxu0 %vm627_vm1, %v747_v56  ;;  %4804 = vmatmul.msk.f32.gmra.mxu1 %vm627_vm1, %v747_v56 }
 0x359   : > { %4869 = vmatmul.msk.f32.gmra.mxu2 %vm627_vm1, %v747_v56  ;;  %4934 = vmatmul.msk.f32.gmra.mxu3 %vm627_vm1, %v747_v56  ;;  %v6361_v59 = vpop.trf.xlu1 }
 0x35f   : > { %v748_v58 = vpop.trf.xlu0 }
 0x360   : > { %4740 = vmatmul.msk.f32.gmra.mxu0 %vm627_vm1, %v748_v58  ;;  %4805 = vmatmul.msk.f32.gmra.mxu1 %vm627_vm1, %v748_v58 }
 0x361   : > { %4870 = vmatmul.msk.f32.gmra.mxu2 %vm627_vm1, %v748_v58  ;;  %4935 = vmatmul.msk.f32.gmra.mxu3 %vm627_vm1, %v748_v58  ;;  %v6367_v61 = vpop.trf.xlu1 }
 0x367   : > { %v749_v60 = vpop.trf.xlu0 }
 0x368   : > { %4741 = vmatmul.msk.f32.gmra.mxu0 %vm627_vm1, %v749_v60  ;;  %4806 = vmatmul.msk.f32.gmra.mxu1 %vm627_vm1, %v749_v60 }
 0x369   : > { %4871 = vmatmul.msk.f32.gmra.mxu2 %vm627_vm1, %v749_v60  ;;  %4936 = vmatmul.msk.f32.gmra.mxu3 %vm627_vm1, %v749_v60  ;;  %v6373_v63 = vpop.trf.xlu1 }
 0x36f   : > { %v750_v62 = vpop.trf.xlu0 }
 0x370   : > { %4742 = vmatmul.msk.f32.gmra.mxu0 %vm627_vm1, %v750_v62  ;;  %4807 = vmatmul.msk.f32.gmra.mxu1 %vm627_vm1, %v750_v62 }
 0x371   : > { %4872 = vmatmul.msk.f32.gmra.mxu2 %vm627_vm1, %v750_v62  ;;  %4937 = vmatmul.msk.f32.gmra.mxu3 %vm627_vm1, %v750_v62  ;;  %v6379_v1 = vpop.trf.xlu1 }
 0x377   : > { %v751_v0 = vpop.trf.xlu0 }
 0x378   : > { %4743 = vmatmul.msk.f32.gmra.mxu0 %vm627_vm1, %v751_v0  ;;  %4808 = vmatmul.msk.f32.gmra.mxu1 %vm627_vm1, %v751_v0 }
 0x379   : > { %4873 = vmatmul.msk.f32.gmra.mxu2 %vm627_vm1, %v751_v0  ;;  %4938 = vmatmul.msk.f32.gmra.mxu3 %vm627_vm1, %v751_v0  ;;  %v6397_v4 = vpop.trf.xlu1 }
 0x37d   : > { %v6385_v2 = vpop.f32.mrf.mxu0  ;;  %v6387_v3 = vpop.f32.mrf.mxu1 }
 0x37e   : > { %11045 = vst [vmem:[#allocation25_spill] sm:$0xff] %v6385_v2  ;;  %v1891_v40 = vmax.f32 %v6385_v2, %v6387_v3 }
 0x37f   : > { %11046 = vst [vmem:[#allocation26_spill] sm:$0xff] %v6387_v3 }
 0x380   : > { %4744 = vmatmul.msk.f32.gmra.mxu0 %vm627_vm1, %v6289_v35  ;;  %4809 = vmatmul.msk.f32.gmra.mxu1 %vm627_vm1, %v6289_v35 }
 0x381   : > { %4874 = vmatmul.msk.f32.gmra.mxu2 %vm627_vm1, %v6289_v35  ;;  %4939 = vmatmul.msk.f32.gmra.mxu3 %vm627_vm1, %v6289_v35  ;;  %v6417_v10 = vpop.trf.xlu1  ;;  %v6477_v35 = vpop.trf.xlu2 }
 0x382   : > { %11065 = vst [vmem:[#allocation45_spill] sm:$0xff] %v6477_v35 }
 0x384   : > { %v6399_v5 = vpop.f32.mrf.mxu2  ;;  %v6401_v6 = vpop.f32.mrf.mxu3 }
 0x385   : > { %11047 = vst [vmem:[#allocation27_spill] sm:$0xff] %v6399_v5  ;;  %v6403_v7 = vpop.f32.mrf.mxu0  ;;  %v6405_v8 = vpop.f32.mrf.mxu1  ;;  %v1892_v46 = vmax.f32 %v1891_v40, %v6399_v5 }
 0x386   : > { %11048 = vst [vmem:[#allocation28_spill] sm:$0xff] %v6401_v6  ;;  %v1896_v11 = vmax.f32 %v6403_v7, %v6405_v8 }
 0x387   : > { %11049 = vst [vmem:[#allocation29_spill] sm:$0xff] %v6403_v7  ;;  %v1893_v50 = vmax.f32 %v1892_v46, %v6401_v6 }
 0x388   : > { %11050 = vst [vmem:[#allocation30_spill] sm:$0xff] %v6405_v8  ;;  %4745 = vmatmul.msk.f32.gmra.mxu0 %vm627_vm1, %v6295_v37  ;;  %4810 = vmatmul.msk.f32.gmra.mxu1 %vm627_vm1, %v6295_v37 }
 0x389   : > { %4875 = vmatmul.msk.f32.gmra.mxu2 %vm627_vm1, %v6295_v37  ;;  %4940 = vmatmul.msk.f32.gmra.mxu3 %vm627_vm1, %v6295_v37  ;;  %v6439_v18 = vpop.trf.xlu1  ;;  %v6512_v48 = vpop.trf.xlu2 }
 0x38a   : > { %11070 = vst [vmem:[#allocation50_spill] sm:$0xff] %v6512_v48 }
 0x38c   : > { %v6421_v12 = vpop.f32.mrf.mxu2  ;;  %v6423_v13 = vpop.f32.mrf.mxu3 }
 0x38d   : > { %11052 = vst [vmem:[#allocation32_spill] sm:$0xff] %v6421_v12  ;;  %v6425_v14 = vpop.f32.mrf.mxu0  ;;  %v6427_v15 = vpop.f32.mrf.mxu1  ;;  %v1897_v16 = vmax.f32 %v1896_v11, %v6421_v12 }
 0x38e   : > { %11053 = vst [vmem:[#allocation33_spill] sm:$0xff] %v6423_v13  ;;  %v1901_v19 = vmax.f32 %v6425_v14, %v6427_v15 }
 0x38f   : > { %11054 = vst [vmem:[#allocation34_spill] sm:$0xff] %v6425_v14  ;;  %v1898_v17 = vmax.f32 %v1897_v16, %v6423_v13 }
 0x390   : > { %11055 = vst [vmem:[#allocation35_spill] sm:$0xff] %v6427_v15  ;;  %4746 = vmatmul.msk.f32.gmra.mxu0 %vm627_vm1, %v6301_v39  ;;  %4811 = vmatmul.msk.f32.gmra.mxu1 %vm627_vm1, %v6301_v39 }
 0x391   : > { %4876 = vmatmul.msk.f32.gmra.mxu2 %vm627_vm1, %v6301_v39  ;;  %4941 = vmatmul.msk.f32.gmra.mxu3 %vm627_vm1, %v6301_v39  ;;  %v6463_v27 = vpop.trf.xlu1  ;;  %v6536_v0 = vpop.trf.xlu2 }
 0x392   : > { %1899 = vmax.xlane.f32.xlu0 %v1898_v17  ;;  %11073 = vst [vmem:[#allocation53_spill] sm:$0xff] %v6536_v0 }
 0x394   : > { %v6445_v21 = vpop.f32.mrf.mxu2  ;;  %v6447_v22 = vpop.f32.mrf.mxu3 }
 0x395   : > { %11057 = vst [vmem:[#allocation37_spill] sm:$0xff] %v6445_v21  ;;  %v6449_v23 = vpop.f32.mrf.mxu0  ;;  %v6451_v24 = vpop.f32.mrf.mxu1  ;;  %v1902_v25 = vmax.f32 %v1901_v19, %v6445_v21 }
 0x396   : > { %11058 = vst [vmem:[#allocation38_spill] sm:$0xff] %v6447_v22  ;;  %v1906_v28 = vmax.f32 %v6449_v23, %v6451_v24 }
 0x397   : > { %11059 = vst [vmem:[#allocation39_spill] sm:$0xff] %v6449_v23  ;;  %v1903_v26 = vmax.f32 %v1902_v25, %v6447_v22 }
 0x398   : > { %11060 = vst [vmem:[#allocation40_spill] sm:$0xff] %v6451_v24  ;;  %4747 = vmatmul.msk.f32.gmra.mxu0 %vm627_vm1, %v6307_v41  ;;  %4812 = vmatmul.msk.f32.gmra.mxu1 %vm627_vm1, %v6307_v41 }
 0x399   : > { %4877 = vmatmul.msk.f32.gmra.mxu2 %vm627_vm1, %v6307_v41  ;;  %4942 = vmatmul.msk.f32.gmra.mxu3 %vm627_vm1, %v6307_v41  ;;  %v6487_v36 = vpop.trf.xlu1 }
 0x39a   : > { %1904 = vmax.xlane.f32.xlu0 %v1903_v26 }
 0x39c   : > { %v6467_v29 = vpop.f32.mrf.mxu2  ;;  %v6469_v30 = vpop.f32.mrf.mxu3 }
 0x39d   : > { %11061 = vst [vmem:[#allocation41_spill] sm:$0xff] %v6467_v29  ;;  %v6471_v31 = vpop.f32.mrf.mxu0  ;;  %v6473_v32 = vpop.f32.mrf.mxu1  ;;  %v1907_v33 = vmax.f32 %v1906_v28, %v6467_v29 }
 0x39e   : > { %11062 = vst [vmem:[#allocation42_spill] sm:$0xff] %v6469_v30  ;;  %v1911_v37 = vmax.f32 %v6471_v31, %v6473_v32 }
 0x39f   : > { %11063 = vst [vmem:[#allocation43_spill] sm:$0xff] %v6471_v31  ;;  %v1908_v34 = vmax.f32 %v1907_v33, %v6469_v30 }
 0x3a0   : > { %11064 = vst [vmem:[#allocation44_spill] sm:$0xff] %v6473_v32  ;;  %4748 = vmatmul.msk.f32.gmra.mxu0 %vm627_vm1, %v6313_v43  ;;  %4813 = vmatmul.msk.f32.gmra.mxu1 %vm627_vm1, %v6313_v43 }
 0x3a1   : > { %4878 = vmatmul.msk.f32.gmra.mxu2 %vm627_vm1, %v6313_v43  ;;  %4943 = vmatmul.msk.f32.gmra.mxu3 %vm627_vm1, %v6313_v43  ;;  %v6515_v52 = vpop.trf.xlu1 }
 0x3a2   : > { %1909 = vmax.xlane.f32.xlu2 %v1908_v34 }
 0x3a4   : > { %v6491_v38 = vpop.f32.mrf.mxu2  ;;  %v6493_v39 = vpop.f32.mrf.mxu3 }
 0x3a5   : > { %11066 = vst [vmem:[#allocation46_spill] sm:$0xff] %v6491_v38  ;;  %v6497_v41 = vpop.f32.mrf.mxu0  ;;  %v6499_v42 = vpop.f32.mrf.mxu1  ;;  %v1912_v44 = vmax.f32 %v1911_v37, %v6491_v38 }
 0x3a6   : > { %11067 = vst [vmem:[#allocation47_spill] sm:$0xff] %v6493_v39  ;;  %v1916_v58 = vmax.f32 %v6497_v41, %v6499_v42 }
 0x3a7   : > { %11068 = vst [vmem:[#allocation48_spill] sm:$0xff] %v6497_v41  ;;  %v1913_v43 = vmax.f32 %v1912_v44, %v6493_v39 }
 0x3a8   : > { %11069 = vst [vmem:[#allocation49_spill] sm:$0xff] %v6499_v42  ;;  %4749 = vmatmul.msk.f32.gmra.mxu0 %vm627_vm1, %v6319_v45  ;;  %4814 = vmatmul.msk.f32.gmra.mxu1 %vm627_vm1, %v6319_v45 }
 0x3a9   : > { %4879 = vmatmul.msk.f32.gmra.mxu2 %vm627_vm1, %v6319_v45  ;;  %4944 = vmatmul.msk.f32.gmra.mxu3 %vm627_vm1, %v6319_v45  ;;  %v6550_v33 = vpop.trf.xlu1 }
 0x3aa   : > { %1914 = vmax.xlane.f32.xlu2 %v1913_v43 }
 0x3ac   : > { %v6517_v54 = vpop.f32.mrf.mxu2  ;;  %v6519_v56 = vpop.f32.mrf.mxu3 }
 0x3ad   : > { %11071 = vst [vmem:[#allocation51_spill] sm:$0xff] %v6517_v54  ;;  %v6523_v60 = vpop.f32.mrf.mxu0  ;;  %v6525_v62 = vpop.f32.mrf.mxu1  ;;  %1894 = vmax.xlane.f32.xlu1 %v1893_v50  ;;  %v1917_v45 = vmax.f32 %v1916_v58, %v6517_v54 }
 0x3ae   : > { %11072 = vst [vmem:[#allocation52_spill] sm:$0xff] %v6519_v56  ;;  %v1921_v19 = vmax.f32 %v6523_v60, %v6525_v62  ;;  %v6572_v50 = vpop.trf.xlu2 }
 0x3af   : > { %v1918_v11 = vmax.f32 %v1917_v45, %v6519_v56  ;;  %11074 = vst [vmem:[#allocation54_spill] sm:$0xff] %v6572_v50 }
 0x3b0   : > { %4750 = vmatmul.msk.f32.gmra.mxu0 %vm627_vm1, %v6325_v47  ;;  %4815 = vmatmul.msk.f32.gmra.mxu1 %vm627_vm1, %v6325_v47 }
 0x3b1   : > { %4880 = vmatmul.msk.f32.gmra.mxu2 %vm627_vm1, %v6325_v47  ;;  %4945 = vmatmul.msk.f32.gmra.mxu3 %vm627_vm1, %v6325_v47  ;;  %v6583_v58 = vpop.trf.xlu1 }
 0x3b4   : > { %v6539_v16 = vpop.f32.mrf.mxu2  ;;  %v6541_v17 = vpop.f32.mrf.mxu3 }
 0x3b5   : > { %v6545_v25 = vpop.f32.mrf.mxu0  ;;  %v6547_v26 = vpop.f32.mrf.mxu1  ;;  %1919 = vmax.xlane.f32.xlu1 %v1918_v11  ;;  %v1922_v28 = vmax.f32 %v1921_v19, %v6539_v16 }
 0x3b6   : > { %v1926_v47 = vmax.f32 %v6545_v25, %v6547_v26 }
 0x3b7   : > { %v1923_v34 = vmax.f32 %v1922_v28, %v6541_v17 }
 0x3b8   : > { %4751 = vmatmul.msk.f32.gmra.mxu0 %vm627_vm1, %v6331_v49  ;;  %4816 = vmatmul.msk.f32.gmra.mxu1 %vm627_vm1, %v6331_v49 }
 0x3b9   : > { %4946 = vmatmul.msk.f32.gmra.mxu3 %vm627_vm1, %v6331_v49  ;;  %4881 = vmatmul.msk.f32.gmra.mxu2 %vm627_vm1, %v6331_v49 }
 0x3bc   : > { %v6563_v37 = vpop.f32.mrf.mxu2  ;;  %v6565_v40 = vpop.f32.mrf.mxu3 }
 0x3bd   : > { %v6567_v44 = vpop.f32.mrf.mxu0  ;;  %v6569_v43 = vpop.f32.mrf.mxu1  ;;  %1924 = vmax.xlane.f32.xlu1 %v1923_v34  ;;  %v1927_v46 = vmax.f32 %v1926_v47, %v6563_v37 }
 0x3be   : > { %v1931_v45 = vmax.f32 %v6567_v44, %v6569_v43 }
 0x3bf   : > { %v1928_v49 = vmax.f32 %v1927_v46, %v6565_v40 }
 0x3c0   : > { %4752 = vmatmul.msk.f32.gmra.mxu0 %vm627_vm1, %v6337_v51  ;;  %4817 = vmatmul.msk.f32.gmra.mxu1 %vm627_vm1, %v6337_v51 }
 0x3c1   : > { %4947 = vmatmul.msk.f32.gmra.mxu3 %vm627_vm1, %v6337_v51  ;;  %4882 = vmatmul.msk.f32.gmra.mxu2 %vm627_vm1, %v6337_v51  ;;  %v6601_v51 = vpop.trf.xlu2 }
 0x3c2   : > { %1929 = vmax.xlane.f32.xlu0 %v1928_v49  ;;  %11075 = vst [vmem:[#allocation55_spill] sm:$0xff] %v6601_v51 }
 0x3c4   : > { %v6587_v11 = vpop.f32.mrf.mxu2  ;;  %v6589_v19 = vpop.f32.mrf.mxu3 }
 0x3c5   : > { %v6591_v28 = vpop.f32.mrf.mxu0  ;;  %v6593_v47 = vpop.f32.mrf.mxu1  ;;  %v1932_v34 = vmax.f32 %v1931_v45, %v6587_v11 }
 0x3c6   : > { %v1936_v49 = vmax.f32 %v6591_v28, %v6593_v47  ;;  %v6609_v45 = vpop.trf.xlu1 }
 0x3c7   : > { %v1933_v46 = vmax.f32 %v1932_v34, %v6589_v19 }
 0x3c8   : > { %4753 = vmatmul.msk.f32.gmra.mxu0 %vm627_vm1, %v6343_v53  ;;  %4818 = vmatmul.msk.f32.gmra.mxu1 %vm627_vm1, %v6343_v53 }
 0x3c9   : > { %4948 = vmatmul.msk.f32.gmra.mxu3 %vm627_vm1, %v6343_v53  ;;  %4883 = vmatmul.msk.f32.gmra.mxu2 %vm627_vm1, %v6343_v53  ;;  %v6629_v53 = vpop.trf.xlu2 }
 0x3ca   : > { %1934 = vmax.xlane.f32.xlu0 %v1933_v46  ;;  %11076 = vst [vmem:[#allocation56_spill] sm:$0xff] %v6629_v53 }
 0x3cc   : > { %v6611_v34 = vpop.f32.mrf.mxu2  ;;  %v6613_v6 = vpop.f32.mrf.mxu3 }
 0x3cd   : > { %v6615_v5 = vpop.f32.mrf.mxu0  ;;  %v6617_v3 = vpop.f32.mrf.mxu1  ;;  %v1937_v2 = vmax.f32 %v1936_v49, %v6611_v34 }
 0x3ce   : > { %v1941_v46 = vmax.f32 %v6615_v5, %v6617_v3  ;;  %v6643_v21 = vpop.trf.xlu1 }
 0x3cf   : > { %v1938_v30 = vmax.f32 %v1937_v2, %v6613_v6 }
 0x3d0   : > { %4754 = vmatmul.msk.f32.gmra.mxu0 %vm627_vm1, %v6349_v55  ;;  %4819 = vmatmul.msk.f32.gmra.mxu1 %vm627_vm1, %v6349_v55 }
 0x3d1   : > { %4949 = vmatmul.msk.f32.gmra.mxu3 %vm627_vm1, %v6349_v55  ;;  %4884 = vmatmul.msk.f32.gmra.mxu2 %vm627_vm1, %v6349_v55  ;;  %v6664_v56 = vpop.trf.xlu2 }
 0x3d2   : > { %1939 = vmax.xlane.f32.xlu2 %v1938_v30  ;;  %11077 = vst [vmem:[#allocation57_spill] sm:$0xff] %v6664_v56 }
 0x3d4   : > { %v6633_v49 = vpop.f32.mrf.mxu2  ;;  %v6635_v2 = vpop.f32.mrf.mxu3 }
 0x3d5   : > { %v6637_v29 = vpop.f32.mrf.mxu0  ;;  %v6639_v24 = vpop.f32.mrf.mxu1  ;;  %v1942_v23 = vmax.f32 %v1941_v46, %v6633_v49 }
 0x3d6   : > { %v1946_v55 = vmax.f32 %v6637_v29, %v6639_v24 }
 0x3d7   : > { %v1943_v22 = vmax.f32 %v1942_v23, %v6635_v2 }
 0x3d8   : > { %4755 = vmatmul.msk.f32.gmra.mxu0 %vm627_vm1, %v6355_v57  ;;  %4820 = vmatmul.msk.f32.gmra.mxu1 %vm627_vm1, %v6355_v57 }
 0x3d9   : > { %4950 = vmatmul.msk.f32.gmra.mxu3 %vm627_vm1, %v6355_v57  ;;  %4885 = vmatmul.msk.f32.gmra.mxu2 %vm627_vm1, %v6355_v57  ;;  %v6675_v57 = vpop.trf.xlu1 }
 0x3da   : > { %1944 = vmax.xlane.f32.xlu0 %v1943_v22 }
 0x3dc   : > { %v6655_v30 = vpop.f32.mrf.mxu2  ;;  %v6657_v23 = vpop.f32.mrf.mxu3 }
 0x3dd   : > { %v6659_v46 = vpop.f32.mrf.mxu0  ;;  %v6661_v15 = vpop.f32.mrf.mxu1  ;;  %v1947_v14 = vmax.f32 %v1946_v55, %v6655_v30 }
 0x3de   : > { %v1951_v22 = vmax.f32 %v6659_v46, %v6661_v15 }
 0x3df   : > { %v1948_v54 = vmax.f32 %v1947_v14, %v6657_v23 }
 0x3e0   : > { %4756 = vmatmul.msk.f32.gmra.mxu0 %vm627_vm1, %v6361_v59  ;;  %4821 = vmatmul.msk.f32.gmra.mxu1 %vm627_vm1, %v6361_v59 }
 0x3e1   : > { %4951 = vmatmul.msk.f32.gmra.mxu3 %vm627_vm1, %v6361_v59  ;;  %4886 = vmatmul.msk.f32.gmra.mxu2 %vm627_vm1, %v6361_v59  ;;  %v6693_v59 = vpop.trf.xlu2 }
 0x3e2   : > { %1949 = vmax.xlane.f32.xlu2 %v1948_v54  ;;  %11078 = vst [vmem:[#allocation58_spill] sm:$0xff] %v6693_v59 }
 0x3e4   : > { %v6679_v55 = vpop.f32.mrf.mxu2  ;;  %v6681_v14 = vpop.f32.mrf.mxu3 }
 0x3e5   : > { %v6683_v42 = vpop.f32.mrf.mxu0  ;;  %v6685_v41 = vpop.f32.mrf.mxu1  ;;  %v1952_v39 = vmax.f32 %v1951_v22, %v6679_v55 }
 0x3e6   : > { %v1956_v54 = vmax.f32 %v6683_v42, %v6685_v41  ;;  %v6701_v22 = vpop.trf.xlu1 }
 0x3e7   : > { %v1953_v38 = vmax.f32 %v1952_v39, %v6681_v14 }
 0x3e8   : > { %4757 = vmatmul.msk.f32.gmra.mxu0 %vm627_vm1, %v6367_v61  ;;  %4822 = vmatmul.msk.f32.gmra.mxu1 %vm627_vm1, %v6367_v61 }
 0x3e9   : > { %4952 = vmatmul.msk.f32.gmra.mxu3 %vm627_vm1, %v6367_v61  ;;  %4887 = vmatmul.msk.f32.gmra.mxu2 %vm627_vm1, %v6367_v61  ;;  %v6721_v61 = vpop.trf.xlu2 }
 0x3ea   : > { %1954 = vmax.xlane.f32.xlu0 %v1953_v38  ;;  %11079 = vst [vmem:[#allocation59_spill] sm:$0xff] %v6721_v61 }
 0x3ec   : > { %v6703_v39 = vpop.f32.mrf.mxu2  ;;  %v6705_v32 = vpop.f32.mrf.mxu3 }
 0x3ed   : > { %v6707_v31 = vpop.f32.mrf.mxu0  ;;  %v6709_v13 = vpop.f32.mrf.mxu1  ;;  %v1957_v12 = vmax.f32 %v1956_v54, %v6703_v39 }
 0x3ee   : > { %v1961_v38 = vmax.f32 %v6707_v31, %v6709_v13  ;;  %v6735_v51 = vpop.trf.xlu1 }
 0x3ef   : > { %v1958_v8 = vmax.f32 %v1957_v12, %v6705_v32 }
 0x3f0   : > { %4758 = vmatmul.msk.f32.gmra.mxu0 %vm627_vm1, %v6373_v63  ;;  %4823 = vmatmul.msk.f32.gmra.mxu1 %vm627_vm1, %v6373_v63 }
 0x3f1   : > { %4953 = vmatmul.msk.f32.gmra.mxu3 %vm627_vm1, %v6373_v63  ;;  %4888 = vmatmul.msk.f32.gmra.mxu2 %vm627_vm1, %v6373_v63  ;;  %v6756_v0 = vpop.trf.xlu2 }
 0x3f2   : > { %1959 = vmax.xlane.f32.xlu2 %v1958_v8  ;;  %11082 = vst [vmem:[#allocation62_spill] sm:$0xff] %v6756_v0 }
 0x3f4   : > { %v6725_v54 = vpop.f32.mrf.mxu2  ;;  %v6727_v12 = vpop.f32.mrf.mxu3 }
 0x3f5   : > { %v6729_v7 = vpop.f32.mrf.mxu0  ;;  %v6731_v59 = vpop.f32.mrf.mxu1  ;;  %v1962_v56 = vmax.f32 %v1961_v38, %v6725_v54 }
 0x3f6   : > { %v1966_v63 = vmax.f32 %v6729_v7, %v6731_v59 }
 0x3f7   : > { %v1963_v53 = vmax.f32 %v1962_v56, %v6727_v12 }
 0x3f8   : > { %4759 = vmatmul.msk.f32.gmra.mxu0 %vm627_vm1, %v6379_v1  ;;  %4824 = vmatmul.msk.f32.gmra.mxu1 %vm627_vm1, %v6379_v1 }
 0x3f9   : > { %4954 = vmatmul.msk.f32.gmra.mxu3 %vm627_vm1, %v6379_v1  ;;  %4889 = vmatmul.msk.f32.gmra.mxu2 %vm627_vm1, %v6379_v1  ;;  %v6767_v1 = vpop.trf.xlu1 }
 0x3fa   : > { %1964 = vmax.xlane.f32.xlu0 %v1963_v53 }
 0x3fc   : > { %v6747_v8 = vpop.f32.mrf.mxu2  ;;  %v6749_v56 = vpop.f32.mrf.mxu3 }
 0x3fd   : > { %v6751_v38 = vpop.f32.mrf.mxu0  ;;  %v6753_v61 = vpop.f32.mrf.mxu1  ;;  %v1967_v50 = vmax.f32 %v1966_v63, %v6747_v8 }
 0x3fe   : > { %11080 = vst [vmem:[#allocation60_spill] sm:$0xff] %v6751_v38  ;;  %v1971_v53 = vmax.f32 %v6751_v38, %v6753_v61 }
 0x3ff   : > { %11081 = vst [vmem:[#allocation61_spill] sm:$0xff] %v6753_v61  ;;  %v1968_v48 = vmax.f32 %v1967_v50, %v6749_v56 }
 0x400   : > { %4760 = vmatmul.msk.f32.gmra.mxu0 %vm627_vm1, %v6397_v4  ;;  %4825 = vmatmul.msk.f32.gmra.mxu1 %vm627_vm1, %v6397_v4 }
 0x401   : > { %4955 = vmatmul.msk.f32.gmra.mxu3 %vm627_vm1, %v6397_v4  ;;  %4890 = vmatmul.msk.f32.gmra.mxu2 %vm627_vm1, %v6397_v4  ;;  %v6785_v4 = vpop.trf.xlu2 }
 0x402   : > { %1969 = vmax.xlane.f32.xlu2 %v1968_v48  ;;  %11087 = vst [vmem:[#allocation67_spill] sm:$0xff] %v6785_v4 }
 0x404   : > { %v6771_v63 = vpop.f32.mrf.mxu3  ;;  %v6773_v50 = vpop.f32.mrf.mxu2 }
 0x405   : > { %11083 = vst [vmem:[#allocation63_spill] sm:$0xff] %v6771_v63  ;;  %v6775_v0 = vpop.f32.mrf.mxu0  ;;  %v1972_v35 = vmax.f32 %v1971_v53, %v6773_v50  ;;  %v6778_v20 = vpop.f32.mrf.mxu1 }
 0x406   : > { %11084 = vst [vmem:[#allocation64_spill] sm:$0xff] %v6773_v50  ;;  %v1976_v48 = vmax.f32 %v6775_v0, %v6778_v20  ;;  %v6793_v53 = vpop.trf.xlu1 }
 0x407   : > { %11085 = vst [vmem:[#allocation65_spill] sm:$0xff] %v6775_v0  ;;  %v1973_v9 = vmax.f32 %v1972_v35, %v6771_v63 }
 0x408   : > { %11086 = vst [vmem:[#allocation66_spill] sm:$0xff] %v6778_v20  ;;  %4761 = vmatmul.msk.f32.gmra.mxu0 %vm627_vm1, %v6417_v10  ;;  %4826 = vmatmul.msk.f32.gmra.mxu1 %vm627_vm1, %v6417_v10 }
 0x409   : > { %4956 = vmatmul.msk.f32.gmra.mxu3 %vm627_vm1, %v6417_v10  ;;  %4891 = vmatmul.msk.f32.gmra.mxu2 %vm627_vm1, %v6417_v10 }
 0x40a   : > { %1974 = vmax.xlane.f32.xlu2 %v1973_v9  ;;  %v6813_v9 = vpop.trf.xlu2 }
 0x40b   : > { %11092 = vst [vmem:[#allocation72_spill] sm:$0xff] %v6813_v9 }
 0x40c   : > { %v6795_v35 = vpop.f32.mrf.mxu3  ;;  %v6797_v63 = vpop.f32.mrf.mxu2 }
 0x40d   : > { %11088 = vst [vmem:[#allocation68_spill] sm:$0xff] %v6795_v35  ;;  %v6799_v50 = vpop.f32.mrf.mxu0  ;;  %v1977_v61 = vmax.f32 %v1976_v48, %v6797_v63  ;;  %v6802_v38 = vpop.f32.mrf.mxu1 }
 0x40e   : > { %11089 = vst [vmem:[#allocation69_spill] sm:$0xff] %v6797_v63  ;;  %v1981_v10 = vmax.f32 %v6799_v50, %v6802_v38  ;;  %v6826_v0 = vpop.trf.xlu1 }
 0x40f   : > { %11090 = vst [vmem:[#allocation70_spill] sm:$0xff] %v6799_v50  ;;  %v1978_v4 = vmax.f32 %v1977_v61, %v6795_v35 }
 0x410   : > { %11091 = vst [vmem:[#allocation71_spill] sm:$0xff] %v6802_v38  ;;  %4762 = vmatmul.msk.f32.gmra.mxu0 %vm627_vm1, %v6439_v18  ;;  %4827 = vmatmul.msk.f32.gmra.mxu1 %vm627_vm1, %v6439_v18 }
 0x411   : > { %4957 = vmatmul.msk.f32.gmra.mxu3 %vm627_vm1, %v6439_v18  ;;  %4892 = vmatmul.msk.f32.gmra.mxu2 %vm627_vm1, %v6439_v18 }
 0x412   : > { %1979 = vmax.xlane.f32.xlu1 %v1978_v4 }
 0x414   : > { %v6817_v48 = vpop.f32.mrf.mxu3  ;;  %v6819_v61 = vpop.f32.mrf.mxu2 }
 0x415   : > { %11093 = vst [vmem:[#allocation73_spill] sm:$0xff] %v6817_v48  ;;  %v6821_v35 = vpop.f32.mrf.mxu0  ;;  %v1982_v63 = vmax.f32 %v1981_v10, %v6819_v61  ;;  %v6824_v20 = vpop.f32.mrf.mxu1 }
 0x416   : > { %11094 = vst [vmem:[#allocation74_spill] sm:$0xff] %v6819_v61  ;;  %v1986_v4 = vmax.f32 %v6821_v35, %v6824_v20 }
 0x417   : > { %11095 = vst [vmem:[#allocation75_spill] sm:$0xff] %v6821_v35  ;;  %v1983_v18 = vmax.f32 %v1982_v63, %v6817_v48  ;;  %v6843_v63 = vpop.trf.xlu2 }
 0x418   : > { %11096 = vst [vmem:[#allocation76_spill] sm:$0xff] %v6824_v20  ;;  %4763 = vmatmul.msk.f32.gmra.mxu0 %vm627_vm1, %v6463_v27  ;;  %4828 = vmatmul.msk.f32.gmra.mxu1 %vm627_vm1, %v6463_v27 }
 0x419   : > { %4958 = vmatmul.msk.f32.gmra.mxu3 %vm627_vm1, %v6463_v27  ;;  %4893 = vmatmul.msk.f32.gmra.mxu2 %vm627_vm1, %v6463_v27  ;;  %11099 = vst [vmem:[#allocation79_spill] sm:$0xff] %v6843_v63 }
 0x41a   : > { %1984 = vmax.xlane.f32.xlu1 %v1983_v18  ;;  %v6861_v18 = vpop.xlane.xlu0 %1899 }
 0x41b   : > { %11103 = vst [vmem:[#allocation83_spill] sm:$0xff] %v6861_v18 }
 0x41c   : > { %v6839_v10 = vpop.f32.mrf.mxu3  ;;  %v6841_v61 = vpop.f32.mrf.mxu2 }
 0x41d   : > { %11097 = vst [vmem:[#allocation77_spill] sm:$0xff] %v6839_v10  ;;  %v6845_v48 = vpop.f32.mrf.mxu0  ;;  %v1987_v38 = vmax.f32 %v1986_v4, %v6841_v61  ;;  %v6848_v50 = vpop.f32.mrf.mxu1 }
 0x41e   : > { %11098 = vst [vmem:[#allocation78_spill] sm:$0xff] %v6841_v61 }
 0x41f   : > { %11100 = vst [vmem:[#allocation80_spill] sm:$0xff] %v6845_v48  ;;  %v1988_v9 = vmax.f32 %v1987_v38, %v6839_v10  ;;  %v1991_v38 = vmax.f32 %v6845_v48, %v6848_v50 }
 0x420   : > { %11101 = vst [vmem:[#allocation81_spill] sm:$0xff] %v6848_v50  ;;  %4764 = vmatmul.msk.f32.gmra.mxu0 %vm627_vm1, %v6487_v36  ;;  %4829 = vmatmul.msk.f32.gmra.mxu1 %vm627_vm1, %v6487_v36  ;;  %v6855_v27 = vpop.xlane.xlu1 %1894 }
 0x421   : > { %11102 = vst [vmem:[#allocation82_spill] sm:$0xff] %v6855_v27  ;;  %4959 = vmatmul.msk.f32.gmra.mxu3 %vm627_vm1, %v6487_v36  ;;  %4894 = vmatmul.msk.f32.gmra.mxu2 %vm627_vm1, %v6487_v36  ;;  %v6874_v27 = vpop.trf.xlu2 }
 0x422   : > { %1989 = vmax.xlane.f32.xlu0 %v1988_v9  ;;  %11108 = vst [vmem:[#allocation88_spill] sm:$0xff] %v6874_v27 }
 0x424   : > { %v6865_v4 = vpop.f32.mrf.mxu2  ;;  %v6867_v10 = vpop.f32.mrf.mxu3 }
 0x425   : > { %11104 = vst [vmem:[#allocation84_spill] sm:$0xff] %v6865_v4  ;;  %v6869_v61 = vpop.f32.mrf.mxu0  ;;  %v1992_v20 = vmax.f32 %v1991_v38, %v6865_v4  ;;  %v6872_v35 = vpop.f32.mrf.mxu1 }
 0x426   : > { %11105 = vst [vmem:[#allocation85_spill] sm:$0xff] %v6867_v10  ;;  %v1996_v38 = vmax.f32 %v6869_v61, %v6872_v35 }
 0x427   : > { %11106 = vst [vmem:[#allocation86_spill] sm:$0xff] %v6869_v61  ;;  %v1993_v36 = vmax.f32 %v1992_v20, %v6867_v10  ;;  %v6893_v10 = vpop.xlane.xlu0 %1904 }
 0x428   : > { %11107 = vst [vmem:[#allocation87_spill] sm:$0xff] %v6872_v35  ;;  %4765 = vmatmul.msk.f32.gmra.mxu0 %vm627_vm1, %v6515_v52  ;;  %4830 = vmatmul.msk.f32.gmra.mxu1 %vm627_vm1, %v6515_v52  ;;  %v6881_v9 = vpop.xlane.xlu1 %1919 }
 0x429   : > { %11109 = vst [vmem:[#allocation89_spill] sm:$0xff] %v6881_v9  ;;  %4960 = vmatmul.msk.f32.gmra.mxu3 %vm627_vm1, %v6515_v52  ;;  %4895 = vmatmul.msk.f32.gmra.mxu2 %vm627_vm1, %v6515_v52 }
 0x42a   : > { %1994 = vmax.xlane.f32.xlu0 %v1993_v36  ;;  %11112 = vst [vmem:[#allocation92_spill] sm:$0xff] %v6893_v10  ;;  %v6905_v36 = vpop.xlane.xlu2 %1909 }
 0x42b   : > { %11113 = vst [vmem:[#allocation93_spill] sm:$0xff] %v6905_v36 }
 0x42c   : > { %v6889_v4 = vpop.f32.mrf.mxu2  ;;  %v6891_v20 = vpop.f32.mrf.mxu3 }
 0x42d   : > { %11110 = vst [vmem:[#allocation90_spill] sm:$0xff] %v6889_v4  ;;  %v6895_v50 = vpop.f32.mrf.mxu0  ;;  %v1997_v48 = vmax.f32 %v1996_v38, %v6889_v4  ;;  %v6898_v9 = vpop.f32.mrf.mxu1 }
 0x42e   : > { %11111 = vst [vmem:[#allocation91_spill] sm:$0xff] %v6891_v20 }
 0x42f   : > { %v1998_v18 = vmax.f32 %v1997_v48, %v6891_v20  ;;  %v2001_v20 = vmax.f32 %v6895_v50, %v6898_v9 }
 0x430   : > { %4766 = vmatmul.msk.f32.gmra.mxu0 %vm627_vm1, %v6550_v33  ;;  %4831 = vmatmul.msk.f32.gmra.mxu1 %vm627_vm1, %v6550_v33  ;;  %v1925_v52 = vpop.xlane.xlu1 %1924 }
 0x431   : > { %4961 = vmatmul.msk.f32.gmra.mxu3 %vm627_vm1, %v6550_v33  ;;  %v2235_v10 = vsub.f32 %v6523_v60, %v1925_v52  ;;  %v2236_v38 = vsub.f32 %v6525_v62, %v1925_v52  ;;  %v2237_v4 = vsub.f32 %v6539_v16, %v1925_v52  ;;  %v2238_v48 = vsub.f32 %v6541_v17, %v1925_v52 }
 0x432   : > { %4896 = vmatmul.msk.f32.gmra.mxu2 %vm627_vm1, %v6550_v33  ;;  %1999 = vmax.xlane.f32.xlu2 %v1998_v18 }
 0x433   : > { %v2515_v35 = vmul.f32 1.442695, %v2235_v10  ;;  %v2517_v36 = vmul.f32 1.442695, %v2236_v38  ;;  %v2519_v61 = vmul.f32 1.442695, %v2237_v4 }
 0x434   : > { %v6917_v27 = vpop.f32.mrf.mxu3  ;;  %v6919_v63 = vpop.f32.mrf.mxu2  ;;  %v2521_v60 = vmul.f32 1.442695, %v2238_v48 }
 0x435   : > { %5101 = vpow2.f32 %v2515_v35  ;;  %v1930_v62 = vpop.xlane.xlu0 %1929  ;;  %v6921_v16 = vpop.f32.mrf.mxu0  ;;  %v2002_v17 = vmax.f32 %v2001_v20, %v6919_v63 }
 0x436   : > { %5103 = vpow2.f32 %v2517_v36  ;;  %v2239_v33 = vsub.f32 %v6545_v25, %v1930_v62  ;;  %v2240_v18 = vsub.f32 %v6547_v26, %v1930_v62  ;;  %v2241_v10 = vsub.f32 %v6563_v37, %v1930_v62  ;;  %v6927_v52 = vpop.f32.mrf.mxu1  ;;  %v6941_v37 = vpop.xlane.xlu2 %1914 }
 0x437   : > { %v2003_v4 = vmax.f32 %v2002_v17, %v6917_v27  ;;  %5105 = vpow2.f32 %v2519_v61  ;;  %v2242_v35 = vsub.f32 %v6565_v40, %v1930_v62  ;;  %11115 = vst [vmem:[#allocation95_spill] sm:$0xff] %v6941_v37  ;;  %v2006_v40 = vmax.f32 %v6921_v16, %v6927_v52 }
 0x438   : > { %v2523_v38 = vmul.f32 1.442695, %v2239_v33  ;;  %v2525_v48 = vmul.f32 1.442695, %v2240_v18  ;;  %4767 = vmatmul.msk.f32.gmra.mxu0 %vm627_vm1, %v6583_v58  ;;  %4832 = vmatmul.msk.f32.gmra.mxu1 %vm627_vm1, %v6583_v58  ;;  %5107 = vpow2.f32 %v2521_v60  ;;  %v2527_v25 = vmul.f32 1.442695, %v2241_v10 }
 0x439   : > { %4962 = vmatmul.msk.f32.gmra.mxu3 %vm627_vm1, %v6583_v58  ;;  %v2529_v20 = vmul.f32 1.442695, %v2242_v35 }
 0x43a   : > { %5109 = vpow2.f32 %v2523_v38  ;;  %4897 = vmatmul.msk.f32.gmra.mxu2 %vm627_vm1, %v6583_v58  ;;  %2004 = vmax.xlane.f32.xlu2 %v2003_v4 }
 0x43b   : > { %v6939_v26 = vpop.eup %5101  ;;  %5111 = vpow2.f32 %v2525_v48 }
 0x43c   : > { %11114 = vst [vmem:[#allocation94_spill] sm:$0xff] %v6939_v26  ;;  %v6945_v61 = vpop.eup %5103  ;;  %v6947_v36 = vpop.f32.mrf.mxu3  ;;  %5113 = vpow2.f32 %v2527_v25 }
 0x43d   : > { %11116 = vst [vmem:[#allocation96_spill] sm:$0xff] %v6945_v61  ;;  %v6949_v60 = vpop.f32.mrf.mxu2  ;;  %v1935_v62 = vpop.xlane.xlu0 %1934  ;;  %v3009_v33 = vadd.f32 %v6945_v61, %v6939_v26  ;;  %5115 = vpow2.f32 %v2529_v20 }
 0x43e   : > { %11117 = vst [vmem:[#allocation97_spill] sm:$0xff] %v6949_v60  ;;  %v6951_v17 = vpop.f32.mrf.mxu0  ;;  %v2007_v58 = vmax.f32 %v2006_v40, %v6949_v60  ;;  %v6956_v18 = vpop.eup %5105  ;;  %v2243_v10 = vsub.f32 %v6567_v44, %v1935_v62  ;;  %v2244_v4 = vsub.f32 %v6569_v43, %v1935_v62  ;;  %v2245_v35 = vsub.f32 %v6587_v11, %v1935_v62 }
 0x43f   : > { %11118 = vst [vmem:[#allocation98_spill] sm:$0xff] %v6956_v18  ;;  %v6961_v38 = vpop.f32.mrf.mxu1  ;;  %v6963_v48 = vpop.eup %5107  ;;  %v3010_v37 = vadd.f32 %v6956_v18, %v3009_v33  ;;  %v2246_v61 = vsub.f32 %v6589_v19, %v1935_v62 }
 0x440   : > { %11119 = vst [vmem:[#allocation99_spill] sm:$0xff] %v6963_v48  ;;  %v2008_v25 = vmax.f32 %v2007_v58, %v6947_v36  ;;  %v6967_v40 = vpop.eup %5109  ;;  %v2531_v26 = vmul.f32 1.442695, %v2243_v10  ;;  %v2533_v60 = vmul.f32 1.442695, %v2244_v4  ;;  %4768 = vmatmul.msk.f32.gmra.mxu0 %vm627_vm1, %v6609_v45  ;;  %4833 = vmatmul.msk.f32.gmra.mxu1 %vm627_vm1, %v6609_v45  ;;  %v2011_v62 = vmax.f32 %v6951_v17, %v6961_v38 }
 0x441   : > { %v6974_v44 = vpop.eup %5111  ;;  %v2535_v43 = vmul.f32 1.442695, %v2245_v35  ;;  %4963 = vmatmul.msk.f32.gmra.mxu3 %vm627_vm1, %v6609_v45  ;;  %v3011_v11 = vadd.f32 %v6963_v48, %v3010_v37  ;;  %v2537_v58 = vmul.f32 1.442695, %v2246_v61 }
 0x442   : > { %2009 = vmax.xlane.f32.xlu1 %v2008_v25  ;;  %5117 = vpow2.f32 %v2531_v26  ;;  %4898 = vmatmul.msk.f32.gmra.mxu2 %vm627_vm1, %v6609_v45  ;;  %v3014_v19 = vadd.f32 %v6974_v44, %v6967_v40  ;;  %v6983_v20 = vpop.eup %5113 }
 0x443   : > { %11120 = vst [vmem:[#allocation100_spill] sm:$0xff] %v6983_v20  ;;  %5119 = vpow2.f32 %v2533_v60  ;;  %3012 = vadd.xlane.f32.xlu0 %v3011_v11  ;;  %v6995_v35 = vpop.eup %5115 }
 0x444   : > { %v6987_v33 = vpop.f32.mrf.mxu3  ;;  %v3015_v26 = vadd.f32 %v6983_v20, %v3014_v19  ;;  %5121 = vpow2.f32 %v2535_v43 }
 0x445   : > { %v6989_v10 = vpop.f32.mrf.mxu2  ;;  %v1940_v37 = vpop.xlane.xlu2 %1939  ;;  %5123 = vpow2.f32 %v2537_v58 }
 0x446   : > { %v6992_v45 = vpop.f32.mrf.mxu0  ;;  %v2012_v4 = vmax.f32 %v2011_v62, %v6989_v10  ;;  %v2247_v60 = vsub.f32 %v6591_v28, %v1940_v37  ;;  %v2248_v25 = vsub.f32 %v6593_v47, %v1940_v37  ;;  %v2249_v61 = vsub.f32 %v6611_v34, %v1940_v37 }
 0x447   : > { %v7000_v11 = vpop.f32.mrf.mxu1  ;;  %v3016_v48 = vadd.f32 %v6995_v35, %v3015_v26  ;;  %v2250_v18 = vsub.f32 %v6613_v6, %v1940_v37 }
 0x448   : > { %v2013_v19 = vmax.f32 %v2012_v4, %v6987_v33  ;;  %v7004_v43 = vpop.eup %5117  ;;  %v2539_v62 = vmul.f32 1.442695, %v2247_v60  ;;  %v2541_v20 = vmul.f32 1.442695, %v2248_v25  ;;  %4769 = vmatmul.msk.f32.gmra.mxu0 %vm627_vm1, %v6643_v21  ;;  %4834 = vmatmul.msk.f32.gmra.mxu1 %vm627_vm1, %v6643_v21  ;;  %v2543_v47 = vmul.f32 1.442695, %v2249_v61 }
 0x449   : > { %11121 = vst [vmem:[#allocation101_spill] sm:$0xff] %v7004_v43  ;;  %v7011_v28 = vpop.eup %5119  ;;  %3017 = vadd.xlane.f32.xlu2 %v3016_v48  ;;  %4964 = vmatmul.msk.f32.gmra.mxu3 %vm627_vm1, %v6643_v21  ;;  %v2016_v58 = vmax.f32 %v6992_v45, %v7000_v11  ;;  %v2545_v26 = vmul.f32 1.442695, %v2250_v18 }
 0x44a   : > { %11122 = vst [vmem:[#allocation102_spill] sm:$0xff] %v7011_v28  ;;  %5125 = vpow2.f32 %v2539_v62  ;;  %4899 = vmatmul.msk.f32.gmra.mxu2 %vm627_vm1, %v6643_v21  ;;  %2014 = vmax.xlane.f32.xlu1 %v2013_v19  ;;  %v3019_v6 = vadd.f32 %v7011_v28, %v7004_v43  ;;  %v7019_v34 = vpop.eup %5121 }
 0x44b   : > { %11123 = vst [vmem:[#allocation103_spill] sm:$0xff] %v7019_v34  ;;  %5127 = vpow2.f32 %v2541_v20  ;;  %v7031_v61 = vpop.eup %5123 }
 0x44c   : > { %v7023_v37 = vpop.f32.mrf.mxu3  ;;  %v3020_v4 = vadd.f32 %v7019_v34, %v3019_v6  ;;  %5129 = vpow2.f32 %v2543_v47  ;;  %11124 = vst [vmem:[#allocation104_spill] sm:$0xff] %v7031_v61 }
 0x44d   : > { %v7025_v48 = vpop.f32.mrf.mxu2  ;;  %v1945_v60 = vpop.xlane.xlu0 %1944  ;;  %5131 = vpow2.f32 %v2545_v26 }
 0x44e   : > { %v7028_v21 = vpop.f32.mrf.mxu0  ;;  %v2017_v25 = vmax.f32 %v2016_v58, %v7025_v48  ;;  %v2251_v20 = vsub.f32 %v6615_v5, %v1945_v60  ;;  %v2252_v19 = vsub.f32 %v6617_v3, %v1945_v60  ;;  %v2253_v18 = vsub.f32 %v6633_v49, %v1945_v60 }
 0x44f   : > { %v7036_v62 = vpop.f32.mrf.mxu1  ;;  %v3021_v43 = vadd.f32 %v7031_v61, %v3020_v4  ;;  %v2254_v34 = vsub.f32 %v6635_v2, %v1945_v60 }
 0x450   : > { %v2018_v6 = vmax.f32 %v2017_v25, %v7023_v37  ;;  %v7040_v47 = vpop.eup %5125  ;;  %v2547_v58 = vmul.f32 1.442695, %v2251_v20  ;;  %v2549_v28 = vmul.f32 1.442695, %v2252_v19  ;;  %4770 = vmatmul.msk.f32.gmra.mxu0 %vm627_vm1, %v6675_v57  ;;  %4835 = vmatmul.msk.f32.gmra.mxu1 %vm627_vm1, %v6675_v57  ;;  %v2551_v5 = vmul.f32 1.442695, %v2253_v18 }
 0x451   : > { %11125 = vst [vmem:[#allocation105_spill] sm:$0xff] %v7040_v47  ;;  %v7047_v3 = vpop.eup %5127  ;;  %3022 = vadd.xlane.f32.xlu2 %v3021_v43  ;;  %4965 = vmatmul.msk.f32.gmra.mxu3 %vm627_vm1, %v6675_v57  ;;  %v2021_v26 = vmax.f32 %v7028_v21, %v7036_v62  ;;  %v2553_v4 = vmul.f32 1.442695, %v2254_v34 }
 0x452   : > { %5133 = vpow2.f32 %v2547_v58  ;;  %4900 = vmatmul.msk.f32.gmra.mxu2 %vm627_vm1, %v6675_v57  ;;  %2019 = vmax.xlane.f32.xlu0 %v2018_v6  ;;  %v3024_v49 = vadd.f32 %v7047_v3, %v7040_v47  ;;  %v7055_v2 = vpop.eup %5129 }
 0x453   : > { %11126 = vst [vmem:[#allocation106_spill] sm:$0xff] %v7055_v2  ;;  %5135 = vpow2.f32 %v2549_v28  ;;  %v7067_v18 = vpop.eup %5131 }
 0x454   : > { %v7059_v60 = vpop.f32.mrf.mxu3  ;;  %v3025_v25 = vadd.f32 %v7055_v2, %v3024_v49  ;;  %5137 = vpow2.f32 %v2551_v5 }
 0x455   : > { %v7061_v43 = vpop.f32.mrf.mxu2  ;;  %v1950_v20 = vpop.xlane.xlu2 %1949  ;;  %5139 = vpow2.f32 %v2553_v4 }
 0x456   : > { %v7064_v57 = vpop.f32.mrf.mxu0  ;;  %v2022_v19 = vmax.f32 %v2021_v26, %v7061_v43  ;;  %v2255_v28 = vsub.f32 %v6637_v29, %v1950_v20  ;;  %v2256_v6 = vsub.f32 %v6639_v24, %v1950_v20  ;;  %v2257_v34 = vsub.f32 %v6655_v30, %v1950_v20 }
 0x457   : > { %v7072_v58 = vpop.f32.mrf.mxu1  ;;  %v3026_v47 = vadd.f32 %v7067_v18, %v3025_v25  ;;  %v2258_v61 = vsub.f32 %v6657_v23, %v1950_v20 }
 0x458   : > { %v2023_v49 = vmax.f32 %v2022_v19, %v7059_v60  ;;  %v7076_v5 = vpop.eup %5133  ;;  %v2555_v26 = vmul.f32 1.442695, %v2255_v28  ;;  %v2557_v2 = vmul.f32 1.442695, %v2256_v6  ;;  %4771 = vmatmul.msk.f32.gmra.mxu0 %vm627_vm1, %v6701_v22  ;;  %4836 = vmatmul.msk.f32.gmra.mxu1 %vm627_vm1, %v6701_v22  ;;  %v2559_v29 = vmul.f32 1.442695, %v2257_v34 }
 0x459   : > { %11127 = vst [vmem:[#allocation107_spill] sm:$0xff] %v7076_v5  ;;  %v7083_v24 = vpop.eup %5135  ;;  %3027 = vadd.xlane.f32.xlu1 %v3026_v47  ;;  %4966 = vmatmul.msk.f32.gmra.mxu3 %vm627_vm1, %v6701_v22  ;;  %v2026_v4 = vmax.f32 %v7064_v57, %v7072_v58  ;;  %v2561_v25 = vmul.f32 1.442695, %v2258_v61 }
 0x45a   : > { %11128 = vst [vmem:[#allocation108_spill] sm:$0xff] %v7083_v24  ;;  %5141 = vpow2.f32 %v2555_v26  ;;  %4901 = vmatmul.msk.f32.gmra.mxu2 %vm627_vm1, %v6701_v22  ;;  %2024 = vmax.xlane.f32.xlu0 %v2023_v49  ;;  %v3029_v30 = vadd.f32 %v7083_v24, %v7076_v5  ;;  %v7091_v23 = vpop.eup %5137 }
 0x45b   : > { %11129 = vst [vmem:[#allocation109_spill] sm:$0xff] %v7091_v23  ;;  %5143 = vpow2.f32 %v2557_v2  ;;  %v7103_v34 = vpop.eup %5139 }
 0x45c   : > { %v7095_v20 = vpop.f32.mrf.mxu3  ;;  %v3030_v19 = vadd.f32 %v7091_v23, %v3029_v30  ;;  %5145 = vpow2.f32 %v2559_v29  ;;  %11130 = vst [vmem:[#allocation110_spill] sm:$0xff] %v7103_v34 }
 0x45d   : > { %v7097_v47 = vpop.f32.mrf.mxu2  ;;  %v1955_v28 = vpop.xlane.xlu0 %1954  ;;  %5147 = vpow2.f32 %v2561_v25 }
 0x45e   : > { %v7100_v22 = vpop.f32.mrf.mxu0  ;;  %v2027_v6 = vmax.f32 %v2026_v4, %v7097_v47  ;;  %v2259_v2 = vsub.f32 %v6659_v46, %v1955_v28  ;;  %v2260_v49 = vsub.f32 %v6661_v15, %v1955_v28  ;;  %v3031_v61 = vadd.f32 %v7103_v34, %v3030_v19 }
 0x45f   : > { %v7107_v26 = vpop.f32.mrf.mxu1  ;;  %v2261_v25 = vsub.f32 %v6679_v55, %v1955_v28  ;;  %v2262_v23 = vsub.f32 %v6681_v14, %v1955_v28 }
 0x460   : > { %v2028_v5 = vmax.f32 %v2027_v6, %v7095_v20  ;;  %v7111_v24 = vpop.eup %5141  ;;  %4772 = vmatmul.msk.f32.gmra.mxu0 %vm627_vm1, %v6735_v51  ;;  %4837 = vmatmul.msk.f32.gmra.mxu1 %vm627_vm1, %v6735_v51  ;;  %v2563_v46 = vmul.f32 1.442695, %v2259_v2  ;;  %v2565_v15 = vmul.f32 1.442695, %v2260_v49 }
 0x461   : > { %11131 = vst [vmem:[#allocation111_spill] sm:$0xff] %v7111_v24  ;;  %v7117_v29 = vpop.eup %5143  ;;  %3032 = vadd.xlane.f32.xlu1 %v3031_v61  ;;  %4967 = vmatmul.msk.f32.gmra.mxu3 %vm627_vm1, %v6735_v51 }
 0x462   : > { %11132 = vst [vmem:[#allocation112_spill] sm:$0xff] %v7117_v29  ;;  %4902 = vmatmul.msk.f32.gmra.mxu2 %vm627_vm1, %v6735_v51  ;;  %2029 = vmax.xlane.f32.xlu2 %v2028_v5  ;;  %v3034_v30 = vadd.f32 %v7117_v29, %v7111_v24  ;;  %v7125_v4 = vpop.eup %5145  ;;  %5149 = vpow2.f32 %v2563_v46 }
 0x463   : > { %11133 = vst [vmem:[#allocation113_spill] sm:$0xff] %v7125_v4  ;;  %v7135_v34 = vpop.eup %5147  ;;  %5151 = vpow2.f32 %v2565_v15 }
 0x464   : > { %v7128_v19 = vpop.f32.mrf.mxu3  ;;  %v3035_v2 = vadd.f32 %v7125_v4, %v3034_v30  ;;  %11134 = vst [vmem:[#allocation114_spill] sm:$0xff] %v7135_v34  ;;  %v2567_v30 = vmul.f32 1.442695, %v2261_v25 }
 0x465   : > { %v7130_v6 = vpop.f32.mrf.mxu2  ;;  %v1960_v61 = vpop.xlane.xlu2 %1959 }
 0x466   : > { %v7133_v49 = vpop.f32.mrf.mxu0  ;;  %v2263_v51 = vsub.f32 %v6683_v42, %v1960_v61  ;;  %v2264_v5 = vsub.f32 %v6685_v41, %v1960_v61  ;;  %v2265_v24 = vsub.f32 %v6703_v39, %v1960_v61  ;;  %v3036_v29 = vadd.f32 %v7135_v34, %v3035_v2 }
 0x467   : > { %v7140_v55 = vpop.f32.mrf.mxu1  ;;  %v2031_v41 = vmax.f32 %v7100_v22, %v7107_v26  ;;  %v2266_v42 = vsub.f32 %v6705_v32, %v1960_v61  ;;  %v2569_v32 = vmul.f32 1.442695, %v2262_v23 }
 0x468   : > { %v2571_v46 = vmul.f32 1.442695, %v2263_v51  ;;  %v2573_v4 = vmul.f32 1.442695, %v2264_v5  ;;  %4773 = vmatmul.msk.f32.gmra.mxu0 %vm627_vm1, %v6767_v1  ;;  %4838 = vmatmul.msk.f32.gmra.mxu1 %vm627_vm1, %v6767_v1  ;;  %v2575_v39 = vmul.f32 1.442695, %v2265_v24  ;;  %v7155_v14 = vpop.eup %5149  ;;  %v2036_v28 = vmax.f32 %v7133_v49, %v7140_v55 }
 0x469   : > { %3037 = vadd.xlane.f32.xlu0 %v3036_v29  ;;  %4968 = vmatmul.msk.f32.gmra.mxu3 %vm627_vm1, %v6767_v1  ;;  %11135 = vst [vmem:[#allocation115_spill] sm:$0xff] %v7155_v14  ;;  %v2032_v15 = vmax.f32 %v2031_v41, %v7130_v6  ;;  %v7160_v25 = vpop.eup %5151  ;;  %v2577_v2 = vmul.f32 1.442695, %v2266_v42 }
 0x46a   : > { %5153 = vpow2.f32 %v2571_v46  ;;  %4903 = vmatmul.msk.f32.gmra.mxu2 %vm627_vm1, %v6767_v1  ;;  %v3039_v42 = vadd.f32 %v7160_v25, %v7155_v14 }
 0x46b   : > { %5155 = vpow2.f32 %v2573_v4  ;;  %v2033_v23 = vmax.f32 %v2032_v15, %v7128_v19 }
 0x46c   : > { %5157 = vpow2.f32 %v2567_v30  ;;  %v7162_v24 = vpop.f32.mrf.mxu3 }
 0x46d   : > { %v7164_v29 = vpop.f32.mrf.mxu2  ;;  %5159 = vpow2.f32 %v2575_v39  ;;  %v1965_v61 = vpop.xlane.xlu0 %1964 }
 0x46e   : > { %v7166_v1 = vpop.f32.mrf.mxu0  ;;  %v2037_v4 = vmax.f32 %v2036_v28, %v7164_v29  ;;  %v2267_v51 = vsub.f32 %v6707_v31, %v1965_v61  ;;  %v2268_v5 = vsub.f32 %v6709_v13, %v1965_v61  ;;  %v2269_v46 = vsub.f32 %v6725_v54, %v1965_v61 }
 0x46f   : > { %v7172_v41 = vpop.f32.mrf.mxu1  ;;  %5161 = vpow2.f32 %v2569_v32  ;;  %v2270_v31 = vsub.f32 %v6727_v12, %v1965_v61 }
 0x470   : > { %v2038_v30 = vmax.f32 %v2037_v4, %v7162_v24  ;;  %v7178_v39 = vpop.eup %5153  ;;  %v2579_v34 = vmul.f32 1.442695, %v2267_v51  ;;  %v2581_v28 = vmul.f32 1.442695, %v2268_v5  ;;  %4774 = vmatmul.msk.f32.gmra.mxu0 %vm627_vm1, %v6793_v53  ;;  %4839 = vmatmul.msk.f32.gmra.mxu1 %vm627_vm1, %v6793_v53  ;;  %5163 = vpow2.f32 %v2577_v2 }
 0x471   : > { %11136 = vst [vmem:[#allocation116_spill] sm:$0xff] %v7178_v39  ;;  %v7184_v13 = vpop.eup %5155  ;;  %v2583_v54 = vmul.f32 1.442695, %v2269_v46  ;;  %2034 = vmax.xlane.f32.xlu0 %v2033_v23  ;;  %4969 = vmatmul.msk.f32.gmra.mxu3 %vm627_vm1, %v6793_v53 }
 0x472   : > { %v7189_v15 = vpop.eup %5157  ;;  %5165 = vpow2.f32 %v2579_v34  ;;  %4904 = vmatmul.msk.f32.gmra.mxu2 %vm627_vm1, %v6793_v53  ;;  %2039 = vmax.xlane.f32.xlu2 %v2038_v30  ;;  %v3044_v32 = vadd.f32 %v7184_v13, %v7178_v39  ;;  %v2585_v34 = vmul.f32 1.442695, %v2270_v31 }
 0x473   : > { %v7195_v4 = vpop.eup %5159  ;;  %5167 = vpow2.f32 %v2581_v28  ;;  %v3040_v12 = vadd.f32 %v7189_v15, %v3039_v42 }
 0x474   : > { %11137 = vst [vmem:[#allocation117_spill] sm:$0xff] %v7195_v4  ;;  %v7198_v2 = vpop.f32.mrf.mxu3  ;;  %v3045_v51 = vadd.f32 %v7195_v4, %v3044_v32  ;;  %5169 = vpow2.f32 %v2583_v54 }
 0x475   : > { %v7200_v61 = vpop.f32.mrf.mxu2  ;;  %v1970_v5 = vpop.xlane.xlu2 %1969  ;;  %5171 = vpow2.f32 %v2585_v34 }
 0x476   : > { %v7203_v46 = vpop.f32.mrf.mxu0  ;;  %v7205_v53 = vpop.eup %5161  ;;  %v2271_v23 = vsub.f32 %v6729_v7, %v1970_v5  ;;  %v2272_v30 = vsub.f32 %v6731_v59, %v1970_v5  ;;  %v2273_v28 = vsub.f32 %v6747_v8, %v1970_v5  ;;  %v2274_v31 = vsub.f32 %v6749_v56, %v1970_v5 }
 0x477   : > { %v7210_v42 = vpop.f32.mrf.mxu1  ;;  %v7212_v14 = vpop.eup %5163  ;;  %v3041_v39 = vadd.f32 %v7205_v53, %v3040_v12  ;;  %v2041_v8 = vmax.f32 %v7166_v1, %v7172_v41 }
 0x478   : > { %11138 = vst [vmem:[#allocation118_spill] sm:$0xff] %v7210_v42  ;;  %v7215_v32 = vpop.eup %5165  ;;  %v2587_v54 = vmul.f32 1.442695, %v2271_v23  ;;  %v2589_v4 = vmul.f32 1.442695, %v2272_v30  ;;  %4775 = vmatmul.msk.f32.gmra.mxu0 %vm627_vm1, %v6826_v0  ;;  %4840 = vmatmul.msk.f32.gmra.mxu1 %vm627_vm1, %v6826_v0  ;;  %v3046_v7 = vadd.f32 %v7212_v14, %v3045_v51 }
 0x479   : > { %11139 = vst [vmem:[#allocation119_spill] sm:$0xff] %v7215_v32  ;;  %v7223_v59 = vpop.eup %5167  ;;  %v2591_v12 = vmul.f32 1.442695, %v2273_v28  ;;  %3042 = vadd.xlane.f32.xlu0 %v3041_v39  ;;  %4970 = vmatmul.msk.f32.gmra.mxu3 %vm627_vm1, %v6826_v0  ;;  %v2042_v34 = vmax.f32 %v2041_v8, %v7200_v61  ;;  %v2593_v5 = vmul.f32 1.442695, %v2274_v31 }
 0x47a   : > { %11140 = vst [vmem:[#allocation120_spill] sm:$0xff] %v7223_v59  ;;  %5173 = vpow2.f32 %v2587_v54  ;;  %4905 = vmatmul.msk.f32.gmra.mxu2 %vm627_vm1, %v6826_v0  ;;  %3047 = vadd.xlane.f32.xlu2 %v3046_v7  ;;  %v3049_v56 = vadd.f32 %v7223_v59, %v7215_v32  ;;  %v7233_v51 = vpop.eup %5169 }
 0x47b   : > { %11141 = vst [vmem:[#allocation121_spill] sm:$0xff] %v7233_v51  ;;  %5175 = vpow2.f32 %v2589_v4  ;;  %v7245_v54 = vpop.eup %5171  ;;  %v2043_v7 = vmax.f32 %v2042_v34, %v7198_v2  ;;  %v11146_v4 = vld [vmem:[#allocation31_spill] sm:$0xff] }
 0x47c   : > { %v7236_v23 = vpop.f32.mrf.mxu3  ;;  %v3050_v30 = vadd.f32 %v7233_v51, %v3049_v56  ;;  %5177 = vpow2.f32 %v2591_v12  ;;  %11144 = vst [vmem:[#allocation124_spill] sm:$0xff] %v7245_v54  ;;  %v2046_v12 = vmax.f32 %v7203_v46, %v7210_v42 }
 0x47d   : > { %v7238_v39 = vpop.f32.mrf.mxu2  ;;  %5179 = vpow2.f32 %v2593_v5 }
 0x47e   : > { %v7241_v28 = vpop.f32.mrf.mxu0  ;;  %v3051_v31 = vadd.f32 %v7245_v54, %v3050_v30  ;;  %v2047_v54 = vmax.f32 %v2046_v12, %v7238_v39 }
 0x47f   : > { %11142 = vst [vmem:[#allocation122_spill] sm:$0xff] %v7241_v28  ;;  %v7243_v0 = vpop.f32.mrf.mxu1 }
 0x480   : > { %11143 = vst [vmem:[#allocation123_spill] sm:$0xff] %v7243_v0  ;;  %v7248_v59 = vpop.eup %5173  ;;  %4776 = vmatmul.msk.f32.gmra.mxu0 %vm627_vm1, %v11146_v4  ;;  %4841 = vmatmul.msk.f32.gmra.mxu1 %vm627_vm1, %v11146_v4  ;;  %v2051_v12 = vmax.f32 %v7241_v28, %v7243_v0  ;;  %v11159_v28 = vld [vmem:[#allocation45_spill] sm:$0xff] }
 0x481   : > { %11145 = vst [vmem:[#allocation125_spill] sm:$0xff] %v7248_v59  ;;  %v7255_v8 = vpop.eup %5175  ;;  %2044 = vmax.xlane.f32.xlu0 %v2043_v7  ;;  %4971 = vmatmul.msk.f32.gmra.mxu3 %vm627_vm1, %v11146_v4 }
 0x482   : > { %11147 = vst [vmem:[#allocation31_spill] sm:$0xff] %v7255_v8  ;;  %4906 = vmatmul.msk.f32.gmra.mxu2 %vm627_vm1, %v11146_v4  ;;  %3052 = vadd.xlane.f32.xlu2 %v3051_v31  ;;  %v3054_v56 = vadd.f32 %v7255_v8, %v7248_v59  ;;  %v7265_v34 = vpop.eup %5177  ;;  %v11154_v31 = vld [vmem:[#allocation36_spill] sm:$0xff]  ;;  %v2048_v8 = vmax.f32 %v2047_v54, %v7236_v23 }
 0x483   : > { %11148 = vst [vmem:[#allocation126_spill] sm:$0xff] %v7265_v34  ;;  %v7275_v32 = vpop.eup %5179 }
 0x484   : > { %v7267_v5 = vpop.f32.mrf.mxu3  ;;  %v3055_v7 = vadd.f32 %v7265_v34, %v3054_v56  ;;  %11152 = vst [vmem:[#allocation130_spill] sm:$0xff] %v7275_v32 }
 0x485   : > { %11149 = vst [vmem:[#allocation127_spill] sm:$0xff] %v7267_v5  ;;  %v7269_v30 = vpop.f32.mrf.mxu2 }
 0x486   : > { %11150 = vst [vmem:[#allocation128_spill] sm:$0xff] %v7269_v30  ;;  %v7273_v51 = vpop.f32.mrf.mxu0  ;;  %v3056_v4 = vadd.f32 %v7275_v32, %v3055_v7  ;;  %v2052_v54 = vmax.f32 %v2051_v12, %v7269_v30 }
 0x487   : > { %11151 = vst [vmem:[#allocation129_spill] sm:$0xff] %v7273_v51  ;;  %v7277_v42 = vpop.f32.mrf.mxu1 }
 0x488   : > { %11153 = vst [vmem:[#allocation131_spill] sm:$0xff] %v7277_v42  ;;  %4777 = vmatmul.msk.f32.gmra.mxu0 %vm627_vm1, %v11154_v31  ;;  %4842 = vmatmul.msk.f32.gmra.mxu1 %vm627_vm1, %v11154_v31  ;;  %v2056_v56 = vmax.f32 %v7273_v51, %v7277_v42  ;;  %v11170_v51 = vld [vmem:[#allocation53_spill] sm:$0xff] }
 0x489   : > { %3057 = vadd.xlane.f32.xlu1 %v3056_v4  ;;  %4972 = vmatmul.msk.f32.gmra.mxu3 %vm627_vm1, %v11154_v31 }
 0x48a   : > { %4907 = vmatmul.msk.f32.gmra.mxu2 %vm627_vm1, %v11154_v31  ;;  %2049 = vmax.xlane.f32.xlu2 %v2048_v8  ;;  %v2053_v8 = vmax.f32 %v2052_v54, %v7267_v5 }
 0x48c   : > { %v7293_v7 = vpop.f32.mrf.mxu3 }
 0x48d   : > { %11155 = vst [vmem:[#allocation36_spill] sm:$0xff] %v7293_v7  ;;  %v7295_v32 = vpop.f32.mrf.mxu2 }
 0x48e   : > { %11156 = vst [vmem:[#allocation132_spill] sm:$0xff] %v7295_v32  ;;  %v7298_v4 = vpop.f32.mrf.mxu0  ;;  %v2057_v34 = vmax.f32 %v2056_v56, %v7295_v32 }
 0x48f   : > { %11157 = vst [vmem:[#allocation133_spill] sm:$0xff] %v7298_v4  ;;  %v7301_v59 = vpop.f32.mrf.mxu1 }
 0x490   : > { %11158 = vst [vmem:[#allocation134_spill] sm:$0xff] %v7301_v59  ;;  %v2058_v0 = vmax.f32 %v2057_v34, %v7293_v7  ;;  %4778 = vmatmul.msk.f32.gmra.mxu0 %vm627_vm1, %v11159_v28  ;;  %4843 = vmatmul.msk.f32.gmra.mxu1 %vm627_vm1, %v11159_v28  ;;  %v2061_v31 = vmax.f32 %v7298_v4, %v7301_v59 }
 0x491   : > { %4973 = vmatmul.msk.f32.gmra.mxu3 %vm627_vm1, %v11159_v28 }
 0x492   : > { %2059 = vmax.xlane.f32.xlu1 %v2058_v0  ;;  %4908 = vmatmul.msk.f32.gmra.mxu2 %vm627_vm1, %v11159_v28  ;;  %v11164_v0 = vld [vmem:[#allocation50_spill] sm:$0xff] }
 0x493   : > { %2054 = vmax.xlane.f32.xlu2 %v2053_v8 }
 0x494   : > { %v7315_v34 = vpop.f32.mrf.mxu3 }
 0x495   : > { %11160 = vst [vmem:[#allocation45_spill] sm:$0xff] %v7315_v34  ;;  %v7317_v12 = vpop.f32.mrf.mxu2 }
 0x496   : > { %11161 = vst [vmem:[#allocation135_spill] sm:$0xff] %v7317_v12  ;;  %v7319_v56 = vpop.f32.mrf.mxu0  ;;  %v2062_v7 = vmax.f32 %v2061_v31, %v7317_v12 }
 0x497   : > { %11162 = vst [vmem:[#allocation136_spill] sm:$0xff] %v7319_v56  ;;  %v7322_v54 = vpop.f32.mrf.mxu1 }
 0x498   : > { %11163 = vst [vmem:[#allocation137_spill] sm:$0xff] %v7322_v54  ;;  %v2063_v32 = vmax.f32 %v2062_v7, %v7315_v34  ;;  %4779 = vmatmul.msk.f32.gmra.mxu0 %vm627_vm1, %v11164_v0  ;;  %4844 = vmatmul.msk.f32.gmra.mxu1 %vm627_vm1, %v11164_v0  ;;  %v2066_v28 = vmax.f32 %v7319_v56, %v7322_v54  ;;  %v7339_v7 = vpop.xlane.xlu2 %1974 }
 0x499   : > { %4974 = vmatmul.msk.f32.gmra.mxu3 %vm627_vm1, %v11164_v0  ;;  %11167 = vst [vmem:[#allocation139_spill] sm:$0xff] %v7339_v7 }
 0x49a   : > { %2064 = vmax.xlane.f32.xlu1 %v2063_v32  ;;  %4909 = vmatmul.msk.f32.gmra.mxu2 %vm627_vm1, %v11164_v0  ;;  %v7351_v0 = vpop.xlane.xlu1 %1979 }
 0x49b   : > { %11171 = vst [vmem:[#allocation53_spill] sm:$0xff] %v7351_v0 }
 0x49c   : > { %v7335_v8 = vpop.f32.mrf.mxu3 }
 0x49d   : > { %11165 = vst [vmem:[#allocation50_spill] sm:$0xff] %v7335_v8  ;;  %v7337_v31 = vpop.f32.mrf.mxu2 }
 0x49e   : > { %11166 = vst [vmem:[#allocation138_spill] sm:$0xff] %v7337_v31  ;;  %v7341_v42 = vpop.f32.mrf.mxu0  ;;  %v2067_v5 = vmax.f32 %v2066_v28, %v7337_v31  ;;  %v7357_v28 = vpop.xlane.xlu0 %1989 }
 0x49f   : > { %11168 = vst [vmem:[#allocation140_spill] sm:$0xff] %v7341_v42  ;;  %v7344_v30 = vpop.f32.mrf.mxu1 }
 0x4a0   : > { %11169 = vst [vmem:[#allocation141_spill] sm:$0xff] %v7344_v30  ;;  %v2068_v32 = vmax.f32 %v2067_v5, %v7335_v8  ;;  %4780 = vmatmul.msk.f32.gmra.mxu0 %vm627_vm1, %v11170_v51  ;;  %4845 = vmatmul.msk.f32.gmra.mxu1 %vm627_vm1, %v11170_v51  ;;  %v2071_v5 = vmax.f32 %v7341_v42, %v7344_v30  ;;  %v11182_v42 = vld [vmem:[#allocation55_spill] sm:$0xff] }
 0x4a1   : > { %4975 = vmatmul.msk.f32.gmra.mxu3 %vm627_vm1, %v11170_v51  ;;  %11172 = vst [vmem:[#allocation142_spill] sm:$0xff] %v7357_v28 }
 0x4a2   : > { %2069 = vmax.xlane.f32.xlu0 %v2068_v32  ;;  %4910 = vmatmul.msk.f32.gmra.mxu2 %vm627_vm1, %v11170_v51  ;;  %v11178_v51 = vld [vmem:[#allocation54_spill] sm:$0xff]  ;;  %v7381_v28 = vpop.xlane.xlu1 %1984 }
 0x4a3   : > { %11179 = vst [vmem:[#allocation54_spill] sm:$0xff] %v7381_v28 }
 0x4a4   : > { %v7361_v7 = vpop.f32.mrf.mxu3 }
 0x4a5   : > { %11173 = vst [vmem:[#allocation143_spill] sm:$0xff] %v7361_v7  ;;  %v7363_v8 = vpop.f32.mrf.mxu2  ;;  %v7365_v34 = vpop.xlane.xlu2 %1999 }
 0x4a6   : > { %11174 = vst [vmem:[#allocation144_spill] sm:$0xff] %v7363_v8  ;;  %v7367_v31 = vpop.f32.mrf.mxu0  ;;  %v2072_v0 = vmax.f32 %v2071_v5, %v7363_v8 }
 0x4a7   : > { %11175 = vst [vmem:[#allocation145_spill] sm:$0xff] %v7365_v34  ;;  %v7370_v12 = vpop.f32.mrf.mxu1  ;;  %v7392_v34 = vpop.xlane.xlu0 %1994 }
 0x4a8   : > { %11176 = vst [vmem:[#allocation146_spill] sm:$0xff] %v7367_v31  ;;  %v2073_v32 = vmax.f32 %v2072_v0, %v7361_v7  ;;  %4781 = vmatmul.msk.f32.gmra.mxu0 %vm627_vm1, %v11178_v51  ;;  %4846 = vmatmul.msk.f32.gmra.mxu1 %vm627_vm1, %v11178_v51  ;;  %v2076_v5 = vmax.f32 %v7367_v31, %v7370_v12 }
 0x4a9   : > { %11177 = vst [vmem:[#allocation147_spill] sm:$0xff] %v7370_v12  ;;  %4976 = vmatmul.msk.f32.gmra.mxu3 %vm627_vm1, %v11178_v51 }
 0x4aa   : > { %2074 = vmax.xlane.f32.xlu0 %v2073_v32  ;;  %4911 = vmatmul.msk.f32.gmra.mxu2 %vm627_vm1, %v11178_v51  ;;  %11180 = vst [vmem:[#allocation148_spill] sm:$0xff] %v7392_v34 }
 0x4ac   : > { %v7385_v54 = vpop.f32.mrf.mxu3 }
 0x4ad   : > { %v7387_v0 = vpop.f32.mrf.mxu2  ;;  %v2005_v56 = vpop.xlane.xlu2 %2004 }
 0x4ae   : > { %v7389_v59 = vpop.f32.mrf.mxu0  ;;  %v2077_v4 = vmax.f32 %v2076_v5, %v7387_v0  ;;  %v2299_v32 = vsub.f32 %v6895_v50, %v2005_v56  ;;  %v2300_v51 = vsub.f32 %v6898_v9, %v2005_v56  ;;  %v2301_v28 = vsub.f32 %v6919_v63, %v2005_v56 }
 0x4af   : > { %v7397_v7 = vpop.f32.mrf.mxu1  ;;  %v2302_v12 = vsub.f32 %v6917_v27, %v2005_v56 }
 0x4b0   : > { %11181 = vst [vmem:[#allocation149_spill] sm:$0xff] %v7397_v7  ;;  %v2078_v31 = vmax.f32 %v2077_v4, %v7385_v54  ;;  %v2643_v8 = vmul.f32 1.442695, %v2299_v32  ;;  %v2645_v30 = vmul.f32 1.442695, %v2300_v51  ;;  %4782 = vmatmul.msk.f32.gmra.mxu0 %vm627_vm1, %v11182_v42  ;;  %4847 = vmatmul.msk.f32.gmra.mxu1 %vm627_vm1, %v11182_v42  ;;  %v2081_v63 = vmax.f32 %v7389_v59, %v7397_v7 }
 0x4b1   : > { %v2647_v5 = vmul.f32 1.442695, %v2301_v28  ;;  %4977 = vmatmul.msk.f32.gmra.mxu3 %vm627_vm1, %v11182_v42  ;;  %v2649_v50 = vmul.f32 1.442695, %v2302_v12  ;;  %v11184_v28 = vld [vmem:[#allocation97_spill] sm:$0xff] }
 0x4b2   : > { %2079 = vmax.xlane.f32.xlu2 %v2078_v31  ;;  %5181 = vpow2.f32 %v2643_v8  ;;  %4912 = vmatmul.msk.f32.gmra.mxu2 %vm627_vm1, %v11182_v42 }
 0x4b3   : > { %5183 = vpow2.f32 %v2645_v30 }
 0x4b4   : > { %v7411_v27 = vpop.f32.mrf.mxu3  ;;  %5185 = vpow2.f32 %v2647_v5 }
 0x4b5   : > { %11183 = vst [vmem:[#allocation55_spill] sm:$0xff] %v7411_v27  ;;  %v2010_v9 = vpop.xlane.xlu1 %2009  ;;  %v7416_v31 = vpop.f32.mrf.mxu2  ;;  %5187 = vpow2.f32 %v2649_v50 }
 0x4b6   : > { %v2303_v4 = vsub.f32 %v6921_v16, %v2010_v9  ;;  %v2304_v56 = vsub.f32 %v6927_v52, %v2010_v9  ;;  %v2305_v32 = vsub.f32 %v11184_v28, %v2010_v9  ;;  %11185 = vst [vmem:[#allocation97_spill] sm:$0xff] %v7416_v31  ;;  %v7418_v8 = vpop.f32.mrf.mxu0  ;;  %v2306_v42 = vsub.f32 %v6947_v36, %v2010_v9  ;;  %v3013_v12 = vpop.xlane.xlu0 %3012  ;;  %v11189_v52 = vld [vmem:[#allocation56_spill] sm:$0xff] }
 0x4b7   : > { %11186 = vst [vmem:[#allocation150_spill] sm:$0xff] %v7418_v8  ;;  %v7421_v30 = vpop.f32.mrf.mxu1  ;;  %v2082_v51 = vmax.f32 %v2081_v63, %v7416_v31  ;;  %5189 = vrcp.f32 %v3013_v12 }
 0x4b8   : > { %11187 = vst [vmem:[#allocation151_spill] sm:$0xff] %v7421_v30  ;;  %v2651_v34 = vmul.f32 1.442695, %v2303_v4  ;;  %v2653_v5 = vmul.f32 1.442695, %v2304_v56  ;;  %v7424_v7 = vpop.eup %5181  ;;  %4783 = vmatmul.msk.f32.gmra.mxu0 %vm627_vm1, %v11189_v52  ;;  %4848 = vmatmul.msk.f32.gmra.mxu1 %vm627_vm1, %v11189_v52 }
 0x4b9   : > { %11188 = vst [vmem:[#allocation152_spill] sm:$0xff] %v7424_v7  ;;  %v2655_v16 = vmul.f32 1.442695, %v2305_v32  ;;  %v2083_v36 = vmax.f32 %v2082_v51, %v7411_v27  ;;  %v7431_v9 = vpop.eup %5183  ;;  %4978 = vmatmul.msk.f32.gmra.mxu3 %vm627_vm1, %v11189_v52  ;;  %v2657_v50 = vmul.f32 1.442695, %v2306_v42 }
 0x4ba   : > { %11190 = vst [vmem:[#allocation56_spill] sm:$0xff] %v7431_v9  ;;  %5191 = vpow2.f32 %v2651_v34  ;;  %4913 = vmatmul.msk.f32.gmra.mxu2 %vm627_vm1, %v11189_v52  ;;  %v3089_v63 = vadd.f32 %v7431_v9, %v7424_v7  ;;  %v7439_v4 = vpop.eup %5185 }
 0x4bb   : > { %5193 = vpow2.f32 %v2653_v5  ;;  %2084 = vmax.xlane.f32.xlu2 %v2083_v36  ;;  %11191 = vst [vmem:[#allocation153_spill] sm:$0xff] %v7439_v4  ;;  %v7444_v32 = vpop.eup %5187 }
 0x4bc   : > { %5195 = vpow2.f32 %v2655_v16  ;;  %v3018_v56 = vpop.xlane.xlu2 %3017  ;;  %v7441_v28 = vpop.f32.mrf.mxu3  ;;  %v3090_v34 = vadd.f32 %v7439_v4, %v3089_v63  ;;  %11192 = vst [vmem:[#allocation154_spill] sm:$0xff] %v7444_v32  ;;  %v2086_v63 = vmax.f32 %v7418_v8, %v7421_v30  ;;  %v11200_v30 = vld [vmem:[#allocation94_spill] sm:$0xff] }
 0x4bd   : > { %5197 = vrcp.f32 %v3018_v56  ;;  %v2015_v12 = vpop.xlane.xlu1 %2014  ;;  %v7446_v42 = vpop.f32.mrf.mxu2 }
 0x4be   : > { %11193 = vst [vmem:[#allocation155_spill] sm:$0xff] %v7446_v42  ;;  %v5190_v51 = vpop.eup %5189  ;;  %5199 = vpow2.f32 %v2657_v50  ;;  %v2307_v5 = vsub.f32 %v6951_v17, %v2015_v12  ;;  %v2308_v52 = vsub.f32 %v6961_v38, %v2015_v12  ;;  %v2309_v36 = vsub.f32 %v6989_v10, %v2015_v12  ;;  %v7451_v16 = vpop.f32.mrf.mxu0  ;;  %v11198_v38 = vld [vmem:[#allocation57_spill] sm:$0xff] }
 0x4bf   : > { %11194 = vst [vmem:[#allocation156_spill] sm:$0xff] %v7451_v16  ;;  %v7453_v9 = vpop.f32.mrf.mxu1  ;;  %v2310_v56 = vsub.f32 %v6987_v33, %v2015_v12  ;;  %v3091_v4 = vadd.f32 %v7444_v32, %v3090_v34  ;;  %v2087_v33 = vmax.f32 %v2086_v63, %v7446_v42  ;;  %v7480_v8 = vmul.f32 %v5190_v51, %v11200_v30 }
 0x4c0   : > { %11195 = vst [vmem:[#allocation157_spill] sm:$0xff] %v7453_v9  ;;  %v7455_v7 = vpop.eup %5191  ;;  %v2659_v17 = vmul.f32 1.442695, %v2307_v5  ;;  %v2661_v27 = vmul.f32 1.442695, %v2308_v52  ;;  %4784 = vmatmul.msk.f32.gmra.mxu0 %vm627_vm1, %v11198_v38  ;;  %4849 = vmatmul.msk.f32.gmra.mxu1 %vm627_vm1, %v11198_v38  ;;  %v2091_v5 = vmax.f32 %v7451_v16, %v7453_v9  ;;  %v11201_v9 = vld [vmem:[#allocation96_spill] sm:$0xff] }
 0x4c1   : > { %11196 = vst [vmem:[#allocation158_spill] sm:$0xff] %v7455_v7  ;;  %v7461_v50 = vpop.eup %5193  ;;  %3092 = vadd.xlane.f32.xlu1 %v3091_v4  ;;  %4979 = vmatmul.msk.f32.gmra.mxu3 %vm627_vm1, %v11198_v38  ;;  %v2663_v12 = vmul.f32 1.442695, %v2309_v36  ;;  %v2665_v4 = vmul.f32 1.442695, %v2310_v56  ;;  %v7490_v16 = vmul.f32 %v5190_v51, %v11201_v9 }
 0x4c2   : > { %11197 = vst [vmem:[#allocation159_spill] sm:$0xff] %v7461_v50  ;;  %v3094_v10 = vadd.f32 %v7461_v50, %v7455_v7  ;;  %v7472_v34 = vpop.eup %5195  ;;  %4914 = vmatmul.msk.f32.gmra.mxu2 %vm627_vm1, %v11198_v38  ;;  %5201 = vpow2.f32 %v2659_v17 }
 0x4c3   : > { %11199 = vst [vmem:[#allocation57_spill] sm:$0xff] %v7472_v34  ;;  %v5198_v52 = vpop.eup %5197  ;;  %5203 = vpow2.f32 %v2661_v27 }
 0x4c4   : > { %v3095_v32 = vadd.f32 %v7472_v34, %v3094_v10  ;;  %v7482_v50 = vpop.eup %5199  ;;  %v7484_v63 = vpop.f32.mrf.mxu3  ;;  %v7487_v36 = vmul.f32 %v5198_v52, %v6967_v40  ;;  %11202 = vst [vmem:[#allocation94_spill] sm:$0xff] %v7490_v16  ;;  %v7493_v38 = vmul.f32 %v5198_v52, %v6974_v44  ;;  %v2088_v10 = vmax.f32 %v2087_v33, %v7441_v28  ;;  %v11204_v34 = vld [vmem:[#allocation100_spill] sm:$0xff]  ;;  %v11207_v33 = vld [vmem:[#allocation98_spill] sm:$0xff] }
 0x4c5   : > { %v2020_v56 = vpop.xlane.xlu0 %2019  ;;  %v7495_v17 = vpop.f32.mrf.mxu2  ;;  %v7500_v27 = vmul.f32 %v5198_v52, %v11204_v34  ;;  %v7503_v7 = vmul.f32 %v5198_v52, %v6995_v35  ;;  %5205 = vpow2.f32 %v2663_v12  ;;  %v7515_v34 = vmul.f32 %v5190_v51, %v11207_v33  ;;  %v11209_v35 = vld [vmem:[#allocation99_spill] sm:$0xff] }
 0x4c6   : > { %11203 = vst [vmem:[#allocation96_spill] sm:$0xff] %v7493_v38  ;;  %v3096_v30 = vadd.f32 %v7482_v50, %v3095_v32  ;;  %v2311_v40 = vsub.f32 %v6992_v45, %v2020_v56  ;;  %v2312_v9 = vsub.f32 %v7000_v11, %v2020_v56  ;;  %v2313_v44 = vsub.f32 %v7025_v48, %v2020_v56  ;;  %v7508_v42 = vpop.f32.mrf.mxu0  ;;  %v11211_v48 = vld [vmem:[#allocation58_spill] sm:$0xff]  ;;  %v3023_v33 = vpop.xlane.xlu2 %3022 }
 0x4c7   : > { %11205 = vst [vmem:[#allocation100_spill] sm:$0xff] %v7500_v27  ;;  %v7510_v31 = vpop.f32.mrf.mxu1  ;;  %5207 = vpow2.f32 %v2665_v4  ;;  %v7518_v12 = vmul.f32 %v5190_v51, %v11209_v35  ;;  %v2314_v45 = vsub.f32 %v7023_v37, %v2020_v56  ;;  %v2092_v51 = vmax.f32 %v2091_v5, %v7495_v17  ;;  %v11221_v38 = vld [vmem:[#allocation106_spill] sm:$0xff] }
 0x4c8   : > { %11206 = vst [vmem:[#allocation160_spill] sm:$0xff] %v7503_v7  ;;  %3097 = vadd.xlane.f32.xlu0 %v3096_v30  ;;  %v2667_v11 = vmul.f32 1.442695, %v2311_v40  ;;  %v2669_v52 = vmul.f32 1.442695, %v2312_v9  ;;  %4785 = vmatmul.msk.f32.gmra.mxu0 %vm627_vm1, %v11211_v48  ;;  %v7527_v30 = vpop.eup %5201  ;;  %v2096_v5 = vmax.f32 %v7508_v42, %v7510_v31 }
 0x4c9   : > { %11208 = vst [vmem:[#allocation98_spill] sm:$0xff] %v7515_v34  ;;  %4850 = vmatmul.msk.f32.gmra.mxu1 %vm627_vm1, %v11211_v48  ;;  %v2671_v32 = vmul.f32 1.442695, %v2313_v44  ;;  %2089 = vmax.xlane.f32.xlu1 %v2088_v10  ;;  %v7536_v40 = vpop.eup %5203  ;;  %v2673_v56 = vmul.f32 1.442695, %v2314_v45 }
 0x4ca   : > { %11210 = vst [vmem:[#allocation99_spill] sm:$0xff] %v7518_v12  ;;  %4980 = vmatmul.msk.f32.gmra.mxu3 %vm627_vm1, %v11211_v48  ;;  %5209 = vpow2.f32 %v2667_v11  ;;  %4915 = vmatmul.msk.f32.gmra.mxu2 %vm627_vm1, %v11211_v48  ;;  %v2093_v11 = vmax.f32 %v2092_v51, %v7484_v63 }
 0x4cb   : > { %11212 = vst [vmem:[#allocation58_spill] sm:$0xff] %v7527_v30  ;;  %5211 = vpow2.f32 %v2669_v52  ;;  %v7540_v9 = vpop.eup %5205  ;;  %v3099_v52 = vadd.f32 %v7536_v40, %v7527_v30 }
 0x4cc   : > { %11213 = vst [vmem:[#allocation161_spill] sm:$0xff] %v7536_v40  ;;  %5213 = vrcp.f32 %v3023_v33  ;;  %v3028_v10 = vpop.xlane.xlu1 %3027  ;;  %v7544_v44 = vpop.f32.mrf.mxu3 }
 0x4cd   : > { %11214 = vst [vmem:[#allocation162_spill] sm:$0xff] %v7540_v9  ;;  %v7546_v35 = vpop.eup %5207  ;;  %5215 = vpow2.f32 %v2671_v32  ;;  %v2025_v37 = vpop.xlane.xlu0 %2024 }
 0x4ce   : > { %11215 = vst [vmem:[#allocation163_spill] sm:$0xff] %v7546_v35  ;;  %v7548_v4 = vpop.f32.mrf.mxu2  ;;  %5217 = vrcp.f32 %v3028_v10  ;;  %v2315_v48 = vsub.f32 %v7028_v21, %v2025_v37  ;;  %v2316_v33 = vsub.f32 %v7036_v62, %v2025_v37  ;;  %v2317_v12 = vsub.f32 %v7061_v43, %v2025_v37  ;;  %v7556_v7 = vpop.f32.mrf.mxu0  ;;  %v11217_v10 = vld [vmem:[#allocation59_spill] sm:$0xff] }
 0x4cf   : > { %v7558_v34 = vpop.f32.mrf.mxu1  ;;  %v2097_v32 = vmax.f32 %v2096_v5, %v7548_v4  ;;  %v2318_v51 = vsub.f32 %v7059_v60, %v2025_v37  ;;  %5219 = vpow2.f32 %v2673_v56  ;;  %v3100_v43 = vadd.f32 %v7540_v9, %v3099_v52 }
 0x4d0   : > { %2094 = vmax.xlane.f32.xlu0 %v2093_v11  ;;  %v7561_v45 = vpop.eup %5209  ;;  %v2675_v27 = vmul.f32 1.442695, %v2315_v48  ;;  %v2677_v16 = vmul.f32 1.442695, %v2316_v33  ;;  %4786 = vmatmul.msk.f32.gmra.mxu0 %vm627_vm1, %v11217_v10  ;;  %v2679_v60 = vmul.f32 1.442695, %v2317_v12 }
 0x4d1   : > { %11216 = vst [vmem:[#allocation164_spill] sm:$0xff] %v7561_v45  ;;  %4851 = vmatmul.msk.f32.gmra.mxu1 %vm627_vm1, %v11217_v10  ;;  %v7568_v21 = vpop.eup %5211  ;;  %v2098_v62 = vmax.f32 %v2097_v32, %v7544_v44  ;;  %v2681_v48 = vmul.f32 1.442695, %v2318_v51 }
 0x4d2   : > { %11218 = vst [vmem:[#allocation59_spill] sm:$0xff] %v7568_v21  ;;  %4981 = vmatmul.msk.f32.gmra.mxu3 %vm627_vm1, %v11217_v10  ;;  %v7574_v5 = vpop.eup %5213  ;;  %5221 = vpow2.f32 %v2675_v27  ;;  %4916 = vmatmul.msk.f32.gmra.mxu2 %vm627_vm1, %v11217_v10  ;;  %v3104_v37 = vadd.f32 %v7568_v21, %v7561_v45  ;;  %v3101_v27 = vadd.f32 %v7546_v35, %v3100_v43  ;;  %v11224_v35 = vld [vmem:[#allocation102_spill] sm:$0xff] }
 0x4d3   : > { %v7580_v11 = vpop.eup %5215  ;;  %5223 = vpow2.f32 %v2677_v16  ;;  %2099 = vmax.xlane.f32.xlu2 %v2098_v62 }
 0x4d4   : > { %11219 = vst [vmem:[#allocation165_spill] sm:$0xff] %v7580_v11  ;;  %v7582_v56 = vpop.eup %5217  ;;  %v7584_v33 = vpop.f32.mrf.mxu3  ;;  %v3105_v12 = vadd.f32 %v7580_v11, %v3104_v37  ;;  %5225 = vpow2.f32 %v2679_v60  ;;  %v11226_v60 = vld [vmem:[#allocation103_spill] sm:$0xff] }
 0x4d5   : > { %v2030_v52 = vpop.xlane.xlu2 %2029  ;;  %v7592_v10 = vmul.f32 %v7582_v56, %v7047_v3  ;;  %v7596_v16 = vmul.f32 %v7582_v56, %v11221_v38  ;;  %v7605_v37 = vpop.eup %5219  ;;  %v2101_v3 = vmax.f32 %v7556_v7, %v7558_v34  ;;  %v7611_v38 = vmul.f32 %v7574_v5, %v11224_v35 }
 0x4d6   : > { %v7586_v32 = vpop.f32.mrf.mxu2  ;;  %v2319_v51 = vsub.f32 %v7064_v57, %v2030_v52  ;;  %v2320_v62 = vsub.f32 %v7072_v58, %v2030_v52  ;;  %v2321_v9 = vsub.f32 %v7097_v47, %v2030_v52  ;;  %v7601_v21 = vpop.f32.mrf.mxu0  ;;  %v7615_v57 = vmul.f32 %v7574_v5, %v11226_v60  ;;  %v11228_v58 = vld [vmem:[#allocation104_spill] sm:$0xff] }
 0x4d7   : > { %11220 = vst [vmem:[#allocation166_spill] sm:$0xff] %v7592_v10  ;;  %v7603_v43 = vpop.f32.mrf.mxu1  ;;  %v7619_v47 = vmul.f32 %v7574_v5, %v11228_v58  ;;  %5227 = vpow2.f32 %v2681_v48  ;;  %v2322_v40 = vsub.f32 %v7095_v20, %v2030_v52  ;;  %v2102_v60 = vmax.f32 %v2101_v3, %v7586_v32  ;;  %v3033_v52 = vpop.xlane.xlu1 %3032  ;;  %v11240_v10 = vld [vmem:[#allocation67_spill] sm:$0xff] }
 0x4d8   : > { %11222 = vst [vmem:[#allocation106_spill] sm:$0xff] %v7596_v16  ;;  %3102 = vadd.xlane.f32.xlu0 %v3101_v27  ;;  %v7621_v11 = vpop.eup %5221  ;;  %v2683_v45 = vmul.f32 1.442695, %v2319_v51  ;;  %v2685_v30 = vmul.f32 1.442695, %v2320_v62  ;;  %v11231_v27 = vld [vmem:[#allocation62_spill] sm:$0xff]  ;;  %v3106_v58 = vadd.f32 %v7605_v37, %v3105_v12  ;;  %v7644_v3 = vmul.f32 %v7582_v56, %v7067_v18 }
 0x4d9   : > { %11223 = vst [vmem:[#allocation167_spill] sm:$0xff] %v7603_v43  ;;  %4787 = vmatmul.msk.f32.gmra.mxu0 %vm627_vm1, %v11231_v27  ;;  %4852 = vmatmul.msk.f32.gmra.mxu1 %vm627_vm1, %v11231_v27  ;;  %v7628_v35 = vpop.eup %5223  ;;  %v2687_v51 = vmul.f32 1.442695, %v2321_v9  ;;  %v2689_v18 = vmul.f32 1.442695, %v2322_v40 }
 0x4da   : > { %11225 = vst [vmem:[#allocation102_spill] sm:$0xff] %v7611_v38  ;;  %4982 = vmatmul.msk.f32.gmra.mxu3 %vm627_vm1, %v11231_v27  ;;  %5229 = vpow2.f32 %v2683_v45  ;;  %4917 = vmatmul.msk.f32.gmra.mxu2 %vm627_vm1, %v11231_v27  ;;  %v3109_v62 = vadd.f32 %v7628_v35, %v7621_v11  ;;  %v7646_v12 = vpop.eup %5225  ;;  %v2103_v27 = vmax.f32 %v2102_v60, %v7584_v33 }
 0x4db   : > { %11227 = vst [vmem:[#allocation103_spill] sm:$0xff] %v7615_v57  ;;  %5231 = vpow2.f32 %v2685_v30  ;;  %3107 = vadd.xlane.f32.xlu2 %v3106_v58 }
 0x4dc   : > { %11229 = vst [vmem:[#allocation104_spill] sm:$0xff] %v7619_v47  ;;  %v3038_v20 = vpop.xlane.xlu0 %3037  ;;  %v7648_v38 = vpop.f32.mrf.mxu3  ;;  %5233 = vrcp.f32 %v3033_v52  ;;  %v3110_v48 = vadd.f32 %v7646_v12, %v3109_v62  ;;  %v2106_v52 = vmax.f32 %v7601_v21, %v7603_v43 }
 0x4dd   : > { %11230 = vst [vmem:[#allocation168_spill] sm:$0xff] %v7621_v11  ;;  %v7656_v57 = vpop.eup %5227  ;;  %5235 = vpow2.f32 %v2687_v51 }
 0x4de   : > { %11232 = vst [vmem:[#allocation62_spill] sm:$0xff] %v7628_v35  ;;  %v7652_v45 = vpop.f32.mrf.mxu2  ;;  %v7658_v30 = vpop.f32.mrf.mxu0  ;;  %5237 = vrcp.f32 %v3038_v20  ;;  %v3111_v40 = vadd.f32 %v7656_v57, %v3110_v48 }
 0x4df   : > { %11233 = vst [vmem:[#allocation169_spill] sm:$0xff] %v7644_v3  ;;  %v7660_v58 = vpop.f32.mrf.mxu1  ;;  %5239 = vpow2.f32 %v2689_v18  ;;  %v2107_v18 = vmax.f32 %v2106_v52, %v7652_v45  ;;  %v11243_v52 = vld [vmem:[#allocation108_spill] sm:$0xff] }
 0x4e0   : > { %11234 = vst [vmem:[#allocation170_spill] sm:$0xff] %v7646_v12  ;;  %2104 = vmax.xlane.f32.xlu0 %v2103_v27  ;;  %v7662_v16 = vpop.eup %5229  ;;  %v2111_v20 = vmax.f32 %v7658_v30, %v7660_v58 }
 0x4e1   : > { %11235 = vst [vmem:[#allocation171_spill] sm:$0xff] %v7652_v45  ;;  %4788 = vmatmul.msk.f32.gmra.mxu0 %vm627_vm1, %v11240_v10  ;;  %4853 = vmatmul.msk.f32.gmra.mxu1 %vm627_vm1, %v11240_v10  ;;  %v7668_v60 = vpop.eup %5231  ;;  %v11246_v45 = vld [vmem:[#allocation72_spill] sm:$0xff] }
 0x4e2   : > { %11236 = vst [vmem:[#allocation172_spill] sm:$0xff] %v7656_v57  ;;  %4983 = vmatmul.msk.f32.gmra.mxu3 %vm627_vm1, %v11240_v10  ;;  %4918 = vmatmul.msk.f32.gmra.mxu2 %vm627_vm1, %v11240_v10  ;;  %v3114_v51 = vadd.f32 %v7668_v60, %v7662_v16  ;;  %v7679_v62 = vpop.eup %5233 }
 0x4e3   : > { %11237 = vst [vmem:[#allocation173_spill] sm:$0xff] %v7658_v30  ;;  %3112 = vadd.xlane.f32.xlu2 %v3111_v40  ;;  %v7681_v27 = vpop.eup %5235 }
 0x4e4   : > { %11238 = vst [vmem:[#allocation174_spill] sm:$0xff] %v7660_v58  ;;  %v2035_v9 = vpop.xlane.xlu0 %2034  ;;  %v7685_v48 = vpop.f32.mrf.mxu3  ;;  %v3115_v40 = vadd.f32 %v7681_v27, %v3114_v51 }
 0x4e5   : > { %11239 = vst [vmem:[#allocation175_spill] sm:$0xff] %v7662_v16  ;;  %v2323_v47 = vsub.f32 %v7100_v22, %v2035_v9  ;;  %v2324_v10 = vsub.f32 %v7107_v26, %v2035_v9  ;;  %v2325_v3 = vsub.f32 %v7130_v6, %v2035_v9  ;;  %v2040_v11 = vpop.xlane.xlu2 %2039  ;;  %v7702_v22 = vmul.f32 %v7679_v62, %v11243_v52  ;;  %v7704_v26 = vpop.eup %5237  ;;  %v11247_v52 = vld [vmem:[#allocation109_spill] sm:$0xff] }
 0x4e6   : > { %11241 = vst [vmem:[#allocation67_spill] sm:$0xff] %v7668_v60  ;;  %v7691_v16 = vpop.f32.mrf.mxu2  ;;  %v2327_v57 = vsub.f32 %v7133_v49, %v2040_v11  ;;  %v2328_v12 = vsub.f32 %v7140_v55, %v2040_v11  ;;  %v7696_v35 = vpop.f32.mrf.mxu0  ;;  %v2326_v6 = vsub.f32 %v7128_v19, %v2035_v9  ;;  %v2329_v55 = vsub.f32 %v7164_v29, %v2040_v11  ;;  %v11249_v19 = vld [vmem:[#allocation110_spill] sm:$0xff] }
 0x4e7   : > { %11242 = vst [vmem:[#allocation176_spill] sm:$0xff] %v7681_v27  ;;  %v7698_v60 = vpop.f32.mrf.mxu1  ;;  %v2691_v58 = vmul.f32 1.442695, %v2323_v47  ;;  %v2693_v30 = vmul.f32 1.442695, %v2324_v10  ;;  %v2112_v51 = vmax.f32 %v2111_v20, %v7691_v16  ;;  %v7708_v27 = vpop.eup %5239  ;;  %v7717_v43 = vmul.f32 %v7679_v62, %v11247_v52  ;;  %v11251_v52 = vld [vmem:[#allocation112_spill] sm:$0xff] }
 0x4e8   : > { %11244 = vst [vmem:[#allocation108_spill] sm:$0xff] %v7702_v22  ;;  %v2695_v49 = vmul.f32 1.442695, %v2325_v3  ;;  %v7721_v47 = vmul.f32 %v7679_v62, %v11249_v19  ;;  %v2699_v9 = vmul.f32 1.442695, %v2327_v57  ;;  %v3116_v3 = vadd.f32 %v7708_v27, %v3115_v40  ;;  %v11253_v40 = vld [vmem:[#allocation113_spill] sm:$0xff] }
 0x4e9   : > { %11245 = vst [vmem:[#allocation177_spill] sm:$0xff] %v7708_v27  ;;  %4789 = vmatmul.msk.f32.gmra.mxu0 %vm627_vm1, %v11246_v45  ;;  %4854 = vmatmul.msk.f32.gmra.mxu1 %vm627_vm1, %v11246_v45  ;;  %5241 = vpow2.f32 %v2691_v58  ;;  %v2108_v29 = vmax.f32 %v2107_v18, %v7648_v38  ;;  %v2701_v20 = vmul.f32 1.442695, %v2328_v12  ;;  %v2113_v10 = vmax.f32 %v2112_v51, %v7685_v48 }
 0x4ea   : > { %11248 = vst [vmem:[#allocation72_spill] sm:$0xff] %v7717_v43  ;;  %4984 = vmatmul.msk.f32.gmra.mxu3 %vm627_vm1, %v11246_v45  ;;  %5243 = vpow2.f32 %v2693_v30  ;;  %4919 = vmatmul.msk.f32.gmra.mxu2 %vm627_vm1, %v11246_v45  ;;  %v7732_v19 = vmul.f32 %v7704_v26, %v11251_v52  ;;  %v2697_v58 = vmul.f32 1.442695, %v2326_v6  ;;  %v2330_v57 = vsub.f32 %v7162_v24, %v2040_v11  ;;  %v11255_v30 = vld [vmem:[#allocation114_spill] sm:$0xff]  ;;  %v11259_v24 = vld [vmem:[#allocation79_spill] sm:$0xff] }
 0x4eb   : > { %11250 = vst [vmem:[#allocation109_spill] sm:$0xff] %v7721_v47  ;;  %3117 = vadd.xlane.f32.xlu1 %v3116_v3  ;;  %2109 = vmax.xlane.f32.xlu2 %v2108_v29  ;;  %v7737_v27 = vmul.f32 %v7704_v26, %v11253_v40  ;;  %v7741_v12 = vmul.f32 %v7704_v26, %v11255_v30  ;;  %5245 = vpow2.f32 %v2695_v49  ;;  %v2703_v45 = vmul.f32 1.442695, %v2329_v55 }
 0x4ec   : > { %11252 = vst [vmem:[#allocation110_spill] sm:$0xff] %v7732_v19  ;;  %v2116_v18 = vmax.f32 %v7696_v35, %v7698_v60  ;;  %v3043_v51 = vpop.xlane.xlu0 %3042  ;;  %2114 = vmax.xlane.f32.xlu0 %v2113_v10  ;;  %v7745_v6 = vpop.f32.mrf.mxu3  ;;  %5247 = vpow2.f32 %v2699_v9  ;;  %v2705_v9 = vmul.f32 1.442695, %v2330_v57 }
 0x4ed   : > { %11254 = vst [vmem:[#allocation112_spill] sm:$0xff] %v7737_v27  ;;  %v3048_v11 = vpop.xlane.xlu2 %3047  ;;  %5249 = vpow2.f32 %v2701_v20 }
 0x4ee   : > { %11256 = vst [vmem:[#allocation113_spill] sm:$0xff] %v7741_v12  ;;  %v7749_v3 = vpop.f32.mrf.mxu2  ;;  %v7755_v55 = vpop.f32.mrf.mxu0  ;;  %5251 = vpow2.f32 %v2697_v58 }
 0x4ef   : > { %v7757_v52 = vpop.f32.mrf.mxu1  ;;  %v2117_v10 = vmax.f32 %v2116_v18, %v7749_v3  ;;  %v7760_v40 = vpop.eup %5241  ;;  %5253 = vpow2.f32 %v2703_v45 }
 0x4f0   : > { %11257 = vst [vmem:[#allocation114_spill] sm:$0xff] %v7760_v40  ;;  %v7762_v30 = vpop.eup %5243  ;;  %5255 = vrcp.f32 %v3043_v51  ;;  %v2121_v51 = vmax.f32 %v7755_v55, %v7757_v52 }
 0x4f1   : > { %11258 = vst [vmem:[#allocation178_spill] sm:$0xff] %v7762_v30  ;;  %4790 = vmatmul.msk.f32.gmra.mxu0 %vm627_vm1, %v11259_v24  ;;  %4855 = vmatmul.msk.f32.gmra.mxu1 %vm627_vm1, %v11259_v24  ;;  %v2118_v20 = vmax.f32 %v2117_v10, %v7745_v6  ;;  %v3119_v18 = vadd.f32 %v7762_v30, %v7760_v40  ;;  %v7773_v58 = vpop.eup %5245  ;;  %5257 = vrcp.f32 %v3048_v11 }
 0x4f2   : > { %4985 = vmatmul.msk.f32.gmra.mxu3 %vm627_vm1, %v11259_v24  ;;  %11260 = vst [vmem:[#allocation79_spill] sm:$0xff] %v7773_v58  ;;  %4920 = vmatmul.msk.f32.gmra.mxu2 %vm627_vm1, %v11259_v24  ;;  %v7777_v57 = vpop.eup %5247  ;;  %5259 = vpow2.f32 %v2705_v9 }
 0x4f3   : > { %11261 = vst [vmem:[#allocation179_spill] sm:$0xff] %v7777_v57  ;;  %2119 = vmax.xlane.f32.xlu2 %v2118_v20  ;;  %v3120_v45 = vadd.f32 %v7773_v58, %v3119_v18  ;;  %v7780_v10 = vpop.eup %5249 }
 0x4f4   : > { %v2045_v49 = vpop.xlane.xlu0 %2044  ;;  %v7784_v29 = vpop.f32.mrf.mxu3 }
 0x4f5   : > { %v7786_v47 = vpop.eup %5251  ;;  %v2331_v11 = vsub.f32 %v7166_v1, %v2045_v49  ;;  %v2332_v24 = vsub.f32 %v7172_v41, %v2045_v49  ;;  %v2333_v12 = vsub.f32 %v7200_v61, %v2045_v49  ;;  %v2334_v9 = vsub.f32 %v7198_v2, %v2045_v49  ;;  %v3053_v20 = vpop.xlane.xlu2 %3052 }
 0x4f6   : > { %11262 = vst [vmem:[#allocation180_spill] sm:$0xff] %v7786_v47  ;;  %v7792_v18 = vpop.f32.mrf.mxu2  ;;  %v7794_v43 = vpop.eup %5253  ;;  %v3121_v27 = vadd.f32 %v7786_v47, %v3120_v45  ;;  %v3124_v1 = vadd.f32 %v7780_v10, %v7777_v57  ;;  %v11267_v45 = vld [vmem:[#allocation88_spill] sm:$0xff] }
 0x4f7   : > { %11263 = vst [vmem:[#allocation181_spill] sm:$0xff] %v7792_v18  ;;  %v2122_v22 = vmax.f32 %v2121_v51, %v7792_v18  ;;  %v7798_v19 = vpop.f32.mrf.mxu0  ;;  %v7800_v40 = vpop.f32.mrf.mxu1  ;;  %v2707_v61 = vmul.f32 1.442695, %v2331_v11  ;;  %v2709_v2 = vmul.f32 1.442695, %v2332_v24  ;;  %v11272_v24 = vld [vmem:[#allocation117_spill] sm:$0xff] }
 0x4f8   : > { %11264 = vst [vmem:[#allocation182_spill] sm:$0xff] %v7794_v43  ;;  %v7804_v41 = vpop.eup %5255  ;;  %v2711_v58 = vmul.f32 1.442695, %v2333_v12  ;;  %3122 = vadd.xlane.f32.xlu1 %v3121_v27  ;;  %v3125_v30 = vadd.f32 %v7794_v43, %v3124_v1  ;;  %v2713_v18 = vmul.f32 1.442695, %v2334_v9 }
 0x4f9   : > { %11265 = vst [vmem:[#allocation183_spill] sm:$0xff] %v7798_v19  ;;  %v7806_v49 = vpop.eup %5257  ;;  %4791 = vmatmul.msk.f32.gmra.mxu0 %vm627_vm1, %v11267_v45  ;;  %v2123_v51 = vmax.f32 %v2122_v22, %v7784_v29  ;;  %5261 = vpow2.f32 %v2707_v61  ;;  %4856 = vmatmul.msk.f32.gmra.mxu1 %vm627_vm1, %v11267_v45  ;;  %v7820_v27 = vmul.f32 %v7804_v41, %v7160_v25 }
 0x4fa   : > { %11266 = vst [vmem:[#allocation184_spill] sm:$0xff] %v7800_v40  ;;  %v7812_v47 = vpop.eup %5259  ;;  %4986 = vmatmul.msk.f32.gmra.mxu3 %vm627_vm1, %v11267_v45  ;;  %v7824_v12 = vmul.f32 %v7806_v49, %v7184_v13  ;;  %5263 = vpow2.f32 %v2709_v2  ;;  %4921 = vmatmul.msk.f32.gmra.mxu2 %vm627_vm1, %v11267_v45  ;;  %v7831_v11 = vmul.f32 %v7804_v41, %v7189_v15 }
 0x4fb   : > { %11268 = vst [vmem:[#allocation88_spill] sm:$0xff] %v7812_v47  ;;  %v3126_v22 = vadd.f32 %v7812_v47, %v3125_v30  ;;  %v7835_v9 = vmul.f32 %v7806_v49, %v11272_v24  ;;  %2124 = vmax.xlane.f32.xlu2 %v2123_v51  ;;  %5265 = vpow2.f32 %v2711_v58  ;;  %v7845_v15 = vmul.f32 %v7806_v49, %v7212_v14  ;;  %v11277_v51 = vld [vmem:[#allocation118_spill] sm:$0xff] }
 0x4fc   : > { %11269 = vst [vmem:[#allocation185_spill] sm:$0xff] %v7820_v27  ;;  %v3058_v13 = vpop.xlane.xlu1 %3057  ;;  %v7839_v1 = vpop.f32.mrf.mxu3  ;;  %v7851_v45 = vmul.f32 %v7804_v41, %v7205_v53 }
 0x4fd   : > { %11270 = vst [vmem:[#allocation186_spill] sm:$0xff] %v7824_v12  ;;  %3127 = vadd.xlane.f32.xlu0 %v3126_v22  ;;  %5267 = vrcp.f32 %v3058_v13  ;;  %v2050_v61 = vpop.xlane.xlu2 %2049 }
 0x4fe   : > { %11271 = vst [vmem:[#allocation187_spill] sm:$0xff] %v7831_v11  ;;  %v7847_v2 = vpop.f32.mrf.mxu2  ;;  %5269 = vpow2.f32 %v2713_v18  ;;  %v2335_v58 = vsub.f32 %v7203_v46, %v2050_v61  ;;  %v2336_v22 = vsub.f32 %v11277_v51, %v2050_v61  ;;  %v2337_v24 = vsub.f32 %v7238_v39, %v2050_v61 }
 0x4ff   : > { %11273 = vst [vmem:[#allocation117_spill] sm:$0xff] %v7835_v9  ;;  %v7856_v30 = vpop.f32.mrf.mxu0  ;;  %v7858_v25 = vpop.f32.mrf.mxu1  ;;  %5271 = vrcp.f32 %v3053_v20  ;;  %v2338_v13 = vsub.f32 %v7236_v23, %v2050_v61 }
 0x500   : > { %11274 = vst [vmem:[#allocation188_spill] sm:$0xff] %v7845_v15  ;;  %v7860_v14 = vpop.eup %5261  ;;  %v2715_v18 = vmul.f32 1.442695, %v2335_v58  ;;  %v2717_v46 = vmul.f32 1.442695, %v2336_v22 }
 0x501   : > { %11275 = vst [vmem:[#allocation189_spill] sm:$0xff] %v7847_v2  ;;  %v7865_v11 = vpop.eup %5263  ;;  %v2719_v9 = vmul.f32 1.442695, %v2337_v24  ;;  %v2721_v12 = vmul.f32 1.442695, %v2338_v13  ;;  %v11286_v24 = vld [vmem:[#allocation125_spill] sm:$0xff]  ;;  %v2126_v13 = vmax.f32 %v7798_v19, %v7800_v40 }
 0x502   : > { %11276 = vst [vmem:[#allocation190_spill] sm:$0xff] %v7851_v45  ;;  %v3129_v39 = vadd.f32 %v7865_v11, %v7860_v14  ;;  %v7869_v51 = vpop.eup %5265  ;;  %5273 = vpow2.f32 %v2715_v18  ;;  %v11298_v40 = vld [vmem:[#allocation121_spill] sm:$0xff] }
 0x503   : > { %11278 = vst [vmem:[#allocation118_spill] sm:$0xff] %v7856_v30  ;;  %v5268_v27 = vpop.eup %5267  ;;  %5275 = vpow2.f32 %v2717_v46  ;;  %v11289_v46 = vld [vmem:[#allocation31_spill] sm:$0xff] }
 0x504   : > { %11279 = vst [vmem:[#allocation191_spill] sm:$0xff] %v7858_v25  ;;  %v3130_v20 = vadd.f32 %v7869_v51, %v3129_v39  ;;  %v7872_v23 = vpop.eup %5269  ;;  %v7874_v61 = vpop.f32.mrf.mxu3  ;;  %5277 = vpow2.f32 %v2719_v9  ;;  %v3423_v45 = vmul.f32 %v5268_v27, %v11286_v24  ;;  %v7887_v39 = vmul.f32 %v5268_v27, %v11289_v46  ;;  %v11300_v46 = vld [vmem:[#allocation116_spill] sm:$0xff] }
 0x505   : > { %11280 = vst [vmem:[#allocation192_spill] sm:$0xff] %v7860_v14  ;;  %v5272_v53 = vpop.eup %5271  ;;  %5279 = vpow2.f32 %v2721_v12  ;;  %v11296_v14 = vld [vmem:[#allocation120_spill] sm:$0xff]  ;;  %v3415_v19 = vmul.f32 %v7806_v49, %v11300_v46 }
 0x506   : > { %11281 = vst [vmem:[#allocation193_spill] sm:$0xff] %v7865_v11  ;;  %v3131_v58 = vadd.f32 %v7872_v23, %v3130_v20  ;;  %v7877_v22 = vpop.f32.mrf.mxu2  ;;  %v2127_v11 = vmax.f32 %v2126_v13, %v7847_v2  ;;  %v7899_v47 = vmul.f32 %v5272_v53, %v11296_v14  ;;  %v7902_v12 = vmul.f32 %v5272_v53, %v11298_v40  ;;  %v11301_v14 = vld [vmem:[#allocation115_spill] sm:$0xff] }
 0x507   : > { %11282 = vst [vmem:[#allocation194_spill] sm:$0xff] %v7869_v51  ;;  %v7880_v15 = vpop.f32.mrf.mxu0  ;;  %v7882_v18 = vpop.f32.mrf.mxu1  ;;  %v11291_v51 = vld [vmem:[#allocation126_spill] sm:$0xff]  ;;  %v3411_v40 = vmul.f32 %v7804_v41, %v11301_v14 }
 0x508   : > { %11283 = vst [vmem:[#allocation195_spill] sm:$0xff] %v7872_v23  ;;  %3132 = vadd.xlane.f32.xlu0 %v3131_v58  ;;  %v7890_v9 = vmul.f32 %v5268_v27, %v11291_v51  ;;  %v7892_v20 = vpop.eup %5273  ;;  %v11294_v23 = vld [vmem:[#allocation119_spill] sm:$0xff] }
 0x509   : > { %11284 = vst [vmem:[#allocation196_spill] sm:$0xff] %v7874_v61  ;;  %v3419_v57 = vmul.f32 %v5272_v53, %v11294_v23  ;;  %v7895_v24 = vpop.eup %5275  ;;  %v3651_v23 = vpack.c.bf16 %v3415_v19, %v3411_v40  ;;  %v11309_v19 = vld [vmem:[#allocation107_spill] sm:$0xff] }
 0x50a   : > { %11285 = vst [vmem:[#allocation197_spill] sm:$0xff] %v7877_v22  ;;  %v3134_v51 = vadd.f32 %v7895_v24, %v7892_v20  ;;  %v7908_v43 = vpop.eup %5277 }
 0x50b   : > { %11287 = vst [vmem:[#allocation125_spill] sm:$0xff] %v7880_v15  ;;  %v3655_v58 = vpack.c.bf16 %v3423_v45, %v3419_v57  ;;  %v7919_v49 = vpop.eup %5279  ;;  %v2128_v45 = vmax.f32 %v2127_v11, %v7839_v1  ;;  %v11307_v11 = vld [vmem:[#allocation124_spill] sm:$0xff] }
 0x50c   : > { %11288 = vst [vmem:[#allocation198_spill] sm:$0xff] %v7882_v18  ;;  %v7916_v2 = vpop.f32.mrf.mxu3  ;;  %v3135_v57 = vadd.f32 %v7908_v43, %v3134_v51  ;;  %v2131_v51 = vmax.f32 %v7856_v30, %v7858_v25 }
 0x50d   : > { %11290 = vst [vmem:[#allocation31_spill] sm:$0xff] %v7887_v39  ;;  %3755 = vmatpush.bf16.msrb.mxu0 %v3655_v58 }
 0x50e   : > { %11292 = vst [vmem:[#allocation126_spill] sm:$0xff] %v7890_v9  ;;  %v7922_v46 = vpop.f32.mrf.mxu2  ;;  %v3136_v14 = vadd.f32 %v7919_v49, %v3135_v57  ;;  %v11310_v57 = vld [vmem:[#allocation105_spill] sm:$0xff] }
 0x50f   : > { %11293 = vst [vmem:[#allocation199_spill] sm:$0xff] %v7892_v20  ;;  %v7929_v13 = vpop.f32.mrf.mxu0  ;;  %v7931_v41 = vpop.f32.mrf.mxu1 }
 0x510   : > { %11295 = vst [vmem:[#allocation119_spill] sm:$0xff] %v7895_v24  ;;  %v11304_v24 = vld [vmem:[#allocation130_spill] sm:$0xff]  ;;  %2129 = vmax.xlane.f32.xlu0 %v2128_v45  ;;  %3137 = vadd.xlane.f32.xlu2 %v3136_v14  ;;  %v3399_v45 = vmul.f32 %v7582_v56, %v11310_v57 }
 0x511   : > { %11297 = vst [vmem:[#allocation120_spill] sm:$0xff] %v7899_v47  ;;  %v7925_v20 = vmul.f32 %v5268_v27, %v11304_v24  ;;  %v11306_v47 = vld [vmem:[#allocation111_spill] sm:$0xff]  ;;  %v2136_v27 = vmax.f32 %v7880_v15, %v7882_v18  ;;  %3756 = vmatpush.bf16.msrb.mxu0 %v3651_v23 }
 0x512   : > { %11299 = vst [vmem:[#allocation121_spill] sm:$0xff] %v7902_v12  ;;  %v3407_v58 = vmul.f32 %v7704_v26, %v11306_v47  ;;  %v7937_v12 = vmul.f32 %v5272_v53, %v11307_v11  ;;  %v3403_v26 = vmul.f32 %v7679_v62, %v11309_v19  ;;  %v2132_v47 = vmax.f32 %v2131_v51, %v7877_v22  ;;  %v11311_v11 = vld [vmem:[#allocation101_spill] sm:$0xff] }
 0x513   : > { %11302 = vst [vmem:[#allocation116_spill] sm:$0xff] %v7916_v2  ;;  %v2137_v53 = vmax.f32 %v2136_v27, %v7922_v46  ;;  %v3395_v9 = vmul.f32 %v7574_v5, %v11311_v11  ;;  %v2141_v27 = vmax.f32 %v7929_v13, %v7931_v41  ;;  %v11318_v11 = vld [vmem:[#allocation141_spill] sm:$0xff] }
 0x514   : > { %11303 = vst [vmem:[#allocation115_spill] sm:$0xff] %v7922_v46  ;;  %v3647_v40 = vpack.c.bf16 %v3407_v58, %v3403_v26  ;;  %v7951_v23 = vpop.f32.mrf.mxu3  ;;  %v2133_v62 = vmax.f32 %v2132_v47, %v7874_v61  ;;  %v7966_v26 = vpop.xlane.xlu2 %2054  ;;  %v11315_v47 = vpack.c.bf16 %v7487_v36, %v7480_v8 }
 0x515   : > { %11305 = vst [vmem:[#allocation130_spill] sm:$0xff] %v7925_v20  ;;  %v7953_v39 = vpop.xlane.xlu0 %2069  ;;  %v3643_v51 = vpack.c.bf16 %v3399_v45, %v3395_v9  ;;  %v2138_v56 = vmax.f32 %v2137_v53, %v7916_v2  ;;  %v11317_v45 = vld [vmem:[#allocation140_spill] sm:$0xff] }
 0x516   : > { %11308 = vst [vmem:[#allocation111_spill] sm:$0xff] %v7937_v12  ;;  %3757 = vmatpush.bf16.msrb.mxu0 %v3647_v40  ;;  %v7956_v14 = vpop.f32.mrf.mxu2 }
 0x517   : > { %v7958_v19 = vpop.f32.mrf.mxu0  ;;  %v7960_v58 = vpop.f32.mrf.mxu1  ;;  %v2142_v5 = vmax.f32 %v2141_v27, %v7956_v14  ;;  %11314 = vst [vmem:[#allocation105_spill] sm:$0xff] %v7966_v26  ;;  %v11321_v27 = vld [vmem:[#allocation143_spill] sm:$0xff] }
 0x518   : > { %11312 = vst [vmem:[#allocation124_spill] sm:$0xff] %v7958_v19  ;;  %2134 = vmax.xlane.f32.xlu0 %v2133_v62  ;;  %2139 = vmax.xlane.f32.xlu2 %v2138_v56  ;;  %v2146_v9 = vmax.f32 %v7958_v19, %v7960_v58 }
 0x519   : > { %11313 = vst [vmem:[#allocation107_spill] sm:$0xff] %v7960_v58  ;;  %v2143_v36 = vmax.f32 %v2142_v5, %v7951_v23 }
 0x51a   : > { %3758 = vmatpush.bf16.msrb.mxu0 %v3643_v51  ;;  %v11319_v51 = vld [vmem:[#allocation144_spill] sm:$0xff] }
 0x51c   : > { %v7973_v40 = vpop.f32.mrf.mxu3 }
 0x51d   : > { %11316 = vst [vmem:[#allocation101_spill] sm:$0xff] %v7973_v40  ;;  %v2075_v57 = vpop.xlane.xlu0 %2074 }
 0x51e   : > { %3759 = vmatpush.bf16.msrb.mxu0 %v11315_v47  ;;  %v2355_v53 = vsub.f32 %v11317_v45, %v2075_v57  ;;  %v2356_v62 = vsub.f32 %v11318_v11, %v2075_v57  ;;  %v2357_v56 = vsub.f32 %v11319_v51, %v2075_v57  ;;  %v7978_v24 = vpop.f32.mrf.mxu2  ;;  %v2358_v12 = vsub.f32 %v11321_v27, %v2075_v57  ;;  %v7988_v11 = vpop.xlane.xlu1 %2059 }
 0x51f   : > { %11320 = vst [vmem:[#allocation140_spill] sm:$0xff] %v7978_v24  ;;  %v7981_v20 = vpop.f32.mrf.mxu0  ;;  %v7983_v8 = vpop.f32.mrf.mxu1  ;;  %v2147_v47 = vmax.f32 %v2146_v9, %v7978_v24  ;;  %v11326_v9 = vld [vmem:[#allocation146_spill] sm:$0xff] }
 0x520   : > { %11322 = vst [vmem:[#allocation141_spill] sm:$0xff] %v7981_v20  ;;  %v2755_v2 = vmul.f32 1.442695, %v2355_v53  ;;  %v2757_v46 = vmul.f32 1.442695, %v2356_v62  ;;  %2144 = vmax.xlane.f32.xlu2 %v2143_v36  ;;  %v2151_v57 = vmax.f32 %v7981_v20, %v7983_v8  ;;  %v11327_v62 = vld [vmem:[#allocation147_spill] sm:$0xff] }
 0x521   : > { %11323 = vst [vmem:[#allocation144_spill] sm:$0xff] %v7983_v8  ;;  %v2759_v18 = vmul.f32 1.442695, %v2357_v56  ;;  %v2148_v45 = vmax.f32 %v2147_v47, %v7973_v40  ;;  %v2761_v51 = vmul.f32 1.442695, %v2358_v12 }
 0x522   : > { %5281 = vpow2.f32 %v2755_v2  ;;  %11324 = vst [vmem:[#allocation143_spill] sm:$0xff] %v7988_v11 }
 0x523   : > { %5283 = vpow2.f32 %v2757_v46  ;;  %2149 = vmax.xlane.f32.xlu1 %v2148_v45 }
 0x524   : > { %5285 = vpow2.f32 %v2759_v18  ;;  %v7992_v27 = vpop.f32.mrf.mxu3 }
 0x525   : > { %11325 = vst [vmem:[#allocation200_spill] sm:$0xff] %v7992_v27  ;;  %v2080_v5 = vpop.xlane.xlu2 %2079  ;;  %5287 = vpow2.f32 %v2761_v51 }
 0x526   : > { %v2359_v53 = vsub.f32 %v11326_v9, %v2080_v5  ;;  %v2360_v56 = vsub.f32 %v11327_v62, %v2080_v5  ;;  %v2361_v36 = vsub.f32 %v7387_v0, %v2080_v5  ;;  %v7997_v47 = vpop.f32.mrf.mxu2  ;;  %v2362_v2 = vsub.f32 %v7385_v54, %v2080_v5  ;;  %v8019_v30 = vpop.xlane.xlu1 %2064 }
 0x527   : > { %11328 = vst [vmem:[#allocation146_spill] sm:$0xff] %v7997_v47  ;;  %v2152_v12 = vmax.f32 %v2151_v57, %v7997_v47  ;;  %v8001_v18 = vpop.f32.mrf.mxu0  ;;  %v8003_v46 = vpop.f32.mrf.mxu1 }
 0x528   : > { %11329 = vst [vmem:[#allocation147_spill] sm:$0xff] %v8001_v18  ;;  %v8005_v45 = vpop.eup %5281  ;;  %v2763_v15 = vmul.f32 1.442695, %v2359_v53  ;;  %v2765_v61 = vmul.f32 1.442695, %v2360_v56  ;;  %v11335_v53 = vld [vmem:[#allocation83_spill] sm:$0xff] }
 0x529   : > { %11330 = vst [vmem:[#allocation201_spill] sm:$0xff] %v8003_v46  ;;  %v8007_v9 = vpop.eup %5283  ;;  %v2767_v62 = vmul.f32 1.442695, %v2361_v36  ;;  %v2153_v0 = vmax.f32 %v2152_v12, %v7992_v27  ;;  %v2769_v57 = vmul.f32 1.442695, %v2362_v2  ;;  %v11336_v56 = vld [vmem:[#allocation29_spill] sm:$0xff] }
 0x52a   : > { %11331 = vst [vmem:[#allocation202_spill] sm:$0xff] %v8005_v45  ;;  %5289 = vpow2.f32 %v2763_v15  ;;  %v3159_v51 = vadd.f32 %v8007_v9, %v8005_v45  ;;  %v8012_v54 = vpop.eup %5285  ;;  %v2215_v25 = vsub.f32 %v11336_v56, %v11335_v53  ;;  %v11338_v15 = vld [vmem:[#allocation30_spill] sm:$0xff]  ;;  %v11340_v56 = vld [vmem:[#allocation149_spill] sm:$0xff]  ;;  %v11345_v27 = vld [vmem:[#allocation55_spill] sm:$0xff] }
 0x52b   : > { %11332 = vst [vmem:[#allocation203_spill] sm:$0xff] %v8007_v9  ;;  %5291 = vpow2.f32 %v2765_v61  ;;  %2154 = vmax.xlane.f32.xlu1 %v2153_v0  ;;  %v8015_v22 = vpop.eup %5287  ;;  %v2216_v12 = vsub.f32 %v11338_v15, %v11335_v53  ;;  %v2156_v61 = vmax.f32 %v8001_v18, %v8003_v46 }
 0x52c   : > { %11333 = vst [vmem:[#allocation204_spill] sm:$0xff] %v8012_v54  ;;  %v3160_v5 = vadd.f32 %v8012_v54, %v3159_v51  ;;  %5293 = vpow2.f32 %v2767_v62  ;;  %v8021_v36 = vpop.f32.mrf.mxu3  ;;  %v11341_v54 = vld [vmem:[#allocation97_spill] sm:$0xff] }
 0x52d   : > { %11334 = vst [vmem:[#allocation205_spill] sm:$0xff] %v8015_v22  ;;  %5295 = vpow2.f32 %v2769_v57  ;;  %v2475_v57 = vmul.f32 1.442695, %v2215_v25 }
 0x52e   : > { %11337 = vst [vmem:[#allocation83_spill] sm:$0xff] %v8021_v36  ;;  %v2085_v2 = vpop.xlane.xlu2 %2084  ;;  %v8027_v0 = vpop.f32.mrf.mxu2  ;;  %v3161_v51 = vadd.f32 %v8015_v22, %v3160_v5 }
 0x52f   : > { %11339 = vst [vmem:[#allocation29_spill] sm:$0xff] %v8027_v0  ;;  %v2363_v26 = vsub.f32 %v7389_v59, %v2085_v2  ;;  %v2364_v11 = vsub.f32 %v11340_v56, %v2085_v2  ;;  %v2365_v62 = vsub.f32 %v11341_v54, %v2085_v2  ;;  %v8033_v9 = vpop.f32.mrf.mxu0  ;;  %v8035_v45 = vpop.f32.mrf.mxu1  ;;  %v2366_v46 = vsub.f32 %v11345_v27, %v2085_v2  ;;  %v11347_v56 = vld [vmem:[#allocation32_spill] sm:$0xff]  ;;  %v11349_v27 = vld [vmem:[#allocation33_spill] sm:$0xff] }
 0x530   : > { %11342 = vst [vmem:[#allocation30_spill] sm:$0xff] %v8033_v9  ;;  %v8037_v15 = vpop.eup %5289  ;;  %3162 = vadd.xlane.f32.xlu2 %v3161_v51  ;;  %v2157_v18 = vmax.f32 %v2156_v61, %v8027_v0  ;;  %v2217_v22 = vsub.f32 %v11347_v56, %v11335_v53  ;;  %v2218_v2 = vsub.f32 %v11349_v27, %v11335_v53  ;;  %v2477_v61 = vmul.f32 1.442695, %v2216_v12 }
 0x531   : > { %11343 = vst [vmem:[#allocation149_spill] sm:$0xff] %v8035_v45  ;;  %v8041_v47 = vpop.eup %5291  ;;  %v2771_v5 = vmul.f32 1.442695, %v2363_v26  ;;  %v2773_v59 = vmul.f32 1.442695, %v2364_v11 }
 0x532   : > { %11344 = vst [vmem:[#allocation97_spill] sm:$0xff] %v8037_v15  ;;  %v2775_v54 = vmul.f32 1.442695, %v2365_v62  ;;  %v2158_v8 = vmax.f32 %v2157_v18, %v8021_v36  ;;  %v3164_v20 = vadd.f32 %v8041_v47, %v8037_v15  ;;  %v8048_v40 = vpop.eup %5293  ;;  %v2777_v25 = vmul.f32 1.442695, %v2366_v46  ;;  %v11353_v15 = vld [vmem:[#allocation43_spill] sm:$0xff] }
 0x533   : > { %11346 = vst [vmem:[#allocation55_spill] sm:$0xff] %v8041_v47  ;;  %5297 = vpow2.f32 %v2771_v5  ;;  %v8053_v11 = vpop.eup %5295  ;;  %v2161_v18 = vmax.f32 %v8033_v9, %v8035_v45  ;;  %v2479_v56 = vmul.f32 1.442695, %v2217_v22  ;;  %v11352_v47 = vld [vmem:[#allocation95_spill] sm:$0xff]  ;;  %v11355_v46 = vld [vmem:[#allocation44_spill] sm:$0xff]  ;;  %v11358_v22 = vld [vmem:[#allocation46_spill] sm:$0xff] }
 0x534   : > { %11348 = vst [vmem:[#allocation32_spill] sm:$0xff] %v8048_v40  ;;  %5299 = vpow2.f32 %v2773_v59  ;;  %2159 = vmax.xlane.f32.xlu0 %v2158_v8  ;;  %v3165_v26 = vadd.f32 %v8048_v40, %v3164_v20  ;;  %v3093_v51 = vpop.xlane.xlu1 %3092  ;;  %v8057_v62 = vpop.f32.mrf.mxu3  ;;  %v2227_v53 = vsub.f32 %v11353_v15, %v11352_v47  ;;  %v2481_v20 = vmul.f32 1.442695, %v2218_v2 }
 0x535   : > { %11350 = vst [vmem:[#allocation33_spill] sm:$0xff] %v8053_v11  ;;  %5301 = vpow2.f32 %v2475_v57  ;;  %v2228_v57 = vsub.f32 %v11355_v46, %v11352_v47  ;;  %v2229_v40 = vsub.f32 %v11358_v22, %v11352_v47 }
 0x536   : > { %11351 = vst [vmem:[#allocation206_spill] sm:$0xff] %v8057_v62  ;;  %5303 = vpow2.f32 %v2775_v54  ;;  %v8061_v12 = vpop.f32.mrf.mxu2  ;;  %v3166_v8 = vadd.f32 %v8053_v11, %v3165_v26  ;;  %v11360_v54 = vld [vmem:[#allocation47_spill] sm:$0xff] }
 0x537   : > { %11354 = vst [vmem:[#allocation95_spill] sm:$0xff] %v8061_v12  ;;  %5305 = vpow2.f32 %v2477_v61  ;;  %v2162_v5 = vmax.f32 %v2161_v18, %v8061_v12  ;;  %v8067_v59 = vpop.f32.mrf.mxu0  ;;  %v8069_v27 = vpop.f32.mrf.mxu1  ;;  %v2230_v61 = vsub.f32 %v11360_v54, %v11352_v47  ;;  %v2499_v18 = vmul.f32 1.442695, %v2227_v53  ;;  %v11366_v54 = vld [vmem:[#allocation48_spill] sm:$0xff] }
 0x538   : > { %11356 = vst [vmem:[#allocation43_spill] sm:$0xff] %v8067_v59  ;;  %5307 = vpow2.f32 %v2777_v25  ;;  %3167 = vadd.xlane.f32.xlu1 %v3166_v8  ;;  %v2501_v11 = vmul.f32 1.442695, %v2228_v57  ;;  %v2503_v22 = vmul.f32 1.442695, %v2229_v40  ;;  %v2166_v53 = vmax.f32 %v8067_v59, %v8069_v27  ;;  %v11369_v40 = vld [vmem:[#allocation150_spill] sm:$0xff] }
 0x539   : > { %11357 = vst [vmem:[#allocation44_spill] sm:$0xff] %v8069_v27  ;;  %v8073_v15 = vpop.eup %5297  ;;  %5309 = vrcp.f32 %v3093_v51  ;;  %v2163_v2 = vmax.f32 %v2162_v5, %v8057_v62  ;;  %v2505_v51 = vmul.f32 1.442695, %v2230_v61  ;;  %v11365_v5 = vld [vmem:[#allocation89_spill] sm:$0xff] }
 0x53a   : > { %11359 = vst [vmem:[#allocation46_spill] sm:$0xff] %v8073_v15  ;;  %v8078_v26 = vpop.eup %5299  ;;  %5311 = vpow2.f32 %v2479_v56  ;;  %v2231_v56 = vsub.f32 %v11366_v54, %v11365_v5 }
 0x53b   : > { %11361 = vst [vmem:[#allocation47_spill] sm:$0xff] %v8078_v26  ;;  %v8080_v46 = vpop.eup %5301  ;;  %5313 = vpow2.f32 %v2481_v20  ;;  %v3098_v12 = vpop.xlane.xlu0 %3097  ;;  %v3169_v25 = vadd.f32 %v8078_v26, %v8073_v15 }
 0x53c   : > { %11362 = vst [vmem:[#allocation207_spill] sm:$0xff] %v8080_v46  ;;  %v8084_v8 = vpop.eup %5303  ;;  %5315 = vrcp.f32 %v3098_v12  ;;  %2164 = vmax.xlane.f32.xlu0 %v2163_v2  ;;  %v2090_v20 = vpop.xlane.xlu1 %2089  ;;  %v11370_v2 = vld [vmem:[#allocation151_spill] sm:$0xff]  ;;  %v2507_v36 = vmul.f32 1.442695, %v2231_v56 }
 0x53d   : > { %11363 = vst [vmem:[#allocation208_spill] sm:$0xff] %v8084_v8  ;;  %v8086_v47 = vpop.eup %5305  ;;  %v8092_v57 = vpop.f32.mrf.mxu3  ;;  %v3170_v46 = vadd.f32 %v8084_v8, %v3169_v25  ;;  %5317 = vpow2.f32 %v2499_v18  ;;  %v2367_v12 = vsub.f32 %v11369_v40, %v2090_v20  ;;  %v2368_v15 = vsub.f32 %v11370_v2, %v2090_v20  ;;  %v11384_v56 = vld [vmem:[#allocation159_spill] sm:$0xff] }
 0x53e   : > { %11364 = vst [vmem:[#allocation209_spill] sm:$0xff] %v8086_v47  ;;  %v8095_v26 = vpop.eup %5307  ;;  %v11371_v47 = vld [vmem:[#allocation155_spill] sm:$0xff]  ;;  %v8100_v62 = vpop.f32.mrf.mxu2  ;;  %5319 = vpow2.f32 %v2501_v11  ;;  %v2370_v18 = vsub.f32 %v7441_v28, %v2090_v20  ;;  %v11377_v11 = vld [vmem:[#allocation49_spill] sm:$0xff] }
 0x53f   : > { %11367 = vst [vmem:[#allocation89_spill] sm:$0xff] %v8092_v57  ;;  %v2369_v61 = vsub.f32 %v11371_v47, %v2090_v20  ;;  %v5310_v54 = vpop.eup %5309  ;;  %v8102_v45 = vpop.f32.mrf.mxu0  ;;  %v3171_v59 = vadd.f32 %v8095_v26, %v3170_v46  ;;  %v2167_v25 = vmax.f32 %v2166_v53, %v8100_v62  ;;  %5321 = vpow2.f32 %v2503_v22  ;;  %v11380_v22 = vld [vmem:[#allocation56_spill] sm:$0xff] }
 0x540   : > { %11368 = vst [vmem:[#allocation48_spill] sm:$0xff] %v8095_v26  ;;  %v8104_v27 = vpop.f32.mrf.mxu1  ;;  %v8108_v8 = vpop.eup %5311  ;;  %v2779_v40 = vmul.f32 1.442695, %v2367_v12  ;;  %v2781_v2 = vmul.f32 1.442695, %v2368_v15  ;;  %5323 = vpow2.f32 %v2505_v51  ;;  %v2232_v9 = vsub.f32 %v11377_v11, %v11365_v5  ;;  %v11378_v26 = vld [vmem:[#allocation152_spill] sm:$0xff] }
 0x541   : > { %11372 = vst [vmem:[#allocation150_spill] sm:$0xff] %v8100_v62  ;;  %v8111_v47 = vpop.eup %5313  ;;  %3172 = vadd.xlane.f32.xlu1 %v3171_v59  ;;  %v2168_v0 = vmax.f32 %v2167_v25, %v8092_v57  ;;  %v2783_v53 = vmul.f32 1.442695, %v2369_v61  ;;  %v8120_v28 = vmul.f32 %v5310_v54, %v11380_v22  ;;  %v11382_v51 = vld [vmem:[#allocation158_spill] sm:$0xff]  ;;  %v11386_v12 = vld [vmem:[#allocation57_spill] sm:$0xff] }
 0x542   : > { %11373 = vst [vmem:[#allocation151_spill] sm:$0xff] %v8102_v45  ;;  %v5316_v46 = vpop.eup %5315  ;;  %5325 = vpow2.f32 %v2779_v40  ;;  %v11388_v40 = vld [vmem:[#allocation156_spill] sm:$0xff]  ;;  %v2509_v57 = vmul.f32 1.442695, %v2232_v9 }
 0x543   : > { %11374 = vst [vmem:[#allocation155_spill] sm:$0xff] %v8104_v27  ;;  %5327 = vpow2.f32 %v2781_v2  ;;  %v8122_v15 = vpop.xlane.xlu0 %2094  ;;  %2169 = vmax.xlane.f32.xlu2 %v2168_v0  ;;  %v8125_v20 = vmul.f32 %v5316_v46, %v11382_v51  ;;  %v8128_v59 = vmul.f32 %v5316_v46, %v11384_v56  ;;  %v8131_v25 = vmul.f32 %v5316_v46, %v11386_v12  ;;  %v8133_v61 = vpop.eup %5317  ;;  %v11389_v2 = vld [vmem:[#allocation157_spill] sm:$0xff] }
 0x544   : > { %11375 = vst [vmem:[#allocation210_spill] sm:$0xff] %v8108_v8  ;;  %v8117_v8 = vmul.f32 %v5310_v54, %v11378_v26  ;;  %v2785_v26 = vmul.f32 1.442695, %v2370_v18  ;;  %v2371_v11 = vsub.f32 %v11388_v40, %v8122_v15  ;;  %v2372_v22 = vsub.f32 %v11389_v2, %v8122_v15  ;;  %v8142_v51 = vpop.eup %5319 }
 0x545   : > { %11376 = vst [vmem:[#allocation211_spill] sm:$0xff] %v8111_v47  ;;  %v11390_v47 = vld [vmem:[#allocation153_spill] sm:$0xff]  ;;  %v2373_v56 = vsub.f32 %v7495_v17, %v8122_v15  ;;  %v8146_v12 = vpop.f32.mrf.mxu3  ;;  %v8152_v62 = vpop.eup %5321  ;;  %5329 = vpow2.f32 %v2783_v53  ;;  %v8163_v18 = vmul.f32 %v5316_v46, %v7482_v50  ;;  %v11401_v50 = vld [vmem:[#allocation154_spill] sm:$0xff] }
 0x546   : > { %11379 = vst [vmem:[#allocation49_spill] sm:$0xff] %v8117_v8  ;;  %v8140_v0 = vmul.f32 %v5310_v54, %v11390_v47  ;;  %v2787_v2 = vmul.f32 1.442695, %v2371_v11  ;;  %v8154_v47 = vpop.f32.mrf.mxu2  ;;  %v8158_v24 = vpop.eup %5323  ;;  %5331 = vpow2.f32 %v2507_v36  ;;  %v2789_v17 = vmul.f32 1.442695, %v2372_v22  ;;  %v11400_v36 = vld [vmem:[#allocation51_spill] sm:$0xff] }
 0x547   : > { %11381 = vst [vmem:[#allocation152_spill] sm:$0xff] %v8120_v28  ;;  %v2100_v58 = vpop.xlane.xlu2 %2099  ;;  %v8160_v19 = vpop.f32.mrf.mxu0  ;;  %5333 = vpow2.f32 %v2785_v26  ;;  %v2233_v22 = vsub.f32 %v11400_v36, %v11365_v5  ;;  %v8177_v46 = vmul.f32 %v5310_v54, %v11401_v50 }
 0x548   : > { %11383 = vst [vmem:[#allocation56_spill] sm:$0xff] %v8125_v20  ;;  %v8165_v40 = vpop.eup %5325  ;;  %v2375_v53 = vsub.f32 %v7508_v42, %v2100_v58  ;;  %v2376_v11 = vsub.f32 %v7510_v31, %v2100_v58  ;;  %v2377_v28 = vsub.f32 %v7548_v4, %v2100_v58  ;;  %v8170_v9 = vpop.f32.mrf.mxu1  ;;  %5335 = vpow2.f32 %v2509_v57  ;;  %v11404_v57 = vld [vmem:[#allocation52_spill] sm:$0xff]  ;;  %v11410_v20 = vld [vmem:[#allocation81_spill] sm:$0xff] }
 0x549   : > { %11385 = vst [vmem:[#allocation158_spill] sm:$0xff] %v8128_v59  ;;  %5337 = vpow2.f32 %v2787_v2  ;;  %v2378_v26 = vsub.f32 %v7544_v44, %v2100_v58  ;;  %v2234_v54 = vsub.f32 %v11404_v57, %v11365_v5  ;;  %v11406_v44 = vld [vmem:[#allocation148_spill] sm:$0xff]  ;;  %v2511_v50 = vmul.f32 1.442695, %v2233_v22 }
 0x54a   : > { %11387 = vst [vmem:[#allocation159_spill] sm:$0xff] %v8131_v25  ;;  %v2791_v25 = vmul.f32 1.442695, %v2373_v56  ;;  %v2795_v42 = vmul.f32 1.442695, %v2375_v53  ;;  %5339 = vpow2.f32 %v2789_v17  ;;  %v11407_v58 = vld [vmem:[#allocation80_spill] sm:$0xff]  ;;  %v2292_v5 = vsub.f32 %v11410_v20, %v11406_v44 }
 0x54b   : > { %11391 = vst [vmem:[#allocation57_spill] sm:$0xff] %v8140_v0  ;;  %v8172_v0 = vpop.eup %5327  ;;  %v2797_v59 = vmul.f32 1.442695, %v2376_v11  ;;  %v2799_v31 = vmul.f32 1.442695, %v2377_v28  ;;  %v3103_v4 = vpop.xlane.xlu0 %3102  ;;  %v2291_v2 = vsub.f32 %v11407_v58, %v11406_v44  ;;  %v2176_v28 = vmax.f32 %v8160_v19, %v8170_v9 }
 0x54c   : > { %11392 = vst [vmem:[#allocation156_spill] sm:$0xff] %v8146_v12  ;;  %v3174_v8 = vadd.f32 %v8172_v0, %v8165_v40  ;;  %v8184_v36 = vpop.eup %5329  ;;  %5341 = vpow2.f32 %v2795_v42  ;;  %v2801_v42 = vmul.f32 1.442695, %v2378_v26  ;;  %v2513_v20 = vmul.f32 1.442695, %v2234_v54 }
 0x54d   : > { %11393 = vst [vmem:[#allocation157_spill] sm:$0xff] %v8154_v47  ;;  %v8188_v56 = vpop.eup %5331  ;;  %5343 = vpow2.f32 %v2797_v59  ;;  %v8195_v53 = vpop.f32.mrf.mxu3  ;;  %v2374_v59 = vsub.f32 %v7484_v63, %v8122_v15  ;;  %v2627_v15 = vmul.f32 1.442695, %v2291_v2 }
 0x54e   : > { %11394 = vst [vmem:[#allocation153_spill] sm:$0xff] %v8158_v24  ;;  %v3175_v17 = vadd.f32 %v8184_v36, %v3174_v8  ;;  %v8197_v11 = vpop.eup %5333  ;;  %5345 = vpow2.f32 %v2791_v25  ;;  %v8201_v57 = vpop.f32.mrf.mxu2  ;;  %v11415_v25 = vld [vmem:[#allocation84_spill] sm:$0xff] }
 0x54f   : > { %11395 = vst [vmem:[#allocation212_spill] sm:$0xff] %v8160_v19  ;;  %5347 = vpow2.f32 %v2799_v31  ;;  %v3108_v58 = vpop.xlane.xlu2 %3107  ;;  %v2177_v22 = vmax.f32 %v2176_v28, %v8201_v57  ;;  %v2293_v26 = vsub.f32 %v11415_v25, %v11406_v44  ;;  %v2171_v31 = vmax.f32 %v8102_v45, %v8104_v27 }
 0x550   : > { %11396 = vst [vmem:[#allocation213_spill] sm:$0xff] %v8163_v18  ;;  %v3176_v8 = vadd.f32 %v8197_v11, %v3175_v17  ;;  %v8208_v18 = vpop.f32.mrf.mxu0  ;;  %5349 = vrcp.f32 %v3103_v4  ;;  %v2629_v17 = vmul.f32 1.442695, %v2292_v5 }
 0x551   : > { %11397 = vst [vmem:[#allocation214_spill] sm:$0xff] %v8165_v40  ;;  %5351 = vrcp.f32 %v3108_v58  ;;  %v2178_v28 = vmax.f32 %v2177_v22, %v8195_v53 }
 0x552   : > { %11398 = vst [vmem:[#allocation215_spill] sm:$0xff] %v8170_v9  ;;  %v8217_v9 = vpop.f32.mrf.mxu1  ;;  %3177 = vadd.xlane.f32.xlu0 %v3176_v8  ;;  %5353 = vpow2.f32 %v2801_v42 }
 0x553   : > { %11399 = vst [vmem:[#allocation216_spill] sm:$0xff] %v8172_v0  ;;  %v11416_v0 = vld [vmem:[#allocation85_spill] sm:$0xff]  ;;  %5355 = vpow2.f32 %v2511_v50  ;;  %v2105_v4 = vpop.xlane.xlu0 %2104  ;;  %2179 = vmax.xlane.f32.xlu2 %v2178_v28 }
 0x554   : > { %11402 = vst [vmem:[#allocation51_spill] sm:$0xff] %v8177_v46  ;;  %v8203_v46 = vpop.eup %5335  ;;  %v2294_v40 = vsub.f32 %v11416_v0, %v11406_v44  ;;  %v2793_v0 = vmul.f32 1.442695, %v2374_v59  ;;  %v2172_v44 = vmax.f32 %v2171_v31, %v8154_v47  ;;  %5357 = vpow2.f32 %v2513_v20  ;;  %v11424_v47 = vld [vmem:[#allocation145_spill] sm:$0xff] }
 0x555   : > { %11403 = vst [vmem:[#allocation154_spill] sm:$0xff] %v8184_v36  ;;  %v8211_v36 = vpop.eup %5337  ;;  %v2379_v8 = vsub.f32 %v7556_v7, %v2105_v4  ;;  %v2380_v58 = vsub.f32 %v7558_v34, %v2105_v4  ;;  %5359 = vpow2.f32 %v2627_v15  ;;  %v8235_v42 = vpop.f32.mrf.mxu3  ;;  %v2381_v20 = vsub.f32 %v7586_v32, %v2105_v4  ;;  %v11425_v15 = vld [vmem:[#allocation86_spill] sm:$0xff] }
 0x556   : > { %11405 = vst [vmem:[#allocation52_spill] sm:$0xff] %v8188_v56  ;;  %v8219_v63 = vpop.eup %5339  ;;  %v2633_v5 = vmul.f32 1.442695, %v2294_v40  ;;  %5361 = vpow2.f32 %v2629_v17  ;;  %v8242_v28 = vpop.f32.mrf.mxu2  ;;  %v2295_v40 = vsub.f32 %v11425_v15, %v11424_v47  ;;  %v2173_v27 = vmax.f32 %v2172_v44, %v8146_v12  ;;  %v11429_v32 = vld [vmem:[#allocation58_spill] sm:$0xff] }
 0x557   : > { %11408 = vst [vmem:[#allocation148_spill] sm:$0xff] %v8195_v53  ;;  %v8224_v54 = vpop.eup %5341  ;;  %v3179_v59 = vadd.f32 %v8219_v63, %v8211_v36  ;;  %v2805_v7 = vmul.f32 1.442695, %v2380_v58  ;;  %5363 = vpow2.f32 %v2793_v0  ;;  %v3113_v45 = vpop.xlane.xlu2 %3112  ;;  %v11431_v58 = vld [vmem:[#allocation164_spill] sm:$0xff]  ;;  %v11432_v53 = vld [vmem:[#allocation161_spill] sm:$0xff]  ;;  %v11434_v0 = vld [vmem:[#allocation59_spill] sm:$0xff] }
 0x558   : > { %11409 = vst [vmem:[#allocation80_spill] sm:$0xff] %v8197_v11  ;;  %v8226_v25 = vpop.eup %5343  ;;  %v2631_v11 = vmul.f32 1.442695, %v2293_v26  ;;  %v2803_v26 = vmul.f32 1.442695, %v2379_v8 }
 0x559   : > { %11411 = vst [vmem:[#allocation81_spill] sm:$0xff] %v8201_v57  ;;  %v8229_v2 = vpop.eup %5345  ;;  %v3184_v50 = vadd.f32 %v8226_v25, %v8224_v54 }
 0x55a   : > { %11412 = vst [vmem:[#allocation217_spill] sm:$0xff] %v8203_v46  ;;  %v8233_v22 = vpop.eup %5347  ;;  %v8252_v17 = vpop.f32.mrf.mxu1  ;;  %5365 = vpow2.f32 %v2803_v26  ;;  %2174 = vmax.xlane.f32.xlu0 %v2173_v27  ;;  %v11439_v27 = vld [vmem:[#allocation165_spill] sm:$0xff] }
 0x55b   : > { %11413 = vst [vmem:[#allocation218_spill] sm:$0xff] %v8208_v18  ;;  %v5350_v31 = vpop.eup %5349  ;;  %5367 = vpow2.f32 %v2805_v7 }
 0x55c   : > { %11414 = vst [vmem:[#allocation219_spill] sm:$0xff] %v8211_v36  ;;  %v5352_v34 = vpop.eup %5351  ;;  %v8255_v8 = vmul.f32 %v5350_v31, %v11429_v32  ;;  %v8261_v15 = vmul.f32 %v5350_v31, %v11432_v53  ;;  %v3180_v32 = vadd.f32 %v8229_v2, %v3179_v59  ;;  %v11441_v59 = vld [vmem:[#allocation163_spill] sm:$0xff]  ;;  %5369 = vpow2.f32 %v2631_v11 }
 0x55d   : > { %11417 = vst [vmem:[#allocation84_spill] sm:$0xff] %v8217_v9  ;;  %v8250_v36 = vpop.eup %5353  ;;  %v8264_v44 = vmul.f32 %v5352_v34, %v11434_v0  ;;  %v8286_v26 = vmul.f32 %v5350_v31, %v11441_v59  ;;  %5371 = vpow2.f32 %v2633_v5  ;;  %v2635_v11 = vmul.f32 1.442695, %v2295_v40 }
 0x55e   : > { %11418 = vst [vmem:[#allocation85_spill] sm:$0xff] %v8219_v63  ;;  %v3185_v63 = vadd.f32 %v8233_v22, %v3184_v50  ;;  %v8266_v12 = vpop.eup %5355  ;;  %v2382_v50 = vsub.f32 %v7584_v33, %v2105_v4  ;;  %v11437_v33 = vld [vmem:[#allocation162_spill] sm:$0xff]  ;;  %v2181_v5 = vmax.f32 %v8208_v18, %v8217_v9 }
 0x55f   : > { %11419 = vst [vmem:[#allocation220_spill] sm:$0xff] %v8224_v54  ;;  %v8258_v54 = vmul.f32 %v5352_v34, %v11431_v58  ;;  %v8271_v57 = vpop.eup %5357  ;;  %v2807_v58 = vmul.f32 1.442695, %v2381_v20  ;;  %v8280_v4 = vmul.f32 %v5350_v31, %v11437_v33  ;;  %v8289_v20 = vmul.f32 %v5352_v34, %v7605_v37  ;;  %v11446_v31 = vld [vmem:[#allocation87_spill] sm:$0xff]  ;;  %v8303_v37 = vpop.f32.mrf.mxu2  ;;  %v11455_v18 = vld [vmem:[#allocation174_spill] sm:$0xff] }
 0x560   : > { %11420 = vst [vmem:[#allocation221_spill] sm:$0xff] %v8226_v25  ;;  %v8247_v25 = vpop.f32.mrf.mxu0  ;;  %v8277_v19 = vpop.eup %5359  ;;  %v2809_v0 = vmul.f32 1.442695, %v2382_v50  ;;  %v2296_v59 = vsub.f32 %v11446_v31, %v11424_v47  ;;  %v11450_v31 = vld [vmem:[#allocation167_spill] sm:$0xff] }
 0x561   : > { %11421 = vst [vmem:[#allocation222_spill] sm:$0xff] %v8229_v2  ;;  %v8291_v7 = vpop.eup %5361  ;;  %5373 = vpow2.f32 %v2807_v58  ;;  %v3118_v50 = vpop.xlane.xlu1 %3117 }
 0x562   : > { %11422 = vst [vmem:[#allocation223_spill] sm:$0xff] %v8233_v22  ;;  %v3186_v22 = vadd.f32 %v8250_v36, %v3185_v63  ;;  %v8283_v63 = vmul.f32 %v5352_v34, %v11439_v27  ;;  %v8293_v53 = vpop.eup %5363  ;;  %5375 = vrcp.f32 %v3113_v45  ;;  %v2110_v33 = vpop.xlane.xlu2 %2109  ;;  %v2182_v45 = vmax.f32 %v2181_v5, %v8242_v28  ;;  %v11458_v5 = vld [vmem:[#allocation34_spill] sm:$0xff] }
 0x563   : > { %11423 = vst [vmem:[#allocation224_spill] sm:$0xff] %v8242_v28  ;;  %v8305_v34 = vpop.eup %5365  ;;  %5377 = vrcp.f32 %v3118_v50  ;;  %v2383_v27 = vsub.f32 %v7601_v21, %v2110_v33  ;;  %v2384_v58 = vsub.f32 %v11450_v31, %v2110_v33  ;;  %v8323_v50 = vpop.f32.mrf.mxu1  ;;  %v11460_v28 = vld [vmem:[#allocation90_spill] sm:$0xff] }
 0x564   : > { %11426 = vst [vmem:[#allocation145_spill] sm:$0xff] %v8247_v25  ;;  %3187 = vadd.xlane.f32.xlu2 %v3186_v22  ;;  %v8295_v22 = vpop.f32.mrf.mxu3  ;;  %5379 = vpow2.f32 %v2809_v0  ;;  %v11457_v0 = vld [vmem:[#allocation92_spill] sm:$0xff] }
 0x565   : > { %11427 = vst [vmem:[#allocation86_spill] sm:$0xff] %v8250_v36  ;;  %v2811_v31 = vmul.f32 1.442695, %v2383_v27  ;;  %v2813_v9 = vmul.f32 1.442695, %v2384_v58  ;;  %5381 = vpow2.f32 %v2635_v11  ;;  %v2297_v27 = vsub.f32 %v11460_v28, %v11424_v47 }
 0x566   : > { %11428 = vst [vmem:[#allocation225_spill] sm:$0xff] %v8252_v17 }
 0x567   : > { %11430 = vst [vmem:[#allocation58_spill] sm:$0xff] %v8255_v8  ;;  %5383 = vpow2.f32 %v2811_v31 }
 0x568   : > { %11433 = vst [vmem:[#allocation164_spill] sm:$0xff] %v8261_v15  ;;  %v3181_v15 = vadd.f32 %v8293_v53, %v3180_v32  ;;  %v8317_v40 = vpop.f32.mrf.mxu0  ;;  %v2386_v32 = vsub.f32 %v7648_v38, %v2110_v33  ;;  %5385 = vpow2.f32 %v2813_v9 }
 0x569   : > { %11435 = vst [vmem:[#allocation161_spill] sm:$0xff] %v8264_v44  ;;  %v11452_v44 = vld [vmem:[#allocation173_spill] sm:$0xff] }
 0x56a   : > { %11436 = vst [vmem:[#allocation59_spill] sm:$0xff] %v8266_v12  ;;  %3182 = vadd.xlane.f32.xlu0 %v3181_v15  ;;  %v2817_v38 = vmul.f32 1.442695, %v2386_v32  ;;  %v8345_v15 = vmul.f32 1.442695, %v2296_v59  ;;  %v2191_v59 = vmax.f32 %v8317_v40, %v8323_v50 }
 0x56b   : > { %11438 = vst [vmem:[#allocation162_spill] sm:$0xff] %v8280_v4  ;;  %v8310_v4 = vpop.eup %5367 }
 0x56c   : > { %11440 = vst [vmem:[#allocation165_spill] sm:$0xff] %v8283_v63  ;;  %v8315_v63 = vpop.xlane.xlu0 %2114  ;;  %v8325_v21 = vpop.eup %5369 }
 0x56d   : > { %11442 = vst [vmem:[#allocation163_spill] sm:$0xff] %v8286_v26  ;;  %v11451_v26 = vld [vmem:[#allocation171_spill] sm:$0xff]  ;;  %v2387_v36 = vsub.f32 %v11452_v44, %v8315_v63  ;;  %v8329_v2 = vpop.eup %5371  ;;  %v2389_v44 = vsub.f32 %v7691_v16, %v8315_v63  ;;  %v2183_v16 = vmax.f32 %v2182_v45, %v8235_v42  ;;  %v8348_v32 = vpop.f32.mrf.mxu3  ;;  %v2390_v9 = vsub.f32 %v7685_v48, %v8315_v63 }
 0x56e   : > { %11443 = vst [vmem:[#allocation226_spill] sm:$0xff] %v8289_v20  ;;  %v2385_v20 = vsub.f32 %v11451_v26, %v2110_v33  ;;  %v8335_v33 = vpop.eup %5373  ;;  %v2120_v45 = vpop.xlane.xlu2 %2119 }
 0x56f   : > { %11444 = vst [vmem:[#allocation227_spill] sm:$0xff] %v8291_v7  ;;  %v8343_v58 = vpop.eup %5375  ;;  %v2819_v11 = vmul.f32 1.442695, %v2387_v36  ;;  %v2823_v36 = vmul.f32 1.442695, %v2389_v44  ;;  %v2393_v48 = vsub.f32 %v7749_v3, %v2120_v45  ;;  %v8377_v44 = vpop.f32.mrf.mxu1 }
 0x570   : > { %11445 = vst [vmem:[#allocation228_spill] sm:$0xff] %v8293_v53  ;;  %v2815_v26 = vmul.f32 1.442695, %v2385_v20  ;;  %v2388_v53 = vsub.f32 %v11455_v18, %v8315_v63  ;;  %v2186_v20 = vmax.f32 %v8247_v25, %v8252_v17  ;;  %v3189_v18 = vadd.f32 %v8310_v4, %v8305_v34  ;;  %v8350_v8 = vpop.eup %5377  ;;  %v11472_v25 = vld [vmem:[#allocation170_spill] sm:$0xff] }
 0x571   : > { %11447 = vst [vmem:[#allocation87_spill] sm:$0xff] %v8303_v37  ;;  %v2394_v63 = vsub.f32 %v7745_v6, %v2120_v45  ;;  %v2831_v6 = vmul.f32 1.442695, %v2393_v48 }
 0x572   : > { %11448 = vst [vmem:[#allocation229_spill] sm:$0xff] %v8305_v34  ;;  %5387 = vpow2.f32 %v2815_v26  ;;  %v2821_v28 = vmul.f32 1.442695, %v2388_v53  ;;  %v8353_v17 = vmax.f32 %v2186_v20, %v8303_v37  ;;  %v3190_v31 = vadd.f32 %v8335_v33, %v3189_v18  ;;  %v8356_v34 = vpop.f32.mrf.mxu2  ;;  %v8367_v18 = vpop.f32.mrf.mxu0  ;;  %2184 = vmax.xlane.f32.xlu0 %v2183_v16 }
 0x573   : > { %11449 = vst [vmem:[#allocation230_spill] sm:$0xff] %v8310_v4  ;;  %v8358_v4 = vpop.eup %5379  ;;  %5389 = vpow2.f32 %v2817_v38  ;;  %v2391_v26 = vsub.f32 %v7696_v35, %v2120_v45  ;;  %v2392_v20 = vsub.f32 %v7698_v60, %v2120_v45  ;;  %v2833_v3 = vmul.f32 1.442695, %v2394_v63 }
 0x574   : > { %11453 = vst [vmem:[#allocation167_spill] sm:$0xff] %v8323_v50  ;;  %v3191_v53 = vadd.f32 %v8358_v4, %v3190_v31  ;;  %v8373_v38 = vpop.eup %5381  ;;  %5391 = vpow2.f32 %v2819_v11  ;;  %v11469_v31 = vld [vmem:[#allocation62_spill] sm:$0xff]  ;;  %v8387_v11 = vmul.f32 %v8343_v58, %v11472_v25  ;;  %v2192_v45 = vmax.f32 %v2191_v59, %v8356_v34  ;;  %v3123_v59 = vpop.xlane.xlu1 %3122 }
 0x575   : > { %11454 = vst [vmem:[#allocation171_spill] sm:$0xff] %v8325_v21  ;;  %v8381_v35 = vmul.f32 %v8343_v58, %v11469_v31  ;;  %v8383_v60 = vpop.eup %5383  ;;  %5393 = vpow2.f32 %v2821_v28  ;;  %v8406_v63 = vpop.f32.mrf.mxu3  ;;  %v11481_v31 = vld [vmem:[#allocation172_spill] sm:$0xff] }
 0x576   : > { %11456 = vst [vmem:[#allocation173_spill] sm:$0xff] %v8329_v2  ;;  %3192 = vadd.xlane.f32.xlu2 %v3191_v53  ;;  %v8389_v16 = vpop.eup %5385  ;;  %5395 = vpow2.f32 %v2823_v36  ;;  %v11479_v36 = vld [vmem:[#allocation133_spill] sm:$0xff] }
 0x577   : > { %11459 = vst [vmem:[#allocation174_spill] sm:$0xff] %v8335_v33  ;;  %v11465_v33 = vld [vmem:[#allocation67_spill] sm:$0xff]  ;;  %v3194_v28 = vadd.f32 %v8389_v16, %v8383_v60  ;;  %v2347_v48 = vsub.f32 %v11479_v36, %v8019_v30 }
 0x578   : > { %11461 = vst [vmem:[#allocation92_spill] sm:$0xff] %v8348_v32  ;;  %v8371_v37 = vmul.f32 %v8350_v8, %v11465_v33  ;;  %v2827_v33 = vmul.f32 1.442695, %v2391_v26  ;;  %v8392_v50 = vpop.eup %5387  ;;  %v11476_v26 = vld [vmem:[#allocation176_spill] sm:$0xff] }
 0x579   : > { %11462 = vst [vmem:[#allocation34_spill] sm:$0xff] %v8356_v34  ;;  %v8400_v25 = vmul.f32 %v8350_v8, %v11476_v26  ;;  %v8424_v34 = vpop.xlane.xlu2 %2124 }
 0x57a   : > { %11463 = vst [vmem:[#allocation90_spill] sm:$0xff] %v8358_v4  ;;  %v2829_v4 = vmul.f32 1.442695, %v2392_v20  ;;  %5397 = vpow2.f32 %v2827_v33  ;;  %v8402_v20 = vpop.eup %5389  ;;  %v8410_v33 = vmul.f32 %v8343_v58, %v11481_v31  ;;  %v8416_v26 = vpop.f32.mrf.mxu2  ;;  %v2193_v31 = vmax.f32 %v2192_v45, %v8348_v32 }
 0x57b   : > { %11464 = vst [vmem:[#allocation231_spill] sm:$0xff] %v8367_v18  ;;  %v8421_v36 = vpop.eup %5391 }
 0x57c   : > { %11466 = vst [vmem:[#allocation67_spill] sm:$0xff] %v8371_v37  ;;  %5399 = vpow2.f32 %v2829_v4  ;;  %v3195_v37 = vadd.f32 %v8392_v50, %v3194_v28  ;;  %v2188_v28 = vmax.f32 %v8353_v17, %v8295_v22  ;;  %v2395_v4 = vsub.f32 %v7755_v55, %v8424_v34  ;;  %2194 = vmax.xlane.f32.xlu0 %v2193_v31  ;;  %v11492_v55 = vld [vmem:[#allocation37_spill] sm:$0xff] }
 0x57d   : > { %11467 = vst [vmem:[#allocation232_spill] sm:$0xff] %v8373_v38  ;;  %5401 = vpow2.f32 %v2831_v6  ;;  %v3128_v6 = vpop.xlane.xlu0 %3127 }
 0x57e   : > { %11468 = vst [vmem:[#allocation233_spill] sm:$0xff] %v8377_v44  ;;  %5403 = vpow2.f32 %v2833_v3  ;;  %v8436_v3 = vpop.f32.mrf.mxu0  ;;  %v3196_v17 = vadd.f32 %v8402_v20, %v3195_v37  ;;  %2189 = vmax.xlane.f32.xlu2 %v2188_v28  ;;  %v3004_v28 = vadd.f32 %v8203_v46, %v8188_v56  ;;  %v8480_v56 = vpop.f32.mrf.mxu3 }
 0x57f   : > { %11470 = vst [vmem:[#allocation62_spill] sm:$0xff] %v8381_v35  ;;  %v2825_v35 = vmul.f32 1.442695, %v2390_v9  ;;  %v8428_v9 = vpop.eup %5393  ;;  %5405 = vrcp.f32 %v3123_v59  ;;  %v8442_v59 = vpop.f32.mrf.mxu1 }
 0x580   : > { %11471 = vst [vmem:[#allocation234_spill] sm:$0xff] %v8383_v60  ;;  %v11483_v60 = vld [vmem:[#allocation177_spill] sm:$0xff]  ;;  %v8438_v45 = vpop.eup %5395  ;;  %5407 = vrcp.f32 %v3128_v6  ;;  %3197 = vadd.xlane.f32.xlu1 %v3196_v17  ;;  %v3199_v37 = vadd.f32 %v8428_v9, %v8421_v36 }
 0x581   : > { %11473 = vst [vmem:[#allocation170_spill] sm:$0xff] %v8387_v11  ;;  %v8414_v53 = vmul.f32 %v8350_v8, %v11483_v60  ;;  %v11489_v11 = vld [vmem:[#allocation35_spill] sm:$0xff]  ;;  %5409 = vpow2.f32 %v2825_v35  ;;  %v11498_v17 = vld [vmem:[#allocation181_spill] sm:$0xff] }
 0x582   : > { %11474 = vst [vmem:[#allocation235_spill] sm:$0xff] %v8389_v16  ;;  %v2639_v16 = vmul.f32 1.442695, %v2297_v27  ;;  %v2396_v27 = vsub.f32 %v7757_v52, %v8424_v34  ;;  %v2196_v52 = vmax.f32 %v8367_v18, %v8377_v44  ;;  %5411 = vpow2.f32 %v8345_v15  ;;  %v8478_v46 = vpop.f32.mrf.mxu2 }
 0x583   : > { %11475 = vst [vmem:[#allocation236_spill] sm:$0xff] %v8392_v50  ;;  %v2835_v50 = vmul.f32 1.442695, %v2395_v4 }
 0x584   : > { %11477 = vst [vmem:[#allocation176_spill] sm:$0xff] %v8400_v25  ;;  %v2837_v6 = vmul.f32 1.442695, %v2396_v27  ;;  %5413 = vpow2.f32 %v2639_v16  ;;  %v2197_v35 = vmax.f32 %v2196_v52, %v8416_v26  ;;  %v2397_v25 = vsub.f32 %v11498_v17, %v8424_v34  ;;  %v11499_v52 = vld [vmem:[#allocation136_spill] sm:$0xff] }
 0x585   : > { %11478 = vst [vmem:[#allocation237_spill] sm:$0xff] %v8402_v20  ;;  %v11503_v20 = vld [vmem:[#allocation178_spill] sm:$0xff] }
 0x586   : > { %11480 = vst [vmem:[#allocation133_spill] sm:$0xff] %v8406_v63  ;;  %v8516_v44 = vpop.f32.mrf.mxu0 }
 0x587   : > { %11482 = vst [vmem:[#allocation172_spill] sm:$0xff] %v8410_v33  ;;  %v2739_v33 = vmul.f32 1.442695, %v2347_v48  ;;  %v11494_v48 = vld [vmem:[#allocation134_spill] sm:$0xff] }
 0x588   : > { %11484 = vst [vmem:[#allocation177_spill] sm:$0xff] %v8414_v53  ;;  %v8445_v53 = vpop.eup %5397  ;;  %v2348_v31 = vsub.f32 %v11494_v48, %v8019_v30  ;;  %v11497_v48 = vld [vmem:[#allocation91_spill] sm:$0xff] }
 0x589   : > { %11485 = vst [vmem:[#allocation238_spill] sm:$0xff] %v8416_v26  ;;  %v8451_v32 = vpop.eup %5399  ;;  %v2298_v27 = vsub.f32 %v11497_v48, %v11424_v47  ;;  %5415 = vpow2.f32 %v2739_v33  ;;  %v11501_v48 = vld [vmem:[#allocation135_spill] sm:$0xff] }
 0x58a   : > { %11486 = vst [vmem:[#allocation239_spill] sm:$0xff] %v8421_v36  ;;  %v8458_v60 = vpop.eup %5401  ;;  %v3204_v4 = vadd.f32 %v8451_v32, %v8445_v53  ;;  %v3200_v36 = vadd.f32 %v8438_v45, %v3199_v37  ;;  %5417 = vpow2.f32 %v2835_v50  ;;  %v2349_v37 = vsub.f32 %v11501_v48, %v8019_v30 }
 0x58b   : > { %11487 = vst [vmem:[#allocation240_spill] sm:$0xff] %v8428_v9  ;;  %v8465_v15 = vpop.eup %5403  ;;  %v2351_v9 = vsub.f32 %v11499_v52, %v7953_v39  ;;  %v2741_v17 = vmul.f32 1.442695, %v2348_v31  ;;  %5419 = vpow2.f32 %v2837_v6  ;;  %v2198_v50 = vmax.f32 %v2197_v35, %v8406_v63  ;;  %v11509_v35 = vld [vmem:[#allocation182_spill] sm:$0xff] }
 0x58c   : > { %11488 = vst [vmem:[#allocation241_spill] sm:$0xff] %v8438_v45  ;;  %v8472_v16 = vpop.eup %5405  ;;  %v3205_v47 = vadd.f32 %v8458_v60, %v3204_v4  ;;  %v2398_v45 = vsub.f32 %v7784_v29, %v8424_v34  ;;  %v2839_v31 = vmul.f32 1.442695, %v2397_v25  ;;  %v11507_v34 = vld [vmem:[#allocation79_spill] sm:$0xff]  ;;  %v8518_v25 = vpop.f32.mrf.mxu1 }
 0x58d   : > { %11490 = vst [vmem:[#allocation35_spill] sm:$0xff] %v8442_v59  ;;  %v8483_v33 = vpop.eup %5407  ;;  %v8495_v26 = vmul.f32 %v8472_v16, %v11503_v20  ;;  %v8506_v6 = vmul.f32 %v8472_v16, %v11507_v34  ;;  %v11512_v20 = vld [vmem:[#allocation138_spill] sm:$0xff]  ;;  %2199 = vmax.xlane.f32.xlu2 %v2198_v50  ;;  %5421 = vpow2.f32 %v2741_v17 }
 0x58e   : > { %11491 = vst [vmem:[#allocation242_spill] sm:$0xff] %v8445_v53  ;;  %v11500_v53 = vld [vmem:[#allocation137_spill] sm:$0xff]  ;;  %v8489_v52 = vpop.eup %5409  ;;  %v8499_v4 = vmul.f32 %v8483_v33, %v7780_v10  ;;  %v2747_v10 = vmul.f32 1.442695, %v2351_v9  ;;  %5423 = vpow2.f32 %v2839_v31  ;;  %v11523_v31 = vld [vmem:[#allocation50_spill] sm:$0xff] }
 0x58f   : > { %11493 = vst [vmem:[#allocation37_spill] sm:$0xff] %v8451_v32  ;;  %v2352_v32 = vsub.f32 %v11500_v53, %v7953_v39  ;;  %v3206_v53 = vadd.f32 %v8465_v15, %v3205_v47  ;;  %v8501_v48 = vpop.eup %5411  ;;  %v3201_v29 = vadd.f32 %v8489_v52, %v3200_v36  ;;  %v8510_v47 = vmul.f32 %v8483_v33, %v11509_v35 }
 0x590   : > { %11495 = vst [vmem:[#allocation134_spill] sm:$0xff] %v8458_v60  ;;  %v2353_v60 = vsub.f32 %v11512_v20, %v7953_v39  ;;  %v2201_v35 = vmax.f32 %v8436_v3, %v8442_v59  ;;  %v11517_v20 = vld [vmem:[#allocation88_spill] sm:$0xff]  ;;  %v2641_v36 = vmul.f32 1.442695, %v2298_v27  ;;  %v11522_v27 = vld [vmem:[#allocation45_spill] sm:$0xff]  ;;  %5425 = vpow2.f32 %v2747_v10 }
 0x591   : > { %11496 = vst [vmem:[#allocation243_spill] sm:$0xff] %v8465_v15  ;;  %v8512_v15 = vpop.eup %5413  ;;  %v2749_v63 = vmul.f32 1.442695, %v2352_v32  ;;  %3207 = vadd.xlane.f32.xlu0 %v3206_v53  ;;  %3202 = vadd.xlane.f32.xlu1 %v3201_v29  ;;  %v11515_v32 = vld [vmem:[#allocation180_spill] sm:$0xff]  ;;  %v8534_v53 = vmul.f32 %v8483_v33, %v11517_v20  ;;  %v11521_v20 = vld [vmem:[#allocation38_spill] sm:$0xff]  ;;  %v2350_v17 = vsub.f32 %v11522_v27, %v8019_v30 }
 0x592   : > { %11502 = vst [vmem:[#allocation91_spill] sm:$0xff] %v8489_v52  ;;  %v8522_v34 = vpop.eup %5415  ;;  %v3133_v52 = vpop.xlane.xlu0 %3132  ;;  %v8530_v50 = vmul.f32 %v8472_v16, %v11515_v32  ;;  %v2202_v29 = vmax.f32 %v2201_v35, %v8478_v46  ;;  %v2206_v32 = vmax.f32 %v8516_v44, %v8518_v25  ;;  %v2751_v35 = vmul.f32 1.442695, %v2353_v60 }
 0x593   : > { %11504 = vst [vmem:[#allocation181_spill] sm:$0xff] %v8495_v26  ;;  %v8536_v18 = vpop.eup %5417  ;;  %v2841_v26 = vmul.f32 1.442695, %v2398_v45  ;;  %v2743_v45 = vmul.f32 1.442695, %v2349_v37  ;;  %5427 = vpow2.f32 %v2749_v63  ;;  %v2999_v30 = vadd.f32 %v8142_v51, %v8133_v61 }
 0x594   : > { %11505 = vst [vmem:[#allocation136_spill] sm:$0xff] %v8499_v4  ;;  %v3005_v4 = vadd.f32 %v8266_v12, %v3004_v28  ;;  %v8539_v59 = vpop.eup %5419  ;;  %v8550_v28 = vpop.f32.mrf.mxu2  ;;  %5429 = vpow2.f32 %v2641_v36  ;;  %v2203_v37 = vmax.f32 %v2202_v29, %v8480_v56  ;;  %v3079_v63 = vadd.f32 %v8291_v7, %v8277_v19 }
 0x595   : > { %11506 = vst [vmem:[#allocation137_spill] sm:$0xff] %v8501_v48  ;;  %v2207_v12 = vmax.f32 %v2206_v32, %v8550_v28  ;;  %5431 = vpow2.f32 %v2841_v26  ;;  %v8566_v60 = vpop.eup %5421  ;;  %v11525_v10 = vsub.f32 %v11458_v5, %v11457_v0  ;;  %v11526_v36 = vsub.f32 %v11489_v11, %v11457_v0  ;;  %v11530_v11 = vld [vmem:[#allocation183_spill] sm:$0xff] }
 0x596   : > { %11508 = vst [vmem:[#allocation135_spill] sm:$0xff] %v8506_v6  ;;  %v2222_v6 = vsub.f32 %v11521_v20, %v11457_v0  ;;  %v3006_v9 = vadd.f32 %v8271_v57, %v3005_v4  ;;  %v3209_v20 = vadd.f32 %v8539_v59, %v8536_v18  ;;  %5433 = vpow2.f32 %v2743_v45  ;;  %v8574_v26 = vpop.eup %5423  ;;  %v11531_v45 = vld [vmem:[#allocation184_spill] sm:$0xff] }
 0x597   : > { %11510 = vst [vmem:[#allocation178_spill] sm:$0xff] %v8510_v47  ;;  %v2354_v47 = vsub.f32 %v11523_v31, %v7953_v39  ;;  %v2483_v4 = vmul.f32 1.442695, %v11525_v10  ;;  %v2485_v32 = vmul.f32 1.442695, %v11526_v36  ;;  %5435 = vpow2.f32 %v2751_v35  ;;  %v8579_v5 = vpop.eup %5425 }
 0x598   : > { %11511 = vst [vmem:[#allocation79_spill] sm:$0xff] %v8512_v15  ;;  %v2745_v27 = vmul.f32 1.442695, %v2350_v17  ;;  %v2489_v31 = vmul.f32 1.442695, %v2222_v6  ;;  %5437 = vrcp.f32 %v3133_v52  ;;  %v3210_v36 = vadd.f32 %v8574_v26, %v3209_v20  ;;  %v11536_v52 = vld [vmem:[#allocation189_spill] sm:$0xff] }
 0x599   : > { %11513 = vst [vmem:[#allocation182_spill] sm:$0xff] %v8518_v25  ;;  %v8555_v25 = vpop.f32.mrf.mxu3  ;;  %3007 = vadd.xlane.f32.xlu0 %v3006_v9  ;;  %2204 = vmax.xlane.f32.xlu1 %v2203_v37  ;;  %v3138_v9 = vpop.xlane.xlu2 %3137  ;;  %v3080_v35 = vadd.f32 %v8325_v21, %v3079_v63  ;;  %v11538_v20 = vld [vmem:[#allocation40_spill] sm:$0xff] }
 0x59a   : > { %11514 = vst [vmem:[#allocation138_spill] sm:$0xff] %v8522_v34  ;;  %v2208_v39 = vmax.f32 %v2207_v12, %v8555_v25  ;;  %v11528_v12 = vsub.f32 %v11492_v55, %v11457_v0  ;;  %v11533_v0 = vld [vmem:[#allocation93_spill] sm:$0xff]  ;;  %v11534_v55 = vld [vmem:[#allocation39_spill] sm:$0xff]  ;;  %5439 = vrcp.f32 %v3138_v9 }
 0x59b   : > { %11516 = vst [vmem:[#allocation180_spill] sm:$0xff] %v8530_v50  ;;  %v2753_v50 = vmul.f32 1.442695, %v2354_v47  ;;  %v2223_v6 = vsub.f32 %v11534_v55, %v11533_v0  ;;  %v3000_v47 = vadd.f32 %v8152_v62, %v2999_v30  ;;  %5441 = vpow2.f32 %v2745_v27 }
 0x59c   : > { %11518 = vst [vmem:[#allocation88_spill] sm:$0xff] %v8534_v53  ;;  %v2487_v29 = vmul.f32 1.442695, %v11528_v12  ;;  %v2130_v53 = vpop.xlane.xlu0 %2129  ;;  %2209 = vmax.xlane.f32.xlu2 %v2208_v39  ;;  %v3084_v30 = vadd.f32 %v8501_v48, %v8373_v38 }
 0x59d   : > { %11519 = vst [vmem:[#allocation244_spill] sm:$0xff] %v8536_v18  ;;  %v2399_v10 = vsub.f32 %v11530_v11, %v2130_v53  ;;  %v2400_v17 = vsub.f32 %v11531_v45, %v2130_v53  ;;  %v2401_v39 = vsub.f32 %v11536_v52, %v2130_v53  ;;  %v11539_v18 = vld [vmem:[#allocation41_spill] sm:$0xff]  ;;  %5443 = vpow2.f32 %v2753_v50  ;;  %v11542_v52 = vld [vmem:[#allocation42_spill] sm:$0xff] }
 0x59e   : > { %11520 = vst [vmem:[#allocation245_spill] sm:$0xff] %v8539_v59  ;;  %v8584_v59 = vpop.eup %5427  ;;  %v2225_v55 = vsub.f32 %v11539_v18, %v11533_v0  ;;  %v2226_v18 = vsub.f32 %v11542_v52, %v11533_v0  ;;  %v3001_v50 = vadd.f32 %v8158_v24, %v3000_v47 }
 0x59f   : > { %11524 = vst [vmem:[#allocation38_spill] sm:$0xff] %v8566_v60  ;;  %v8590_v37 = vpop.eup %5429  ;;  %v2843_v12 = vmul.f32 1.442695, %v2399_v10  ;;  %v2845_v11 = vmul.f32 1.442695, %v2400_v17  ;;  %v3149_v10 = vadd.f32 %v8566_v60, %v8522_v34  ;;  %v3154_v17 = vadd.f32 %v8584_v59, %v8579_v5 }
 0x5a0   : > { %11527 = vst [vmem:[#allocation45_spill] sm:$0xff] %v8574_v26  ;;  %v8593_v45 = vpop.eup %5431  ;;  %v2224_v26 = vsub.f32 %v11538_v20, %v11533_v0  ;;  %v3081_v20 = vadd.f32 %v8329_v2, %v3080_v35 }
 0x5a1   : > { %11529 = vst [vmem:[#allocation50_spill] sm:$0xff] %v8579_v5  ;;  %v8601_v63 = vpop.eup %5433  ;;  %5445 = vpow2.f32 %v2843_v12  ;;  %v3211_v27 = vadd.f32 %v8593_v45, %v3210_v36  ;;  %v2402_v36 = vsub.f32 %v7839_v1, %v2130_v53  ;;  %v2847_v12 = vmul.f32 1.442695, %v2401_v39  ;;  %3002 = vadd.xlane.f32.xlu1 %v3001_v50  ;;  %v8618_v0 = vpop.xlane.xlu2 %2139 }
 0x5a2   : > { %11532 = vst [vmem:[#allocation183_spill] sm:$0xff] %v8584_v59  ;;  %v8608_v9 = vpop.eup %5435  ;;  %5447 = vpow2.f32 %v2845_v11  ;;  %v3085_v5 = vadd.f32 %v8512_v15, %v3084_v30  ;;  %v3150_v47 = vadd.f32 %v8601_v63, %v3149_v10  ;;  %v2493_v1 = vmul.f32 1.442695, %v2224_v26  ;;  %v11546_v11 = vld [vmem:[#allocation192_spill] sm:$0xff] }
 0x5a3   : > { %11535 = vst [vmem:[#allocation184_spill] sm:$0xff] %v8590_v37  ;;  %v5438_v21 = vpop.eup %5437  ;;  %5449 = vpow2.f32 %v2483_v4  ;;  %3212 = vadd.xlane.f32.xlu0 %v3211_v27  ;;  %v3155_v4 = vadd.f32 %v8608_v9, %v3154_v17  ;;  %v2495_v53 = vmul.f32 1.442695, %v2225_v55  ;;  %v2849_v39 = vmul.f32 1.442695, %v2402_v36  ;;  %v11547_v27 = vld [vmem:[#allocation199_spill] sm:$0xff] }
 0x5a4   : > { %11537 = vst [vmem:[#allocation93_spill] sm:$0xff] %v8593_v45  ;;  %v5440_v34 = vpop.eup %5439  ;;  %5451 = vpow2.f32 %v2485_v32  ;;  %v2491_v45 = vmul.f32 1.442695, %v2223_v6  ;;  %3082 = vadd.xlane.f32.xlu2 %v3081_v20  ;;  %v2497_v32 = vmul.f32 1.442695, %v2226_v18  ;;  %v3483_v30 = vmul.f32 %v5438_v21, %v11546_v11  ;;  %v11549_v17 = vld [vmem:[#allocation193_spill] sm:$0xff] }
 0x5a5   : > { %11540 = vst [vmem:[#allocation39_spill] sm:$0xff] %v8601_v63  ;;  %v8616_v59 = vpop.eup %5441  ;;  %5453 = vpow2.f32 %v2487_v29  ;;  %v3487_v29 = vmul.f32 %v5440_v34, %v11547_v27  ;;  %v3086_v10 = vadd.f32 %v8590_v37, %v3085_v5  ;;  %v8632_v50 = vmul.f32 %v5438_v21, %v11549_v17  ;;  %v11554_v36 = vld [vmem:[#allocation179_spill] sm:$0xff]  ;;  %v11556_v17 = vld [vmem:[#allocation194_spill] sm:$0xff]  ;;  %v11689_v15 = vld [vmem:[#allocation208_spill] sm:$0xff] }
 0x5a6   : > { %11541 = vst [vmem:[#allocation189_spill] sm:$0xff] %v8608_v9  ;;  %v8622_v35 = vpop.eup %5443  ;;  %5455 = vpow2.f32 %v2489_v31  ;;  %v11551_v31 = vld [vmem:[#allocation119_spill] sm:$0xff]  ;;  %v3151_v20 = vadd.f32 %v8616_v59, %v3150_v47  ;;  %v11691_v63 = vld [vmem:[#allocation48_spill] sm:$0xff] }
 0x5a7   : > { %11543 = vst [vmem:[#allocation40_spill] sm:$0xff] %v8616_v59  ;;  %v8624_v6 = vpop.eup %5445  ;;  %5457 = vpow2.f32 %v2847_v12  ;;  %v8635_v26 = vmul.f32 %v5440_v34, %v11551_v31  ;;  %v3687_v18 = vpack.c.bf16 %v3487_v29, %v3483_v30  ;;  %v3479_v12 = vmul.f32 %v8483_v33, %v11554_v36  ;;  %v11560_v33 = vld [vmem:[#allocation114_spill] sm:$0xff]  ;;  %v11561_v29 = vld [vmem:[#allocation195_spill] sm:$0xff]  ;;  %v11688_v59 = vld [vmem:[#allocation157_spill] sm:$0xff] }
 0x5a8   : > { %11544 = vst [vmem:[#allocation41_spill] sm:$0xff] %v8622_v35  ;;  %v8628_v52 = vpop.eup %5447  ;;  %5459 = vpow2.f32 %v2491_v45  ;;  %v3156_v11 = vadd.f32 %v8622_v35, %v3155_v4  ;;  %v8650_v31 = vmul.f32 %v5438_v21, %v11556_v17  ;;  %v8653_v30 = vmul.f32 %v5440_v34, %v7908_v43  ;;  %v11565_v43 = vld [vmem:[#allocation175_spill] sm:$0xff] }
 0x5a9   : > { %11545 = vst [vmem:[#allocation42_spill] sm:$0xff] %v8624_v6  ;;  %v8637_v55 = vpop.eup %5449  ;;  %v3214_v5 = vadd.f32 %v8628_v52, %v8624_v6  ;;  %5461 = vpow2.f32 %v2849_v39  ;;  %3774 = vmatpush.bf16.msra.mxu1 %v3687_v18  ;;  %v3475_v4 = vmul.f32 %v8472_v16, %v11560_v33  ;;  %v8660_v36 = vmul.f32 %v5438_v21, %v11561_v29  ;;  %v2145_v21 = vpop.xlane.xlu2 %2144  ;;  %v11570_v39 = vld [vmem:[#allocation124_spill] sm:$0xff] }
 0x5aa   : > { %11548 = vst [vmem:[#allocation192_spill] sm:$0xff] %v8628_v52  ;;  %v8643_v27 = vpop.eup %5451  ;;  %v8663_v52 = vmul.f32 %v5440_v34, %v7919_v49  ;;  %5463 = vpow2.f32 %v2493_v1  ;;  %3087 = vadd.xlane.f32.xlu1 %v3086_v10  ;;  %v3471_v17 = vmul.f32 %v8350_v8, %v11565_v43  ;;  %v2411_v10 = vsub.f32 %v7929_v13, %v2145_v21 }
 0x5ab   : > { %11550 = vst [vmem:[#allocation199_spill] sm:$0xff] %v8632_v50  ;;  %v8655_v47 = vpop.eup %5453  ;;  %3152 = vadd.xlane.f32.xlu0 %v3151_v20  ;;  %5465 = vpow2.f32 %v2495_v53  ;;  %v3683_v16 = vpack.c.bf16 %v3479_v12, %v3475_v4  ;;  %v11567_v20 = vld [vmem:[#allocation168_spill] sm:$0xff]  ;;  %v2412_v8 = vsub.f32 %v7931_v41, %v2145_v21  ;;  %v2414_v53 = vsub.f32 %v7951_v23, %v2145_v21  ;;  %v2150_v12 = vpop.xlane.xlu1 %2149 }
 0x5ac   : > { %11552 = vst [vmem:[#allocation193_spill] sm:$0xff] %v8635_v26  ;;  %v8665_v45 = vpop.eup %5455  ;;  %3157 = vadd.xlane.f32.xlu2 %v3156_v11  ;;  %v3467_v49 = vmul.f32 %v8343_v58, %v11567_v20  ;;  %v2413_v11 = vsub.f32 %v7956_v14, %v2145_v21  ;;  %5467 = vpow2.f32 %v2497_v32  ;;  %v2867_v4 = vmul.f32 1.442695, %v2411_v10 }
 0x5ad   : > { %11553 = vst [vmem:[#allocation119_spill] sm:$0xff] %v8637_v55  ;;  %v8671_v18 = vpop.eup %5457  ;;  %3775 = vmatpush.bf16.msra.mxu1 %v3683_v16  ;;  %v2869_v58 = vmul.f32 1.442695, %v2412_v8  ;;  %v2873_v34 = vmul.f32 1.442695, %v2414_v53  ;;  %v2415_v13 = vsub.f32 %v11570_v39, %v2150_v12  ;;  %v11581_v53 = vld [vmem:[#allocation25_spill] sm:$0xff] }
 0x5ae   : > { %11555 = vst [vmem:[#allocation179_spill] sm:$0xff] %v8643_v27  ;;  %v8677_v1 = vpop.eup %5459  ;;  %v3215_v33 = vadd.f32 %v8671_v18, %v3214_v5  ;;  %v2871_v29 = vmul.f32 1.442695, %v2413_v11  ;;  %v3679_v43 = vpack.c.bf16 %v3471_v17, %v3467_v49  ;;  %5469 = vpow2.f32 %v2867_v4  ;;  %v11575_v5 = vld [vmem:[#allocation101_spill] sm:$0xff]  ;;  %v11577_v49 = vld [vmem:[#allocation58_spill] sm:$0xff]  ;;  %v8704_v4 = vpop.xlane.xlu0 %2134 }
 0x5af   : > { %11557 = vst [vmem:[#allocation194_spill] sm:$0xff] %v8650_v31  ;;  %v8684_v20 = vpop.eup %5461  ;;  %5471 = vpow2.f32 %v2869_v58  ;;  %v2418_v16 = vsub.f32 %v11575_v5, %v2150_v12  ;;  %v2875_v17 = vmul.f32 1.442695, %v2415_v13  ;;  %v11578_v10 = vpack.c.bf16 %v8258_v54, %v11577_v49  ;;  %v11582_v58 = vld [vmem:[#allocation141_spill] sm:$0xff]  ;;  %v11584_v13 = vld [vmem:[#allocation146_spill] sm:$0xff] }
 0x5b0   : > { %11558 = vst [vmem:[#allocation246_spill] sm:$0xff] %v8653_v30  ;;  %v8689_v31 = vpop.eup %5463  ;;  %v3216_v32 = vadd.f32 %v8684_v20, %v3215_v33  ;;  %5473 = vpow2.f32 %v2871_v29  ;;  %v11580_v33 = vld [vmem:[#allocation82_spill] sm:$0xff]  ;;  %v11592_v30 = vld [vmem:[#allocation49_spill] sm:$0xff] }
 0x5b1   : > { %11559 = vst [vmem:[#allocation247_spill] sm:$0xff] %v8655_v47  ;;  %v8692_v23 = vpop.eup %5465  ;;  %3776 = vmatpush.bf16.msra.mxu1 %v3679_v43  ;;  %5475 = vpow2.f32 %v2873_v34  ;;  %v11583_v43 = vld [vmem:[#allocation144_spill] sm:$0xff] }
 0x5b2   : > { %11562 = vst [vmem:[#allocation114_spill] sm:$0xff] %v8660_v36  ;;  %v11571_v36 = vld [vmem:[#allocation107_spill] sm:$0xff]  ;;  %v8695_v39 = vpop.eup %5467  ;;  %5477 = vpow2.f32 %v2875_v17 }
 0x5b3   : > { %11563 = vst [vmem:[#allocation195_spill] sm:$0xff] %v8663_v52  ;;  %v2416_v41 = vsub.f32 %v11571_v36, %v2150_v12  ;;  %v11572_v52 = vld [vmem:[#allocation140_spill] sm:$0xff]  ;;  %v2155_v8 = vpop.xlane.xlu1 %2154 }
 0x5b4   : > { %11564 = vst [vmem:[#allocation248_spill] sm:$0xff] %v8665_v45  ;;  %v2417_v14 = vsub.f32 %v11572_v52, %v2150_v12  ;;  %3217 = vadd.xlane.f32.xlu2 %v3216_v32  ;;  %v2881_v52 = vmul.f32 1.442695, %v2418_v16  ;;  %v8700_v11 = vpop.eup %5469  ;;  %v2211_v12 = vsub.f32 %v11581_v53, %v11580_v33  ;;  %v2419_v29 = vsub.f32 %v11582_v58, %v2155_v8  ;;  %v11586_v32 = vld [vmem:[#allocation200_spill] sm:$0xff]  ;;  %v11588_v16 = vld [vmem:[#allocation26_spill] sm:$0xff]  ;;  %v11590_v58 = vld [vmem:[#allocation27_spill] sm:$0xff] }
 0x5b5   : > { %11566 = vst [vmem:[#allocation175_spill] sm:$0xff] %v8671_v18  ;;  %v2877_v21 = vmul.f32 1.442695, %v2416_v41  ;;  %3777 = vmatpush.bf16.msra.mxu1 %v11578_v10  ;;  %v2420_v34 = vsub.f32 %v11583_v43, %v2155_v8  ;;  %v2421_v41 = vsub.f32 %v11584_v13, %v2155_v8  ;;  %v2422_v54 = vsub.f32 %v11586_v32, %v2155_v8 }
 0x5b6   : > { %11568 = vst [vmem:[#allocation168_spill] sm:$0xff] %v8677_v1  ;;  %v2879_v36 = vmul.f32 1.442695, %v2417_v14  ;;  %v8709_v14 = vpop.eup %5471  ;;  %v2212_v17 = vsub.f32 %v11588_v16, %v11580_v33  ;;  %v2213_v43 = vsub.f32 %v11590_v58, %v11580_v33  ;;  %v2467_v50 = vmul.f32 1.442695, %v2211_v12  ;;  %v2160_v12 = vpop.xlane.xlu0 %2159 }
 0x5b7   : > { %11569 = vst [vmem:[#allocation249_spill] sm:$0xff] %v8684_v20  ;;  %5479 = vpow2.f32 %v2877_v21  ;;  %v8712_v5 = vpop.eup %5473  ;;  %v2883_v21 = vmul.f32 1.442695, %v2419_v29  ;;  %v2885_v49 = vmul.f32 1.442695, %v2420_v34  ;;  %v3229_v10 = vadd.f32 %v8709_v14, %v8700_v11 }
 0x5b8   : > { %11573 = vst [vmem:[#allocation124_spill] sm:$0xff] %v8689_v31  ;;  %5481 = vpow2.f32 %v2879_v36  ;;  %v8718_v53 = vpop.eup %5475  ;;  %v2887_v13 = vmul.f32 1.442695, %v2421_v41  ;;  %v11591_v36 = vld [vmem:[#allocation56_spill] sm:$0xff]  ;;  %v2889_v16 = vmul.f32 1.442695, %v2422_v54  ;;  %v3163_v54 = vpop.xlane.xlu2 %3162 }
 0x5b9   : > { %11574 = vst [vmem:[#allocation107_spill] sm:$0xff] %v8692_v23  ;;  %5483 = vpow2.f32 %v2881_v52  ;;  %v11593_v8 = vpack.c.bf16 %v11591_v36, %v11592_v30  ;;  %v8725_v32 = vpop.eup %5477  ;;  %v3230_v29 = vadd.f32 %v8712_v5, %v3229_v10  ;;  %v2469_v58 = vmul.f32 1.442695, %v2212_v17  ;;  %v11600_v17 = vld [vmem:[#allocation201_spill] sm:$0xff] }
 0x5ba   : > { %11576 = vst [vmem:[#allocation140_spill] sm:$0xff] %v8695_v39  ;;  %5485 = vpow2.f32 %v2883_v21  ;;  %v2471_v36 = vmul.f32 1.442695, %v2213_v43  ;;  %v2424_v10 = vsub.f32 %v11600_v17, %v2160_v12  ;;  %v11607_v17 = vld [vmem:[#allocation61_spill] sm:$0xff] }
 0x5bb   : > { %11579 = vst [vmem:[#allocation101_spill] sm:$0xff] %v8700_v11  ;;  %3778 = vmatpush.bf16.msra.mxu1 %v11593_v8  ;;  %5487 = vpow2.f32 %v2885_v49  ;;  %v3231_v52 = vadd.f32 %v8718_v53, %v3230_v29  ;;  %v11601_v8 = vld [vmem:[#allocation29_spill] sm:$0xff] }
 0x5bc   : > { %11585 = vst [vmem:[#allocation58_spill] sm:$0xff] %v8709_v14  ;;  %v11596_v14 = vld [vmem:[#allocation28_spill] sm:$0xff]  ;;  %5489 = vpow2.f32 %v2887_v13  ;;  %v2425_v29 = vsub.f32 %v11601_v8, %v2160_v12  ;;  %v11603_v13 = vld [vmem:[#allocation83_spill] sm:$0xff] }
 0x5bd   : > { %11587 = vst [vmem:[#allocation82_spill] sm:$0xff] %v8712_v5  ;;  %v8728_v34 = vpop.eup %5479  ;;  %v2214_v26 = vsub.f32 %v11596_v14, %v11580_v33  ;;  %5491 = vpow2.f32 %v2467_v50  ;;  %3232 = vadd.xlane.f32.xlu1 %v3231_v52  ;;  %v11599_v33 = vld [vmem:[#allocation147_spill] sm:$0xff]  ;;  %v2426_v50 = vsub.f32 %v11603_v13, %v2160_v12 }
 0x5be   : > { %11589 = vst [vmem:[#allocation25_spill] sm:$0xff] %v8718_v53  ;;  %v3234_v30 = vadd.f32 %v8728_v34, %v8725_v32  ;;  %v8735_v41 = vpop.eup %5481  ;;  %5493 = vpow2.f32 %v2889_v16  ;;  %v2423_v14 = vsub.f32 %v11599_v33, %v2160_v12  ;;  %v11606_v16 = vld [vmem:[#allocation60_spill] sm:$0xff]  ;;  %v2893_v33 = vmul.f32 1.442695, %v2424_v10  ;;  %v11618_v5 = vld [vmem:[#allocation71_spill] sm:$0xff] }
 0x5bf   : > { %11594 = vst [vmem:[#allocation141_spill] sm:$0xff] %v8725_v32  ;;  %v8738_v49 = vpop.eup %5483  ;;  %5495 = vpow2.f32 %v2469_v58  ;;  %v2473_v43 = vmul.f32 1.442695, %v2214_v26  ;;  %v2895_v8 = vmul.f32 1.442695, %v2425_v29 }
 0x5c0   : > { %11595 = vst [vmem:[#allocation144_spill] sm:$0xff] %v8728_v34  ;;  %v3235_v21 = vadd.f32 %v8735_v41, %v3234_v30  ;;  %v8743_v34 = vpop.eup %5485  ;;  %5497 = vpow2.f32 %v2471_v36  ;;  %v11605_v30 = vld [vmem:[#allocation139_spill] sm:$0xff]  ;;  %v2891_v53 = vmul.f32 1.442695, %v2423_v14  ;;  %v2897_v36 = vmul.f32 1.442695, %v2426_v50 }
 0x5c1   : > { %11597 = vst [vmem:[#allocation146_spill] sm:$0xff] %v8735_v41  ;;  %v8747_v11 = vpop.eup %5487  ;;  %v2275_v32 = vsub.f32 %v11606_v16, %v11605_v30  ;;  %v2276_v41 = vsub.f32 %v11607_v17, %v11605_v30  ;;  %5499 = vrcp.f32 %v3163_v54  ;;  %v11614_v50 = vld [vmem:[#allocation149_spill] sm:$0xff] }
 0x5c2   : > { %11598 = vst [vmem:[#allocation200_spill] sm:$0xff] %v8738_v49  ;;  %v3236_v52 = vadd.f32 %v8738_v49, %v3235_v21  ;;  %v3239_v26 = vadd.f32 %v8747_v11, %v8743_v34  ;;  %v8755_v58 = vpop.eup %5489  ;;  %5501 = vpow2.f32 %v2891_v53  ;;  %v3168_v21 = vpop.xlane.xlu1 %3167  ;;  %v11613_v53 = vld [vmem:[#allocation30_spill] sm:$0xff] }
 0x5c3   : > { %11602 = vst [vmem:[#allocation26_spill] sm:$0xff] %v8743_v34  ;;  %v8757_v12 = vpop.eup %5491  ;;  %5503 = vpow2.f32 %v2893_v33  ;;  %v2595_v13 = vmul.f32 1.442695, %v2275_v32  ;;  %v2597_v29 = vmul.f32 1.442695, %v2276_v41  ;;  %v11615_v34 = vld [vmem:[#allocation95_spill] sm:$0xff] }
 0x5c4   : > { %11604 = vst [vmem:[#allocation27_spill] sm:$0xff] %v8747_v11  ;;  %3237 = vadd.xlane.f32.xlu0 %v3236_v52  ;;  %v3240_v14 = vadd.f32 %v8755_v58, %v3239_v26  ;;  %v8760_v10 = vpop.eup %5493  ;;  %5505 = vpow2.f32 %v2473_v43  ;;  %v2165_v52 = vpop.xlane.xlu0 %2164  ;;  %v11616_v49 = vld [vmem:[#allocation54_spill] sm:$0xff] }
 0x5c5   : > { %11608 = vst [vmem:[#allocation56_spill] sm:$0xff] %v8755_v58  ;;  %v8762_v54 = vpop.eup %5495  ;;  %5507 = vpow2.f32 %v2895_v8  ;;  %v2427_v33 = vsub.f32 %v11613_v53, %v2165_v52  ;;  %v2428_v11 = vsub.f32 %v11614_v50, %v2165_v52  ;;  %v2429_v26 = vsub.f32 %v11615_v34, %v2165_v52  ;;  %v11617_v43 = vld [vmem:[#allocation70_spill] sm:$0xff] }
 0x5c6   : > { %11609 = vst [vmem:[#allocation49_spill] sm:$0xff] %v8757_v12  ;;  %v3241_v16 = vadd.f32 %v8760_v10, %v3240_v14  ;;  %v8765_v17 = vpop.eup %5497  ;;  %5509 = vrcp.f32 %v3168_v21  ;;  %v2283_v32 = vsub.f32 %v11617_v43, %v11616_v49  ;;  %v2284_v41 = vsub.f32 %v11618_v5, %v11616_v49  ;;  %v11619_v8 = vld [vmem:[#allocation206_spill] sm:$0xff] }
 0x5c7   : > { %11610 = vst [vmem:[#allocation28_spill] sm:$0xff] %v8760_v10  ;;  %v5500_v58 = vpop.eup %5499  ;;  %5511 = vpow2.f32 %v2897_v36  ;;  %v2899_v21 = vmul.f32 1.442695, %v2427_v33  ;;  %v2901_v10 = vmul.f32 1.442695, %v2428_v11  ;;  %v11623_v43 = vld [vmem:[#allocation74_spill] sm:$0xff] }
 0x5c8   : > { %11611 = vst [vmem:[#allocation147_spill] sm:$0xff] %v8762_v54  ;;  %v2430_v54 = vsub.f32 %v11619_v8, %v2165_v52  ;;  %v8775_v14 = vpop.eup %5501  ;;  %5513 = vpow2.f32 %v2595_v13  ;;  %v2903_v50 = vmul.f32 1.442695, %v2429_v26  ;;  %v11625_v13 = vld [vmem:[#allocation73_spill] sm:$0xff]  ;;  %v2611_v33 = vmul.f32 1.442695, %v2283_v32 }
 0x5c9   : > { %11612 = vst [vmem:[#allocation201_spill] sm:$0xff] %v8765_v17  ;;  %v8777_v53 = vpop.eup %5503  ;;  %5515 = vpow2.f32 %v2597_v29  ;;  %v2285_v17 = vsub.f32 %v11623_v43, %v11616_v49  ;;  %v2286_v11 = vsub.f32 %v11625_v13, %v11616_v49  ;;  %v2613_v8 = vmul.f32 1.442695, %v2284_v41  ;;  %v11630_v43 = vld [vmem:[#allocation204_spill] sm:$0xff]  ;;  %v11633_v49 = vld [vmem:[#allocation43_spill] sm:$0xff]  ;;  %v11635_v13 = vld [vmem:[#allocation150_spill] sm:$0xff] }
 0x5ca   : > { %11620 = vst [vmem:[#allocation29_spill] sm:$0xff] %v8775_v14  ;;  %v8779_v34 = vpop.eup %5505  ;;  %5517 = vpow2.f32 %v2899_v21  ;;  %v2905_v5 = vmul.f32 1.442695, %v2430_v54  ;;  %v3244_v36 = vadd.f32 %v8777_v53, %v8775_v14  ;;  %v11628_v21 = vld [vmem:[#allocation203_spill] sm:$0xff]  ;;  %v11634_v41 = vld [vmem:[#allocation44_spill] sm:$0xff] }
 0x5cb   : > { %11621 = vst [vmem:[#allocation83_spill] sm:$0xff] %v8777_v53  ;;  %v8785_v52 = vpop.eup %5507  ;;  %5519 = vpow2.f32 %v2901_v10  ;;  %v8794_v54 = vmul.f32 %v5500_v58, %v11628_v21  ;;  %v8797_v53 = vmul.f32 %v5500_v58, %v11630_v43 }
 0x5cc   : > { %3242 = vadd.xlane.f32.xlu0 %v3241_v16  ;;  %11622 = vst [vmem:[#allocation139_spill] sm:$0xff] %v8779_v34  ;;  %v5510_v29 = vpop.eup %5509  ;;  %v2170_v16 = vpop.xlane.xlu2 %2169  ;;  %v3245_v26 = vadd.f32 %v8785_v52, %v3244_v36  ;;  %v11626_v34 = vld [vmem:[#allocation202_spill] sm:$0xff]  ;;  %5521 = vpow2.f32 %v2903_v50  ;;  %v11637_v36 = vld [vmem:[#allocation97_spill] sm:$0xff] }
 0x5cd   : > { %11624 = vst [vmem:[#allocation60_spill] sm:$0xff] %v8785_v52  ;;  %v8791_v12 = vmul.f32 %v5500_v58, %v11626_v34  ;;  %v8799_v14 = vpop.eup %5511  ;;  %v2431_v32 = vsub.f32 %v11633_v49, %v2170_v16  ;;  %v2432_v10 = vsub.f32 %v11634_v41, %v2170_v16  ;;  %v2433_v20 = vsub.f32 %v11635_v13, %v2170_v16  ;;  %v11639_v52 = vld [vmem:[#allocation205_spill] sm:$0xff]  ;;  %v11643_v41 = vld [vmem:[#allocation55_spill] sm:$0xff] }
 0x5ce   : > { %11629 = vst [vmem:[#allocation30_spill] sm:$0xff] %v8794_v54  ;;  %v8804_v18 = vpop.eup %5513  ;;  %5523 = vpow2.f32 %v2905_v5  ;;  %v3246_v34 = vadd.f32 %v8799_v14, %v3245_v26  ;;  %v8808_v21 = vmul.f32 %v5510_v29, %v11637_v36  ;;  %v8811_v43 = vmul.f32 %v5500_v58, %v11639_v52  ;;  %v11642_v50 = vld [vmem:[#allocation89_spill] sm:$0xff]  ;;  %v11646_v36 = vld [vmem:[#allocation32_spill] sm:$0xff]  ;;  %v3173_v26 = vpop.xlane.xlu1 %3172 }
 0x5cf   : > { %11627 = vst [vmem:[#allocation61_spill] sm:$0xff] %v8791_v12  ;;  %v8813_v6 = vpop.eup %5515  ;;  %v2434_v37 = vsub.f32 %v11642_v50, %v2170_v16  ;;  %v2907_v49 = vmul.f32 1.442695, %v2431_v32  ;;  %v2909_v2 = vmul.f32 1.442695, %v2432_v10  ;;  %v8817_v35 = vmul.f32 %v5510_v29, %v11643_v41  ;;  %v11648_v58 = vld [vmem:[#allocation33_spill] sm:$0xff] }
 0x5d0   : > { %11631 = vst [vmem:[#allocation149_spill] sm:$0xff] %v8797_v53  ;;  %v8819_v13 = vpop.eup %5517  ;;  %v2911_v5 = vmul.f32 1.442695, %v2433_v20  ;;  %3247 = vadd.xlane.f32.xlu2 %v3246_v34  ;;  %v8827_v52 = vmul.f32 %v5510_v29, %v11648_v58  ;;  %v2615_v16 = vmul.f32 1.442695, %v2285_v17  ;;  %v11651_v32 = vld [vmem:[#allocation142_spill] sm:$0xff] }
 0x5d1   : > { %11632 = vst [vmem:[#allocation95_spill] sm:$0xff] %v8799_v14  ;;  %v8824_v14 = vmul.f32 %v5510_v29, %v11646_v36  ;;  %v11652_v10 = vld [vmem:[#allocation75_spill] sm:$0xff]  ;;  %5525 = vpow2.f32 %v2907_v49  ;;  %v2913_v17 = vmul.f32 1.442695, %v2434_v37  ;;  %v11655_v49 = vld [vmem:[#allocation76_spill] sm:$0xff]  ;;  %v11656_v41 = vld [vmem:[#allocation78_spill] sm:$0xff] }
 0x5d2   : > { %11636 = vst [vmem:[#allocation54_spill] sm:$0xff] %v8804_v18  ;;  %v2287_v50 = vsub.f32 %v11652_v10, %v11651_v32  ;;  %5527 = vpow2.f32 %v2909_v2  ;;  %v2288_v10 = vsub.f32 %v11655_v49, %v11651_v32  ;;  %v2617_v20 = vmul.f32 1.442695, %v2286_v11  ;;  %v11658_v37 = vld [vmem:[#allocation77_spill] sm:$0xff]  ;;  %v11668_v54 = vld [vmem:[#allocation212_spill] sm:$0xff] }
 0x5d3   : > { %11638 = vst [vmem:[#allocation70_spill] sm:$0xff] %v8808_v21  ;;  %5529 = vpow2.f32 %v2611_v33  ;;  %v2289_v53 = vsub.f32 %v11656_v41, %v11651_v32 }
 0x5d4   : > { %11640 = vst [vmem:[#allocation71_spill] sm:$0xff] %v8811_v43  ;;  %5531 = vpow2.f32 %v2911_v5  ;;  %v2619_v29 = vmul.f32 1.442695, %v2287_v50  ;;  %v2621_v5 = vmul.f32 1.442695, %v2288_v10 }
 0x5d5   : > { %11641 = vst [vmem:[#allocation206_spill] sm:$0xff] %v8813_v6  ;;  %v8829_v6 = vpop.eup %5519  ;;  %5533 = vpow2.f32 %v2613_v8  ;;  %v11661_v8 = vld [vmem:[#allocation129_spill] sm:$0xff] }
 0x5d6   : > { %11644 = vst [vmem:[#allocation74_spill] sm:$0xff] %v8817_v35  ;;  %v3249_v34 = vadd.f32 %v8829_v6, %v8819_v13  ;;  %v8841_v36 = vpop.eup %5521  ;;  %5535 = vpow2.f32 %v2615_v16 }
 0x5d7   : > { %11645 = vst [vmem:[#allocation73_spill] sm:$0xff] %v8819_v13  ;;  %v8843_v58 = vpop.eup %5523  ;;  %5537 = vpow2.f32 %v2913_v17  ;;  %v11670_v13 = vld [vmem:[#allocation81_spill] sm:$0xff] }
 0x5d8   : > { %11647 = vst [vmem:[#allocation202_spill] sm:$0xff] %v8824_v14  ;;  %v3250_v2 = vadd.f32 %v8841_v36, %v3249_v34  ;;  %v8851_v33 = vpop.eup %5525  ;;  %v11660_v34 = vld [vmem:[#allocation143_spill] sm:$0xff]  ;;  %5539 = vrcp.f32 %v3173_v26  ;;  %v11666_v26 = vld [vmem:[#allocation122_spill] sm:$0xff] }
 0x5d9   : > { %11649 = vst [vmem:[#allocation203_spill] sm:$0xff] %v8827_v52  ;;  %v2290_v52 = vsub.f32 %v11658_v37, %v11651_v32  ;;  %v8855_v49 = vpop.eup %5527  ;;  %v2343_v11 = vsub.f32 %v11661_v8, %v11660_v34  ;;  %5541 = vpow2.f32 %v2617_v20  ;;  %v3178_v32 = vpop.xlane.xlu0 %3177 }
 0x5da   : > { %11650 = vst [vmem:[#allocation204_spill] sm:$0xff] %v8829_v6  ;;  %v3251_v43 = vadd.f32 %v8843_v58, %v3250_v2  ;;  %v8859_v16 = vpop.eup %5529  ;;  %v3254_v50 = vadd.f32 %v8855_v49, %v8851_v33  ;;  %5543 = vpow2.f32 %v2619_v29  ;;  %v2623_v2 = vmul.f32 1.442695, %v2289_v53  ;;  %v2180_v6 = vpop.xlane.xlu2 %2179  ;;  %v11669_v53 = vld [vmem:[#allocation215_spill] sm:$0xff] }
 0x5db   : > { %11653 = vst [vmem:[#allocation43_spill] sm:$0xff] %v8841_v36  ;;  %v8863_v41 = vpop.eup %5531  ;;  %v2625_v37 = vmul.f32 1.442695, %v2290_v52  ;;  %5545 = vrcp.f32 %v3178_v32  ;;  %v2731_v14 = vmul.f32 1.442695, %v2343_v11  ;;  %v2439_v29 = vsub.f32 %v11668_v54, %v2180_v6  ;;  %v11671_v52 = vld [vmem:[#allocation148_spill] sm:$0xff] }
 0x5dc   : > { %11654 = vst [vmem:[#allocation44_spill] sm:$0xff] %v8843_v58  ;;  %3252 = vadd.xlane.f32.xlu2 %v3251_v43  ;;  %v8865_v17 = vpop.eup %5533  ;;  %v3255_v10 = vadd.f32 %v8863_v41, %v3254_v50  ;;  %5547 = vpow2.f32 %v2621_v5  ;;  %v11665_v43 = vld [vmem:[#allocation105_spill] sm:$0xff]  ;;  %v2440_v35 = vsub.f32 %v11669_v53, %v2180_v6  ;;  %v2442_v32 = vsub.f32 %v11671_v52, %v2180_v6  ;;  %v11672_v11 = vld [vmem:[#allocation123_spill] sm:$0xff]  ;;  %v11674_v54 = vld [vmem:[#allocation128_spill] sm:$0xff] }
 0x5dd   : > { %11657 = vst [vmem:[#allocation150_spill] sm:$0xff] %v8851_v33  ;;  %v8868_v8 = vpop.eup %5535  ;;  %v2339_v20 = vsub.f32 %v11666_v26, %v11665_v43  ;;  %v2441_v33 = vsub.f32 %v11670_v13, %v2180_v6  ;;  %5549 = vpow2.f32 %v2623_v2  ;;  %v2340_v26 = vsub.f32 %v11672_v11, %v11665_v43  ;;  %v11675_v52 = vld [vmem:[#allocation46_spill] sm:$0xff] }
 0x5de   : > { %11659 = vst [vmem:[#allocation97_spill] sm:$0xff] %v8855_v49  ;;  %v8872_v49 = vpop.eup %5537  ;;  %5551 = vpow2.f32 %v2625_v37  ;;  %v2925_v36 = vmul.f32 1.442695, %v2440_v35  ;;  %v2341_v53 = vsub.f32 %v11674_v54, %v11665_v43  ;;  %v11677_v37 = vld [vmem:[#allocation47_spill] sm:$0xff]  ;;  %v11680_v11 = vld [vmem:[#allocation214_spill] sm:$0xff] }
 0x5df   : > { %11662 = vst [vmem:[#allocation205_spill] sm:$0xff] %v8859_v16  ;;  %v5540_v58 = vpop.eup %5539  ;;  %v3256_v50 = vadd.f32 %v8872_v49, %v3255_v10  ;;  %v2723_v13 = vmul.f32 1.442695, %v2339_v20  ;;  %5553 = vpow2.f32 %v2731_v14  ;;  %v2927_v6 = vmul.f32 1.442695, %v2441_v33  ;;  %v11682_v20 = vld [vmem:[#allocation216_spill] sm:$0xff] }
 0x5e0   : > { %11663 = vst [vmem:[#allocation89_spill] sm:$0xff] %v8863_v41  ;;  %v8879_v5 = vpop.eup %5541  ;;  %v2923_v41 = vmul.f32 1.442695, %v2439_v29  ;;  %v2929_v10 = vmul.f32 1.442695, %v2442_v32  ;;  %v8891_v21 = vmul.f32 %v5540_v58, %v11677_v37  ;;  %v11684_v33 = vld [vmem:[#allocation154_spill] sm:$0xff]  ;;  %v8908_v9 = vmul.f32 %v5540_v58, %v11689_v15 }
 0x5e1   : > { %11664 = vst [vmem:[#allocation55_spill] sm:$0xff] %v8865_v17  ;;  %v8883_v12 = vpop.eup %5543  ;;  %3257 = vadd.xlane.f32.xlu1 %v3256_v50  ;;  %v2175_v35 = vpop.xlane.xlu0 %2174  ;;  %v11687_v54 = vld [vmem:[#allocation155_spill] sm:$0xff]  ;;  %v8917_v48 = vmul.f32 %v5540_v58, %v11691_v63 }
 0x5e2   : > { %11667 = vst [vmem:[#allocation32_spill] sm:$0xff] %v8872_v49  ;;  %v5546_v2 = vpop.eup %5545  ;;  %5555 = vpow2.f32 %v2923_v41  ;;  %v8888_v49 = vmul.f32 %v5540_v58, %v11675_v52  ;;  %v11686_v41 = vld [vmem:[#allocation151_spill] sm:$0xff]  ;;  %v2436_v52 = vsub.f32 %v11687_v54, %v2175_v35  ;;  %v2437_v37 = vsub.f32 %v11688_v59, %v2175_v35  ;;  %v11694_v59 = vld [vmem:[#allocation156_spill] sm:$0xff] }
 0x5e3   : > { %11673 = vst [vmem:[#allocation33_spill] sm:$0xff] %v8883_v12  ;;  %v8893_v29 = vpop.eup %5547  ;;  %5557 = vpow2.f32 %v2925_v36  ;;  %v8896_v18 = vmul.f32 %v5546_v2, %v11680_v11  ;;  %v8899_v14 = vmul.f32 %v5546_v2, %v11682_v20  ;;  %v8902_v50 = vmul.f32 %v5546_v2, %v11684_v33  ;;  %v3188_v11 = vpop.xlane.xlu2 %3187  ;;  %v11699_v63 = vld [vmem:[#allocation127_spill] sm:$0xff] }
 0x5e4   : > { %11676 = vst [vmem:[#allocation142_spill] sm:$0xff] %v8888_v49  ;;  %v2435_v32 = vsub.f32 %v11686_v41, %v2175_v35  ;;  %v8910_v36 = vpop.eup %5549  ;;  %5559 = vpow2.f32 %v2927_v6  ;;  %v2438_v54 = vsub.f32 %v11694_v59, %v2175_v35  ;;  %v2917_v60 = vmul.f32 1.442695, %v2436_v52  ;;  %v11696_v49 = vld [vmem:[#allocation80_spill] sm:$0xff] }
 0x5e5   : > { %11678 = vst [vmem:[#allocation75_spill] sm:$0xff] %v8891_v21  ;;  %v8919_v41 = vpop.eup %5551  ;;  %5561 = vpow2.f32 %v2929_v10  ;;  %v2919_v6 = vmul.f32 1.442695, %v2437_v37  ;;  %v2342_v58 = vsub.f32 %v11699_v63, %v11665_v43  ;;  %v2725_v35 = vmul.f32 1.442695, %v2340_v26  ;;  %v11705_v37 = vld [vmem:[#allocation118_spill] sm:$0xff] }
 0x5e6   : > { %11679 = vst [vmem:[#allocation76_spill] sm:$0xff] %v8893_v29  ;;  %v2915_v15 = vmul.f32 1.442695, %v2435_v32  ;;  %v8922_v38 = vpop.eup %5553  ;;  %5563 = vrcp.f32 %v3188_v11  ;;  %v11701_v32 = vld [vmem:[#allocation131_spill] sm:$0xff]  ;;  %v2921_v11 = vmul.f32 1.442695, %v2438_v54  ;;  %v2403_v20 = vsub.f32 %v11705_v37, %v8704_v4 }
 0x5e7   : > { %11681 = vst [vmem:[#allocation78_spill] sm:$0xff] %v8896_v18  ;;  %v8927_v18 = vmul.f32 %v5546_v2, %v11696_v49  ;;  %v2344_v52 = vsub.f32 %v11701_v32, %v11660_v34  ;;  %v2727_v59 = vmul.f32 1.442695, %v2341_v53  ;;  %v2729_v26 = vmul.f32 1.442695, %v2342_v58  ;;  %v11704_v32 = vld [vmem:[#allocation132_spill] sm:$0xff] }
 0x5e8   : > { %11683 = vst [vmem:[#allocation77_spill] sm:$0xff] %v8899_v14  ;;  %v8929_v33 = vpop.eup %5555  ;;  %5565 = vpow2.f32 %v2915_v15  ;;  %v2851_v37 = vmul.f32 1.442695, %v2403_v20 }
 0x5e9   : > { %11685 = vst [vmem:[#allocation143_spill] sm:$0xff] %v8902_v50  ;;  %v8933_v10 = vpop.eup %5557  ;;  %5567 = vpow2.f32 %v2917_v60  ;;  %v3183_v43 = vpop.xlane.xlu0 %3182  ;;  %v2733_v54 = vmul.f32 1.442695, %v2344_v52 }
 0x5ea   : > { %11690 = vst [vmem:[#allocation129_spill] sm:$0xff] %v8908_v9  ;;  %5569 = vpow2.f32 %v2723_v13  ;;  %v3264_v49 = vadd.f32 %v8933_v10, %v8929_v33  ;;  %v8941_v2 = vpop.eup %5559  ;;  %v2345_v13 = vsub.f32 %v11704_v32, %v11660_v34  ;;  %v11710_v32 = vld [vmem:[#allocation220_spill] sm:$0xff]  ;;  %v11714_v9 = vld [vmem:[#allocation223_spill] sm:$0xff] }
 0x5eb   : > { %11692 = vst [vmem:[#allocation105_spill] sm:$0xff] %v8917_v48  ;;  %5571 = vpow2.f32 %v2919_v6  ;;  %v8943_v15 = vpop.eup %5561  ;;  %v3193_v14 = vpop.xlane.xlu2 %3192 }
 0x5ec   : > { %11693 = vst [vmem:[#allocation122_spill] sm:$0xff] %v8919_v41  ;;  %5573 = vrcp.f32 %v3183_v43  ;;  %v3265_v63 = vadd.f32 %v8941_v2, %v3264_v49  ;;  %v5564_v60 = vpop.eup %5563  ;;  %v2735_v52 = vmul.f32 1.442695, %v2345_v13  ;;  %v11719_v13 = vld [vmem:[#allocation85_spill] sm:$0xff] }
 0x5ed   : > { %11695 = vst [vmem:[#allocation212_spill] sm:$0xff] %v8922_v38  ;;  %5575 = vpow2.f32 %v2725_v35 }
 0x5ee   : > { %11697 = vst [vmem:[#allocation215_spill] sm:$0xff] %v8927_v18  ;;  %v8950_v48 = vpop.eup %5565  ;;  %5577 = vpow2.f32 %v2921_v11  ;;  %v3266_v53 = vadd.f32 %v8943_v15, %v3265_v63  ;;  %v8963_v63 = vmul.f32 %v5564_v60, %v11710_v32  ;;  %v11712_v18 = vld [vmem:[#allocation221_spill] sm:$0xff]  ;;  %v11723_v32 = vld [vmem:[#allocation228_spill] sm:$0xff] }
 0x5ef   : > { %11698 = vst [vmem:[#allocation81_spill] sm:$0xff] %v8929_v33  ;;  %v8953_v6 = vpop.eup %5567  ;;  %5579 = vpow2.f32 %v2727_v59  ;;  %v8966_v59 = vmul.f32 %v5564_v60, %v11712_v18 }
 0x5f0   : > { %11700 = vst [vmem:[#allocation148_spill] sm:$0xff] %v8933_v10  ;;  %v8955_v58 = vpop.eup %5569  ;;  %5581 = vpow2.f32 %v2729_v26  ;;  %3267 = vadd.xlane.f32.xlu0 %v3266_v53  ;;  %v3259_v35 = vadd.f32 %v8953_v6, %v8950_v48  ;;  %v8969_v26 = vmul.f32 %v5564_v60, %v11714_v9  ;;  %v11717_v10 = vld [vmem:[#allocation219_spill] sm:$0xff]  ;;  %v11726_v9 = vld [vmem:[#allocation218_spill] sm:$0xff] }
 0x5f1   : > { %11702 = vst [vmem:[#allocation123_spill] sm:$0xff] %v8941_v2  ;;  %v8959_v49 = vpop.eup %5571  ;;  %5583 = vpow2.f32 %v2733_v54  ;;  %v2185_v50 = vpop.xlane.xlu0 %2184  ;;  %v11721_v54 = vld [vmem:[#allocation222_spill] sm:$0xff]  ;;  %v11728_v2 = vld [vmem:[#allocation224_spill] sm:$0xff] }
 0x5f2   : > { %11703 = vst [vmem:[#allocation128_spill] sm:$0xff] %v8943_v15  ;;  %v5574_v43 = vpop.eup %5573  ;;  %v3260_v11 = vadd.f32 %v8959_v49, %v3259_v35  ;;  %v2443_v33 = vsub.f32 %v11726_v9, %v2185_v50  ;;  %5585 = vpow2.f32 %v2735_v52 }
 0x5f3   : > { %11706 = vst [vmem:[#allocation46_spill] sm:$0xff] %v8950_v48  ;;  %v8971_v53 = vpop.eup %5575  ;;  %v8977_v20 = vmul.f32 %v5574_v43, %v11719_v13  ;;  %v8980_v35 = vmul.f32 %v5574_v43, %v11721_v54  ;;  %v8983_v21 = vmul.f32 %v5574_v43, %v11723_v32  ;;  %v11727_v48 = vld [vmem:[#allocation84_spill] sm:$0xff]  ;;  %v11730_v32 = vld [vmem:[#allocation86_spill] sm:$0xff]  ;;  %5587 = vpow2.f32 %v2851_v37  ;;  %v2190_v37 = vpop.xlane.xlu2 %2189 }
 0x5f4   : > { %11707 = vst [vmem:[#allocation47_spill] sm:$0xff] %v8953_v6  ;;  %v8974_v6 = vmul.f32 %v5574_v43, %v11717_v10  ;;  %v8985_v18 = vpop.eup %5577  ;;  %v2444_v15 = vsub.f32 %v11727_v48, %v2185_v50  ;;  %v2446_v10 = vsub.f32 %v8235_v42, %v2185_v50  ;;  %v8999_v7 = vmul.f32 %v5564_v60, %v11730_v32 }
 0x5f5   : > { %11708 = vst [vmem:[#allocation214_spill] sm:$0xff] %v8955_v58  ;;  %v8991_v24 = vpop.eup %5579  ;;  %v3261_v13 = vadd.f32 %v8985_v18, %v3260_v11  ;;  %v2931_v48 = vmul.f32 1.442695, %v2443_v33  ;;  %v2989_v54 = vadd.f32 %v8643_v27, %v8637_v55  ;;  %v2994_v43 = vadd.f32 %v8689_v31, %v8677_v1 }
 0x5f6   : > { %11709 = vst [vmem:[#allocation216_spill] sm:$0xff] %v8959_v49  ;;  %v2445_v49 = vsub.f32 %v11728_v2, %v2185_v50  ;;  %v9001_v9 = vpop.eup %5581  ;;  %v2933_v2 = vmul.f32 1.442695, %v2444_v15  ;;  %v2937_v32 = vmul.f32 1.442695, %v2446_v10  ;;  %v11735_v10 = vld [vmem:[#allocation145_spill] sm:$0xff] }
 0x5f7   : > { %11711 = vst [vmem:[#allocation154_spill] sm:$0xff] %v8963_v63  ;;  %v9005_v50 = vpop.eup %5583  ;;  %3262 = vadd.xlane.f32.xlu1 %v3261_v13  ;;  %5589 = vpow2.f32 %v2931_v48  ;;  %v2990_v15 = vadd.f32 %v8655_v47, %v2989_v54  ;;  %v11733_v13 = vld [vmem:[#allocation167_spill] sm:$0xff]  ;;  %v2447_v48 = vsub.f32 %v11735_v10, %v2190_v37  ;;  %v2450_v54 = vsub.f32 %v8295_v22, %v2190_v37 }
 0x5f8   : > { %11713 = vst [vmem:[#allocation151_spill] sm:$0xff] %v8966_v59  ;;  %v2935_v11 = vmul.f32 1.442695, %v2445_v49  ;;  %5591 = vpow2.f32 %v2933_v2  ;;  %v9012_v52 = vpop.eup %5585  ;;  %v11741_v59 = vld [vmem:[#allocation92_spill] sm:$0xff] }
 0x5f9   : > { %11715 = vst [vmem:[#allocation155_spill] sm:$0xff] %v8969_v26  ;;  %5593 = vrcp.f32 %v3193_v14  ;;  %v2195_v33 = vpop.xlane.xlu0 %2194  ;;  %v9018_v60 = vpop.eup %5587  ;;  %v11736_v14 = vld [vmem:[#allocation225_spill] sm:$0xff]  ;;  %v2939_v27 = vmul.f32 1.442695, %v2447_v48 }
 0x5fa   : > { %11716 = vst [vmem:[#allocation157_spill] sm:$0xff] %v8971_v53  ;;  %5595 = vpow2.f32 %v2935_v11  ;;  %v2451_v49 = vsub.f32 %v8317_v40, %v2195_v33  ;;  %v2452_v42 = vsub.f32 %v11733_v13, %v2195_v33  ;;  %v2448_v2 = vsub.f32 %v11736_v14, %v2190_v37  ;;  %v11737_v11 = vld [vmem:[#allocation87_spill] sm:$0xff] }
 0x5fb   : > { %11718 = vst [vmem:[#allocation208_spill] sm:$0xff] %v8974_v6  ;;  %5597 = vpow2.f32 %v2937_v32  ;;  %v2454_v10 = vsub.f32 %v11741_v59, %v2195_v33  ;;  %v2945_v14 = vmul.f32 1.442695, %v2450_v54  ;;  %v11747_v54 = vld [vmem:[#allocation191_spill] sm:$0xff] }
 0x5fc   : > { %11720 = vst [vmem:[#allocation48_spill] sm:$0xff] %v8977_v20  ;;  %v2947_v26 = vmul.f32 1.442695, %v2451_v49  ;;  %v2941_v31 = vmul.f32 1.442695, %v2448_v2  ;;  %v9041_v49 = vadd.f32 %v8665_v45, %v2990_v15 }
 0x5fd   : > { %11722 = vst [vmem:[#allocation156_spill] sm:$0xff] %v8980_v35  ;;  %v9024_v32 = vpop.eup %5589  ;;  %v11739_v35 = vld [vmem:[#allocation34_spill] sm:$0xff]  ;;  %v2953_v15 = vmul.f32 1.442695, %v2454_v10 }
 0x5fe   : > { %11724 = vst [vmem:[#allocation80_spill] sm:$0xff] %v8983_v21  ;;  %v2449_v21 = vsub.f32 %v11737_v11, %v2190_v37  ;;  %v2453_v40 = vsub.f32 %v11739_v35, %v2195_v33  ;;  %v9027_v13 = vpop.eup %5591  ;;  %v11742_v37 = vld [vmem:[#allocation207_spill] sm:$0xff]  ;;  %v11743_v11 = vld [vmem:[#allocation209_spill] sm:$0xff]  ;;  %v11754_v10 = vld [vmem:[#allocation238_spill] sm:$0xff] }
 0x5ff   : > { %11725 = vst [vmem:[#allocation127_spill] sm:$0xff] %v8985_v18  ;;  %v9030_v47 = vpop.eup %5593  ;;  %v3269_v22 = vadd.f32 %v9027_v13, %v9024_v32  ;;  %v9036_v1 = vadd.f32 %v11743_v11, %v11742_v37  ;;  %v2404_v11 = vsub.f32 %v11747_v54, %v8704_v4  ;;  %v11752_v54 = vld [vmem:[#allocation231_spill] sm:$0xff] }
 0x600   : > { %11729 = vst [vmem:[#allocation131_spill] sm:$0xff] %v8991_v24  ;;  %v2943_v20 = vmul.f32 1.442695, %v2449_v21  ;;  %v9038_v35 = vpop.eup %5595  ;;  %v2995_v21 = vadd.f32 %v8692_v23, %v2994_v43  ;;  %v2951_v48 = vmul.f32 1.442695, %v2453_v40  ;;  %v11749_v43 = vld [vmem:[#allocation196_spill] sm:$0xff] }
 0x601   : > { %11731 = vst [vmem:[#allocation132_spill] sm:$0xff] %v8999_v7  ;;  %v3198_v7 = vpop.xlane.xlu1 %3197  ;;  %v9044_v59 = vpop.eup %5597  ;;  %v3270_v2 = vadd.f32 %v9038_v35, %v3269_v22  ;;  %v2406_v37 = vsub.f32 %v11749_v43, %v8704_v4 }
 0x602   : > { %11732 = vst [vmem:[#allocation118_spill] sm:$0xff] %v9005_v50  ;;  %5599 = vrcp.f32 %v3198_v7  ;;  %v2949_v7 = vmul.f32 1.442695, %v2452_v42 }
 0x603   : > { %11734 = vst [vmem:[#allocation220_spill] sm:$0xff] %v9018_v60  ;;  %5601 = vpow2.f32 %v2947_v26  ;;  %v11746_v26 = vld [vmem:[#allocation64_spill] sm:$0xff] }
 0x604   : > { %11738 = vst [vmem:[#allocation221_spill] sm:$0xff] %v9024_v32  ;;  %5603 = vpow2.f32 %v2939_v27  ;;  %v2277_v33 = vsub.f32 %v11746_v26, %v11605_v30  ;;  %v11748_v27 = vld [vmem:[#allocation197_spill] sm:$0xff]  ;;  %v2200_v32 = vpop.xlane.xlu2 %2199  ;;  %v3208_v40 = vpop.xlane.xlu0 %3207  ;;  %v11750_v26 = vld [vmem:[#allocation230_spill] sm:$0xff] }
 0x605   : > { %11740 = vst [vmem:[#allocation223_spill] sm:$0xff] %v9027_v13  ;;  %5605 = vpow2.f32 %v2941_v31  ;;  %v2405_v42 = vsub.f32 %v11748_v27, %v8704_v4  ;;  %v3271_v31 = vadd.f32 %v9044_v59, %v3270_v2  ;;  %v9060_v22 = vmul.f32 %v9030_v47, %v11750_v26  ;;  %v11753_v27 = vld [vmem:[#allocation233_spill] sm:$0xff]  ;;  %v11757_v2 = vld [vmem:[#allocation235_spill] sm:$0xff]  ;;  %v11759_v26 = vld [vmem:[#allocation174_spill] sm:$0xff] }
 0x606   : > { %11744 = vst [vmem:[#allocation219_spill] sm:$0xff] %v9038_v35  ;;  %5607 = vpow2.f32 %v2943_v20  ;;  %v2455_v45 = vsub.f32 %v11752_v54, %v2200_v32  ;;  %v2456_v20 = vsub.f32 %v11753_v27, %v2200_v32  ;;  %v2457_v23 = vsub.f32 %v11754_v10, %v2200_v32  ;;  %v11756_v4 = vld [vmem:[#allocation133_spill] sm:$0xff] }
 0x607   : > { %11745 = vst [vmem:[#allocation85_spill] sm:$0xff] %v9044_v59  ;;  %5609 = vpow2.f32 %v2945_v14  ;;  %v2458_v14 = vsub.f32 %v11756_v4, %v2200_v32  ;;  %3272 = vadd.xlane.f32.xlu0 %v3271_v31  ;;  %v11763_v31 = vld [vmem:[#allocation90_spill] sm:$0xff]  ;;  %v2853_v32 = vmul.f32 1.442695, %v2404_v11  ;;  %v11773_v11 = vld [vmem:[#allocation53_spill] sm:$0xff] }
 0x608   : > { %v9053_v13 = vpop.eup %5599  ;;  %11751 = vst [vmem:[#allocation222_spill] sm:$0xff] %v9060_v22  ;;  %5611 = vpow2.f32 %v2949_v7  ;;  %v9074_v7 = vmul.f32 %v9030_v47, %v11759_v26  ;;  %v2955_v27 = vmul.f32 1.442695, %v2455_v45  ;;  %v2957_v10 = vmul.f32 1.442695, %v2456_v20  ;;  %v11766_v45 = vld [vmem:[#allocation236_spill] sm:$0xff] }
 0x609   : > { %v3203_v55 = vpop.xlane.xlu1 %3202  ;;  %v9065_v35 = vpop.eup %5601  ;;  %5613 = vpow2.f32 %v2951_v48  ;;  %v9070_v43 = vmul.f32 %v9053_v13, %v11757_v2  ;;  %v2959_v59 = vmul.f32 1.442695, %v2457_v23  ;;  %v2961_v48 = vmul.f32 1.442695, %v2458_v14  ;;  %v11768_v20 = vld [vmem:[#allocation237_spill] sm:$0xff]  ;;  %v11771_v26 = vld [vmem:[#allocation63_spill] sm:$0xff] }
 0x60a   : > { %11755 = vst [vmem:[#allocation228_spill] sm:$0xff] %v9065_v35  ;;  %v9076_v54 = vpop.eup %5603  ;;  %5615 = vpow2.f32 %v2953_v15  ;;  %v9084_v4 = vmul.f32 %v9030_v47, %v11763_v31  ;;  %v9092_v23 = vmul.f32 %v9053_v13, %v11766_v45  ;;  %v11776_v31 = vld [vmem:[#allocation35_spill] sm:$0xff] }
 0x60b   : > { %11758 = vst [vmem:[#allocation218_spill] sm:$0xff] %v9070_v43  ;;  %v9078_v18 = vpop.eup %5605  ;;  %5617 = vrcp.f32 %v3203_v55  ;;  %v9096_v55 = vmul.f32 %v9053_v13, %v11768_v20 }
 0x60c   : > { %11760 = vst [vmem:[#allocation84_spill] sm:$0xff] %v9074_v7  ;;  %v9086_v2 = vpop.eup %5607  ;;  %5619 = vpow2.f32 %v2955_v27  ;;  %v3274_v15 = vadd.f32 %v9078_v18, %v9076_v54  ;;  %v9103_v27 = vadd.f32 %v8695_v39, %v2995_v21  ;;  %v2855_v21 = vmul.f32 1.442695, %v2405_v42  ;;  %v9118_v39 = vpop.xlane.xlu0 %3007 }
 0x60d   : > { %11761 = vst [vmem:[#allocation224_spill] sm:$0xff] %v9076_v54  ;;  %v9098_v14 = vpop.eup %5609  ;;  %5621 = vpow2.f32 %v2957_v10  ;;  %v9114_v54 = vmul.f32 1.442695, %v2277_v33  ;;  %v11774_v10 = vld [vmem:[#allocation65_spill] sm:$0xff] }
 0x60e   : > { %11762 = vst [vmem:[#allocation86_spill] sm:$0xff] %v9078_v18  ;;  %v9105_v22 = vpop.eup %5611  ;;  %5623 = vpow2.f32 %v2959_v59  ;;  %v3275_v45 = vadd.f32 %v9086_v2, %v3274_v15  ;;  %v11775_v15 = vld [vmem:[#allocation66_spill] sm:$0xff]  ;;  %v2857_v18 = vmul.f32 1.442695, %v2406_v37 }
 0x60f   : > { %11764 = vst [vmem:[#allocation167_spill] sm:$0xff] %v9084_v4  ;;  %v9112_v43 = vpop.eup %5613  ;;  %5625 = vpow2.f32 %v2961_v48 }
 0x610   : > { %11765 = vst [vmem:[#allocation145_spill] sm:$0xff] %v9086_v2  ;;  %v9120_v59 = vpop.eup %5615  ;;  %5627 = vrcp.f32 %v3208_v40  ;;  %v3276_v20 = vadd.f32 %v9098_v14, %v3275_v45  ;;  %v11777_v45 = vld [vmem:[#allocation182_spill] sm:$0xff] }
 0x611   : > { %11767 = vst [vmem:[#allocation225_spill] sm:$0xff] %v9092_v23  ;;  %v2205_v4 = vpop.xlane.xlu1 %2204  ;;  %v9125_v33 = vpop.eup %5617  ;;  %v3279_v23 = vadd.f32 %v9105_v22, %v9065_v35  ;;  %5629 = vpow2.f32 %v2853_v32 }
 0x612   : > { %11769 = vst [vmem:[#allocation87_spill] sm:$0xff] %v9096_v55  ;;  %v2210_v55 = vpop.xlane.xlu2 %2209  ;;  %v2459_v7 = vsub.f32 %v8436_v3, %v2205_v4  ;;  %v2460_v42 = vsub.f32 %v11776_v31, %v2205_v4  ;;  %v2461_v48 = vsub.f32 %v8478_v46, %v2205_v4  ;;  %v9132_v6 = vpop.eup %5619  ;;  %3277 = vadd.xlane.f32.xlu2 %v3276_v20  ;;  %5631 = vpow2.f32 %v2855_v21 }
 0x613   : > { %11770 = vst [vmem:[#allocation34_spill] sm:$0xff] %v9098_v14  ;;  %v2462_v37 = vsub.f32 %v8480_v56, %v2205_v4  ;;  %v2463_v40 = vsub.f32 %v8516_v44, %v2210_v55  ;;  %v2464_v2 = vsub.f32 %v11777_v45, %v2210_v55  ;;  %v9137_v14 = vpop.eup %5621  ;;  %5633 = vpow2.f32 %v2857_v18 }
 0x614   : > { %11772 = vst [vmem:[#allocation92_spill] sm:$0xff] %v9105_v22  ;;  %v2963_v3 = vmul.f32 1.442695, %v2459_v7  ;;  %v2965_v31 = vmul.f32 1.442695, %v2460_v42  ;;  %v9139_v46 = vpop.eup %5623  ;;  %v2465_v35 = vsub.f32 %v8550_v28, %v2210_v55  ;;  %v3284_v32 = vadd.f32 %v9137_v14, %v9132_v6  ;;  %v11779_v42 = vld [vmem:[#allocation240_spill] sm:$0xff] }
 0x615   : > { %11778 = vst [vmem:[#allocation64_spill] sm:$0xff] %v9137_v14  ;;  %v2967_v63 = vmul.f32 1.442695, %v2461_v48  ;;  %v2969_v22 = vmul.f32 1.442695, %v2462_v37  ;;  %v9144_v56 = vpop.eup %5625  ;;  %v2466_v44 = vsub.f32 %v8555_v25, %v2210_v55  ;;  %v3280_v20 = vadd.f32 %v9112_v43, %v3279_v23  ;;  %v11781_v23 = vld [vmem:[#allocation37_spill] sm:$0xff] }
 0x616   : > { %5635 = vpow2.f32 %v2963_v3  ;;  %v2971_v4 = vmul.f32 1.442695, %v2463_v40  ;;  %v9148_v7 = vpop.eup %5627  ;;  %v2973_v21 = vmul.f32 1.442695, %v2464_v2  ;;  %v3285_v18 = vadd.f32 %v9139_v46, %v3284_v32  ;;  %v9155_v48 = vpop.xlane.xlu0 %3212 }
 0x617   : > { %5637 = vpow2.f32 %v2965_v31  ;;  %v9153_v28 = vmul.f32 %v9125_v33, %v11779_v42  ;;  %v3074_v37 = vadd.f32 %v8893_v29, %v8883_v12  ;;  %v3069_v25 = vadd.f32 %v8865_v17, %v8859_v16  ;;  %v9165_v2 = vpop.eup %5629  ;;  %v11785_v17 = vld [vmem:[#allocation241_spill] sm:$0xff] }
 0x618   : > { %5639 = vpow2.f32 %v2967_v63  ;;  %v9163_v55 = vmul.f32 %v9148_v7, %v11781_v23  ;;  %11783 = vst [vmem:[#allocation196_spill] sm:$0xff] %v9165_v2  ;;  %v2975_v40 = vmul.f32 1.442695, %v2465_v35  ;;  %v3286_v45 = vadd.f32 %v9144_v56, %v3285_v18  ;;  %v9169_v32 = vpop.eup %5631  ;;  %v11787_v35 = vld [vmem:[#allocation69_spill] sm:$0xff] }
 0x619   : > { %11780 = vst [vmem:[#allocation191_spill] sm:$0xff] %v9153_v28  ;;  %5641 = vpow2.f32 %v2969_v22  ;;  %v3281_v63 = vadd.f32 %v9120_v59, %v3280_v20  ;;  %v3003_v3 = vpop.xlane.xlu1 %3002  ;;  %v2977_v42 = vmul.f32 1.442695, %v2466_v44  ;;  %v9175_v23 = vmul.f32 %v9125_v33, %v11785_v17  ;;  %v9177_v14 = vpop.eup %5633  ;;  %v11788_v20 = vld [vmem:[#allocation134_spill] sm:$0xff]  ;;  %v11790_v44 = vld [vmem:[#allocation91_spill] sm:$0xff]  ;;  %v11793_v22 = vld [vmem:[#allocation125_spill] sm:$0xff] }
 0x61a   : > { %11782 = vst [vmem:[#allocation197_spill] sm:$0xff] %v9163_v55  ;;  %v3083_v31 = vpop.xlane.xlu2 %3082  ;;  %5643 = vpow2.f32 %v2971_v4  ;;  %3287 = vadd.xlane.f32.xlu1 %v3286_v45  ;;  %v9183_v18 = vmul.f32 %v9148_v7, %v11788_v20  ;;  %v9187_v4 = vmul.f32 %v9125_v33, %v11790_v44  ;;  %v11792_v17 = vsub.f32 %v11774_v10, %v11773_v11  ;;  %v11794_v45 = vld [vmem:[#allocation243_spill] sm:$0xff]  ;;  %v11797_v44 = vld [vmem:[#allocation198_spill] sm:$0xff] }
 0x61b   : > { %11784 = vst [vmem:[#allocation230_spill] sm:$0xff] %v9169_v32  ;;  %5645 = vpow2.f32 %v2973_v21  ;;  %3282 = vadd.xlane.f32.xlu2 %v3281_v63  ;;  %v2407_v21 = vsub.f32 %v11793_v22, %v8618_v0  ;;  %v9201_v63 = vmul.f32 %v9148_v7, %v11794_v45  ;;  %v2408_v55 = vsub.f32 %v11797_v44, %v8618_v0  ;;  %v11799_v44 = vld [vmem:[#allocation36_spill] sm:$0xff] }
 0x61c   : > { %11786 = vst [vmem:[#allocation231_spill] sm:$0xff] %v9175_v23  ;;  %v9189_v29 = vpop.eup %5635  ;;  %v9194_v28 = vmul.f32 1.442695, %v11792_v17  ;;  %5647 = vrcp.f32 %v9118_v39  ;;  %v3070_v16 = vadd.f32 %v8868_v8, %v3069_v25  ;;  %v3075_v22 = vadd.f32 %v8910_v36, %v3074_v37  ;;  %v11800_v37 = vld [vmem:[#allocation115_spill] sm:$0xff] }
 0x61d   : > { %11789 = vst [vmem:[#allocation233_spill] sm:$0xff] %v9183_v18  ;;  %v9203_v20 = vpop.eup %5637  ;;  %5649 = vpow2.f32 %v2975_v40  ;;  %v11798_v40 = vsub.f32 %v11775_v15, %v11773_v11  ;;  %v2346_v10 = vsub.f32 %v11799_v44, %v11660_v34  ;;  %v2409_v18 = vsub.f32 %v11800_v37, %v8618_v0 }
 0x61e   : > { %11791 = vst [vmem:[#allocation238_spill] sm:$0xff] %v9187_v4  ;;  %v9210_v17 = vpop.eup %5639  ;;  %5651 = vpow2.f32 %v2977_v42  ;;  %v3289_v39 = vadd.f32 %v9203_v20, %v9189_v29  ;;  %v3139_v42 = vadd.f32 %v8971_v53, %v8955_v58  ;;  %v2859_v45 = vmul.f32 1.442695, %v2407_v21  ;;  %v3153_v4 = vpop.xlane.xlu0 %3152 }
 0x61f   : > { %11795 = vst [vmem:[#allocation133_spill] sm:$0xff] %v9201_v63  ;;  %v9217_v12 = vpop.eup %5641  ;;  %v9222_v25 = vmul.f32 1.442695, %v11798_v40  ;;  %5653 = vrcp.f32 %v3003_v3  ;;  %v2861_v40 = vmul.f32 1.442695, %v2408_v55  ;;  %v9236_v3 = vadd.f32 %v8879_v5, %v3070_v16 }
 0x620   : > { %11796 = vst [vmem:[#allocation235_spill] sm:$0xff] %v9203_v20  ;;  %v9228_v23 = vpop.eup %5643  ;;  %5655 = vrcp.f32 %v3083_v31  ;;  %v3290_v63 = vadd.f32 %v9210_v17, %v3289_v39  ;;  %v3219_v44 = vadd.f32 %v9165_v2, %v9018_v60  ;;  %v3076_v39 = vadd.f32 %v8919_v41, %v3075_v22  ;;  %v11815_v41 = vld [vmem:[#allocation38_spill] sm:$0xff] }
 0x621   : > { %v9233_v15 = vpop.eup %5645  ;;  %5657 = vrcp.f32 %v3153_v4  ;;  %v3088_v20 = vpop.xlane.xlu1 %3087  ;;  %v2737_v55 = vmul.f32 1.442695, %v2346_v10  ;;  %v3140_v16 = vadd.f32 %v8991_v24, %v3139_v42  ;;  %v9250_v4 = vadd.f32 %v9005_v50, %v8922_v38 }
 0x622   : > { %11801 = vst [vmem:[#allocation174_spill] sm:$0xff] %v9233_v15  ;;  %v3158_v34 = vpop.xlane.xlu2 %3157  ;;  %v5648_v53 = vpop.eup %5647  ;;  %5659 = vrcp.f32 %v3088_v20  ;;  %v3291_v21 = vadd.f32 %v9217_v12, %v3290_v63  ;;  %v3294_v31 = vadd.f32 %v9233_v15, %v9228_v23  ;;  %v11802_v63 = vld [vmem:[#allocation116_spill] sm:$0xff]  ;;  %v2863_v60 = vmul.f32 1.442695, %v2409_v18  ;;  %v11804_v15 = vld [vmem:[#allocation217_spill] sm:$0xff] }
 0x623   : > { %v9244_v37 = vpop.eup %5649  ;;  %2992 = vadd.xlane.f32.xlu2 %v9041_v49  ;;  %5661 = vrcp.f32 %v3158_v34  ;;  %v2410_v2 = vsub.f32 %v11802_v63, %v8618_v0  ;;  %v11803_v49 = vld [vmem:[#allocation52_spill] sm:$0xff]  ;;  %v3220_v42 = vadd.f32 %v9169_v32, %v3219_v44  ;;  %v9260_v24 = vmul.f32 %v5648_v53, %v11804_v15  ;;  %v11807_v44 = vld [vmem:[#allocation59_spill] sm:$0xff] }
 0x624   : > { %v9252_v20 = vpop.eup %5651  ;;  %5663 = vpow2.f32 %v2859_v45  ;;  %3292 = vadd.xlane.f32.xlu1 %v3291_v21  ;;  %v3295_v22 = vadd.f32 %v9244_v37, %v3294_v31  ;;  %v3383_v34 = vmul.f32 %v5648_v53, %v11803_v49  ;;  %v9275_v15 = vmul.f32 %v5648_v53, %v11807_v44  ;;  %v11814_v44 = vld [vmem:[#allocation232_spill] sm:$0xff] }
 0x625   : > { %v5654_v10 = vpop.eup %5653  ;;  %5665 = vpow2.f32 %v2861_v40  ;;  %v9278_v21 = vmul.f32 %v5648_v53, %v8271_v57 }
 0x626   : > { %v5656_v50 = vpop.eup %5655  ;;  %v3379_v38 = vmul.f32 %v5654_v10, %v8133_v61  ;;  %v3296_v58 = vadd.f32 %v9252_v20, %v3295_v22  ;;  %v9265_v0 = vmul.f32 %v5654_v10, %v8142_v51  ;;  %v9268_v18 = vmul.f32 %v5654_v10, %v8152_v62  ;;  %11808 = vst [vmem:[#allocation237_spill] sm:$0xff] %v9275_v15  ;;  %v11810_v62 = vld [vmem:[#allocation227_spill] sm:$0xff]  ;;  %v11812_v22 = vld [vmem:[#allocation153_spill] sm:$0xff] }
 0x627   : > { %v9270_v45 = vpop.eup %5657  ;;  %5667 = vrcp.f32 %v9155_v48  ;;  %v3443_v40 = vmul.f32 %v5656_v50, %v8277_v19  ;;  %11809 = vst [vmem:[#allocation63_spill] sm:$0xff] %v9278_v21  ;;  %v9283_v63 = vmul.f32 %v5656_v50, %v11810_v62  ;;  %v9286_v49 = vmul.f32 %v5654_v10, %v11812_v22  ;;  %v11818_v10 = vld [vmem:[#allocation183_spill] sm:$0xff] }
 0x628   : > { %11805 = vst [vmem:[#allocation90_spill] sm:$0xff] %v9265_v0  ;;  %v5660_v61 = vpop.eup %5659  ;;  %v3635_v31 = vpack.c.bf16 %v3383_v34, %v3379_v38  ;;  %3297 = vadd.xlane.f32.xlu0 %v3296_v58  ;;  %v9293_v57 = vmul.f32 %v9270_v45, %v11815_v41  ;;  %v11816_v38 = vld [vmem:[#allocation137_spill] sm:$0xff]  ;;  %v11819_v22 = vld [vmem:[#allocation39_spill] sm:$0xff]  ;;  %v11828_v0 = vld [vmem:[#allocation40_spill] sm:$0xff] }
 0x629   : > { %11806 = vst [vmem:[#allocation236_spill] sm:$0xff] %v9268_v18  ;;  %v9288_v48 = vpop.eup %5661  ;;  %v3447_v32 = vmul.f32 %v5660_v61, %v11814_v44  ;;  %v9296_v58 = vmul.f32 %v5660_v61, %v11816_v38  ;;  %v9308_v44 = vmul.f32 %v9270_v45, %v11819_v22  ;;  %v11821_v41 = vld [vmem:[#allocation189_spill] sm:$0xff] }
 0x62a   : > { %11811 = vst [vmem:[#allocation53_spill] sm:$0xff] %v9283_v63  ;;  %v3218_v19 = vpop.xlane.xlu2 %3217  ;;  %v9300_v34 = vpop.eup %5663  ;;  %3760 = vmatpush.bf16.msrb.mxu0 %v3635_v31  ;;  %v9304_v62 = vmul.f32 %v9288_v48, %v11818_v10  ;;  %v9312_v51 = vmul.f32 %v9288_v48, %v11821_v41  ;;  %v11826_v10 = vld [vmem:[#allocation79_spill] sm:$0xff]  ;;  %v11832_v31 = vld [vmem:[#allocation173_spill] sm:$0xff]  ;;  %v11834_v41 = vld [vmem:[#allocation184_spill] sm:$0xff] }
 0x62b   : > { %11813 = vst [vmem:[#allocation65_spill] sm:$0xff] %v9286_v49  ;;  %5669 = vrcp.f32 %v3218_v19  ;;  %v9314_v38 = vpop.eup %5665  ;;  %3077 = vadd.xlane.f32.xlu2 %v3076_v39  ;;  %v3667_v53 = vpack.c.bf16 %v3447_v32, %v3443_v40  ;;  %v11824_v19 = vld [vmem:[#allocation171_spill] sm:$0xff]  ;;  %v9322_v15 = vmul.f32 %v5660_v61, %v11826_v10  ;;  %v9331_v32 = vmul.f32 %v9270_v45, %v11828_v0  ;;  %v11830_v39 = vld [vmem:[#allocation41_spill] sm:$0xff] }
 0x62c   : > { %11817 = vst [vmem:[#allocation66_spill] sm:$0xff] %v9296_v58  ;;  %v9319_v18 = vmul.f32 %v5656_v50, %v11824_v19  ;;  %2997 = vadd.xlane.f32.xlu1 %v9103_v27  ;;  %v9335_v40 = vmul.f32 %v9288_v48, %v11830_v39  ;;  %v9342_v22 = vmul.f32 %v5656_v50, %v11832_v31  ;;  %5671 = vpow2.f32 %v2737_v55  ;;  %v11844_v50 = vld [vmem:[#allocation175_spill] sm:$0xff]  ;;  %v11909_v58 = vld [vmem:[#allocation145_spill] sm:$0xff] }
 0x62d   : > { %11820 = vst [vmem:[#allocation35_spill] sm:$0xff] %v9308_v44  ;;  %v5668_v19 = vpop.eup %5667  ;;  %3779 = vmatpush.bf16.msra.mxu1 %v3667_v53  ;;  %v9345_v44 = vmul.f32 %v5660_v61, %v11834_v41  ;;  %v2865_v0 = vmul.f32 1.442695, %v2410_v2  ;;  %5673 = vpow2.f32 %v2863_v60  ;;  %v3221_v53 = vadd.f32 %v9177_v14, %v3220_v42  ;;  %v11836_v61 = vld [vmem:[#allocation244_spill] sm:$0xff]  ;;  %v11837_v2 = vld [vmem:[#allocation245_spill] sm:$0xff]  ;;  %v11842_v42 = vld [vmem:[#allocation42_spill] sm:$0xff] }
 0x62e   : > { %11822 = vst [vmem:[#allocation182_spill] sm:$0xff] %v9312_v51  ;;  %v3141_v51 = vadd.f32 %v9001_v9, %v3140_v16  ;;  %v3145_v10 = vadd.f32 %v9012_v52, %v9250_v4  ;;  %v3547_v55 = vmul.f32 %v5668_v19, %v11836_v61  ;;  %v9358_v41 = vmul.f32 %v5668_v19, %v11837_v2  ;;  %v11838_v16 = vld [vmem:[#allocation45_spill] sm:$0xff]  ;;  %v11843_v4 = vld [vmem:[#allocation192_spill] sm:$0xff]  ;;  %v11848_v2 = vld [vmem:[#allocation239_spill] sm:$0xff] }
 0x62f   : > { %11823 = vst [vmem:[#allocation240_spill] sm:$0xff] %v9314_v38  ;;  %v9361_v27 = vmul.f32 %v5668_v19, %v11838_v16  ;;  %v11840_v60 = vld [vmem:[#allocation93_spill] sm:$0xff]  ;;  %5675 = vpow2.f32 %v2865_v0  ;;  %v3224_v61 = vadd.f32 %v9314_v38, %v9300_v34  ;;  %v3539_v16 = vmul.f32 %v9125_v33, %v11848_v2  ;;  %v11907_v63 = vld [vmem:[#allocation219_spill] sm:$0xff] }
 0x630   : > { %11825 = vst [vmem:[#allocation37_spill] sm:$0xff] %v9319_v18  ;;  %3072 = vadd.xlane.f32.xlu0 %v9236_v3  ;;  %v9364_v39 = vmul.f32 %v5668_v19, %v11840_v60  ;;  %v11846_v3 = vld [vmem:[#allocation249_spill] sm:$0xff]  ;;  %v11849_v19 = vld [vmem:[#allocation242_spill] sm:$0xff]  ;;  %5677 = vpow2.f32 %v9194_v28  ;;  %v11873_v18 = vld [vmem:[#allocation200_spill] sm:$0xff] }
 0x631   : > { %11827 = vst [vmem:[#allocation241_spill] sm:$0xff] %v9322_v15  ;;  %v5670_v31 = vpop.eup %5669  ;;  %v3543_v60 = vmul.f32 %v9148_v7, %v11849_v19  ;;  %v11850_v7 = vsub.f32 %v11771_v26, %v11605_v30  ;;  %5679 = vpow2.f32 %v9222_v25  ;;  %v11853_v19 = vld [vmem:[#allocation147_spill] sm:$0xff]  ;;  %v11855_v26 = vsub.f32 %v11787_v35, %v11773_v11  ;;  %v11859_v35 = vld [vmem:[#allocation201_spill] sm:$0xff] }
 0x632   : > { %11829 = vst [vmem:[#allocation69_spill] sm:$0xff] %v9331_v32  ;;  %v3551_v49 = vmul.f32 %v5670_v31, %v11842_v42  ;;  %v9368_v21 = vmul.f32 %v5670_v31, %v11843_v4  ;;  %5681 = vpow2.f32 %v9114_v54  ;;  %v11856_v4 = vld [vmem:[#allocation234_spill] sm:$0xff]  ;;  %v11857_v54 = vld [vmem:[#allocation211_spill] sm:$0xff]  ;;  %v11858_v32 = vld [vmem:[#allocation229_spill] sm:$0xff] }
 0x633   : > { %11831 = vst [vmem:[#allocation134_spill] sm:$0xff] %v9335_v40  ;;  %3222 = vadd.xlane.f32.xlu2 %v3221_v53  ;;  %v3233_v53 = vpop.xlane.xlu1 %3232  ;;  %v2607_v25 = vmul.f32 1.442695, %v11855_v26 }
 0x634   : > { %11833 = vst [vmem:[#allocation91_spill] sm:$0xff] %v9342_v22  ;;  %v9371_v22 = vmul.f32 %v5670_v31, %v11844_v50  ;;  %v3719_v42 = vpack.c.bf16 %v3551_v49, %v3547_v55  ;;  %3142 = vadd.xlane.f32.xlu1 %v3141_v51  ;;  %v2601_v49 = vmul.f32 1.442695, %v11850_v7  ;;  %v11851_v55 = vld [vmem:[#allocation210_spill] sm:$0xff]  ;;  %v11852_v51 = vld [vmem:[#allocation49_spill] sm:$0xff]  ;;  %v11854_v50 = vld [vmem:[#allocation68_spill] sm:$0xff]  ;;  %v3715_v7 = vpack.c.bf16 %v3543_v60, %v3539_v16 }
 0x635   : > { %11835 = vst [vmem:[#allocation125_spill] sm:$0xff] %v9345_v44  ;;  %v9374_v44 = vmul.f32 %v5670_v31, %v11846_v3  ;;  %v9388_v31 = vpop.eup %5671  ;;  %v2985_v3 = vadd.f32 %v11851_v55, %v9036_v1  ;;  %v2979_v0 = vadd.f32 %v11853_v19, %v11852_v51  ;;  %v2282_v30 = vsub.f32 %v11854_v50, %v11773_v11  ;;  %v11861_v60 = vld [vmem:[#allocation206_spill] sm:$0xff] }
 0x636   : > { %11839 = vst [vmem:[#allocation243_spill] sm:$0xff] %v9361_v27  ;;  %v9391_v33 = vpop.eup %5673  ;;  %3793 = vmatpush.bf16.msra.mxu2 %v3719_v42  ;;  %v3146_v2 = vadd.f32 %v9388_v31, %v3145_v10  ;;  %v3535_v1 = vmul.f32 %v9053_v13, %v11856_v4  ;;  %5683 = vrcp.f32 %v3233_v53  ;;  %v3531_v50 = vmul.f32 %v9030_v47, %v11858_v32  ;;  %v11860_v13 = vld [vmem:[#allocation54_spill] sm:$0xff]  ;;  %v11863_v32 = vld [vmem:[#allocation139_spill] sm:$0xff] }
 0x637   : > { %11841 = vst [vmem:[#allocation198_spill] sm:$0xff] %v9364_v39  ;;  %v3225_v28 = vadd.f32 %v9391_v33, %v3224_v61  ;;  %v9411_v42 = vpop.eup %5675  ;;  %5685 = vpow2.f32 %v2601_v49  ;;  %v2986_v10 = vadd.f32 %v11857_v54, %v2985_v3  ;;  %v3238_v61 = vpop.xlane.xlu0 %3237  ;;  %v2980_v16 = vadd.f32 %v11859_v35, %v2979_v0  ;;  %v11876_v39 = vld [vmem:[#allocation142_spill] sm:$0xff] }
 0x638   : > { %11845 = vst [vmem:[#allocation36_spill] sm:$0xff] %v9371_v22  ;;  %3147 = vadd.xlane.f32.xlu0 %v3146_v2  ;;  %v9416_v40 = vpop.eup %5677  ;;  %5687 = vrcp.f32 %v3238_v61  ;;  %v3059_v4 = vadd.f32 %v11861_v60, %v11860_v13  ;;  %v2609_v49 = vmul.f32 1.442695, %v2282_v30  ;;  %v3711_v3 = vpack.c.bf16 %v3535_v1, %v3531_v50  ;;  %v11864_v1 = vld [vmem:[#allocation154_spill] sm:$0xff] }
 0x639   : > { %11847 = vst [vmem:[#allocation115_spill] sm:$0xff] %v9374_v44  ;;  %v3226_v11 = vadd.f32 %v9411_v42, %v3225_v28  ;;  %v9422_v53 = vpop.eup %5679  ;;  %5689 = vpow2.f32 %v2607_v25  ;;  %v2981_v26 = vadd.f32 %v11863_v32, %v2980_v16  ;;  %v11867_v50 = vld [vmem:[#allocation82_spill] sm:$0xff] }
 0x63a   : > { %3794 = vmatpush.bf16.msra.mxu2 %v3715_v7  ;;  %11862 = vst [vmem:[#allocation116_spill] sm:$0xff] %v9422_v53  ;;  %v9424_v2 = vpop.eup %5681  ;;  %v3064_v0 = vadd.f32 %v9422_v53, %v9416_v40  ;;  %5691 = vpow2.f32 %v2609_v49  ;;  %v11869_v16 = vld [vmem:[#allocation146_spill] sm:$0xff] }
 0x63b   : > { %2987 = vadd.xlane.f32.xlu2 %v2986_v10  ;;  %v3060_v28 = vadd.f32 %v9424_v2, %v3059_v4  ;;  %v11865_v10 = vld [vmem:[#allocation208_spill] sm:$0xff] }
 0x63c   : > { %3227 = vadd.xlane.f32.xlu1 %v3226_v11  ;;  %v9426_v47 = vpop.eup %5683  ;;  %v11866_v61 = vpack.c.bf16 %v11864_v1, %v11865_v10  ;;  %v11879_v10 = vld [vmem:[#allocation70_spill] sm:$0xff] }
 0x63d   : > { %v9432_v7 = vpop.eup %5685  ;;  %v9443_v11 = vmul.f32 %v9426_v47, %v11867_v50 }
 0x63e   : > { %3795 = vmatpush.bf16.msra.mxu2 %v3711_v3  ;;  %v9434_v25 = vpop.eup %5687  ;;  %v11871_v3 = vld [vmem:[#allocation25_spill] sm:$0xff]  ;;  %v3061_v15 = vadd.f32 %v9432_v7, %v3060_v28  ;;  %v11878_v28 = vld [vmem:[#allocation50_spill] sm:$0xff] }
 0x63f   : > { %v9436_v30 = vpop.eup %5689  ;;  %11868 = vst [vmem:[#allocation52_spill] sm:$0xff] %v9443_v11  ;;  %v9447_v4 = vmul.f32 %v9434_v25, %v11869_v16  ;;  %v9451_v49 = vmul.f32 %v9426_v47, %v11871_v3  ;;  %v3243_v50 = vpop.xlane.xlu0 %3242  ;;  %v11875_v3 = vld [vmem:[#allocation78_spill] sm:$0xff]  ;;  %v11880_v11 = vld [vmem:[#allocation61_spill] sm:$0xff] }
 0x640   : > { %2982 = vadd.xlane.f32.xlu0 %v2981_v26  ;;  %v9455_v26 = vmul.f32 %v9434_v25, %v11873_v18  ;;  %v3065_v1 = vadd.f32 %v9436_v30, %v3064_v0  ;;  %v9463_v16 = vpop.eup %5691  ;;  %v11877_v44 = vpack.c.bf16 %v11875_v3, %v11876_v39  ;;  %5693 = vrcp.f32 %v3243_v50  ;;  %v11883_v39 = vld [vmem:[#allocation56_spill] sm:$0xff] }
 0x641   : > { %11870 = vst [vmem:[#allocation217_spill] sm:$0xff] %v9447_v4  ;;  %v3503_v0 = vmul.f32 %v9288_v48, %v11878_v28  ;;  %v11885_v48 = vld [vmem:[#allocation60_spill] sm:$0xff] }
 0x642   : > { %3796 = vmatpush.bf16.msra.mxu2 %v11866_v61  ;;  %11872 = vst [vmem:[#allocation59_spill] sm:$0xff] %v9451_v49  ;;  %v3066_v18 = vadd.f32 %v9463_v16, %v3065_v1  ;;  %v11881_v61 = vpack.c.bf16 %v11879_v10, %v11880_v11  ;;  %v11887_v50 = vld [vmem:[#allocation28_spill] sm:$0xff]  ;;  %v11889_v10 = vld [vmem:[#allocation95_spill] sm:$0xff] }
 0x643   : > { %11874 = vst [vmem:[#allocation227_spill] sm:$0xff] %v9455_v26  ;;  %v3248_v60 = vpop.xlane.xlu2 %3247 }
 0x644   : > { %3062 = vadd.xlane.f32.xlu1 %v3061_v15  ;;  %5695 = vrcp.f32 %v3248_v60  ;;  %v11882_v15 = vld [vmem:[#allocation138_spill] sm:$0xff] }
 0x645   : > { %v3499_v49 = vmul.f32 %v9270_v45, %v11882_v15 }
 0x646   : > { %3797 = vmatpush.bf16.msra.mxu2 %v11877_v44  ;;  %v9476_v4 = vpop.eup %5693 }
 0x647   : > { %v3695_v26 = vpack.c.bf16 %v3503_v0, %v3499_v49  ;;  %v9482_v1 = vmul.f32 %v9476_v4, %v11883_v39  ;;  %v9490_v11 = vmul.f32 %v9476_v4, %v11887_v50  ;;  %v11891_v0 = vld [vmem:[#allocation43_spill] sm:$0xff]  ;;  %v11893_v39 = vld [vmem:[#allocation89_spill] sm:$0xff]  ;;  %v11895_v50 = vld [vmem:[#allocation44_spill] sm:$0xff] }
 0x648   : > { %3067 = vadd.xlane.f32.xlu0 %v3066_v18  ;;  %v11905_v49 = vld [vmem:[#allocation128_spill] sm:$0xff] }
 0x649   : > { %11884 = vst [vmem:[#allocation153_spill] sm:$0xff] %v9482_v1 }
 0x64a   : > { %3798 = vmatpush.bf16.msra.mxu2 %v11881_v61  ;;  %v9478_v44 = vpop.eup %5695  ;;  %11888 = vst [vmem:[#allocation38_spill] sm:$0xff] %v9490_v11 }
 0x64b   : > { %v9486_v60 = vmul.f32 %v9478_v44, %v11885_v48  ;;  %v9494_v45 = vmul.f32 %v9478_v44, %v11889_v10 }
 0x64d   : > { %11886 = vst [vmem:[#allocation232_spill] sm:$0xff] %v9486_v60 }
 0x64e   : > { %3799 = vmatpush.bf16.msra.mxu2 %v3695_v26  ;;  %11890 = vst [vmem:[#allocation137_spill] sm:$0xff] %v9494_v45  ;;  %v11897_v26 = vld [vmem:[#allocation32_spill] sm:$0xff] }
 0x64f   : > { %v3253_v61 = vpop.xlane.xlu2 %3252 }
 0x650   : > { %5697 = vrcp.f32 %v3253_v61 }
 0x654   : > { %v3258_v3 = vpop.xlane.xlu1 %3257 }
 0x655   : > { %5699 = vrcp.f32 %v3258_v3  ;;  %v11903_v3 = vld [vmem:[#allocation127_spill] sm:$0xff] }
 0x656   : > { %v9500_v18 = vpop.eup %5697 }
 0x657   : > { %v9506_v15 = vmul.f32 %v9500_v18, %v11891_v0  ;;  %v9514_v10 = vmul.f32 %v9500_v18, %v11895_v50  ;;  %v11899_v50 = vld [vmem:[#allocation216_spill] sm:$0xff] }
 0x659   : > { %11892 = vst [vmem:[#allocation183_spill] sm:$0xff] %v9506_v15 }
 0x65a   : > { %11896 = vst [vmem:[#allocation189_spill] sm:$0xff] %v9514_v10 }
 0x65b   : > { %v9502_v28 = vpop.eup %5699 }
 0x65c   : > { %v9510_v48 = vmul.f32 %v9502_v28, %v11893_v39  ;;  %v9518_v61 = vmul.f32 %v9502_v28, %v11897_v26  ;;  %v11901_v26 = vld [vmem:[#allocation123_spill] sm:$0xff] }
 0x65e   : > { %11894 = vst [vmem:[#allocation39_spill] sm:$0xff] %v9510_v48 }
 0x65f   : > { %11898 = vst [vmem:[#allocation171_spill] sm:$0xff] %v9518_v61 }
 0x663   : > { %v3268_v0 = vpop.xlane.xlu0 %3267 }
 0x664   : > { %5701 = vrcp.f32 %v3268_v0 }
 0x66a   : > { %v3263_v11 = vpop.xlane.xlu1 %3262  ;;  %v9524_v39 = vpop.eup %5701 }
 0x66b   : > { %5703 = vrcp.f32 %v3263_v11  ;;  %v9534_v60 = vmul.f32 %v9524_v39, %v11901_v26  ;;  %v9542_v0 = vmul.f32 %v9524_v39, %v11905_v49 }
 0x66d   : > { %11902 = vst [vmem:[#allocation40_spill] sm:$0xff] %v9534_v60 }
 0x66e   : > { %11906 = vst [vmem:[#allocation173_spill] sm:$0xff] %v9542_v0 }
 0x671   : > { %v9526_v45 = vpop.eup %5703 }
 0x672   : > { %v9530_v1 = vmul.f32 %v9526_v45, %v11899_v50  ;;  %v9538_v15 = vmul.f32 %v9526_v45, %v11903_v3 }
 0x674   : > { %11900 = vst [vmem:[#allocation79_spill] sm:$0xff] %v9530_v1  ;;  %v11911_v1 = vld [vmem:[#allocation34_spill] sm:$0xff] }
 0x675   : > { %11904 = vst [vmem:[#allocation41_spill] sm:$0xff] %v9538_v15 }
 0x67a   : > { %v3273_v50 = vpop.xlane.xlu0 %3272 }
 0x67b   : > { %5705 = vrcp.f32 %v3273_v50 }
 0x681   : > { %v9548_v26 = vpop.eup %5705 }
 0x682   : > { %v9554_v49 = vmul.f32 %v9548_v26, %v11907_v63 }
 0x684   : > { %11908 = vst [vmem:[#allocation184_spill] sm:$0xff] %v9554_v49 }
 0x685   : > { %v3278_v61 = vpop.xlane.xlu2 %3277 }
 0x686   : > { %5707 = vrcp.f32 %v3278_v61  ;;  %v11913_v61 = vld [vmem:[#allocation85_spill] sm:$0xff] }
 0x687   : > { %v9566_v50 = vmul.f32 %v9548_v26, %v11913_v61 }
 0x689   : > { %11914 = vst [vmem:[#allocation45_spill] sm:$0xff] %v9566_v50 }
 0x68c   : > { %v9550_v48 = vpop.eup %5707 }
 0x68d   : > { %v3288_v3 = vpop.xlane.xlu1 %3287  ;;  %v9558_v11 = vmul.f32 %v9550_v48, %v11909_v58  ;;  %v9562_v10 = vmul.f32 %v9550_v48, %v11911_v1 }
 0x68e   : > { %v3283_v53 = vpop.xlane.xlu2 %3282  ;;  %5709 = vrcp.f32 %v3288_v3 }
 0x68f   : > { %11910 = vst [vmem:[#allocation244_spill] sm:$0xff] %v9558_v11  ;;  %5711 = vrcp.f32 %v3283_v53 }
 0x690   : > { %11912 = vst [vmem:[#allocation245_spill] sm:$0xff] %v9562_v10 }
 0x694   : > { %v9572_v0 = vpop.eup %5709 }
 0x695   : > { %v9574_v58 = vpop.eup %5711  ;;  %v9578_v1 = vmul.f32 %v9572_v0, %v9139_v46  ;;  %v9582_v3 = vmul.f32 %v9572_v0, %v9144_v56 }
 0x696   : > { %v2993_v60 = vpop.xlane.xlu2 %2992  ;;  %v9586_v61 = vmul.f32 %v9574_v58, %v9112_v43  ;;  %v9590_v63 = vmul.f32 %v9574_v58, %v9120_v59 }
 0x697   : > { %11915 = vst [vmem:[#allocation93_spill] sm:$0xff] %v9578_v1  ;;  %v3293_v53 = vpop.xlane.xlu1 %3292 }
 0x698   : > { %11916 = vst [vmem:[#allocation42_spill] sm:$0xff] %v9582_v3  ;;  %5713 = vrcp.f32 %v3293_v53 }
 0x699   : > { %11917 = vst [vmem:[#allocation192_spill] sm:$0xff] %v9586_v61  ;;  %v11925_v61 = vld [vmem:[#allocation119_spill] sm:$0xff] }
 0x69a   : > { %11918 = vst [vmem:[#allocation175_spill] sm:$0xff] %v9590_v63 }
 0x69b   : > { %v3298_v50 = vpop.xlane.xlu0 %3297 }
 0x69c   : > { %5715 = vrcp.f32 %v3298_v50 }
 0x69d   : > { %5717 = vrcp.f32 %v2993_v60 }
 0x69e   : > { %v3078_v56 = vpop.xlane.xlu2 %3077  ;;  %v9596_v10 = vpop.eup %5713 }
 0x69f   : > { %v2998_v49 = vpop.xlane.xlu1 %2997  ;;  %v3611_v59 = vmul.f32 %v9596_v10, %v9189_v29  ;;  %v9604_v53 = vmul.f32 %v9596_v10, %v9210_v17  ;;  %v3607_v17 = vmul.f32 %v9572_v0, %v9132_v6 }
 0x6a0   : > { %5719 = vrcp.f32 %v2998_v49  ;;  %v9614_v49 = vmul.f32 %v9596_v10, %v9217_v12 }
 0x6a1   : > { %5721 = vrcp.f32 %v3078_v56  ;;  %11919 = vst [vmem:[#allocation249_spill] sm:$0xff] %v9604_v53  ;;  %v11930_v53 = vld [vmem:[#allocation248_spill] sm:$0xff] }
 0x6a2   : > { %v9598_v43 = vpop.eup %5715  ;;  %11921 = vst [vmem:[#allocation242_spill] sm:$0xff] %v9614_v49  ;;  %v11929_v49 = vld [vmem:[#allocation224_spill] sm:$0xff] }
 0x6a3   : > { %v3073_v15 = vpop.xlane.xlu0 %3072  ;;  %v3615_v50 = vmul.f32 %v9598_v43, %v9228_v23  ;;  %v9610_v60 = vmul.f32 %v9598_v43, %v9244_v37  ;;  %v9618_v56 = vmul.f32 %v9598_v43, %v9252_v20  ;;  %v9620_v29 = vpop.eup %5717  ;;  %v11924_v23 = vld [vmem:[#allocation228_spill] sm:$0xff]  ;;  %v11928_v37 = vld [vmem:[#allocation107_spill] sm:$0xff] }
 0x6a4   : > { %11923 = vst [vmem:[#allocation49_spill] sm:$0xff] %v9620_v29  ;;  %5723 = vrcp.f32 %v3073_v15  ;;  %v3603_v63 = vmul.f32 %v9574_v58, %v11924_v23  ;;  %v3371_v6 = vmul.f32 %v9620_v29, %v11925_v61  ;;  %v11927_v23 = vld [vmem:[#allocation247_spill] sm:$0xff] }
 0x6a5   : > { %11920 = vst [vmem:[#allocation239_spill] sm:$0xff] %v9610_v60  ;;  %v3751_v46 = vpack.c.bf16 %v3615_v50, %v3611_v59  ;;  %v11926_v59 = vld [vmem:[#allocation168_spill] sm:$0xff]  ;;  %v9640_v1 = vmul.f32 %v9620_v29, %v11927_v23  ;;  %v11946_v23 = vld [vmem:[#allocation131_spill] sm:$0xff] }
 0x6a6   : > { %11922 = vst [vmem:[#allocation210_spill] sm:$0xff] %v9618_v56  ;;  %v9630_v3 = vpop.eup %5719  ;;  %v3223_v20 = vpop.xlane.xlu2 %3222  ;;  %v3599_v56 = vmul.f32 %v9550_v48, %v11929_v49  ;;  %v11932_v60 = vld [vmem:[#allocation140_spill] sm:$0xff]  ;;  %v11935_v49 = vld [vmem:[#allocation221_spill] sm:$0xff] }
 0x6a7   : > { %v9632_v11 = vpop.eup %5721  ;;  %3812 = vmatpush.bf16.msrb.mxu3 %v3751_v46  ;;  %v3143_v15 = vpop.xlane.xlu1 %3142  ;;  %v3375_v50 = vmul.f32 %v9630_v3, %v11926_v59  ;;  %v9644_v12 = vmul.f32 %v9630_v3, %v11928_v37  ;;  %v9650_v46 = vmul.f32 %v9620_v29, %v11930_v53  ;;  %v9654_v61 = vmul.f32 %v9630_v3, %v11932_v60  ;;  %v11934_v37 = vld [vmem:[#allocation33_spill] sm:$0xff] }
 0x6a8   : > { %5725 = vrcp.f32 %v3143_v15  ;;  %v3747_v59 = vpack.c.bf16 %v3607_v17, %v3603_v63  ;;  %v3439_v27 = vmul.f32 %v9632_v11, %v11934_v37  ;;  %v3595_v22 = vmul.f32 %v9548_v26, %v11935_v49  ;;  %v11936_v60 = vld [vmem:[#allocation205_spill] sm:$0xff]  ;;  %v11941_v49 = vld [vmem:[#allocation46_spill] sm:$0xff] }
 0x6a9   : > { %11931 = vst [vmem:[#allocation68_spill] sm:$0xff] %v9650_v46  ;;  %v3631_v38 = vpack.c.bf16 %v3375_v50, %v3371_v6  ;;  %v9674_v15 = vmul.f32 %v9632_v11, %v8910_v36  ;;  %v11939_v50 = vld [vmem:[#allocation122_spill] sm:$0xff] }
 0x6aa   : > { %11933 = vst [vmem:[#allocation234_spill] sm:$0xff] %v9654_v61  ;;  %v9658_v19 = vpop.eup %5723  ;;  %v3743_v37 = vpack.c.bf16 %v3599_v56, %v3595_v22  ;;  %v11944_v36 = vld [vmem:[#allocation214_spill] sm:$0xff] }
 0x6ab   : > { %v3148_v29 = vpop.xlane.xlu0 %3147  ;;  %3813 = vmatpush.bf16.msrb.mxu3 %v3747_v59  ;;  %3761 = vmatpush.bf16.msrb.mxu0 %v3631_v38  ;;  %v3435_v63 = vmul.f32 %v9658_v19, %v11936_v60  ;;  %v9670_v17 = vmul.f32 %v9658_v19, %v8868_v8  ;;  %v9678_v6 = vmul.f32 %v9658_v19, %v8879_v5  ;;  %v11945_v8 = vld [vmem:[#allocation73_spill] sm:$0xff] }
 0x6ac   : > { %5727 = vrcp.f32 %v3148_v29  ;;  %v9682_v59 = vmul.f32 %v9632_v11, %v11939_v50  ;;  %v3587_v60 = vmul.f32 %v9526_v45, %v11941_v49 }
 0x6ad   : > { %11937 = vst [vmem:[#allocation211_spill] sm:$0xff] %v9670_v17  ;;  %v3663_v38 = vpack.c.bf16 %v3439_v27, %v3435_v63  ;;  %5729 = vrcp.f32 %v3223_v20  ;;  %v11942_v27 = vld [vmem:[#allocation81_spill] sm:$0xff]  ;;  %v11943_v63 = vld [vmem:[#allocation150_spill] sm:$0xff] }
 0x6ae   : > { %11938 = vst [vmem:[#allocation229_spill] sm:$0xff] %v9678_v6  ;;  %v9690_v29 = vpop.eup %5725  ;;  %v2988_v5 = vpop.xlane.xlu2 %2987  ;;  %v3591_v22 = vmul.f32 %v9524_v39, %v11942_v27  ;;  %v3583_v49 = vmul.f32 %v9502_v28, %v11943_v63  ;;  %v466_v27 = vld [vmem:[%s6271_s27 + $0x10] sm:$0xff] }
 0x6af   : > { %11940 = vst [vmem:[#allocation201_spill] sm:$0xff] %v9682_v59  ;;  %3780 = vmatpush.bf16.msra.mxu1 %v3663_v38  ;;  %3814 = vmatpush.bf16.msrb.mxu3 %v3743_v37  ;;  %v3228_v50 = vpop.xlane.xlu1 %3227  ;;  %v3491_v20 = vmul.f32 %v9690_v29, %v11944_v36  ;;  %v3579_v38 = vmul.f32 %v9500_v18, %v11945_v8 }
 0x6b0   : > { %5731 = vrcp.f32 %v3228_v50  ;;  %v3739_v56 = vpack.c.bf16 %v3591_v22, %v3587_v60  ;;  %v9704_v37 = vmul.f32 %v9690_v29, %v11946_v23  ;;  %v11947_v50 = vld [vmem:[#allocation212_spill] sm:$0xff]  ;;  %v470_v22 = vld [vmem:[%s6271_s27 + $0x30] sm:$0xff]  ;;  %v9716_v36 = vmul.f32 %v9690_v29, %v9001_v9  ;;  %v11948_v23 = vld [vmem:[#allocation29_spill] sm:$0xff] }
 0x6b1   : > { %5733 = vrcp.f32 %v2988_v5  ;;  %v3735_v59 = vpack.c.bf16 %v3583_v49, %v3579_v38  ;;  %v9732_v61 = vpack.c.bf16 %v470_v22, %v466_v27  ;;  %v11950_v49 = vpack.c.bf16 %v9368_v21, %v9358_v41  ;;  %v11954_v41 = vld [vmem:[#allocation141_spill] sm:$0xff] }
 0x6b2   : > { %v9696_v53 = vpop.eup %5727  ;;  %v3567_v22 = vmul.f32 %v9434_v25, %v11954_v41  ;;  %v468_v41 = vld [vmem:[%s6271_s27 + $0x20] sm:$0xff] }
 0x6b3   : > { %v2983_v6 = vpop.xlane.xlu0 %2982  ;;  %3815 = vmatpush.bf16.msrb.mxu3 %v3739_v56  ;;  %v3495_v60 = vmul.f32 %v9696_v53, %v11947_v50  ;;  %v9712_v5 = vmul.f32 %v9696_v53, %v9012_v52  ;;  %v9720_v8 = vmul.f32 %v9696_v53, %v9388_v31  ;;  %v3575_v56 = vmul.f32 %v9478_v44, %v11948_v23  ;;  %v9724_v63 = vpop.eup %5729 }
 0x6b4   : > { %5735 = vrcp.f32 %v2983_v6  ;;  %v11949_v6 = vld [vmem:[#allocation26_spill] sm:$0xff] }
 0x6b5   : > { %v3691_v50 = vpack.c.bf16 %v3495_v60, %v3491_v20  ;;  %v3571_v23 = vmul.f32 %v9476_v4, %v11949_v6  ;;  %v11951_v20 = vld [vmem:[#allocation230_spill] sm:$0xff]  ;;  %v11955_v6 = vld [vmem:[#allocation101_spill] sm:$0xff] }
 0x6b6   : > { %v9730_v9 = vpop.eup %5731  ;;  %v9743_v38 = vmul.f32 %v9724_v63, %v11951_v20  ;;  %v464_v20 = vld [vmem:[%s6271_s27] sm:$0xff] }
 0x6b7   : > { %3800 = vmatpush.bf16.msra.mxu2 %v3691_v50  ;;  %3816 = vmatpush.bf16.msrb.mxu3 %v3735_v59  ;;  %v3063_v31 = vpop.xlane.xlu1 %3062  ;;  %v9736_v17 = vpop.eup %5733  ;;  %v9747_v60 = vmul.f32 %v9730_v9, %v9391_v33  ;;  %v9751_v59 = vmul.f32 %v9724_v63, %v9177_v14  ;;  %v9755_v27 = vmul.f32 %v9730_v9, %v9411_v42 }
 0x6b8   : > { %5737 = vrcp.f32 %v3063_v31  ;;  %v3731_v21 = vpack.c.bf16 %v3575_v56, %v3571_v23  ;;  %v3563_v33 = vmul.f32 %v9426_v47, %v11955_v6  ;;  %v11956_v31 = vld [vmem:[#allocation207_spill] sm:$0xff]  ;;  %v9780_v46 = vmul.f32 %v9736_v17, %v11851_v55 }
 0x6b9   : > { %11952 = vst [vmem:[#allocation54_spill] sm:$0xff] %v9751_v59  ;;  %v3367_v23 = vmul.f32 %v9736_v17, %v11956_v31  ;;  %v9791_v31 = vmul.f32 %v9736_v17, %v11857_v54  ;;  %v3559_v55 = vmul.f32 %v9730_v9, %v9300_v34  ;;  %v11962_v59 = vld [vmem:[#allocation174_spill] sm:$0xff]  ;;  %v11963_v54 = vld [vmem:[#allocation220_spill] sm:$0xff] }
 0x6ba   : > { %11953 = vst [vmem:[#allocation139_spill] sm:$0xff] %v9755_v27  ;;  %v9759_v50 = vpop.eup %5735  ;;  %3801 = vmatmul.bf16.vlgmr.msra.gmra.mxu2 %v9732_v61  ;;  %v3727_v52 = vpack.c.bf16 %v3567_v22, %v3563_v33  ;;  %v3555_v22 = vmul.f32 %v9724_v63, %v11963_v54  ;;  %v467_v34 = vld [vmem:[%s6271_s27 + $0x18] sm:$0xff] }
 0x6bb   : > { %3869 = vmatpush.bf16.msrb.mxu2 %v11950_v49  ;;  %v3068_v42 = vpop.xlane.xlu0 %3067  ;;  %3817 = vmatpush.bf16.msrb.mxu3 %v3731_v21  ;;  %v3363_v56 = vmul.f32 %v9759_v50, %v11852_v51  ;;  %v9776_v6 = vmul.f32 %v9759_v50, %v11859_v35  ;;  %v11957_v49 = vld [vmem:[#allocation197_spill] sm:$0xff]  ;;  %v11958_v21 = vld [vmem:[#allocation191_spill] sm:$0xff]  ;;  %v9787_v51 = vmul.f32 %v9759_v50, %v11863_v32  ;;  %v471_v33 = vld [vmem:[%s6271_s27 + $0x38] sm:$0xff] }
 0x6bc   : > { %5739 = vrcp.f32 %v3068_v42  ;;  %v11959_v14 = vpack.c.bf16 %v11957_v49, %v11958_v21  ;;  %11961 = vst [vmem:[#allocation208_spill] sm:$0xff] %v9791_v31  ;;  %v3616_v49 = vmul.f32 %v9598_v43, %v11962_v59  ;;  %v11967_v43 = vld [vmem:[#allocation218_spill] sm:$0xff]  ;;  %v11971_v32 = vld [vmem:[#allocation92_spill] sm:$0xff] }
 0x6bd   : > { %11960 = vst [vmem:[#allocation154_spill] sm:$0xff] %v9787_v51  ;;  %v3627_v35 = vpack.c.bf16 %v3367_v23, %v3363_v56  ;;  %v11964_v56 = vld [vmem:[#allocation31_spill] sm:$0xff]  ;;  %v11965_v23 = vld [vmem:[#allocation120_spill] sm:$0xff]  ;;  %v11968_v59 = vld [vmem:[#allocation222_spill] sm:$0xff]  ;;  %v3604_v54 = vmul.f32 %v9574_v58, %v11971_v32 }
 0x6be   : > { %v9803_v21 = vpop.eup %5737  ;;  %v11966_v42 = vpack.c.bf16 %v11964_v56, %v11965_v23  ;;  %v11972_v27 = vld [vmem:[#allocation64_spill] sm:$0xff]  ;;  %v9825_v23 = vpack.c.bf16 %v471_v33, %v467_v34 }
 0x6bf   : > { %3870 = vmatpush.bf16.msrb.mxu2 %v11959_v14  ;;  %v9799_v14 = vpack.c.bf16 %v468_v41, %v464_v20  ;;  %3762 = vmatpush.bf16.msrb.mxu0 %v3627_v35  ;;  %v11969_v20 = vpack.c.bf16 %v11967_v43, %v11968_v59  ;;  %v11970_v41 = vld [vmem:[#allocation235_spill] sm:$0xff]  ;;  %v3608_v51 = vmul.f32 %v9572_v0, %v11972_v27  ;;  %v465_v43 = vld [vmem:[%s6271_s27 + $0x8] sm:$0xff]  ;;  %v11977_v33 = vld [vmem:[#allocation48_spill] sm:$0xff] }
 0x6c0   : > { %3818 = vmatpush.bf16.msrb.mxu3 %v3727_v52  ;;  %v3612_v35 = vmul.f32 %v9596_v10, %v11970_v41  ;;  %v3723_v52 = vpack.c.bf16 %v3559_v55, %v3555_v22  ;;  %v9831_v10 = vmul.f32 %v9803_v21, %v9424_v2  ;;  %v469_v0 = vld [vmem:[%s6271_s27 + $0x28] sm:$0xff]  ;;  %v474_v27 = vld [vmem:[%s6271_s27 + $0x50] sm:$0xff]  ;;  %v11974_v22 = vld [vmem:[#allocation185_spill] sm:$0xff] }
 0x6c1   : > { %v478_v55 = vld [vmem:[%s6271_s27 + $0x70] sm:$0xff]  ;;  %v11973_v2 = vld [vmem:[#allocation186_spill] sm:$0xff] }
 0x6c2   : > { %v9821_v31 = vpop.eup %5739  ;;  %v3752_v56 = vpack.c.bf16 %v3616_v49, %v3612_v35  ;;  %3763 = vmatmul.bf16.vlgmr.msrb.gmra.mxu0 %v9799_v14  ;;  %v11975_v34 = vpack.c.bf16 %v11973_v2, %v11974_v22  ;;  %v9863_v41 = vpack.c.bf16 %v478_v55, %v474_v27  ;;  %v3748_v35 = vpack.c.bf16 %v3608_v51, %v3604_v54  ;;  %v11983_v22 = vld [vmem:[#allocation193_spill] sm:$0xff]  ;;  %v11990_v51 = vld [vmem:[#allocation47_spill] sm:$0xff] }
 0x6c3   : > { %3831 = vmatpush.bf16.msra.mxu0 %v11966_v42  ;;  %3871 = vmatpush.bf16.msrb.mxu2 %v11969_v20  ;;  %v3427_v42 = vmul.f32 %v9803_v21, %v11860_v13  ;;  %v3431_v58 = vmul.f32 %v9821_v31, %v9416_v40  ;;  %v9840_v49 = vmul.f32 %v9821_v31, %v9436_v30  ;;  %v11976_v40 = vld [vmem:[#allocation151_spill] sm:$0xff]  ;;  %v472_v27 = vld [vmem:[%s6271_s27 + $0x40] sm:$0xff] }
 0x6c4   : > { %3819 = vmatpush.bf16.msrb.mxu3 %v3723_v52  ;;  %v9844_v13 = vmul.f32 %v9803_v21, %v9432_v7  ;;  %v9848_v32 = vmul.f32 %v9821_v31, %v9463_v16  ;;  %v11978_v59 = vpack.c.bf16 %v11976_v40, %v11977_v33  ;;  %v9861_v16 = vpack.c.bf16 %v469_v0, %v465_v43  ;;  %v11979_v52 = vld [vmem:[#allocation86_spill] sm:$0xff]  ;;  %v11986_v33 = vld [vmem:[#allocation77_spill] sm:$0xff]  ;;  %v11989_v43 = vld [vmem:[#allocation223_spill] sm:$0xff] }
 0x6c5   : > { %v3659_v20 = vpack.c.bf16 %v3431_v58, %v3427_v42  ;;  %v3661_v30 = vpack.c.bf16 %v9840_v49, %v9831_v10  ;;  %v11980_v42 = vld [vmem:[#allocation110_spill] sm:$0xff]  ;;  %v11981_v58 = vld [vmem:[#allocation108_spill] sm:$0xff]  ;;  %v3596_v0 = vmul.f32 %v9548_v26, %v11989_v43  ;;  %v3588_v54 = vmul.f32 %v9526_v45, %v11990_v51  ;;  %v476_v55 = vld [vmem:[%s6271_s27 + $0x60] sm:$0xff] }
 0x6c6   : > { %v11982_v2 = vpack.c.bf16 %v11980_v42, %v11981_v58  ;;  %v11997_v26 = vld [vmem:[#allocation74_spill] sm:$0xff]  ;;  %v12002_v43 = vld [vmem:[#allocation97_spill] sm:$0xff]  ;;  %v475_v51 = vld [vmem:[%s6271_s27 + $0x58] sm:$0xff] }
 0x6c7   : > { %3832 = vmatpush.bf16.msra.mxu0 %v11975_v34  ;;  %3872 = vmatpush.bf16.msrb.mxu2 %v11978_v59  ;;  %v11984_v34 = vld [vmem:[#allocation199_spill] sm:$0xff]  ;;  %v12155_v10 = vld [vmem:[#allocation169_spill] sm:$0xff]  ;;  %v12156_v49 = vld [vmem:[#allocation104_spill] sm:$0xff] }
 0x6c8   : > { %3888 = vmatpush.bf16.msra.mxu3 %v3752_v56  ;;  %3781 = vmatpush.bf16.msra.mxu1 %v3659_v20  ;;  %v3600_v56 = vmul.f32 %v9550_v48, %v11979_v52  ;;  %v11985_v40 = vpack.c.bf16 %v11983_v22, %v11984_v34  ;;  %v11987_v59 = vld [vmem:[#allocation75_spill] sm:$0xff]  ;;  %v11991_v20 = vld [vmem:[#allocation166_spill] sm:$0xff]  ;;  %v12000_v34 = vld [vmem:[#allocation148_spill] sm:$0xff] }
 0x6c9   : > { %3820 = vmatmul.bf16.vlgmr.msrb.gmra.mxu3 %v9825_v23  ;;  %v11988_v7 = vpack.c.bf16 %v11986_v33, %v11987_v59  ;;  %v11992_v52 = vld [vmem:[#allocation102_spill] sm:$0xff] }
 0x6ca   : > { %3806 = vmatmul.bf16.gmra.mxu2 %v9863_v41  ;;  %v3744_v48 = vpack.c.bf16 %v3600_v56, %v3596_v0  ;;  %v11993_v42 = vpack.c.bf16 %v11991_v20, %v11992_v52  ;;  %v3592_v56 = vmul.f32 %v9524_v39, %v12000_v34  ;;  %v12001_v33 = vld [vmem:[#allocation118_spill] sm:$0xff]  ;;  %v3584_v0 = vmul.f32 %v9502_v28, %v12002_v43  ;;  %v479_v20 = vld [vmem:[%s6271_s27 + $0x78] sm:$0xff]  ;;  %v12016_v43 = vld [vmem:[#allocation161_spill] sm:$0xff] }
 0x6cb   : > { %3833 = vmatpush.bf16.msra.mxu0 %v11982_v2  ;;  %3873 = vmatpush.bf16.msrb.mxu2 %v11988_v7  ;;  %v11994_v7 = vld [vmem:[#allocation136_spill] sm:$0xff]  ;;  %v11998_v2 = vld [vmem:[#allocation30_spill] sm:$0xff]  ;;  %v3496_v59 = vmul.f32 %v9696_v53, %v12001_v33  ;;  %v12010_v53 = vld [vmem:[#allocation157_spill] sm:$0xff] }
 0x6cc   : > { %3850 = vmatpush.bf16.msrb.mxu1 %v11985_v40  ;;  %3889 = vmatpush.bf16.msra.mxu3 %v3748_v35  ;;  %v11995_v35 = vld [vmem:[#allocation181_spill] sm:$0xff]  ;;  %v11999_v22 = vpack.c.bf16 %v11997_v26, %v11998_v2  ;;  %v9895_v40 = vpack.c.bf16 %v476_v55, %v472_v27  ;;  %v3740_v45 = vpack.c.bf16 %v3592_v56, %v3588_v54  ;;  %v12003_v52 = vld [vmem:[#allocation96_spill] sm:$0xff]  ;;  %v12013_v56 = vld [vmem:[#allocation83_spill] sm:$0xff] }
 0x6cd   : > { %3782 = vmatmul.bf16.vlgmr.msra.gmra.mxu1 %v9861_v16  ;;  %v11996_v58 = vpack.c.bf16 %v11994_v7, %v11995_v35  ;;  %v12007_v35 = vld [vmem:[#allocation62_spill] sm:$0xff]  ;;  %v12009_v54 = vpack.c.bf16 %v9304_v62, %v9293_v57  ;;  %v3492_v27 = vmul.f32 %v9690_v29, %v12010_v53  ;;  %v12011_v28 = vld [vmem:[#allocation204_spill] sm:$0xff]  ;;  %v3576_v57 = vmul.f32 %v9478_v44, %v12013_v56  ;;  %v12023_v44 = vld [vmem:[#allocation243_spill] sm:$0xff] }
 0x6ce   : > { %v3580_v55 = vmul.f32 %v9500_v18, %v12011_v28  ;;  %v12012_v26 = vld [vmem:[#allocation124_spill] sm:$0xff]  ;;  %v473_v62 = vld [vmem:[%s6271_s27 + $0x48] sm:$0xff]  ;;  %v12032_v56 = vld [vmem:[#allocation233_spill] sm:$0xff] }
 0x6cf   : > { %3834 = vmatpush.bf16.msra.mxu0 %v11993_v42  ;;  %3874 = vmatpush.bf16.msrb.mxu2 %v11999_v22  ;;  %v12004_v42 = vld [vmem:[#allocation94_spill] sm:$0xff]  ;;  %v3376_v2 = vmul.f32 %v9630_v3, %v12012_v26  ;;  %v3692_v22 = vpack.c.bf16 %v3496_v59, %v3492_v27  ;;  %v12017_v18 = vld [vmem:[#allocation164_spill] sm:$0xff]  ;;  %v12021_v59 = vld [vmem:[#allocation27_spill] sm:$0xff] }
 0x6d0   : > { %3851 = vmatpush.bf16.msrb.mxu1 %v11996_v58  ;;  %3890 = vmatpush.bf16.msra.mxu3 %v3744_v48  ;;  %v12005_v7 = vpack.c.bf16 %v12003_v52, %v12004_v42  ;;  %v12006_v48 = vld [vmem:[#allocation67_spill] sm:$0xff]  ;;  %v9916_v58 = vpack.c.bf16 %v479_v20, %v475_v51  ;;  %v3736_v34 = vpack.c.bf16 %v3584_v0, %v3580_v55  ;;  %v12014_v33 = vld [vmem:[#allocation90_spill] sm:$0xff]  ;;  %v12020_v52 = vld [vmem:[#allocation49_spill] sm:$0xff] }
 0x6d1   : > { %v12008_v39 = vpack.c.bf16 %v12006_v48, %v12007_v35  ;;  %v12015_v29 = vpack.c.bf16 %v9260_v24, %v12014_v33  ;;  %v12018_v51 = vpack.c.bf16 %v12016_v43, %v12017_v18  ;;  %v12019_v20 = vld [vmem:[#allocation179_spill] sm:$0xff]  ;;  %v3572_v0 = vmul.f32 %v9476_v4, %v12021_v59  ;;  %v12022_v42 = vld [vmem:[#allocation36_spill] sm:$0xff]  ;;  %v12027_v28 = vld [vmem:[#allocation158_spill] sm:$0xff] }
 0x6d2   : > { %3768 = vmatmul.bf16.gmra.mxu0 %v9895_v40  ;;  %v3372_v3 = vmul.f32 %v12020_v52, %v12019_v20  ;;  %v12025_v35 = vld [vmem:[#allocation147_spill] sm:$0xff]  ;;  %v12026_v53 = vld [vmem:[#allocation144_spill] sm:$0xff]  ;;  %v12030_v26 = vld [vmem:[#allocation209_spill] sm:$0xff] }
 0x6d3   : > { %3835 = vmatpush.bf16.msra.mxu0 %v12005_v7  ;;  %3875 = vmatpush.bf16.msrb.mxu2 %v12009_v54  ;;  %v12024_v7 = vpack.c.bf16 %v12022_v42, %v12023_v44  ;;  %v3732_v54 = vpack.c.bf16 %v3576_v57, %v3572_v0  ;;  %v3568_v27 = vmul.f32 %v9434_v25, %v12026_v53  ;;  %v12028_v55 = vld [vmem:[#allocation152_spill] sm:$0xff]  ;;  %v12035_v25 = vld [vmem:[#allocation55_spill] sm:$0xff]  ;;  %v12038_v18 = vld [vmem:[#allocation53_spill] sm:$0xff] }
 0x6d4   : > { %3852 = vmatpush.bf16.msrb.mxu1 %v12008_v39  ;;  %3891 = vmatpush.bf16.msra.mxu3 %v3740_v45  ;;  %v477_v45 = vld [vmem:[%s6271_s27 + $0x68] sm:$0xff]  ;;  %v3632_v24 = vpack.c.bf16 %v3376_v2, %v3372_v3  ;;  %v3364_v39 = vmul.f32 %v9759_v50, %v12025_v35  ;;  %v12029_v4 = vpack.c.bf16 %v12027_v28, %v12028_v55  ;;  %v12042_v3 = vld [vmem:[#allocation121_spill] sm:$0xff]  ;;  %v12053_v55 = vld [vmem:[#allocation155_spill] sm:$0xff] }
 0x6d5   : > { %v9939_v48 = vpack.c.bf16 %v477_v45, %v473_v62  ;;  %v12033_v62 = vld [vmem:[#allocation231_spill] sm:$0xff]  ;;  %v3436_v57 = vmul.f32 %v9658_v19, %v12035_v25  ;;  %v12041_v52 = vld [vmem:[#allocation126_spill] sm:$0xff]  ;;  %v12044_v19 = vld [vmem:[#allocation196_spill] sm:$0xff] }
 0x6d6   : > { %v12034_v45 = vpack.c.bf16 %v12032_v56, %v12033_v62  ;;  %v12043_v59 = vpack.c.bf16 %v12041_v52, %v12042_v3  ;;  %v3556_v0 = vmul.f32 %v9724_v63, %v12044_v19  ;;  %v12045_v42 = vld [vmem:[#allocation225_spill] sm:$0xff]  ;;  %v12054_v63 = vld [vmem:[#allocation156_spill] sm:$0xff]  ;;  %v12062_v62 = vld [vmem:[#allocation246_spill] sm:$0xff] }
 0x6d7   : > { %3836 = vmatpush.bf16.msra.mxu0 %v12015_v29  ;;  %3876 = vmatpush.bf16.msrb.mxu2 %v3692_v22  ;;  %v3368_v22 = vmul.f32 %v9736_v17, %v12030_v26  ;;  %v12036_v29 = vld [vmem:[#allocation240_spill] sm:$0xff]  ;;  %v12037_v17 = vld [vmem:[#allocation66_spill] sm:$0xff]  ;;  %v12050_v53 = vld [vmem:[#allocation117_spill] sm:$0xff] }
 0x6d8   : > { %3853 = vmatpush.bf16.msrb.mxu1 %v12018_v51  ;;  %3892 = vmatpush.bf16.msra.mxu3 %v3736_v34  ;;  %v12031_v34 = vld [vmem:[#allocation58_spill] sm:$0xff]  ;;  %v3560_v43 = vmul.f32 %v9730_v9, %v12036_v29  ;;  %v12040_v51 = vld [vmem:[#allocation76_spill] sm:$0xff]  ;;  %v12056_v26 = vld [vmem:[#allocation239_spill] sm:$0xff] }
 0x6d9   : > { %3825 = vmatmul.bf16.gmra.mxu3 %v9916_v58  ;;  %v3564_v2 = vmul.f32 %v9426_v47, %v12031_v34  ;;  %v3628_v50 = vpack.c.bf16 %v3368_v22, %v3364_v39  ;;  %v12039_v47 = vpack.c.bf16 %v12037_v17, %v12038_v18  ;;  %v3440_v20 = vmul.f32 %v9632_v11, %v12040_v51  ;;  %v12046_v9 = vld [vmem:[#allocation84_spill] sm:$0xff]  ;;  %v12057_v22 = vld [vmem:[#allocation249_spill] sm:$0xff]  ;;  %v12065_v25 = vld [vmem:[#allocation143_spill] sm:$0xff] }
 0x6da   : > { %3877 = vmatmul.bf16.vlgmr.msrb.gmra.mxu2 %v9732_v61  ;;  %v12047_v44 = vpack.c.bf16 %v12045_v42, %v12046_v9  ;;  %v3724_v39 = vpack.c.bf16 %v3560_v43, %v3556_v0  ;;  %v12058_v34 = vpack.c.bf16 %v12056_v26, %v12057_v22  ;;  %v12060_v56 = vld [vmem:[#allocation72_spill] sm:$0xff]  ;;  %v12068_v29 = vld [vmem:[#allocation93_spill] sm:$0xff]  ;;  %v12071_v18 = vld [vmem:[#allocation106_spill] sm:$0xff] }
 0x6db   : > { %3945 = vmatpush.bf16.msra.mxu2 %v12024_v7  ;;  %3837 = vmatpush.bf16.msra.mxu0 %v3632_v24  ;;  %v3728_v33 = vpack.c.bf16 %v3568_v27, %v3564_v2  ;;  %v3664_v7 = vpack.c.bf16 %v3440_v20, %v3436_v57  ;;  %v12048_v24 = vld [vmem:[#allocation116_spill] sm:$0xff]  ;;  %v12051_v27 = vld [vmem:[#allocation187_spill] sm:$0xff]  ;;  %v12066_v57 = vld [vmem:[#allocation129_spill] sm:$0xff] }
 0x6dc   : > { %3854 = vmatpush.bf16.msrb.mxu1 %v12029_v4  ;;  %3893 = vmatpush.bf16.msra.mxu3 %v3732_v54  ;;  %v3432_v35 = vmul.f32 %v9821_v31, %v12048_v24  ;;  %v12049_v54 = vld [vmem:[#allocation206_spill] sm:$0xff]  ;;  %v12052_v28 = vpack.c.bf16 %v12050_v53, %v12051_v27  ;;  %v12055_v4 = vpack.c.bf16 %v12053_v55, %v12054_v63  ;;  %v12059_v31 = vld [vmem:[#allocation112_spill] sm:$0xff]  ;;  %v12075_v52 = vld [vmem:[#allocation135_spill] sm:$0xff] }
 0x6dd   : > { %3787 = vmatmul.bf16.gmra.mxu1 %v9939_v48  ;;  %v3428_v11 = vmul.f32 %v9803_v21, %v12049_v54  ;;  %v12061_v21 = vpack.c.bf16 %v12059_v31, %v12060_v56  ;;  %v12069_v43 = vld [vmem:[#allocation192_spill] sm:$0xff]  ;;  %v12074_v20 = vld [vmem:[#allocation178_spill] sm:$0xff]  ;;  %v12078_v19 = vld [vmem:[#allocation149_spill] sm:$0xff] }
 0x6de   : > { %v12070_v17 = vpack.c.bf16 %v12068_v29, %v12069_v43  ;;  %v12076_v3 = vpack.c.bf16 %v12074_v20, %v12075_v52  ;;  %v12080_v42 = vld [vmem:[#allocation244_spill] sm:$0xff]  ;;  %v12084_v24 = vld [vmem:[#allocation98_spill] sm:$0xff]  ;;  %v12090_v27 = vld [vmem:[#allocation35_spill] sm:$0xff]  ;;  %v12108_v29 = vpack.c.bf16 %v9644_v12, %v9640_v1 }
 0x6df   : > { %3946 = vmatpush.bf16.msra.mxu2 %v12034_v45  ;;  %3838 = vmatpush.bf16.msra.mxu0 %v3628_v50  ;;  %v3660_v2 = vpack.c.bf16 %v3432_v35, %v3428_v11  ;;  %v12063_v45 = vld [vmem:[#allocation194_spill] sm:$0xff]  ;;  %v12081_v9 = vld [vmem:[#allocation184_spill] sm:$0xff]  ;;  %v12093_v63 = vld [vmem:[#allocation79_spill] sm:$0xff] }
 0x6e0   : > { %3855 = vmatpush.bf16.msrb.mxu1 %v12039_v47  ;;  %3894 = vmatpush.bf16.msra.mxu3 %v3728_v33  ;;  %v12064_v50 = vpack.c.bf16 %v12062_v62, %v12063_v45  ;;  %v12067_v33 = vpack.c.bf16 %v12065_v25, %v12066_v57  ;;  %v12072_v47 = vld [vmem:[#allocation103_spill] sm:$0xff]  ;;  %v12087_v54 = vld [vmem:[#allocation170_spill] sm:$0xff]  ;;  %v12092_v55 = vld [vmem:[#allocation40_spill] sm:$0xff] }
 0x6e1   : > { %v12073_v51 = vpack.c.bf16 %v12071_v18, %v12072_v47  ;;  %v12089_v53 = vld [vmem:[#allocation182_spill] sm:$0xff]  ;;  %v12095_v26 = vld [vmem:[#allocation237_spill] sm:$0xff]  ;;  %v12096_v22 = vld [vmem:[#allocation236_spill] sm:$0xff] }
 0x6e2   : > { %3839 = vmatmul.bf16.vlgmr.msra.gmra.mxu0 %v9799_v14  ;;  %v12099_v31 = vld [vmem:[#allocation162_spill] sm:$0xff]  ;;  %v12102_v62 = vld [vmem:[#allocation39_spill] sm:$0xff]  ;;  %v12119_v1 = vld [vmem:[#allocation241_spill] sm:$0xff] }
 0x6e3   : > { %3907 = vmatpush.bf16.msrb.mxu0 %v12043_v59  ;;  %3947 = vmatpush.bf16.msra.mxu2 %v12047_v44  ;;  %v12077_v59 = vld [vmem:[#allocation202_spill] sm:$0xff]  ;;  %v12082_v44 = vpack.c.bf16 %v12080_v42, %v12081_v9  ;;  %v12103_v45 = vld [vmem:[#allocation183_spill] sm:$0xff]  ;;  %v12120_v12 = vld [vmem:[#allocation37_spill] sm:$0xff] }
 0x6e4   : > { %3856 = vmatpush.bf16.msrb.mxu1 %v3664_v7  ;;  %3895 = vmatpush.bf16.msra.mxu3 %v3724_v39  ;;  %v12079_v0 = vpack.c.bf16 %v12077_v59, %v12078_v19  ;;  %v12083_v7 = vld [vmem:[#allocation100_spill] sm:$0xff]  ;;  %v12105_v25 = vld [vmem:[#allocation115_spill] sm:$0xff]  ;;  %v12106_v57 = vld [vmem:[#allocation198_spill] sm:$0xff]  ;;  %v12121_v59 = vpack.c.bf16 %v12119_v1, %v12120_v12 }
 0x6e5   : > { %v12085_v35 = vpack.c.bf16 %v12083_v7, %v12084_v24  ;;  %v12086_v39 = vld [vmem:[#allocation176_spill] sm:$0xff]  ;;  %v12109_v43 = vld [vmem:[#allocation159_spill] sm:$0xff]  ;;  %v12116_v20 = vld [vmem:[#allocation238_spill] sm:$0xff] }
 0x6e6   : > { %v12088_v11 = vpack.c.bf16 %v12086_v39, %v12087_v54  ;;  %v12122_v19 = vld [vmem:[#allocation217_spill] sm:$0xff]  ;;  %v12125_v9 = vld [vmem:[#allocation130_spill] sm:$0xff]  ;;  %v12128_v24 = vld [vmem:[#allocation87_spill] sm:$0xff]  ;;  %v12133_v54 = vpack.c.bf16 %v9747_v60, %v9743_v38 }
 0x6e7   : > { %3908 = vmatpush.bf16.msrb.mxu0 %v12052_v28  ;;  %3948 = vmatpush.bf16.msra.mxu2 %v12055_v4  ;;  %v12091_v28 = vpack.c.bf16 %v12089_v53, %v12090_v27  ;;  %v12094_v4 = vpack.c.bf16 %v12092_v55, %v12093_v63  ;;  %v12135_v53 = vld [vmem:[#allocation190_spill] sm:$0xff]  ;;  %v12138_v55 = vld [vmem:[#allocation80_spill] sm:$0xff]  ;;  %v12146_v60 = vld [vmem:[#allocation195_spill] sm:$0xff] }
 0x6e8   : > { %3964 = vmatpush.bf16.msrb.mxu3 %v12058_v34  ;;  %3857 = vmatpush.bf16.msrb.mxu1 %v3660_v2  ;;  %v12097_v34 = vpack.c.bf16 %v12095_v26, %v12096_v22  ;;  %v12098_v2 = vld [vmem:[#allocation165_spill] sm:$0xff]  ;;  %v12141_v26 = vld [vmem:[#allocation242_spill] sm:$0xff]  ;;  %v12171_v1 = vld [vmem:[#allocation172_spill] sm:$0xff] }
 0x6e9   : > { %3896 = vmatmul.bf16.vlgmr.msra.gmra.mxu3 %v9825_v23  ;;  %v12100_v56 = vpack.c.bf16 %v12098_v2, %v12099_v31  ;;  %v12147_v2 = vld [vmem:[#allocation114_spill] sm:$0xff] }
 0x6ea   : > { %3882 = vmatmul.bf16.gmra.mxu2 %v9863_v41  ;;  %v12148_v31 = vpack.c.bf16 %v12146_v60, %v12147_v2  ;;  %v12199_v60 = vld [vmem:[#allocation154_spill] sm:$0xff] }
 0x6eb   : > { %3909 = vmatpush.bf16.msrb.mxu0 %v12061_v21  ;;  %3949 = vmatpush.bf16.msra.mxu2 %v12067_v33  ;;  %v12101_v21 = vpack.c.bf16 %v9712_v5, %v9704_v37  ;;  %v12107_v33 = vpack.c.bf16 %v12105_v25, %v12106_v57  ;;  %v12112_v37 = vld [vmem:[#allocation232_spill] sm:$0xff]  ;;  %v12113_v5 = vld [vmem:[#allocation153_spill] sm:$0xff] }
 0x6ec   : > { %3926 = vmatpush.bf16.msra.mxu1 %v12064_v50  ;;  %3965 = vmatpush.bf16.msrb.mxu3 %v12070_v17  ;;  %v12104_v50 = vpack.c.bf16 %v12102_v62, %v12103_v45  ;;  %v12110_v17 = vld [vmem:[#allocation57_spill] sm:$0xff]  ;;  %v12114_v47 = vpack.c.bf16 %v12112_v37, %v12113_v5  ;;  %v12152_v45 = vld [vmem:[#allocation42_spill] sm:$0xff]  ;;  %v12158_v57 = vld [vmem:[#allocation88_spill] sm:$0xff] }
 0x6ed   : > { %3858 = vmatmul.bf16.vlgmr.msrb.gmra.mxu1 %v9861_v16  ;;  %v12111_v18 = vpack.c.bf16 %v12109_v43, %v12110_v17  ;;  %v12161_v43 = vld [vmem:[#allocation203_spill] sm:$0xff]  ;;  %v12164_v37 = vld [vmem:[#allocation245_spill] sm:$0xff] }
 0x6ee   : > { %v12162_v17 = vld [vmem:[#allocation71_spill] sm:$0xff]  ;;  %v12165_v5 = vld [vmem:[#allocation45_spill] sm:$0xff] }
 0x6ef   : > { %3910 = vmatpush.bf16.msrb.mxu0 %v12073_v51  ;;  %3950 = vmatpush.bf16.msra.mxu2 %v12079_v0  ;;  %v12115_v51 = vld [vmem:[#allocation133_spill] sm:$0xff]  ;;  %v12123_v0 = vld [vmem:[#allocation52_spill] sm:$0xff] }
 0x6f0   : > { %3927 = vmatpush.bf16.msra.mxu1 %v12076_v3  ;;  %3966 = vmatpush.bf16.msrb.mxu3 %v12082_v44  ;;  %v12117_v52 = vpack.c.bf16 %v12115_v51, %v12116_v20  ;;  %v12118_v3 = vpack.c.bf16 %v9780_v46, %v9776_v6  ;;  %v12124_v42 = vpack.c.bf16 %v12122_v19, %v12123_v0  ;;  %v12126_v44 = vld [vmem:[#allocation111_spill] sm:$0xff]  ;;  %v12167_v51 = vld [vmem:[#allocation160_spill] sm:$0xff]  ;;  %v12174_v19 = vld [vmem:[#allocation69_spill] sm:$0xff] }
 0x6f1   : > { %v12127_v7 = vpack.c.bf16 %v12125_v9, %v12126_v44  ;;  %v12131_v46 = vld [vmem:[#allocation211_spill] sm:$0xff]  ;;  %v12177_v9 = vld [vmem:[#allocation41_spill] sm:$0xff] }
 0x6f2   : > { %3844 = vmatmul.bf16.gmra.mxu0 %v9895_v40  ;;  %v12132_v6 = vpack.c.bf16 %v9674_v15, %v12131_v46  ;;  %v12143_v15 = vld [vmem:[#allocation113_spill] sm:$0xff]  ;;  %v12168_v20 = vld [vmem:[#allocation99_spill] sm:$0xff]  ;;  %v12182_v46 = vld [vmem:[#allocation226_spill] sm:$0xff] }
 0x6f3   : > { %3911 = vmatpush.bf16.msrb.mxu0 %v12085_v35  ;;  %3951 = vmatpush.bf16.msra.mxu2 %v12091_v28  ;;  %v12129_v35 = vld [vmem:[#allocation167_spill] sm:$0xff]  ;;  %v12137_v28 = vld [vmem:[#allocation132_spill] sm:$0xff] }
 0x6f4   : > { %3928 = vmatpush.bf16.msra.mxu1 %v12088_v11  ;;  %3967 = vmatpush.bf16.msrb.mxu3 %v12094_v4  ;;  %v12130_v39 = vpack.c.bf16 %v12128_v24, %v12129_v35  ;;  %v12134_v11 = vld [vmem:[#allocation188_spill] sm:$0xff]  ;;  %v12139_v63 = vpack.c.bf16 %v12137_v28, %v12138_v55  ;;  %v12140_v4 = vld [vmem:[#allocation210_spill] sm:$0xff]  ;;  %v12179_v24 = vld [vmem:[#allocation63_spill] sm:$0xff] }
 0x6f5   : > { %v12136_v27 = vpack.c.bf16 %v12134_v11, %v12135_v53  ;;  %v12142_v22 = vpack.c.bf16 %v12140_v4, %v12141_v26  ;;  %v12180_v35 = vld [vmem:[#allocation65_spill] sm:$0xff]  ;;  %v12185_v11 = vpack.c.bf16 %v9720_v8, %v9716_v36  ;;  %v12186_v53 = vld [vmem:[#allocation171_spill] sm:$0xff]  ;;  %v12189_v55 = vld [vmem:[#allocation234_spill] sm:$0xff] }
 0x6f6   : > { %v12192_v26 = vld [vmem:[#allocation213_spill] sm:$0xff]  ;;  %v12198_v8 = vld [vmem:[#allocation208_spill] sm:$0xff] }
 0x6f7   : > { %3912 = vmatpush.bf16.msrb.mxu0 %v12097_v34  ;;  %3952 = vmatpush.bf16.msra.mxu2 %v12101_v21  ;;  %v12144_v34 = vld [vmem:[#allocation109_spill] sm:$0xff]  ;;  %v12200_v2 = vpack.c.bf16 %v12198_v8, %v12199_v60 }
 0x6f8   : > { %3929 = vmatpush.bf16.msra.mxu1 %v12100_v56  ;;  %3968 = vmatpush.bf16.msrb.mxu3 %v12104_v50  ;;  %v12145_v38 = vpack.c.bf16 %v12143_v15, %v12144_v34  ;;  %v12149_v56 = vld [vmem:[#allocation215_spill] sm:$0xff]  ;;  %v12150_v21 = vld [vmem:[#allocation105_spill] sm:$0xff] }
 0x6f9   : > { %3901 = vmatmul.bf16.gmra.mxu3 %v9916_v58  ;;  %v12151_v62 = vpack.c.bf16 %v12149_v56, %v12150_v21  ;;  %v12153_v50 = vld [vmem:[#allocation175_spill] sm:$0xff]  ;;  %v12195_v34 = vld [vmem:[#allocation137_spill] sm:$0xff] }
 0x6fa   : > { %3953 = vmatmul.bf16.vlgmr.msra.gmra.mxu2 %v9732_v61  ;;  %v12154_v25 = vpack.c.bf16 %v12152_v45, %v12153_v50  ;;  %v12202_v56 = vld [vmem:[#allocation91_spill] sm:$0xff] }
 0x6fb   : > { %4021 = vmatpush.bf16.msrb.mxu2 %v12107_v33  ;;  %3913 = vmatpush.bf16.msrb.mxu0 %v12108_v29  ;;  %v12159_v33 = vld [vmem:[#allocation180_spill] sm:$0xff]  ;;  %v12205_v45 = vld [vmem:[#allocation59_spill] sm:$0xff] }
 0x6fc   : > { %3930 = vmatpush.bf16.msra.mxu1 %v12111_v18  ;;  %3969 = vmatpush.bf16.msrb.mxu3 %v12114_v47  ;;  %v12160_v29 = vpack.c.bf16 %v12158_v57, %v12159_v33  ;;  %v12163_v18 = vpack.c.bf16 %v12161_v43, %v12162_v17  ;;  %v12166_v47 = vpack.c.bf16 %v12164_v37, %v12165_v5  ;;  %v10175_v57 = vld [vmem:[%s6254_s5 + $0x60] sm:$0xff]  ;;  %v10178_v33 = vld [vmem:[%s6254_s5 + $0x50] sm:$0xff]  ;;  %v12211_v43 = vld [vmem:[#allocation54_spill] sm:$0xff] }
 0x6fd   : > { %3863 = vmatmul.bf16.gmra.mxu1 %v9939_v48  ;;  %v12213_v37 = vpack.c.bf16 %v9848_v32, %v9844_v13  ;;  %v10194_v5 = vld [vmem:[%s6254_s5 + $0x58] sm:$0xff]  ;;  %v10213_v32 = vld [vmem:[%s6254_s5 + $0x20] sm:$0xff] }
 0x6fe   : > { %v10210_v13 = vld [vmem:[%s6254_s5 + $0x38] sm:$0xff] }
 0x6ff   : > { %4022 = vmatpush.bf16.msrb.mxu2 %v12117_v52  ;;  %3914 = vmatpush.bf16.msrb.mxu0 %v12118_v3  ;;  %v12169_v52 = vpack.c.bf16 %v12167_v51, %v12168_v20  ;;  %v12170_v3 = vld [vmem:[#allocation177_spill] sm:$0xff]  ;;  %v10204_v51 = vld [vmem:[%s6254_s5 + $0x48] sm:$0xff]  ;;  %v10217_v20 = vld [vmem:[%s6254_s5 + $0x10] sm:$0xff] }
 0x700   : > { %3931 = vmatpush.bf16.msra.mxu1 %v12121_v59  ;;  %3970 = vmatpush.bf16.msrb.mxu3 %v12124_v42  ;;  %v12172_v12 = vpack.c.bf16 %v12170_v3, %v12171_v1  ;;  %v12173_v59 = vld [vmem:[#allocation134_spill] sm:$0xff]  ;;  %v12176_v42 = vld [vmem:[#allocation173_spill] sm:$0xff]  ;;  %v10228_v3 = vld [vmem:[%s6254_s5 + $0x18] sm:$0xff] }
 0x701   : > { %v12175_v0 = vpack.c.bf16 %v12173_v59, %v12174_v19  ;;  %v12178_v44 = vpack.c.bf16 %v12176_v42, %v12177_v9  ;;  %v10232_v1 = vld [vmem:[%s6254_s5] sm:$0xff] }
 0x702   : > { %3915 = vmatmul.bf16.vlgmr.msrb.gmra.mxu0 %v9799_v14 }
 0x703   : > { %3983 = vmatpush.bf16.msra.mxu0 %v12127_v7  ;;  %4023 = vmatpush.bf16.msrb.mxu2 %v12130_v39  ;;  %v10132_v7 = vld [vmem:[%s6254_s5 + $0x70] sm:$0xff]  ;;  %v12181_v39 = vpack.c.bf16 %v12179_v24, %v12180_v35 }
 0x704   : > { %3932 = vmatpush.bf16.msra.mxu1 %v12132_v6  ;;  %3971 = vmatpush.bf16.msrb.mxu3 %v12133_v54  ;;  %v12183_v6 = vld [vmem:[#allocation163_spill] sm:$0xff] }
 0x705   : > { %v12184_v54 = vpack.c.bf16 %v12182_v46, %v12183_v6 }
 0x707   : > { %3984 = vmatpush.bf16.msra.mxu0 %v12136_v27  ;;  %4024 = vmatpush.bf16.msrb.mxu2 %v12139_v63  ;;  %v12187_v27 = vld [vmem:[#allocation189_spill] sm:$0xff]  ;;  %v12190_v63 = vld [vmem:[#allocation68_spill] sm:$0xff] }
 0x708   : > { %4040 = vmatpush.bf16.msra.mxu3 %v12142_v22  ;;  %3933 = vmatpush.bf16.msra.mxu1 %v3661_v30  ;;  %v12157_v30 = vpack.c.bf16 %v12155_v10, %v12156_v49  ;;  %v12188_v28 = vpack.c.bf16 %v12186_v53, %v12187_v27  ;;  %v12191_v4 = vpack.c.bf16 %v12189_v55, %v12190_v63  ;;  %v12193_v22 = vld [vmem:[#allocation51_spill] sm:$0xff]  ;;  %v12208_v10 = vld [vmem:[#allocation229_spill] sm:$0xff] }
 0x709   : > { %3972 = vmatmul.bf16.vlgmr.msrb.gmra.mxu3 %v9825_v23  ;;  %v12194_v15 = vpack.c.bf16 %v12192_v26, %v12193_v22 }
 0x70a   : > { %3958 = vmatmul.bf16.gmra.mxu2 %v9863_v41 }
 0x70b   : > { %3985 = vmatpush.bf16.msra.mxu0 %v12145_v38  ;;  %4025 = vmatpush.bf16.msrb.mxu2 %v12151_v62  ;;  %v12196_v38 = vld [vmem:[#allocation38_spill] sm:$0xff]  ;;  %v12204_v62 = vld [vmem:[#allocation227_spill] sm:$0xff] }
 0x70c   : > { %4002 = vmatpush.bf16.msrb.mxu1 %v12148_v31  ;;  %4041 = vmatpush.bf16.msra.mxu3 %v12154_v25  ;;  %v12197_v36 = vpack.c.bf16 %v12195_v34, %v12196_v38  ;;  %v12201_v31 = vld [vmem:[#allocation125_spill] sm:$0xff]  ;;  %v12206_v50 = vpack.c.bf16 %v12204_v62, %v12205_v45 }
 0x70d   : > { %3934 = vmatmul.bf16.vlgmr.msra.gmra.mxu1 %v9861_v16  ;;  %v12203_v21 = vpack.c.bf16 %v12201_v31, %v12202_v56  ;;  %v12207_v25 = vld [vmem:[#allocation201_spill] sm:$0xff] }
 0x70e   : > { %v12209_v49 = vpack.c.bf16 %v12207_v25, %v12208_v10 }
 0x70f   : > { %3986 = vmatpush.bf16.msra.mxu0 %v12157_v30  ;;  %4026 = vmatpush.bf16.msrb.mxu2 %v12163_v18  ;;  %v10171_v30 = vld [vmem:[%s6254_s5 + $0x78] sm:$0xff]  ;;  %v10185_v18 = vld [vmem:[%s6254_s5 + $0x68] sm:$0xff] }
 0x710   : > { %4003 = vmatpush.bf16.msrb.mxu1 %v12160_v29  ;;  %4042 = vmatpush.bf16.msra.mxu3 %v12166_v47  ;;  %v12210_v29 = vld [vmem:[#allocation139_spill] sm:$0xff]  ;;  %v10197_v47 = vld [vmem:[%s6254_s5 + $0x40] sm:$0xff] }
 0x711   : > { %v12212_v17 = vpack.c.bf16 %v12210_v29, %v12211_v43 }
 0x712   : > { %3920 = vmatmul.bf16.gmra.mxu0 %v9895_v40 }
 0x713   : > { %3987 = vmatpush.bf16.msra.mxu0 %v12169_v52  ;;  %4027 = vmatpush.bf16.msrb.mxu2 %v12175_v0  ;;  %v10221_v52 = vld [vmem:[%s6254_s5 + $0x28] sm:$0xff] }
 0x714   : > { %4004 = vmatpush.bf16.msrb.mxu1 %v12172_v12  ;;  %4043 = vmatpush.bf16.msra.mxu3 %v12178_v44 }
 0x717   : > { %3988 = vmatpush.bf16.msra.mxu0 %v12181_v39  ;;  %4028 = vmatpush.bf16.msrb.mxu2 %v12185_v11 }
 0x718   : > { %4005 = vmatpush.bf16.msrb.mxu1 %v12184_v54  ;;  %4044 = vmatpush.bf16.msra.mxu3 %v12188_v28 }
 0x719   : > { %3977 = vmatmul.bf16.gmra.mxu3 %v9916_v58 }
 0x71a   : > { %4029 = vmatmul.bf16.vlgmr.msrb.gmra.mxu2 %v9732_v61  ;;  %v10201_v61 = vld [vmem:[%s6254_s5 + $0x30] sm:$0xff] }
 0x71b   : > { %4129 = vmatpush.xpose.msra.mxu2 %v10132_v7  ;;  %3989 = vmatpush.bf16.msra.mxu0 %v12191_v4 }
 0x71c   : > { %4006 = vmatpush.bf16.msrb.mxu1 %v12194_v15  ;;  %4045 = vmatpush.bf16.msra.mxu3 %v12197_v36 }
 0x71d   : > { %3939 = vmatmul.bf16.gmra.mxu1 %v9939_v48 }
 0x71f   : > { %3990 = vmatpush.bf16.msra.mxu0 %v12200_v2  ;;  %4130 = vmatpush.xpose.msra.mxu2 %v10178_v33 }
 0x720   : > { %4007 = vmatpush.bf16.msrb.mxu1 %v12203_v21  ;;  %4046 = vmatpush.bf16.msra.mxu3 %v12206_v50 }
 0x722   : > { %3991 = vmatmul.bf16.vlgmr.msra.gmra.mxu0 %v9799_v14  ;;  %v10237_v14 = vld [vmem:[%s6254_s5 + $0x8] sm:$0xff] }
 0x723   : > { %4071 = vmatpush.xpose.msrb.mxu0 %v10175_v57  ;;  %4131 = vmatpush.xpose.msra.mxu2 %v10201_v61 }
 0x724   : > { %4008 = vmatpush.bf16.msrb.mxu1 %v12209_v49  ;;  %4047 = vmatpush.bf16.msra.mxu3 %v12212_v17 }
 0x727   : > { %4072 = vmatpush.xpose.msrb.mxu0 %v10197_v47  ;;  %4132 = vmatpush.xpose.msra.mxu2 %v10217_v20 }
 0x728   : > { %4158 = vmatpush.xpose.msrb.mxu3 %v10171_v30  ;;  %4009 = vmatpush.bf16.msrb.mxu1 %v12213_v37 }
 0x729   : > { %4048 = vmatmul.bf16.vlgmr.msra.gmra.mxu3 %v9825_v23 }
 0x72a   : > { %4034 = vmatmul.bf16.gmra.mxu2 %v9863_v41 }
 0x72b   : > { %4073 = vmatpush.xpose.msrb.mxu0 %v10213_v32  ;;  %4330 = vmatpush.msrb.mxu2 %v10185_v18 }
 0x72c   : > { %4100 = vmatpush.xpose.msra.mxu1 %v10185_v18  ;;  %4159 = vmatpush.xpose.msrb.mxu3 %v10194_v5 }
 0x72d   : > { %4331 = vmatpush.msrb.mxu2 %v10204_v51  ;;  %4010 = vmatmul.bf16.vlgmr.msrb.gmra.mxu1 %v9861_v16 }
 0x72f   : > { %4074 = vmatpush.xpose.msrb.mxu0 %v10232_v1  ;;  %4332 = vmatpush.msrb.mxu2 %v10221_v52 }
 0x730   : > { %4101 = vmatpush.xpose.msra.mxu1 %v10204_v51  ;;  %4160 = vmatpush.xpose.msrb.mxu3 %v10210_v13 }
 0x731   : > { %4333 = vmatpush.msrb.mxu2 %v10237_v14 }
 0x732   : > { %3996 = vmatmul.bf16.gmra.mxu0 %v9895_v40 }
 0x734   : > { %4102 = vmatpush.xpose.msra.mxu1 %v10221_v52  ;;  %4161 = vmatpush.xpose.msrb.mxu3 %v10228_v3 }
 0x738   : > { %4359 = vmatpush.msra.mxu3 %v10132_v7  ;;  %4103 = vmatpush.xpose.msra.mxu1 %v10237_v14 }
 0x739   : > { %4053 = vmatmul.bf16.gmra.mxu3 %v9916_v58 }
 0x73a   : > { %4360 = vmatpush.msra.mxu3 %v10178_v33  ;;  %4133 = vmatmul.f32.vlgmr.msra.gmra.mxu2 %v10217_v20 }
 0x73c   : > { %4301 = vmatpush.msrb.mxu1 %v10175_v57  ;;  %4361 = vmatpush.msra.mxu3 %v10201_v61 }
 0x73d   : > { %4015 = vmatmul.bf16.gmra.mxu1 %v9939_v48  ;;  %v3802_v23 = vpop.f32.mrf.mxu2 }
 0x73e   : > { %4302 = vmatpush.msrb.mxu1 %v10197_v47  ;;  %4362 = vmatpush.msra.mxu3 %v10217_v20 }
 0x73f   : > { %v3764_v16 = vpop.f32.mrf.mxu0 }
 0x740   : > { %4303 = vmatpush.msrb.mxu1 %v10213_v32 }
 0x742   : > { %4304 = vmatpush.msrb.mxu1 %v10232_v1  ;;  %4075 = vmatmul.f32.vlgmr.msrb.gmra.mxu0 %v10232_v1 }
 0x743   : > { %4136 = vmatmul.f32.gmra.mxu2 %v10201_v61 }
 0x745   : > { %v3804_v41 = vpop.f32.mrf.mxu2 }
 0x747   : > { %v3766_v59 = vpop.f32.mrf.mxu0 }
 0x749   : > { %4162 = vmatmul.f32.vlgmr.msrb.gmra.mxu3 %v10228_v3 }
 0x74a   : > { %v3783_v12 = vpop.f32.mrf.mxu1  ;;  %4078 = vmatmul.f32.gmra.mxu0 %v10213_v32 }
 0x74b   : > { %v3784_v19 = vadd.f32 %v3783_v12, %v3764_v16  ;;  %4139 = vmatmul.f32.gmra.mxu2 %v10178_v33 }
 0x74c   : > { %v3821_v0 = vpop.f32.mrf.mxu3 }
 0x74d   : > { %v3803_v40 = vadd.f32 %v3802_v23, %v3784_v19  ;;  %4104 = vmatmul.f32.vlgmr.msra.gmra.mxu1 %v10237_v14  ;;  %v3807_v48 = vpop.f32.mrf.mxu2 }
 0x74f   : > { %v10262_v58 = vadd.f32 %v3821_v0, %v3803_v40  ;;  %v3769_v9 = vpop.f32.mrf.mxu0 }
 0x751   : > { %4165 = vmatmul.f32.gmra.mxu3 %v10210_v13 }
 0x752   : > { %v3785_v42 = vpop.f32.mrf.mxu1  ;;  %4081 = vmatmul.f32.gmra.mxu0 %v10197_v47 }
 0x753   : > { %v3786_v44 = vadd.f32 %v3785_v42, %v3766_v59  ;;  %4142 = vmatmul.f32.gmra.mxu2 %v10132_v7 }
 0x754   : > { %v3823_v24 = vpop.f32.mrf.mxu3 }
 0x755   : > { %v3805_v35 = vadd.f32 %v3804_v41, %v3786_v44  ;;  %4107 = vmatmul.f32.gmra.mxu1 %v10221_v52  ;;  %v3809_v46 = vpop.f32.mrf.mxu2 }
 0x757   : > { %v10268_v39 = vadd.f32 %v3823_v24, %v3805_v35  ;;  %v3771_v54 = vpop.f32.mrf.mxu0 }
 0x759   : > { %4168 = vmatmul.f32.gmra.mxu3 %v10194_v5 }
 0x75a   : > { %v3788_v6 = vpop.f32.mrf.mxu1  ;;  %4084 = vmatmul.f32.gmra.mxu0 %v10175_v57 }
 0x75b   : > { %v3789_v11 = vadd.f32 %v3788_v6, %v3769_v9 }
 0x75c   : > { %v3826_v53 = vpop.f32.mrf.mxu3 }
 0x75d   : > { %v3808_v27 = vadd.f32 %v3807_v48, %v3789_v11  ;;  %4110 = vmatmul.f32.gmra.mxu1 %v10204_v51  ;;  %v3878_v55 = vpop.f32.mrf.mxu2 }
 0x75f   : > { %v10274_v28 = vadd.f32 %v3826_v53, %v3808_v27  ;;  %v3840_v26 = vpop.f32.mrf.mxu0 }
 0x761   : > { %4171 = vmatmul.f32.gmra.mxu3 %v10171_v30 }
 0x762   : > { %v3790_v63 = vpop.f32.mrf.mxu1 }
 0x763   : > { %v3791_v4 = vadd.f32 %v3790_v63, %v3771_v54 }
 0x764   : > { %v3828_v22 = vpop.f32.mrf.mxu3 }
 0x765   : > { %v3810_v15 = vadd.f32 %v3809_v46, %v3791_v4  ;;  %4113 = vmatmul.f32.gmra.mxu1 %v10185_v18  ;;  %v3880_v38 = vpop.f32.mrf.mxu2 }
 0x767   : > { %v10279_v34 = vadd.f32 %v3828_v22, %v3810_v15  ;;  %v3842_v8 = vpop.f32.mrf.mxu0 }
 0x76a   : > { %v3859_v36 = vpop.f32.mrf.mxu1 }
 0x76b   : > { %v3860_v60 = vadd.f32 %v3859_v36, %v3840_v26 }
 0x76c   : > { %v3897_v2 = vpop.f32.mrf.mxu3 }
 0x76d   : > { %v3879_v31 = vadd.f32 %v3878_v55, %v3860_v60  ;;  %v3883_v21 = vpop.f32.mrf.mxu2 }
 0x76f   : > { %v10281_v56 = vadd.f32 %v3897_v2, %v3879_v31  ;;  %v3845_v45 = vpop.f32.mrf.mxu0 }
 0x772   : > { %v3861_v62 = vpop.f32.mrf.mxu1 }
 0x773   : > { %v3862_v50 = vadd.f32 %v3861_v62, %v3842_v8 }
 0x774   : > { %v3899_v25 = vpop.f32.mrf.mxu3 }
 0x775   : > { %v3881_v10 = vadd.f32 %v3880_v38, %v3862_v50  ;;  %v3885_v29 = vpop.f32.mrf.mxu2 }
 0x777   : > { %v10283_v49 = vadd.f32 %v3899_v25, %v3881_v10  ;;  %v3847_v17 = vpop.f32.mrf.mxu0 }
 0x77a   : > { %v3864_v43 = vpop.f32.mrf.mxu1 }
 0x77b   : > { %v3865_v37 = vadd.f32 %v3864_v43, %v3845_v45 }
 0x77c   : > { %v3902_v23 = vpop.f32.mrf.mxu3 }
 0x77d   : > { %v3884_v16 = vadd.f32 %v3883_v21, %v3865_v37  ;;  %v3954_v12 = vpop.f32.mrf.mxu2 }
 0x77f   : > { %v10285_v41 = vadd.f32 %v3902_v23, %v3884_v16  ;;  %v3916_v0 = vpop.f32.mrf.mxu0 }
 0x782   : > { %v3866_v59 = vpop.f32.mrf.mxu1 }
 0x783   : > { %v3867_v19 = vadd.f32 %v3866_v59, %v3847_v17 }
 0x784   : > { %v3904_v40 = vpop.f32.mrf.mxu3 }
 0x785   : > { %v3886_v48 = vadd.f32 %v3885_v29, %v3867_v19  ;;  %v3956_v9 = vpop.f32.mrf.mxu2 }
 0x787   : > { %v10287_v42 = vadd.f32 %v3904_v40, %v3886_v48  ;;  %v3918_v35 = vpop.f32.mrf.mxu0 }
 0x78a   : > { %v3935_v44 = vpop.f32.mrf.mxu1 }
 0x78b   : > { %v3936_v24 = vadd.f32 %v3935_v44, %v3916_v0 }
 0x78c   : > { %v3973_v6 = vpop.f32.mrf.mxu3 }
 0x78d   : > { %v3955_v46 = vadd.f32 %v3954_v12, %v3936_v24  ;;  %v3959_v11 = vpop.f32.mrf.mxu2 }
 0x78f   : > { %v10289_v54 = vadd.f32 %v3973_v6, %v3955_v46  ;;  %v3921_v55 = vpop.f32.mrf.mxu0 }
 0x792   : > { %v3937_v53 = vpop.f32.mrf.mxu1 }
 0x793   : > { %v3938_v27 = vadd.f32 %v3937_v53, %v3918_v35 }
 0x794   : > { %v3975_v4 = vpop.f32.mrf.mxu3 }
 0x795   : > { %v3957_v63 = vadd.f32 %v3956_v9, %v3938_v27  ;;  %v3961_v22 = vpop.f32.mrf.mxu2 }
 0x797   : > { %v10291_v26 = vadd.f32 %v3975_v4, %v3957_v63  ;;  %v3923_v36 = vpop.f32.mrf.mxu0 }
 0x79a   : > { %v3940_v15 = vpop.f32.mrf.mxu1 }
 0x79b   : > { %v3941_v38 = vadd.f32 %v3940_v15, %v3921_v55 }
 0x79c   : > { %v3978_v60 = vpop.f32.mrf.mxu3 }
 0x79d   : > { %v3960_v8 = vadd.f32 %v3959_v11, %v3941_v38  ;;  %v4030_v31 = vpop.f32.mrf.mxu2 }
 0x79f   : > { %v10293_v2 = vadd.f32 %v3978_v60, %v3960_v8  ;;  %v3992_v45 = vpop.f32.mrf.mxu0 }
 0x7a2   : > { %v3942_v21 = vpop.f32.mrf.mxu1 }
 0x7a3   : > { %v3943_v62 = vadd.f32 %v3942_v21, %v3923_v36 }
 0x7a4   : > { %v3980_v25 = vpop.f32.mrf.mxu3 }
 0x7a5   : > { %v3962_v50 = vadd.f32 %v3961_v22, %v3943_v62  ;;  %v4032_v29 = vpop.f32.mrf.mxu2 }
 0x7a7   : > { %v10295_v10 = vadd.f32 %v3980_v25, %v3962_v50  ;;  %v3994_v37 = vpop.f32.mrf.mxu0 }
 0x7aa   : > { %v4011_v43 = vpop.f32.mrf.mxu1 }
 0x7ab   : > { %v4012_v17 = vadd.f32 %v4011_v43, %v3992_v45 }
 0x7ac   : > { %v4049_v16 = vpop.f32.mrf.mxu3 }
 0x7ad   : > { %v4031_v23 = vadd.f32 %v4030_v31, %v4012_v17  ;;  %v4035_v19 = vpop.f32.mrf.mxu2 }
 0x7af   : > { %v10297_v12 = vadd.f32 %v4049_v16, %v4031_v23  ;;  %v3997_v40 = vpop.f32.mrf.mxu0 }
 0x7b2   : > { %v4013_v59 = vpop.f32.mrf.mxu1 }
 0x7b3   : > { %v4014_v0 = vadd.f32 %v4013_v59, %v3994_v37 }
 0x7b4   : > { %v4051_v9 = vpop.f32.mrf.mxu3 }
 0x7b5   : > { %v4033_v48 = vadd.f32 %v4032_v29, %v4014_v0  ;;  %v4037_v6 = vpop.f32.mrf.mxu2 }
 0x7b7   : > { %v10299_v44 = vadd.f32 %v4051_v9, %v4033_v48  ;;  %v3999_v46 = vpop.f32.mrf.mxu0 }
 0x7ba   : > { %v4016_v24 = vpop.f32.mrf.mxu1 }
 0x7bb   : > { %v4017_v35 = vadd.f32 %v4016_v24, %v3997_v40 }
 0x7bc   : > { %v4054_v53 = vpop.f32.mrf.mxu3 }
 0x7bd   : > { %v4036_v11 = vadd.f32 %v4035_v19, %v4017_v35  ;;  %v4134_v22 = vpop.f32.mrf.mxu2 }
 0x7bf   : > { %v10301_v27 = vadd.f32 %v4054_v53, %v4036_v11  ;;  %v4076_v4 = vpop.f32.mrf.mxu0 }
 0x7c2   : > { %v4018_v55 = vpop.f32.mrf.mxu1 }
 0x7c3   : > { %v4019_v63 = vadd.f32 %v4018_v55, %v3999_v46 }
 0x7c4   : > { %v4056_v38 = vpop.f32.mrf.mxu3 }
 0x7c5   : > { %v4038_v15 = vadd.f32 %v4037_v6, %v4019_v63 }
 0x7c6   : > { %v4137_v21 = vpop.f32.mrf.mxu2 }
 0x7c7   : > { %v10303_v36 = vadd.f32 %v4056_v38, %v4038_v15  ;;  %v4079_v60 = vpop.f32.mrf.mxu0 }
 0x7ca   : > { %v4105_v8 = vpop.f32.mrf.mxu1 }
 0x7cb   : > { %v4106_v0 = vadd.f32 %v4105_v8, %v4076_v4 }
 0x7cc   : > { %v4163_v31 = vpop.f32.mrf.mxu3 }
 0x7cd   : > { %v4135_v46 = vadd.f32 %v4134_v22, %v4106_v0 }
 0x7ce   : > { %v4140_v25 = vpop.f32.mrf.mxu2 }
 0x7cf   : > { %v4082_v50 = vpop.f32.mrf.mxu0  ;;  %v4164_v53 = vadd.f32 %v4163_v31, %v4135_v46 }
 0x7d2   : > { %v4108_v62 = vpop.f32.mrf.mxu1 }
 0x7d3   : > { %v4109_v59 = vadd.f32 %v4108_v62, %v4079_v60 }
 0x7d4   : > { %v4166_v45 = vpop.f32.mrf.mxu3 }
 0x7d5   : > { %v4138_v24 = vadd.f32 %v4137_v21, %v4109_v59 }
 0x7d6   : > { %v4143_v16 = vpop.f32.mrf.mxu2 }
 0x7d7   : > { %v4085_v17 = vpop.f32.mrf.mxu0  ;;  %v4167_v11 = vadd.f32 %v4166_v45, %v4138_v24 }
 0x7da   : > { %v4111_v29 = vpop.f32.mrf.mxu1 }
 0x7db   : > { %v4112_v37 = vadd.f32 %v4111_v29, %v4082_v50 }
 0x7dc   : > { %v4169_v43 = vpop.f32.mrf.mxu3 }
 0x7dd   : > { %v4141_v40 = vadd.f32 %v4140_v25, %v4112_v37 }
 0x7df   : > { %v4170_v6 = vadd.f32 %v4169_v43, %v4141_v40 }
 0x7e2   : > { %v4114_v23 = vpop.f32.mrf.mxu1 }
 0x7e3   : > { %v4115_v19 = vadd.f32 %v4114_v23, %v4085_v17 }
 0x7e4   : > { %v4172_v9 = vpop.f32.mrf.mxu3 }
 0x7e5   : > { %v4144_v48 = vadd.f32 %v4143_v16, %v4115_v19 }
 0x7e7   : > { %v4173_v35 = vadd.f32 %v4172_v9, %v4144_v48 }
 0x7e9   : > { %4200 = vmatpush.msra.mxu0 %v4173_v35 }
 0x7eb   : > { %4201 = vmatpush.msra.mxu0 %v4170_v6 }
 0x7ed   : > { %4202 = vmatpush.msra.mxu0 %v4167_v11 }
 0x7ef   : > { %4203 = vmatpush.msra.mxu0 %v4164_v53 }
 0x7f0   : > { %4987 = vmatmul.msk.f32.vlgmr.msra.gmra.mxu0 %vm4175_vm2, %v4164_v53 }
 0x7f1   : > { %4388 = vmatpush.msrb.mxu0 %v10171_v30 }
 0x7f3   : > { %4389 = vmatpush.msrb.mxu0 %v10194_v5 }
 0x7f5   : > { %4390 = vmatpush.msrb.mxu0 %v10210_v13 }
 0x7f7   : > { %4391 = vmatpush.msrb.mxu0 %v10228_v3 }
 0x7f8   : > { %4988 = vmatmul.msk.f32.gmra.mxu0 %vm4175_vm2, %v4167_v11 }
 0x800   : > { %4989 = vmatmul.msk.f32.gmra.mxu0 %vm4175_vm2, %v4170_v6 }
 0x808   : > { %4990 = vmatmul.msk.f32.gmra.mxu0 %vm4175_vm2, %v4173_v35 }
 0x86d   : > { %v4205_v55 = vpop.f32.mrf.mxu0 }
 0x86e   : > { %v4217_v63 = vsel %vm4175_vm2, %v4205_v55, -inf }
 0x86f   : > { %4218 = vmax.xlane.f32.xlu2 %v4217_v63 }
 0x875   : > { %v4208_v4 = vpop.f32.mrf.mxu0 }
 0x876   : > { %v4220_v22 = vsel %vm4175_vm2, %v4208_v4, -inf }
 0x877   : > { %4221 = vmax.xlane.f32.xlu1 %v4220_v22 }
 0x87d   : > { %v4211_v15 = vpop.f32.mrf.mxu0 }
 0x87e   : > { %v4223_v38 = vsel %vm4175_vm2, %v4211_v15, -inf }
 0x87f   : > { %4224 = vmax.xlane.f32.xlu0 %v4223_v38 }
 0x885   : > { %v4214_v8 = vpop.f32.mrf.mxu0 }
 0x886   : > { %v4226_v60 = vsel %vm4175_vm2, %v4214_v8, -inf }
 0x887   : > { %4227 = vmax.xlane.f32.xlu2 %v4226_v60 }
 0x8e2   : > { %v4219_v31 = vpop.xlane.xlu2 %4218 }
 0x8e3   : > { %v4229_v21 = vsub.f32 %v4219_v31, %v4205_v55 }
 0x8e5   : > { %v4233_v62 = vsel %vm4175_vm2, %v4229_v21, -inf }
 0x8e6   : > { %4234 = vmax.xlane.f32.xlu1 %v4233_v62 }
 0x8ea   : > { %v4222_v45 = vpop.xlane.xlu1 %4221 }
 0x8eb   : > { %v4230_v50 = vsub.f32 %v4222_v45, %v4208_v4 }
 0x8ed   : > { %v4236_v25 = vsel %vm4175_vm2, %v4230_v50, -inf }
 0x8ee   : > { %4237 = vmax.xlane.f32.xlu0 %v4236_v25 }
 0x8f2   : > { %v4225_v29 = vpop.xlane.xlu0 %4224 }
 0x8f3   : > { %v4231_v43 = vsub.f32 %v4225_v29, %v4211_v15 }
 0x8f5   : > { %v4239_v17 = vsel %vm4175_vm2, %v4231_v43, -inf }
 0x8f6   : > { %4240 = vmax.xlane.f32.xlu2 %v4239_v17 }
 0x8fa   : > { %v4228_v37 = vpop.xlane.xlu2 %4227 }
 0x8fb   : > { %v4232_v23 = vsub.f32 %v4228_v37, %v4214_v8 }
 0x8fd   : > { %v4242_v16 = vsel %vm4175_vm2, %v4232_v23, -inf }
 0x8fe   : > { %4243 = vmax.xlane.f32.xlu1 %v4242_v16 }
 0x959   : > { %v4235_v59 = vpop.xlane.xlu1 %4234 }
 0x95a   : > { %v4245_v19 = vsub.f32 %v4229_v21, %v4235_v59  ;;  %v10341_v59 = vstv %s4405_s26 }
 0x95c   : > { %v4249_v0 = vmul.f32 1.442695, %v4245_v19  ;;  %v10343_v19 = vstv %s5007_s29 }
 0x95e   : > { %5741 = vpow2.f32 %v4249_v0 }
 0x961   : > { %v4238_v40 = vpop.xlane.xlu0 %4237 }
 0x962   : > { %v4246_v48 = vsub.f32 %v4230_v50, %v4238_v40  ;;  %v4408_v40 = vmul.f32 %v10341_v59, %v10262_v58  ;;  %v4409_v58 = vmul.f32 %v10341_v59, %v10281_v56 }
 0x964   : > { %v5742_v9 = vpop.eup %5741  ;;  %v4251_v24 = vmul.f32 1.442695, %v4246_v48 }
 0x965   : > { %v4257_v35 = vsel %vm4175_vm2, %v5742_v9, 0.0 }
 0x966   : > { %5743 = vpow2.f32 %v4251_v24  ;;  %4258 = vadd.xlane.f32.xlu0 %v4257_v35  ;;  %v4411_v35 = vmul.f32 %v10341_v59, %v10297_v12  ;;  %v4458_v12 = vmul.f32 3.0, %v10237_v14  ;;  %v4461_v14 = vmul.f32 3.0, %v10213_v32 }
 0x969   : > { %v4241_v46 = vpop.xlane.xlu2 %4240 }
 0x96a   : > { %v4247_v6 = vsub.f32 %v4231_v43, %v4241_v46 }
 0x96c   : > { %v5744_v11 = vpop.eup %5743  ;;  %v4253_v53 = vmul.f32 1.442695, %v4247_v6  ;;  %v4460_v6 = vmul.f32 3.0, %v10228_v3  ;;  %v4410_v3 = vmul.f32 %v10341_v59, %v10289_v54  ;;  %v4415_v54 = vmul.f32 %v10341_v59, %v10299_v44 }
 0x96d   : > { %v4260_v55 = vsel %vm4175_vm2, %v5744_v11, 0.0 }
 0x96e   : > { %5745 = vpow2.f32 %v4253_v53  ;;  %4261 = vadd.xlane.f32.xlu2 %v4260_v55 }
 0x971   : > { %v4244_v63 = vpop.xlane.xlu1 %4243 }
 0x972   : > { %v4248_v4 = vsub.f32 %v4232_v23, %v4244_v63 }
 0x974   : > { %v5746_v22 = vpop.eup %5745  ;;  %v4255_v15 = vmul.f32 1.442695, %v4248_v4 }
 0x975   : > { %v4263_v38 = vsel %vm4175_vm2, %v5746_v22, 0.0 }
 0x976   : > { %5747 = vpow2.f32 %v4255_v15  ;;  %4264 = vadd.xlane.f32.xlu1 %v4263_v38  ;;  %v4459_v38 = vmul.f32 3.0, %v10217_v20  ;;  %v4464_v20 = vmul.f32 3.0, %v10210_v13  ;;  %v4414_v13 = vmul.f32 %v10341_v59, %v10291_v26 }
 0x977   : > { %v4419_v26 = vmul.f32 %v10341_v59, %v10301_v27 }
 0x97c   : > { %v5748_v8 = vpop.eup %5747 }
 0x97d   : > { %v4266_v60 = vsel %vm4175_vm2, %v5748_v8, 0.0 }
 0x97e   : > { %4267 = vadd.xlane.f32.xlu0 %v4266_v60 }
 0x9d9   : > { %v4259_v31 = vpop.xlane.xlu0 %4258 }
 0x9da   : > { %5749 = vrcp.f32 %v4259_v31 }
 0x9e0   : > { %v5750_v21 = vpop.eup %5749 }
 0x9e1   : > { %v4273_v62 = vmul.f32 %v5750_v21, %v5742_v9  ;;  %v4262_v45 = vpop.xlane.xlu2 %4261  ;;  %v4457_v9 = vmul.f32 3.0, %v10232_v1 }
 0x9e2   : > { %5751 = vrcp.f32 %v4262_v45 }
 0x9e3   : > { %4991 = vmatmul.msk.f32.vlgmr.msrb.gmra.mxu1 %vm4175_vm2, %v4273_v62  ;;  %4995 = vmatmul.msk.f32.vlgmr.msrb.gmra.mxu2 %vm4175_vm2, %v4273_v62 }
 0x9e4   : > { %4999 = vmatmul.msk.f32.vlgmr.msra.gmra.mxu3 %vm4175_vm2, %v4273_v62  ;;  %5003 = vmatmul.msk.f32.vlgmr.msrb.gmra.mxu0 %vm4175_vm2, %v4273_v62 }
 0x9e8   : > { %v5752_v50 = vpop.eup %5751 }
 0x9e9   : > { %v4274_v25 = vmul.f32 %v5752_v50, %v5744_v11  ;;  %v4265_v29 = vpop.xlane.xlu1 %4264 }
 0x9ea   : > { %5753 = vrcp.f32 %v4265_v29 }
 0x9eb   : > { %4992 = vmatmul.msk.f32.gmra.mxu1 %vm4175_vm2, %v4274_v25  ;;  %4996 = vmatmul.msk.f32.gmra.mxu2 %vm4175_vm2, %v4274_v25 }
 0x9ec   : > { %5000 = vmatmul.msk.f32.gmra.mxu3 %vm4175_vm2, %v4274_v25  ;;  %5004 = vmatmul.msk.f32.gmra.mxu0 %vm4175_vm2, %v4274_v25 }
 0x9f0   : > { %v5754_v43 = vpop.eup %5753 }
 0x9f1   : > { %v4275_v17 = vmul.f32 %v5754_v43, %v5746_v22  ;;  %v4268_v37 = vpop.xlane.xlu0 %4267 }
 0x9f2   : > { %5755 = vrcp.f32 %v4268_v37  ;;  %v4413_v37 = vmul.f32 %v10341_v59, %v10283_v49  ;;  %v4416_v49 = vmul.f32 %v10341_v59, %v10274_v28 }
 0x9f3   : > { %4993 = vmatmul.msk.f32.gmra.mxu1 %vm4175_vm2, %v4275_v17  ;;  %4997 = vmatmul.msk.f32.gmra.mxu2 %vm4175_vm2, %v4275_v17 }
 0x9f4   : > { %5001 = vmatmul.msk.f32.gmra.mxu3 %vm4175_vm2, %v4275_v17  ;;  %5005 = vmatmul.msk.f32.gmra.mxu0 %vm4175_vm2, %v4275_v17 }
 0x9f8   : > { %v5756_v23 = vpop.eup %5755 }
 0x9f9   : > { %v4276_v16 = vmul.f32 %v5756_v23, %v5748_v8  ;;  %v4412_v8 = vmul.f32 %v10341_v59, %v10268_v39  ;;  %v4462_v23 = vmul.f32 3.0, %v10221_v52  ;;  %v4465_v52 = vmul.f32 3.0, %v10197_v47 }
 0x9fb   : > { %4994 = vmatmul.msk.f32.gmra.mxu1 %vm4175_vm2, %v4276_v16  ;;  %4998 = vmatmul.msk.f32.gmra.mxu2 %vm4175_vm2, %v4276_v16 }
 0x9fc   : > { %5002 = vmatmul.msk.f32.gmra.mxu3 %vm4175_vm2, %v4276_v16  ;;  %5006 = vmatmul.msk.f32.gmra.mxu0 %vm4175_vm2, %v4276_v16 }
 0xa60   : > { %v4306_v0 = vpop.f32.mrf.mxu1 }
 0xa61   : > { %v4425_v48 = vmul.f32 %v10343_v19, %v4306_v0  ;;  %v4393_v24 = vpop.f32.mrf.mxu0 }
 0xa62   : > { %v4428_v46 = vmul.f32 %v10343_v19, %v4393_v24 }
 0xa63   : > { %v4441_v11 = vadd.f32 %v4425_v48, %v4408_v40  ;;  %v4463_v40 = vmul.f32 3.0, %v10201_v61  ;;  %v4468_v61 = vmul.f32 3.0, %v10194_v5 }
 0xa64   : > { %v4444_v53 = vadd.f32 %v4428_v46, %v4411_v35 }
 0xa65   : > { %v4473_v55 = vadd.f32 %v4457_v9, %v4441_v11 }
 0xa66   : > { %v4476_v63 = vadd.f32 %v4460_v6, %v4444_v53  ;;  %v4335_v4 = vpop.f32.mrf.mxu2 }
 0xa67   : > { %4489 = vst [vmem:[%s10356_s15] sm:$0xff] %v4473_v55  ;;  %v4426_v1 = vmul.f32 %v10343_v19, %v4335_v4  ;;  %v4364_v22 = vpop.f32.mrf.mxu3 }
 0xa68   : > { %4492 = vst [vmem:[%s10356_s15 + $0x18] sm:$0xff] %v4476_v63  ;;  %v4427_v15 = vmul.f32 %v10343_v19, %v4364_v22  ;;  %v4309_v56 = vpop.f32.mrf.mxu1 }
 0xa69   : > { %v4442_v60 = vadd.f32 %v4426_v1, %v4409_v58  ;;  %v4429_v31 = vmul.f32 %v10343_v19, %v4309_v56  ;;  %v4396_v21 = vpop.f32.mrf.mxu0  ;;  %v4417_v58 = vmul.f32 %v10341_v59, %v10285_v41  ;;  %v4466_v1 = vmul.f32 3.0, %v10204_v51 }
 0xa6a   : > { %v4443_v62 = vadd.f32 %v4427_v15, %v4410_v3  ;;  %v4432_v45 = vmul.f32 %v10343_v19, %v4396_v21  ;;  %v4467_v3 = vmul.f32 3.0, %v10178_v33  ;;  %v4420_v41 = vmul.f32 %v10341_v59, %v10279_v34 }
 0xa6b   : > { %v4474_v50 = vadd.f32 %v4458_v12, %v4442_v60  ;;  %v4445_v25 = vadd.f32 %v4429_v31, %v4412_v8  ;;  %v4418_v12 = vmul.f32 %v10341_v59, %v10293_v2  ;;  %v4469_v51 = vmul.f32 3.0, %v10175_v57 }
 0xa6c   : > { %v4475_v29 = vadd.f32 %v4459_v38, %v4443_v62  ;;  %v4448_v39 = vadd.f32 %v4432_v45, %v4415_v54  ;;  %v4423_v2 = vmul.f32 %v10341_v59, %v10303_v36  ;;  %v4472_v33 = vmul.f32 3.0, %v10171_v30 }
 0xa6d   : > { %4490 = vst [vmem:[%s10356_s15 + $0x8] sm:$0xff] %v4474_v50  ;;  %v4477_v43 = vadd.f32 %v4461_v14, %v4445_v25  ;;  %v4421_v45 = vmul.f32 %v10341_v59, %v10287_v42  ;;  %v4422_v25 = vmul.f32 %v10341_v59, %v10295_v10 }
 0xa6e   : > { %4491 = vst [vmem:[%s10356_s15 + $0x10] sm:$0xff] %v4475_v29  ;;  %v4480_v17 = vadd.f32 %v4464_v20, %v4448_v39  ;;  %v4338_v32 = vpop.f32.mrf.mxu2  ;;  %v4470_v20 = vmul.f32 3.0, %v10185_v18  ;;  %v4471_v39 = vmul.f32 3.0, %v10132_v7 }
 0xa6f   : > { %4493 = vst [vmem:[%s10356_s15 + $0x20] sm:$0xff] %v4477_v43  ;;  %v4430_v44 = vmul.f32 %v10343_v19, %v4338_v32  ;;  %v4367_v16 = vpop.f32.mrf.mxu3 }
 0xa70   : > { %4496 = vst [vmem:[%s10356_s15 + $0x38] sm:$0xff] %v4480_v17  ;;  %v4431_v0 = vmul.f32 %v10343_v19, %v4367_v16  ;;  %v4312_v48 = vpop.f32.mrf.mxu1 }
 0xa71   : > { %v4446_v9 = vadd.f32 %v4430_v44, %v4413_v37  ;;  %v4433_v24 = vmul.f32 %v10343_v19, %v4312_v48  ;;  %v4399_v35 = vpop.f32.mrf.mxu0 }
 0xa72   : > { %v4447_v46 = vadd.f32 %v4431_v0, %v4414_v13  ;;  %v4436_v6 = vmul.f32 %v10343_v19, %v4399_v35 }
 0xa73   : > { %v4478_v11 = vadd.f32 %v4462_v23, %v4446_v9  ;;  %v4449_v53 = vadd.f32 %v4433_v24, %v4416_v49 }
 0xa74   : > { %v4479_v55 = vadd.f32 %v4463_v40, %v4447_v46  ;;  %v4452_v28 = vadd.f32 %v4436_v6, %v4419_v26 }
 0xa75   : > { %4494 = vst [vmem:[%s10356_s15 + $0x28] sm:$0xff] %v4478_v11  ;;  %v4481_v63 = vadd.f32 %v4465_v52, %v4449_v53 }
 0xa76   : > { %4495 = vst [vmem:[%s10356_s15 + $0x30] sm:$0xff] %v4479_v55  ;;  %v4484_v4 = vadd.f32 %v4468_v61, %v4452_v28  ;;  %v4341_v47 = vpop.f32.mrf.mxu2 }
 0xa77   : > { %4497 = vst [vmem:[%s10356_s15 + $0x40] sm:$0xff] %v4481_v63  ;;  %v4434_v27 = vmul.f32 %v10343_v19, %v4341_v47  ;;  %v4370_v5 = vpop.f32.mrf.mxu3 }
 0xa78   : > { %4500 = vst [vmem:[%s10356_s15 + $0x58] sm:$0xff] %v4484_v4  ;;  %v4435_v22 = vmul.f32 %v10343_v19, %v4370_v5  ;;  %v4315_v15 = vpop.f32.mrf.mxu1 }
 0xa79   : > { %v4450_v38 = vadd.f32 %v4434_v27, %v4417_v58  ;;  %v4437_v56 = vmul.f32 %v10343_v19, %v4315_v15  ;;  %v4402_v8 = vpop.f32.mrf.mxu0 }
 0xa7a   : > { %v4451_v60 = vadd.f32 %v4435_v22, %v4418_v12  ;;  %v4440_v31 = vmul.f32 %v10343_v19, %v4402_v8 }
 0xa7b   : > { %v4482_v14 = vadd.f32 %v4466_v1, %v4450_v38  ;;  %v4453_v34 = vadd.f32 %v4437_v56, %v4420_v41 }
 0xa7c   : > { %v4483_v21 = vadd.f32 %v4467_v3, %v4451_v60  ;;  %v4456_v54 = vadd.f32 %v4440_v31, %v4423_v2 }
 0xa7d   : > { %4498 = vst [vmem:[%s10356_s15 + $0x48] sm:$0xff] %v4482_v14  ;;  %v4485_v62 = vadd.f32 %v4469_v51, %v4453_v34 }
 0xa7e   : > { %4499 = vst [vmem:[%s10356_s15 + $0x50] sm:$0xff] %v4483_v21  ;;  %v4488_v57 = vadd.f32 %v4472_v33, %v4456_v54  ;;  %v4344_v36 = vpop.f32.mrf.mxu2 }
 0xa7f   : > { %4501 = vst [vmem:[%s10356_s15 + $0x60] sm:$0xff] %v4485_v62  ;;  %v4438_v30 = vmul.f32 %v10343_v19, %v4344_v36  ;;  %v4373_v50 = vpop.f32.mrf.mxu3 }
 0xa80   : > { %4504 = vst [vmem:[%s10356_s15 + $0x78] sm:$0xff] %v4488_v57  ;;  %v4439_v29 = vmul.f32 %v10343_v19, %v4373_v50 }
 0xa81   : > { %v4454_v42 = vadd.f32 %v4438_v30, %v4421_v45 }
 0xa82   : > { %v4455_v43 = vadd.f32 %v4439_v29, %v4422_v25 }
 0xa83   : > { %v4486_v17 = vadd.f32 %v4470_v20, %v4454_v42 }
 0xa84   : > { %v4487_v32 = vadd.f32 %v4471_v39, %v4455_v43 }
 0xa85   : > { %4502 = vst [vmem:[%s10356_s15 + $0x68] sm:$0xff] %v4486_v17 }
 0xa86   : > { %4503 = vst [vmem:[%s10356_s15 + $0x70] sm:$0xff] %v4487_v32 }
 0xa87   : > { %5949 = shalt.err (!%p5946_p2)
}
 0xa88   : > { %s6005_s16 = smov 512   ;;  %s6006_s13 = smov 32  }
 0xa89   : > { %5033 = dma.vmem_to_hbm [thread:$0]  (%p6157_p7), %s4519_s6, 2048, %s4521_s7, %s4506_s9, %s6005_s16, %s6005_s16, %s6006_s13  }
 0xa8a PF: > { %s12216_s3 = sld [smem:[#allocation19_spill]]  ;;  %p12218_p4 = scmp.ge.s32.totalorder %s6000_s24, 2 }
 0xa8c   : > { %p5056_p10 = pnand %p12218_p4, %p6161_p9 }
 0xa8e   : > { %p5057_p0 = pneg %p5056_p10 }
 0xa90   : > { %s4535_s11 = sand.u32 1, %s12216_s3  }
 0xa91   : > { %s4536_s14 = scalar_lea.sflag [#allocation4], %s4535_s11 }
 0xa92   : > { %5983 = dma.done.wait (%p5057_p0), %s4536_s14, 2048  }
 0xa93   : > { %5985 = vsyncadd (%p5057_p0), %s4536_s14, 4294965248  ;;  %s12219_s24 = sld [smem:[#allocation21_spill]]  ;;  %s12222_s21 = smov %s5992_s22 }
 0xa94   : > { %s12220_s23 = sld [smem:[#allocation20_spill]] }
 0xa95   : > { %s12221_s27 = sld [smem:[#allocation22_spill]] }
 0xa99   : > { %p26_p6 = scmp.ge.s32.totalorder %s12219_s24, 4  }
 0xa9a   : > { %s12223_s22 = smov %s12220_s23 }
 0xa9b   : > { %s12224_s23 = smov %s12221_s27  ;;  %28 = sbr.rel (!%p26_p6) target bundleno = 16 (0x10), region = 146 }
 0xaa0   :  { %4542 = vsyncpa [#allocation3], 1 }
 0xaa1   :  { %4544 = vsyncpa [#allocation3 + $0x1], 1 }
 0xaa2   :  { %4545 = vsyncpa [#allocation7], 1 }
 0xaa3   :  { %4547 = vsyncpa [#allocation7 + $0x1], 1 }
 0xaa4   :  { %4548 = vsyncpa [#allocation10], 1 }
 0xaa5   :  { %4550 = vsyncpa [#allocation10 + $0x1], 1 }
 0xaa6   :  { %4551 = vsyncpa [#allocation4], 1 }
 0xaa7   :  { %4553 = vsyncpa [#allocation4 + $0x1], 1 }
 0xaa8   :  { %4554 = vsyncpa [#allocation5], 1 }
 0xaa9   :  { %4556 = vsyncpa [#allocation5 + $0x1], 1 }

</bundles_post_ra>
